<compile_context>
chip_gen: v5e
topology: v5e:2x2
jax: 0.10.0
libtpu: 0.0.40
codegen_flags: <defaults>
</compile_context>

<pallas_src>
import functools

import jax
import jax.numpy as jnp
from jax.experimental import pallas as pl
from jax.experimental.pallas import tpu as pltpu

IN_FEATURES = 784
IN_PADDED = 896        # 7 * 128, lane-dense padded input width
H1, H2, H3 = 1024, 512, 128
OUT_FEATURES = 10
OUT_PADDED = 128       # lane-dense padded output width


def mnist_mlp_kernel(x_ref, w1_ref, b1_ref, w2_ref, b2_ref,
                     w3_ref, b3_ref, w4_ref, b4_ref, o_ref):
    # Layer 1: Linear(784 -> 1024) + ReLU   (bf16 operands, f32 accumulate)
    h = jnp.dot(x_ref[...], w1_ref[...], preferred_element_type=jnp.float32)
    h = jnp.maximum(h + b1_ref[...], 0.0).astype(jnp.bfloat16)
    # Layer 2: Linear(1024 -> 512) + ReLU
    h = jnp.dot(h, w2_ref[...], preferred_element_type=jnp.float32)
    h = jnp.maximum(h + b2_ref[...], 0.0).astype(jnp.bfloat16)
    # Layer 3: Linear(512 -> 128) + ReLU
    h = jnp.dot(h, w3_ref[...], preferred_element_type=jnp.float32)
    h = jnp.maximum(h + b3_ref[...], 0.0).astype(jnp.bfloat16)
    # Layer 4: Linear(128 -> 10) (padded to 128 lanes), no activation
    out = jnp.dot(h, w4_ref[...], preferred_element_type=jnp.float32)
    o_ref[...] = (out + b4_ref[...]).astype(o_ref.dtype)


def mnist_forward(x, kernel_params, *, tile_m=128):
    """x: (B, 784) float32. Returns (B, 10) float32."""
    w1, b1, w2, b2, w3, b3, w4, b4 = kernel_params
    B = x.shape[0]
    Bp = ((B + tile_m - 1) // tile_m) * tile_m  # pad batch to a tile multiple

    # Pad batch rows and feature lanes (784 -> 896) with zeros, cast to bf16.
    xp = jnp.zeros((Bp, IN_PADDED), jnp.bfloat16)
    xp = xp.at[:B, :IN_FEATURES].set(x.astype(jnp.bfloat16))

    grid = (Bp // tile_m,)
    full = lambda shape: pl.BlockSpec(shape, lambda i: (0, 0))  # weights resident

    flops = 2 * Bp * (IN_PADDED * H1 + H1 * H2 + H2 * H3 + H3 * OUT_PADDED)
    bytes_accessed = (
        xp.size * 2
        + (IN_PADDED * H1 + H1 * H2 + H2 * H3 + H3 * OUT_PADDED) * 2  # bf16 weights
        + (H1 + H2 + H3 + OUT_PADDED) * 4                              # f32 biases
        + Bp * OUT_PADDED * 4                                          # f32 output
    )

    out = pl.pallas_call(
        mnist_mlp_kernel,
        out_shape=jax.ShapeDtypeStruct((Bp, OUT_PADDED), jnp.float32),
        grid_spec=pltpu.PrefetchScalarGridSpec(
            num_scalar_prefetch=0,
            grid=grid,
            in_specs=[
                pl.BlockSpec((tile_m, IN_PADDED), lambda i: (i, 0)),  # x tile
                full((IN_PADDED, H1)), full((1, H1)),                 # w1, b1
                full((H1, H2)),        full((1, H2)),                 # w2, b2
                full((H2, H3)),        full((1, H3)),                 # w3, b3
                full((H3, OUT_PADDED)), full((1, OUT_PADDED)),        # w4, b4
            ],
            out_specs=pl.BlockSpec((tile_m, OUT_PADDED), lambda i: (i, 0)),
        ),
        compiler_params=pltpu.CompilerParams(
            dimension_semantics=("parallel",),
            vmem_limit_bytes=32 * 1024 * 1024,
        ),
        cost_estimate=pl.CostEstimate(
            flops=flops, transcendentals=0, bytes_accessed=bytes_accessed),
    )(xp, w1, b1, w2, b2, w3, b3, w4, b4)

    return out[:B, :OUT_FEATURES]


def init_params(key):
    """Logical f32 params; PyTorch Linear init U(-1/sqrt(fan_in), +1/sqrt(fan_in))."""
    def linear(key, fan_in, fan_out):
        kw, kb = jax.random.split(key)
        bound = 1.0 / jnp.sqrt(float(fan_in))
        w = jax.random.uniform(kw, (fan_in, fan_out), jnp.float32, -bound, bound)
        b = jax.random.uniform(kb, (1, fan_out), jnp.float32, -bound, bound)
        return w, b

    k1, k2, k3, k4 = jax.random.split(key, 4)
    w1, b1 = linear(k1, IN_FEATURES, H1)
    w2, b2 = linear(k2, H1, H2)
    w3, b3 = linear(k3, H2, H3)
    w4, b4 = linear(k4, H3, OUT_FEATURES)
    return (w1, b1, w2, b2, w3, b3, w4, b4)


def prepare_params(params):
    """Pad for lane-dense layout and cast weights to bf16 (biases stay f32)."""
    w1, b1, w2, b2, w3, b3, w4, b4 = params
    w1p = jnp.zeros((IN_PADDED, H1), jnp.float32).at[:IN_FEATURES, :].set(w1)
    w4p = jnp.zeros((H3, OUT_PADDED), jnp.float32).at[:, :OUT_FEATURES].set(w4)
    b4p = jnp.zeros((1, OUT_PADDED), jnp.float32).at[:, :OUT_FEATURES].set(b4)
    return (w1p.astype(jnp.bfloat16), b1,
            w2.astype(jnp.bfloat16), b2,
            w3.astype(jnp.bfloat16), b3,
            w4p.astype(jnp.bfloat16), b4p)


def reference_forward(x, params):
    w1, b1, w2, b2, w3, b3, w4, b4 = params
    h = jnp.maximum(x @ w1 + b1, 0.0)
    h = jnp.maximum(h @ w2 + b2, 0.0)
    h = jnp.maximum(h @ w3 + b3, 0.0)
    return h @ w4 + b4


if __name__ == "__main__":
    key = jax.random.PRNGKey(0)
    kx, kp = jax.random.split(key)

    B = 256  # 2 grid steps at tile_m=128 (keeps both v7x TensorCores busy)
    x = jax.random.normal(kx, (B, IN_FEATURES), jnp.float32)
    params = init_params(kp)
    kernel_params = prepare_params(params)

    fwd = jax.jit(functools.partial(mnist_forward, tile_m=128))
    out = fwd(x, kernel_params)
    jax.block_until_ready(out)

    ref = reference_forward(x, params)  # f32 reference
    assert out.shape == (B, OUT_FEATURES)
    max_err = float(jnp.max(jnp.abs(out - ref)))
    assert jnp.allclose(out, ref, atol=5e-2, rtol=5e-2), f"max abs err {max_err}"

    print("KERNEL_OK")
</pallas_src>

<mosaic_0001>
module attributes {stable_mosaic.version = 11 : i64} {
  func.func @mnist_mlp_kernel(%arg0: i32, %arg1: memref<128x896xbf16, #tpu.memory_space<vmem>>, %arg2: memref<896x1024xbf16, #tpu.memory_space<vmem>>, %arg3: memref<1x1024xf32, #tpu.memory_space<vmem>>, %arg4: memref<1024x512xbf16, #tpu.memory_space<vmem>>, %arg5: memref<1x512xf32, #tpu.memory_space<vmem>>, %arg6: memref<512x128xbf16, #tpu.memory_space<vmem>>, %arg7: memref<1x128xf32, #tpu.memory_space<vmem>>, %arg8: memref<128x128xbf16, #tpu.memory_space<vmem>>, %arg9: memref<1x128xf32, #tpu.memory_space<vmem>>, %arg10: memref<128x128xf32, #tpu.memory_space<vmem>>) attributes {dimension_semantics = [#tpu.dimension_semantics<parallel>], iteration_bounds = array<i64: 2>, scalar_prefetch = 0 : i64, scratch_operands = 0 : i64, tpu.core_type = #tpu.core_type<tc>, window_params = [{transform_indices = @transform_0, window_bounds = array<i64: 128, 896>}, {pipeline_mode = #tpu.pipeline_mode<synchronous>, transform_indices = @transform_1, window_bounds = array<i64: 896, 1024>}, {pipeline_mode = #tpu.pipeline_mode<synchronous>, transform_indices = @transform_2, window_bounds = array<i64: 1, 1024>}, {pipeline_mode = #tpu.pipeline_mode<synchronous>, transform_indices = @transform_3, window_bounds = array<i64: 1024, 512>}, {pipeline_mode = #tpu.pipeline_mode<synchronous>, transform_indices = @transform_4, window_bounds = array<i64: 1, 512>}, {pipeline_mode = #tpu.pipeline_mode<synchronous>, transform_indices = @transform_5, window_bounds = array<i64: 512, 128>}, {pipeline_mode = #tpu.pipeline_mode<synchronous>, transform_indices = @transform_6, window_bounds = array<i64: 1, 128>}, {pipeline_mode = #tpu.pipeline_mode<synchronous>, transform_indices = @transform_7, window_bounds = array<i64: 128, 128>}, {pipeline_mode = #tpu.pipeline_mode<synchronous>, transform_indices = @transform_8, window_bounds = array<i64: 1, 128>}, {transform_indices = @transform_9, window_bounds = array<i64: 128, 128>}]} {
    %c0 = arith.constant 0 : index
    %c0_0 = arith.constant 0 : index
    %0 = vector.load %arg1[%c0, %c0_0] : memref<128x896xbf16, #tpu.memory_space<vmem>>, vector<128x896xbf16>
    %c0_1 = arith.constant 0 : index
    %c0_2 = arith.constant 0 : index
    %1 = vector.load %arg2[%c0_1, %c0_2] : memref<896x1024xbf16, #tpu.memory_space<vmem>>, vector<896x1024xbf16>
    %cst = arith.constant dense<0.000000e+00> : vector<128x1024xf32>
    %2 = tpu.matmul %0, %1, %cst {dimension_numbers = #tpu.dot_dimension_numbers<[1], [0], [0], [1], [0, 0, 1, 1], [], []>} : vector<128x896xbf16>, vector<896x1024xbf16>, vector<128x1024xf32> -> vector<128x1024xf32>
    %c0_3 = arith.constant 0 : index
    %c0_4 = arith.constant 0 : index
    %3 = vector.load %arg3[%c0_3, %c0_4] : memref<1x1024xf32, #tpu.memory_space<vmem>>, vector<1x1024xf32>
    %4 = vector.broadcast %3 : vector<1x1024xf32> to vector<128x1024xf32>
    %5 = arith.addf %2, %4 : vector<128x1024xf32>
    %cst_5 = arith.constant 0.000000e+00 : f32
    %6 = vector.broadcast %cst_5 : f32 to vector<128x1024xf32>
    %7 = arith.maximumf %5, %6 : vector<128x1024xf32>
    %8 = arith.truncf %7 : vector<128x1024xf32> to vector<128x1024xbf16>
    %c0_6 = arith.constant 0 : index
    %c0_7 = arith.constant 0 : index
    %9 = vector.load %arg4[%c0_6, %c0_7] : memref<1024x512xbf16, #tpu.memory_space<vmem>>, vector<1024x512xbf16>
    %cst_8 = arith.constant dense<0.000000e+00> : vector<128x512xf32>
    %10 = tpu.matmul %8, %9, %cst_8 {dimension_numbers = #tpu.dot_dimension_numbers<[1], [0], [0], [1], [0, 0, 1, 1], [], []>} : vector<128x1024xbf16>, vector<1024x512xbf16>, vector<128x512xf32> -> vector<128x512xf32>
    %c0_9 = arith.constant 0 : index
    %c0_10 = arith.constant 0 : index
    %11 = vector.load %arg5[%c0_9, %c0_10] : memref<1x512xf32, #tpu.memory_space<vmem>>, vector<1x512xf32>
    %12 = vector.broadcast %11 : vector<1x512xf32> to vector<128x512xf32>
    %13 = arith.addf %10, %12 : vector<128x512xf32>
    %cst_11 = arith.constant 0.000000e+00 : f32
    %14 = vector.broadcast %cst_11 : f32 to vector<128x512xf32>
    %15 = arith.maximumf %13, %14 : vector<128x512xf32>
    %16 = arith.truncf %15 : vector<128x512xf32> to vector<128x512xbf16>
    %c0_12 = arith.constant 0 : index
    %c0_13 = arith.constant 0 : index
    %17 = vector.load %arg6[%c0_12, %c0_13] : memref<512x128xbf16, #tpu.memory_space<vmem>>, vector<512x128xbf16>
    %cst_14 = arith.constant dense<0.000000e+00> : vector<128x128xf32>
    %18 = tpu.matmul %16, %17, %cst_14 {dimension_numbers = #tpu.dot_dimension_numbers<[1], [0], [0], [1], [0, 0, 1, 1], [], []>} : vector<128x512xbf16>, vector<512x128xbf16>, vector<128x128xf32> -> vector<128x128xf32>
    %c0_15 = arith.constant 0 : index
    %c0_16 = arith.constant 0 : index
    %19 = vector.load %arg7[%c0_15, %c0_16] : memref<1x128xf32, #tpu.memory_space<vmem>>, vector<1x128xf32>
    %20 = vector.broadcast %19 : vector<1x128xf32> to vector<128x128xf32>
    %21 = arith.addf %18, %20 : vector<128x128xf32>
    %cst_17 = arith.constant 0.000000e+00 : f32
    %22 = vector.broadcast %cst_17 : f32 to vector<128x128xf32>
    %23 = arith.maximumf %21, %22 : vector<128x128xf32>
    %24 = arith.truncf %23 : vector<128x128xf32> to vector<128x128xbf16>
    %c0_18 = arith.constant 0 : index
    %c0_19 = arith.constant 0 : index
    %25 = vector.load %arg8[%c0_18, %c0_19] : memref<128x128xbf16, #tpu.memory_space<vmem>>, vector<128x128xbf16>
    %cst_20 = arith.constant dense<0.000000e+00> : vector<128x128xf32>
    %26 = tpu.matmul %24, %25, %cst_20 {dimension_numbers = #tpu.dot_dimension_numbers<[1], [0], [0], [1], [0, 0, 1, 1], [], []>} : vector<128x128xbf16>, vector<128x128xbf16>, vector<128x128xf32> -> vector<128x128xf32>
    %c0_21 = arith.constant 0 : index
    %c0_22 = arith.constant 0 : index
    %27 = vector.load %arg9[%c0_21, %c0_22] : memref<1x128xf32, #tpu.memory_space<vmem>>, vector<1x128xf32>
    %28 = vector.broadcast %27 : vector<1x128xf32> to vector<128x128xf32>
    %29 = arith.addf %26, %28 : vector<128x128xf32>
    %c0_23 = arith.constant 0 : index
    %c0_24 = arith.constant 0 : index
    %30 = vector.load %arg10[%c0_23, %c0_24] : memref<128x128xf32, #tpu.memory_space<vmem>>, vector<128x128xf32>
    tpu.vector_store %arg10[%c0_23, %c0_24], %29 {strides = array<i32>} : memref<128x128xf32, #tpu.memory_space<vmem>>, vector<128x128xf32>,
    return
  }
  func.func @transform_0(%arg0: i32) -> (i32, i32) {
    %c0_i32 = arith.constant 0 : i32
    %c0_i32_0 = arith.constant 0 : i32
    return %arg0, %c0_i32 : i32, i32
  }
  func.func @transform_1(%arg0: i32) -> (i32, i32) {
    %c0_i32 = arith.constant 0 : i32
    %c0_i32_0 = arith.constant 0 : i32
    %c0_i32_1 = arith.constant 0 : i32
    return %c0_i32, %c0_i32_0 : i32, i32
  }
  func.func @transform_2(%arg0: i32) -> (i32, i32) {
    %c0_i32 = arith.constant 0 : i32
    %c0_i32_0 = arith.constant 0 : i32
    %c0_i32_1 = arith.constant 0 : i32
    return %c0_i32, %c0_i32_0 : i32, i32
  }
  func.func @transform_3(%arg0: i32) -> (i32, i32) {
    %c0_i32 = arith.constant 0 : i32
    %c0_i32_0 = arith.constant 0 : i32
    %c0_i32_1 = arith.constant 0 : i32
    return %c0_i32, %c0_i32_0 : i32, i32
  }
  func.func @transform_4(%arg0: i32) -> (i32, i32) {
    %c0_i32 = arith.constant 0 : i32
    %c0_i32_0 = arith.constant 0 : i32
    %c0_i32_1 = arith.constant 0 : i32
    return %c0_i32, %c0_i32_0 : i32, i32
  }
  func.func @transform_5(%arg0: i32) -> (i32, i32) {
    %c0_i32 = arith.constant 0 : i32
    %c0_i32_0 = arith.constant 0 : i32
    %c0_i32_1 = arith.constant 0 : i32
    return %c0_i32, %c0_i32_0 : i32, i32
  }
  func.func @transform_6(%arg0: i32) -> (i32, i32) {
    %c0_i32 = arith.constant 0 : i32
    %c0_i32_0 = arith.constant 0 : i32
    %c0_i32_1 = arith.constant 0 : i32
    return %c0_i32, %c0_i32_0 : i32, i32
  }
  func.func @transform_7(%arg0: i32) -> (i32, i32) {
    %c0_i32 = arith.constant 0 : i32
    %c0_i32_0 = arith.constant 0 : i32
    %c0_i32_1 = arith.constant 0 : i32
    return %c0_i32, %c0_i32_0 : i32, i32
  }
  func.func @transform_8(%arg0: i32) -> (i32, i32) {
    %c0_i32 = arith.constant 0 : i32
    %c0_i32_0 = arith.constant 0 : i32
    %c0_i32_1 = arith.constant 0 : i32
    return %c0_i32, %c0_i32_0 : i32, i32
  }
  func.func @transform_9(%arg0: i32) -> (i32, i32) {
    %c0_i32 = arith.constant 0 : i32
    %c0_i32_0 = arith.constant 0 : i32
    return %arg0, %c0_i32 : i32, i32
  }
}

</mosaic_0001>

<bundles_post_ra>
// kernel: mnist_forward.1
= control target key start
LH: loop header
LB: loop body
LE: loop exit
PB: predicated region body
PF: predicated region fallthrough
CT: control target
= control target key end

     0   :  { %s14324_s30 = smov 0   ;;  %s21087_s0 = inlined_call_operand.vmem [shape: bf16[256,896], index: 0, kind: input, shape index: {}]   ;;  %s21088_s1 = inlined_call_operand.vmem [shape: bf16[896,1024], index: 1, kind: input, shape index: {}]   ;;  %s21089_s2 = inlined_call_operand.vmem [shape: f32[1,1024], index: 2, kind: input, shape index: {}]   ;;  %s21090_s3 = inlined_call_operand.vmem [shape: bf16[1024,512], index: 3, kind: input, shape index: {}]   ;;  %s21091_s4 = inlined_call_operand.vmem [shape: f32[1,512], index: 4, kind: input, shape index: {}]   ;;  %s21092_s5 = inlined_call_operand.vmem [shape: bf16[512,128], index: 5, kind: input, shape index: {}]   ;;  %s21093_s6 = inlined_call_operand.vmem [shape: f32[1,128], index: 6, kind: input, shape index: {}]   ;;  %s21094_s7 = inlined_call_operand.vmem [shape: bf16[128,128], index: 7, kind: input, shape index: {}]   ;;  %s21095_s8 = inlined_call_operand.vmem [shape: f32[1,128], index: 8, kind: input, shape index: {}]   ;;  %s21096_s9 = inlined_call_operand.vmem [shape: f32[256,128], index: 9, kind: output, shape index: {}]  }
   0x1 LB: > { %s10212_s10 = sadd.s32 4294967295, %s14272_s30   ;;  %p10216_p0 = scmp.ge.s32.totalorder %s14272_s30, 1  ;;  %s14272_s30 = sphi %s14324_s30, %s19_s30  }
   0x2   : > { %p289_p1 = scmp.lt.s32.totalorder %s14272_s30, 3 }
   0x4   : > { %p290_p2 = pnand %p10216_p0, %p289_p1 }
   0x6   : > { %293 = sbr.rel (%p290_p2) target bundleno = 3330 (0xd02), region = 56 }
   0xb   : > { %v10671_v0 = vld [vmem:[%s21088_s1 + $0x1c0] sm:$0xf]  ;;  %s10217_s27 = sshll.u32 %s10212_s10, 4 }
   0xc   : > { %v13539_v1 = vld [vmem:[%s21088_s1 + $0x1dc] sm:$0xf0]  ;;  %p327_p3 = scmp.lt.s32.totalorder %s10217_s27, 31 }
   0xd   : > { %v10639_v2 = vld [vmem:[%s21088_s1 + $0x180] sm:$0xf]  ;;  %v10672_v3 = vor.u32 %v13539_v1, %v10671_v0 }
   0xe   : > { %v13531_v4 = vld [vmem:[%s21088_s1 + $0x19c] sm:$0xf0]  ;;  %s21707_s27 = smov (!%p327_p3, %s10217_s27), 31 }
   0xf   : > { %3397 = vmatpush.bf16.msra.mxu0 %v10672_v3  ;;  %14223 = vmatpush.bf16.msra.mxu1 %v10672_v3  ;;  %v10640_v5 = vor.u32 %v13531_v4, %v10639_v2  ;;  %v10607_v6 = vld [vmem:[%s21088_s1 + $0x140] sm:$0xf]  ;;  %s14247_s16 = smul.u32 28, %s21707_s27  ;;  %s10220_s11 = sshll.u32 %s21707_s27, 3 }
  0x10   : > { %14224 = vmatpush.bf16.msra.mxu2 %v10672_v3  ;;  %14225 = vmatpush.bf16.msra.mxu3 %v10672_v3  ;;  %v13523_v7 = vld [vmem:[%s21088_s1 + $0x15c] sm:$0xf0]  ;;  %s21066_s14 = scalar_lea.vmem %s21096_s9, %s10220_s11 }
  0x11   : > { %v10608_v8 = vor.u32 %v13523_v7, %v10607_v6  ;;  %v10575_v9 = vld [vmem:[%s21088_s1 + $0x100] sm:$0xf]  ;;  %s14380_s23 = scalar_lea.vmem %s21087_s0, %s14247_s16 }
  0x12   : > { %v13515_v10 = vld [vmem:[%s21088_s1 + $0x11c] sm:$0xf0]  ;;  %v13426_v27 = vld [vmem:[%s14380_s23 + $0x18] sm:$0xf0]  ;;  %v10279_v30 = vld [vmem:[%s14380_s23 + $0x70] sm:$0xf] }
  0x13   : > { %3398 = vmatpush.bf16.msra.mxu0 %v10640_v5  ;;  %14226 = vmatpush.bf16.msra.mxu1 %v10640_v5  ;;  %v10576_v11 = vor.u32 %v13515_v10, %v10575_v9  ;;  %v10543_v12 = vld [vmem:[%s21088_s1 + $0xc0] sm:$0xf]  ;;  %v13440_v31 = vld [vmem:[%s14380_s23 + $0x88] sm:$0xf0]  ;;  %v13454_v35 = vld [vmem:[%s14380_s23 + $0xf8] sm:$0xf0] }
  0x14   : > { %14227 = vmatpush.bf16.msra.mxu2 %v10640_v5  ;;  %14228 = vmatpush.bf16.msra.mxu3 %v10640_v5  ;;  %v13507_v13 = vld [vmem:[%s21088_s1 + $0xdc] sm:$0xf0]  ;;  %v10391_v36 = vld [vmem:[%s14380_s23 + $0x150] sm:$0xf]  ;;  %v13468_v37 = vld [vmem:[%s14380_s23 + $0x168] sm:$0xf0]  ;;  %v14425_v44 = vor.u32 %v13440_v31, %v10279_v30 }
  0x15   : > { %v10544_v14 = vor.u32 %v13507_v13, %v10543_v12  ;;  %v10511_v15 = vld [vmem:[%s21088_s1 + $0x80] sm:$0xf]  ;;  %v14438_v49 = vor.u32 %v13468_v37, %v10391_v36  ;;  %v13475_v31 = vld [vmem:[%s14380_s23 + $0x1a0] sm:$0xf0] }
  0x16   : > { %v13499_v16 = vld [vmem:[%s21088_s1 + $0x9c] sm:$0xf0]  ;;  %21289 = vst [vmem:[#allocation3_spill] sm:$0xff] %v14425_v44 }
  0x17   : > { %3399 = vmatpush.bf16.msra.mxu0 %v10608_v8  ;;  %14229 = vmatpush.bf16.msra.mxu1 %v10608_v8  ;;  %v10512_v17 = vor.u32 %v13499_v16, %v10511_v15  ;;  %v10479_v18 = vld [vmem:[%s21088_s1 + $0x40] sm:$0xf]  ;;  %21291 = vst [vmem:[#allocation5_spill] sm:$0xff] %v14438_v49 }
  0x18   : > { %14230 = vmatpush.bf16.msra.mxu2 %v10608_v8  ;;  %14231 = vmatpush.bf16.msra.mxu3 %v10608_v8  ;;  %v13491_v19 = vld [vmem:[%s21088_s1 + $0x5c] sm:$0xf0] }
  0x19   : > { %v10480_v20 = vor.u32 %v13491_v19, %v10479_v18  ;;  %v10447_v21 = vld [vmem:[%s21088_s1] sm:$0xf]  ;;  %v10251_v18 = vld [vmem:[%s14380_s23 + $0x38] sm:$0xf]  ;;  %v13433_v19 = vld [vmem:[%s14380_s23 + $0x50] sm:$0xf0] }
  0x1a   : > { %v13483_v22 = vld [vmem:[%s21088_s1 + $0x1c] sm:$0xf0] }
  0x1b   : > { %3400 = vmatpush.bf16.msra.mxu0 %v10576_v11  ;;  %14232 = vmatpush.bf16.msra.mxu1 %v10576_v11  ;;  %v11183_v23 = vld [vmem:[%s21088_s1 + $0x5c0] sm:$0xf]  ;;  %v10448_v29 = vor.u32 %v13483_v22, %v10447_v21  ;;  %v13447_v21 = vld [vmem:[%s14380_s23 + $0xc0] sm:$0xf0] }
  0x1c   : > { %14233 = vmatpush.bf16.msra.mxu2 %v10576_v11  ;;  %14234 = vmatpush.bf16.msra.mxu3 %v10576_v11  ;;  %v13667_v24 = vld [vmem:[%s21088_s1 + $0x5dc] sm:$0xf0] }
  0x1d   : > { %v10927_v25 = vld [vmem:[%s21088_s1 + $0x3c0] sm:$0xf]  ;;  %v11184_v38 = vor.u32 %v13667_v24, %v11183_v23 }
  0x1e   : > { %v10223_v26 = vld [vmem:[%s14380_s23] sm:$0xf] }
  0x1f   : > { %3401 = vmatpush.bf16.msra.mxu0 %v10544_v14  ;;  %14235 = vmatpush.bf16.msra.mxu1 %v10544_v14  ;;  %v13603_v28 = vld [vmem:[%s21088_s1 + $0x3dc] sm:$0xf0]  ;;  %v14423_v43 = vor.u32 %v13426_v27, %v10223_v26  ;;  %v10363_v26 = vld [vmem:[%s14380_s23 + $0x118] sm:$0xf]  ;;  %v13461_v27 = vld [vmem:[%s14380_s23 + $0x130] sm:$0xf0] }
  0x20   : > { %14236 = vmatpush.bf16.msra.mxu2 %v10544_v14  ;;  %14237 = vmatpush.bf16.msra.mxu3 %v10544_v14  ;;  %v10335_v32 = vld [vmem:[%s14380_s23 + $0xe0] sm:$0xf]  ;;  %v10928_v39 = vor.u32 %v13603_v28, %v10927_v25  ;;  %v10419_v28 = vld [vmem:[%s14380_s23 + $0x188] sm:$0xf] }
  0x21   : > { %v11439_v33 = vld [vmem:[%s21088_s1 + $0x7c0] sm:$0xf]  ;;  %21288 = vst [vmem:[#allocation2_spill] sm:$0xff] %v14423_v43  ;;  %v14436_v48 = vor.u32 %v13454_v35, %v10335_v32 }
  0x22   : > { %v13731_v34 = vld [vmem:[%s21088_s1 + $0x7dc] sm:$0xf0] }
  0x23   : > { %3402 = vmatpush.bf16.msra.mxu0 %v10512_v17  ;;  %14238 = vmatpush.bf16.msra.mxu1 %v10512_v17  ;;  %v11695_v40 = vld [vmem:[%s21088_s1 + $0x9c0] sm:$0xf]  ;;  %21290 = vst [vmem:[#allocation4_spill] sm:$0xff] %v14436_v48  ;;  %v11440_v50 = vor.u32 %v13731_v34, %v11439_v33 }
  0x24   : > { %14239 = vmatpush.bf16.msra.mxu2 %v10512_v17  ;;  %14240 = vmatpush.bf16.msra.mxu3 %v10512_v17  ;;  %v13795_v41 = vld [vmem:[%s21088_s1 + $0x9dc] sm:$0xf0] }
  0x25   : > { %v11151_v42 = vld [vmem:[%s21088_s1 + $0x580] sm:$0xf]  ;;  %v11696_v51 = vor.u32 %v13795_v41, %v11695_v40 }
  0x26   : > { %v13659_v45 = vld [vmem:[%s21088_s1 + $0x59c] sm:$0xf0] }
  0x27   : > { %3403 = vmatpush.bf16.msra.mxu0 %v10480_v20  ;;  %14241 = vmatpush.bf16.msra.mxu1 %v10480_v20  ;;  %v10895_v46 = vld [vmem:[%s21088_s1 + $0x380] sm:$0xf]  ;;  %v11152_v54 = vor.u32 %v13659_v45, %v11151_v42 }
  0x28   : > { %14242 = vmatpush.bf16.msra.mxu2 %v10480_v20  ;;  %14243 = vmatpush.bf16.msra.mxu3 %v10480_v20  ;;  %v13595_v47 = vld [vmem:[%s21088_s1 + $0x39c] sm:$0xf0]  ;;  %v10307_v20 = vld [vmem:[%s14380_s23 + $0xa8] sm:$0xf] }
  0x29   : > { %v11407_v52 = vld [vmem:[%s21088_s1 + $0x780] sm:$0xf]  ;;  %v10896_v55 = vor.u32 %v13595_v47, %v10895_v46  ;;  %v14541_v40 = vor.u32 %v13447_v21, %v10307_v20  ;;  %v14552_v46 = vor.u32 %v13461_v27, %v10363_v26  ;;  %v14554_v47 = vor.u32 %v13475_v31, %v10419_v28  ;;  %v13535_v26 = vld [vmem:[%s21088_s1 + $0x1c4] sm:$0xf] }
  0x2a   : > { %v13723_v53 = vld [vmem:[%s21088_s1 + $0x79c] sm:$0xf0]  ;;  %v10673_v27 = vld [vmem:[%s21088_s1 + $0x1e0] sm:$0xf0] }
  0x2b   : > { %3404 = vmatpush.bf16.msra.mxu0 %v10448_v29  ;;  %14244 = vmatpush.bf16.msra.mxu1 %v10448_v29  ;;  %v11663_v56 = vld [vmem:[%s21088_s1 + $0x980] sm:$0xf]  ;;  %v11408_v62 = vor.u32 %v13723_v53, %v11407_v52  ;;  %21293 = vst [vmem:[#allocation7_spill] sm:$0xff] %v14541_v40 }
  0x2c   : > { %14245 = vmatpush.bf16.msra.mxu2 %v10448_v29  ;;  %14246 = vmatpush.bf16.msra.mxu3 %v10448_v29  ;;  %v13787_v57 = vld [vmem:[%s21088_s1 + $0x99c] sm:$0xf0]  ;;  %21294 = vst [vmem:[#allocation8_spill] sm:$0xff] %v14552_v46 }
  0x2d   : > { %v11119_v58 = vld [vmem:[%s21088_s1 + $0x540] sm:$0xf]  ;;  %v11664_v63 = vor.u32 %v13787_v57, %v11663_v56  ;;  %21295 = vst [vmem:[#allocation9_spill] sm:$0xff] %v14554_v47 }
  0x2e   : > { %3405 = vmatmul.bf16.vlgmr.msra.gmra.mxu0 %v14423_v43  ;;  %3415 = vmatmul.bf16.vlgmr.msra.gmra.mxu1 %v14425_v44  ;;  %v13651_v59 = vld [vmem:[%s21088_s1 + $0x55c] sm:$0xf0] }
  0x2f   : > { %3446 = vmatpush.bf16.msrb.mxu1 %v10928_v39  ;;  %v10863_v60 = vld [vmem:[%s21088_s1 + $0x340] sm:$0xf]  ;;  %3425 = vmatmul.bf16.vlgmr.msra.gmra.mxu2 %v14436_v48  ;;  %v11120_v3 = vor.u32 %v13651_v59, %v11119_v58  ;;  %v14539_v39 = vor.u32 %v13433_v19, %v10251_v18 }
  0x30   : > { %3495 = vmatpush.bf16.msrb.mxu2 %v11184_v38  ;;  %v13587_v61 = vld [vmem:[%s21088_s1 + $0x35c] sm:$0xf0]  ;;  %3435 = vmatmul.bf16.vlgmr.msra.gmra.mxu3 %v14438_v49 }
  0x31   : > { %3544 = vmatpush.bf16.msrb.mxu3 %v11440_v50  ;;  %3593 = vmatpush.bf16.msrb.mxu0 %v11696_v51  ;;  %v11375_v0 = vld [vmem:[%s21088_s1 + $0x740] sm:$0xf]  ;;  %v10864_v4 = vor.u32 %v13587_v61, %v10863_v60  ;;  %21292 = vst [vmem:[#allocation6_spill] sm:$0xff] %v14539_v39 }
  0x32   : > { %v13715_v1 = vld [vmem:[%s21088_s1 + $0x75c] sm:$0xf0] }
  0x33   : > { %v11631_v2 = vld [vmem:[%s21088_s1 + $0x940] sm:$0xf]  ;;  %3447 = vmatpush.bf16.msrb.mxu1 %v10896_v55  ;;  %v11376_v11 = vor.u32 %v13715_v1, %v11375_v0 }
  0x34   : > { %3496 = vmatpush.bf16.msrb.mxu2 %v11152_v54  ;;  %v13779_v5 = vld [vmem:[%s21088_s1 + $0x95c] sm:$0xf0] }
  0x35   : > { %v11087_v6 = vld [vmem:[%s21088_s1 + $0x500] sm:$0xf]  ;;  %3545 = vmatpush.bf16.msrb.mxu3 %v11408_v62  ;;  %3594 = vmatpush.bf16.msrb.mxu0 %v11664_v63  ;;  %v11632_v12 = vor.u32 %v13779_v5, %v11631_v2 }
  0x36   : > { %v13643_v7 = vld [vmem:[%s21088_s1 + $0x51c] sm:$0xf0] }
  0x37   : > { %v10831_v8 = vld [vmem:[%s21088_s1 + $0x300] sm:$0xf]  ;;  %3448 = vmatpush.bf16.msrb.mxu1 %v10864_v4  ;;  %v11088_v16 = vor.u32 %v13643_v7, %v11087_v6 }
  0x38   : > { %v13579_v9 = vld [vmem:[%s21088_s1 + $0x31c] sm:$0xf0]  ;;  %3497 = vmatpush.bf16.msrb.mxu2 %v11120_v3 }
  0x39   : > { %v11343_v10 = vld [vmem:[%s21088_s1 + $0x700] sm:$0xf]  ;;  %v10832_v17 = vor.u32 %v13579_v9, %v10831_v8  ;;  %3546 = vmatpush.bf16.msrb.mxu3 %v11376_v11  ;;  %3595 = vmatpush.bf16.msrb.mxu0 %v11632_v12 }
  0x3a   : > { %v13707_v13 = vld [vmem:[%s21088_s1 + $0x71c] sm:$0xf0] }
  0x3b   : > { %v11599_v14 = vld [vmem:[%s21088_s1 + $0x900] sm:$0xf]  ;;  %v11344_v29 = vor.u32 %v13707_v13, %v11343_v10  ;;  %3449 = vmatpush.bf16.msrb.mxu1 %v10832_v17 }
  0x3c   : > { %v13771_v15 = vld [vmem:[%s21088_s1 + $0x91c] sm:$0xf0]  ;;  %3498 = vmatpush.bf16.msrb.mxu2 %v11088_v16 }
  0x3d   : > { %v11055_v22 = vld [vmem:[%s21088_s1 + $0x4c0] sm:$0xf]  ;;  %v11600_v30 = vor.u32 %v13771_v15, %v11599_v14  ;;  %3547 = vmatpush.bf16.msrb.mxu3 %v11344_v29  ;;  %v13427_v29 = vld [vmem:[%s14380_s23 + $0x20] sm:$0xf0] }
  0x3e   : > { %v13635_v23 = vld [vmem:[%s21088_s1 + $0x4dc] sm:$0xf0]  ;;  %3410 = vmatmul.bf16.gmra.mxu0 %v14539_v39  ;;  %3420 = vmatmul.bf16.gmra.mxu1 %v14541_v40 }
  0x3f   : > { %v10799_v24 = vld [vmem:[%s21088_s1 + $0x2c0] sm:$0xf]  ;;  %v11056_v34 = vor.u32 %v13635_v23, %v11055_v22  ;;  %3596 = vmatpush.bf16.msrb.mxu0 %v11600_v30  ;;  %3430 = vmatmul.bf16.gmra.mxu2 %v14552_v46  ;;  %v13423_v22 = vld [vmem:[%s14380_s23 + $0x4] sm:$0xf] }
  0x40   : > { %v13571_v25 = vld [vmem:[%s21088_s1 + $0x2dc] sm:$0xf0]  ;;  %3440 = vmatmul.bf16.gmra.mxu3 %v14554_v47 }
  0x41   : > { %v11311_v32 = vld [vmem:[%s21088_s1 + $0x6c0] sm:$0xf]  ;;  %v10800_v35 = vor.u32 %v13571_v25, %v10799_v24  ;;  %3499 = vmatpush.bf16.msrb.mxu2 %v11056_v34  ;;  %v10231_v24 = vld [vmem:[%s14380_s23 + $0x8] sm:$0xf]  ;;  %v13424_v34 = vld [vmem:[%s14380_s23 + $0xc] sm:$0xf] }
  0x42   : > { %v13699_v33 = vld [vmem:[%s21088_s1 + $0x6dc] sm:$0xf0] }
  0x43   : > { %v11567_v36 = vld [vmem:[%s21088_s1 + $0x8c0] sm:$0xf]  ;;  %v11312_v50 = vor.u32 %v13699_v33, %v11311_v32  ;;  %3450 = vmatpush.bf16.msrb.mxu1 %v10800_v35  ;;  %v10233_v35 = vld [vmem:[%s14380_s23 + $0x24] sm:$0xf0] }
  0x44   : > { %v13763_v37 = vld [vmem:[%s21088_s1 + $0x8dc] sm:$0xf0] }
  0x45   : > { %v11023_v38 = vld [vmem:[%s21088_s1 + $0x480] sm:$0xf]  ;;  %v11568_v51 = vor.u32 %v13763_v37, %v11567_v36  ;;  %3548 = vmatpush.bf16.msrb.mxu3 %v11312_v50  ;;  %v10239_v36 = vld [vmem:[%s14380_s23 + $0x10] sm:$0xf]  ;;  %v13428_v37 = vld [vmem:[%s14380_s23 + $0x28] sm:$0xf0] }
  0x46   : > { %v13627_v41 = vld [vmem:[%s21088_s1 + $0x49c] sm:$0xf0] }
  0x47   : > { %v10767_v42 = vld [vmem:[%s21088_s1 + $0x280] sm:$0xf]  ;;  %v11024_v54 = vor.u32 %v13627_v41, %v11023_v38  ;;  %3597 = vmatpush.bf16.msrb.mxu0 %v11568_v51  ;;  %v10676_v38 = vor.u32 %v13535_v26, %v10673_v27  ;;  %v13527_v51 = vld [vmem:[%s21088_s1 + $0x184] sm:$0xf]  ;;  %v10287_v26 = vld [vmem:[%s14380_s23 + $0x78] sm:$0xf] }
  0x48   : > { %v13563_v45 = vld [vmem:[%s21088_s1 + $0x29c] sm:$0xf0]  ;;  %v13441_v27 = vld [vmem:[%s14380_s23 + $0x90] sm:$0xf0] }
  0x49   : > { %v11279_v52 = vld [vmem:[%s21088_s1 + $0x680] sm:$0xf]  ;;  %v10768_v55 = vor.u32 %v13563_v45, %v10767_v42  ;;  %3500 = vmatpush.bf16.msrb.mxu2 %v11024_v54  ;;  %v14668_v54 = vor.u32 %v13424_v34, %v10233_v35 }
  0x4a   : > { %v13691_v53 = vld [vmem:[%s21088_s1 + $0x69c] sm:$0xf0] }
  0x4b   : > { %v11535_v56 = vld [vmem:[%s21088_s1 + $0x880] sm:$0xf]  ;;  %v11280_v62 = vor.u32 %v13691_v53, %v11279_v52  ;;  %3451 = vmatpush.bf16.msrb.mxu1 %v10768_v55  ;;  %v10641_v52 = vld [vmem:[%s21088_s1 + $0x1a0] sm:$0xf0]  ;;  %v14666_v53 = vor.u32 %v13427_v29, %v10231_v24  ;;  %v14670_v55 = vor.u32 %v13428_v37, %v10239_v36  ;;  %v13437_v24 = vld [vmem:[%s14380_s23 + $0x74] sm:$0xf] }
  0x4c   : > { %v13755_v57 = vld [vmem:[%s21088_s1 + $0x89c] sm:$0xf0]  ;;  %v10289_v29 = vld [vmem:[%s14380_s23 + $0x94] sm:$0xf0] }
  0x4d   : > { %v10991_v58 = vld [vmem:[%s21088_s1 + $0x440] sm:$0xf]  ;;  %v11536_v63 = vor.u32 %v13755_v57, %v11535_v56  ;;  %3549 = vmatpush.bf16.msrb.mxu3 %v11280_v62  ;;  %21297 = vst [vmem:[#allocation11_spill] sm:$0xff] %v14670_v55  ;;  %v10644_v57 = vor.u32 %v13527_v51, %v10641_v52  ;;  %v10609_v62 = vld [vmem:[%s21088_s1 + $0x160] sm:$0xf0] }
  0x4e   : > { %v13619_v59 = vld [vmem:[%s21088_s1 + $0x45c] sm:$0xf0] }
  0x4f   : > { %v10735_v60 = vld [vmem:[%s21088_s1 + $0x240] sm:$0xf]  ;;  %v10992_v3 = vor.u32 %v13619_v59, %v10991_v58  ;;  %3598 = vmatpush.bf16.msrb.mxu0 %v11536_v63 }
  0x50   : > { %v13555_v61 = vld [vmem:[%s21088_s1 + $0x25c] sm:$0xf0] }
  0x51   : > { %v11247_v0 = vld [vmem:[%s21088_s1 + $0x640] sm:$0xf]  ;;  %v10736_v4 = vor.u32 %v13555_v61, %v10735_v60  ;;  %3501 = vmatpush.bf16.msrb.mxu2 %v10992_v3  ;;  %v13519_v60 = vld [vmem:[%s21088_s1 + $0x144] sm:$0xf]  ;;  %v13430_v3 = vld [vmem:[%s14380_s23 + $0x3c] sm:$0xf] }
  0x52   : > { %v13683_v1 = vld [vmem:[%s21088_s1 + $0x65c] sm:$0xf0] }
  0x53   : > { %v11503_v2 = vld [vmem:[%s21088_s1 + $0x840] sm:$0xf]  ;;  %v11248_v14 = vor.u32 %v13683_v1, %v11247_v0  ;;  %3452 = vmatpush.bf16.msrb.mxu1 %v10736_v4  ;;  %v10612_v1 = vor.u32 %v13519_v60, %v10609_v62  ;;  %v10253_v4 = vld [vmem:[%s14380_s23 + $0x54] sm:$0xf0]  ;;  %v13448_v60 = vld [vmem:[%s14380_s23 + $0xc8] sm:$0xf0] }
  0x54   : > { %v13747_v5 = vld [vmem:[%s21088_s1 + $0x85c] sm:$0xf0]  ;;  %v10317_v62 = vld [vmem:[%s14380_s23 + $0xcc] sm:$0xf0] }
  0x55   : > { %v10959_v6 = vld [vmem:[%s21088_s1 + $0x400] sm:$0xf]  ;;  %v11504_v15 = vor.u32 %v13747_v5, %v11503_v2  ;;  %3550 = vmatpush.bf16.msrb.mxu3 %v11248_v14 }
  0x56   : > { %v13611_v7 = vld [vmem:[%s21088_s1 + $0x41c] sm:$0xf0] }
  0x57   : > { %v10703_v8 = vld [vmem:[%s21088_s1 + $0x200] sm:$0xf]  ;;  %v10960_v19 = vor.u32 %v13611_v7, %v10959_v6  ;;  %3599 = vmatpush.bf16.msrb.mxu0 %v11504_v15  ;;  %v13434_v6 = vld [vmem:[%s14380_s23 + $0x58] sm:$0xf0]  ;;  %v13431_v7 = vld [vmem:[%s14380_s23 + $0x44] sm:$0xf] }
  0x58   : > { %v13547_v9 = vld [vmem:[%s21088_s1 + $0x21c] sm:$0xf0] }
  0x59   : > { %v12207_v10 = vld [vmem:[%s21088_s1 + $0xdc0] sm:$0xf]  ;;  %v10704_v20 = vor.u32 %v13547_v9, %v10703_v8  ;;  %3502 = vmatpush.bf16.msrb.mxu2 %v10960_v19  ;;  %v10267_v9 = vld [vmem:[%s14380_s23 + $0x48] sm:$0xf]  ;;  %v10577_v19 = vld [vmem:[%s21088_s1 + $0x120] sm:$0xf0] }
  0x5a   : > { %v13923_v11 = vld [vmem:[%s21088_s1 + $0xddc] sm:$0xf0] }
  0x5b   : > { %v11951_v12 = vld [vmem:[%s21088_s1 + $0xbc0] sm:$0xf]  ;;  %v12208_v25 = vor.u32 %v13923_v11, %v12207_v10  ;;  %3453 = vmatpush.bf16.msrb.mxu1 %v10704_v20  ;;  %v13435_v10 = vld [vmem:[%s14380_s23 + $0x60] sm:$0xf0]  ;;  %v14702_v11 = vor.u32 %v13430_v3, %v10253_v4 }
  0x5c   : > { %v13859_v13 = vld [vmem:[%s21088_s1 + $0xbdc] sm:$0xf0]  ;;  %3503 = vmatmul.bf16.vlgmr.msrb.gmra.mxu2 %v14666_v53  ;;  %v14708_v14 = vor.u32 %v13435_v10, %v10267_v9  ;;  %v10513_v9 = vld [vmem:[%s21088_s1 + $0xa0] sm:$0xf0] }
  0x5d   : > { %v11215_v16 = vld [vmem:[%s21088_s1 + $0x600] sm:$0xf]  ;;  %v11952_v28 = vor.u32 %v13859_v13, %v11951_v12  ;;  %3691 = vmatpush.bf16.msra.mxu2 %v12208_v25  ;;  %21298 = vst [vmem:[#allocation12_spill] sm:$0xff] %v14702_v11  ;;  %v10281_v25 = vld [vmem:[%s14380_s23 + $0x8c] sm:$0xf0] }
  0x5e   : > { %v13675_v17 = vld [vmem:[%s21088_s1 + $0x61c] sm:$0xf0] }
  0x5f   : > { %v11471_v18 = vld [vmem:[%s21088_s1 + $0x800] sm:$0xf]  ;;  %v11216_v32 = vor.u32 %v13675_v17, %v11215_v16  ;;  %3642 = vmatpush.bf16.msra.mxu1 %v11952_v28  ;;  %v13511_v17 = vld [vmem:[%s21088_s1 + $0x104] sm:$0xf]  ;;  %v13438_v28 = vld [vmem:[%s14380_s23 + $0x7c] sm:$0xf] }
  0x60   : > { %v13739_v21 = vld [vmem:[%s21088_s1 + $0x81c] sm:$0xf0]  ;;  %v14744_v34 = vor.u32 %v13438_v28, %v10289_v29 }
  0x61   : > { %v10225_v23 = vld [vmem:[%s14380_s23 + $0x1c] sm:$0xf0]  ;;  %v11472_v33 = vor.u32 %v13739_v21, %v11471_v18  ;;  %3551 = vmatpush.bf16.msrb.mxu3 %v11216_v32  ;;  %v14740_v32 = vor.u32 %v13437_v24, %v10281_v25  ;;  %v10351_v24 = vld [vmem:[%s14380_s23 + $0xf0] sm:$0xf]  ;;  %v13456_v25 = vld [vmem:[%s14380_s23 + $0x108] sm:$0xf0] }
  0x62   : > { %v12175_v30 = vld [vmem:[%s21088_s1 + $0xd80] sm:$0xf]  ;;  %v14658_v45 = vor.u32 %v13423_v22, %v10225_v23  ;;  %v10580_v22 = vor.u32 %v13511_v17, %v10577_v19  ;;  %v14822_v29 = vor.u32 %v13456_v25, %v10351_v24  ;;  %v10801_v24 = vld [vmem:[%s21088_s1 + $0x2e0] sm:$0xf0] }
  0x63   : > { %v13915_v31 = vld [vmem:[%s21088_s1 + $0xd9c] sm:$0xf0]  ;;  %3600 = vmatpush.bf16.msrb.mxu0 %v11472_v33  ;;  %21300 = vst [vmem:[#allocation14_spill] sm:$0xff] %v14740_v32  ;;  %v14742_v33 = vor.u32 %v13441_v27, %v10287_v26 }
  0x64   : > { %v11919_v41 = vld [vmem:[%s21088_s1 + $0xb80] sm:$0xf]  ;;  %21296 = vst [vmem:[#allocation10_spill] sm:$0xff] %v14658_v45  ;;  %v12176_v50 = vor.u32 %v13915_v31, %v12175_v30  ;;  %3454 = vmatmul.bf16.vlgmr.msrb.gmra.mxu1 %v14658_v45  ;;  %3552 = vmatmul.bf16.vlgmr.msrb.gmra.mxu3 %v14668_v54  ;;  %v13442_v31 = vld [vmem:[%s14380_s23 + $0x98] sm:$0xf0] }
  0x65   : > { %v13851_v42 = vld [vmem:[%s21088_s1 + $0xb9c] sm:$0xf0]  ;;  %3740 = vmatpush.bf16.msra.mxu3 %v10676_v38  ;;  %21301 = vst [vmem:[#allocation15_spill] sm:$0xff] %v14742_v33  ;;  %v13503_v38 = vld [vmem:[%s21088_s1 + $0xc4] sm:$0xf] }
  0x66   : > { %v11920_v56 = vor.u32 %v13851_v42, %v11919_v41  ;;  %3692 = vmatpush.bf16.msra.mxu2 %v12176_v50  ;;  %3601 = vmatmul.bf16.vlgmr.msrb.gmra.mxu0 %v14670_v55  ;;  %v12143_v58 = vld [vmem:[%s21088_s1 + $0xd40] sm:$0xf]  ;;  %v10545_v42 = vld [vmem:[%s21088_s1 + $0xe0] sm:$0xf0]  ;;  %21307 = vst [vmem:[#allocation21_spill] sm:$0xff] %v14822_v29 }
  0x67   : > { %v13907_v59 = vld [vmem:[%s21088_s1 + $0xd5c] sm:$0xf0]  ;;  %v10548_v52 = vor.u32 %v13503_v38, %v10545_v42 }
  0x68   : > { %3643 = vmatpush.bf16.msra.mxu1 %v11920_v56  ;;  %v12144_v61 = vor.u32 %v13907_v59, %v12143_v58  ;;  %v11887_v63 = vld [vmem:[%s21088_s1 + $0xb40] sm:$0xf]  ;;  %v10309_v58 = vld [vmem:[%s14380_s23 + $0xc4] sm:$0xf0]  ;;  %v10315_v59 = vld [vmem:[%s14380_s23 + $0xb0] sm:$0xf] }
  0x69   : > { %3741 = vmatpush.bf16.msra.mxu3 %v10644_v57  ;;  %v13843_v0 = vld [vmem:[%s21088_s1 + $0xb5c] sm:$0xf0]  ;;  %v13444_v57 = vld [vmem:[%s14380_s23 + $0xac] sm:$0xf] }
  0x6a   : > { %v11888_v2 = vor.u32 %v13843_v0, %v11887_v63  ;;  %3693 = vmatpush.bf16.msra.mxu2 %v12144_v61  ;;  %v10259_v5 = vld [vmem:[%s14380_s23 + $0x40] sm:$0xf]  ;;  %v13445_v61 = vld [vmem:[%s14380_s23 + $0xb4] sm:$0xf]  ;;  %v10323_v63 = vld [vmem:[%s14380_s23 + $0xb8] sm:$0xf] }
  0x6b   : > { %v10261_v8 = vld [vmem:[%s14380_s23 + $0x5c] sm:$0xf0]  ;;  %v14704_v12 = vor.u32 %v13434_v6, %v10259_v5  ;;  %v13449_v0 = vld [vmem:[%s14380_s23 + $0xd0] sm:$0xf0]  ;;  %v14782_v3 = vor.u32 %v13445_v61, %v10317_v62  ;;  %v13583_v61 = vld [vmem:[%s21088_s1 + $0x344] sm:$0xf] }
  0x6c   : > { %3644 = vmatpush.bf16.msra.mxu1 %v11888_v2  ;;  %v14706_v13 = vor.u32 %v13431_v7, %v10261_v8  ;;  %v12111_v15 = vld [vmem:[%s21088_s1 + $0xd00] sm:$0xf]  ;;  %v14780_v2 = vor.u32 %v13448_v60, %v10315_v59  ;;  %v14784_v4 = vor.u32 %v13449_v0, %v10323_v63  ;;  %v13495_v7 = vld [vmem:[%s21088_s1 + $0x84] sm:$0xf]  ;;  %v13458_v0 = vld [vmem:[%s14380_s23 + $0x11c] sm:$0xf] }
  0x6d   : > { %3742 = vmatpush.bf16.msra.mxu3 %v10612_v1  ;;  %21299 = vst [vmem:[#allocation13_spill] sm:$0xff] %v14704_v12  ;;  %3508 = vmatmul.bf16.gmra.mxu2 %v14704_v12  ;;  %v13899_v16 = vld [vmem:[%s21088_s1 + $0xd1c] sm:$0xf0]  ;;  %v14778_v1 = vor.u32 %v13444_v57, %v10309_v58  ;;  %v10865_v62 = vld [vmem:[%s21088_s1 + $0x360] sm:$0xf0] }
  0x6e   : > { %v12112_v18 = vor.u32 %v13899_v16, %v12111_v15  ;;  %v11855_v20 = vld [vmem:[%s21088_s1 + $0xb00] sm:$0xf]  ;;  %21303 = vst [vmem:[#allocation17_spill] sm:$0xff] %v14780_v2  ;;  %v10516_v16 = vor.u32 %v13495_v7, %v10513_v9  ;;  %v10868_v63 = vor.u32 %v13583_v61, %v10865_v62  ;;  %v13462_v7 = vld [vmem:[%s14380_s23 + $0x138] sm:$0xf0] }
  0x6f   : > { %v13835_v21 = vld [vmem:[%s21088_s1 + $0xb1c] sm:$0xf0]  ;;  %21302 = vst [vmem:[#allocation16_spill] sm:$0xff] %v14778_v1  ;;  %v13465_v61 = vld [vmem:[%s14380_s23 + $0x154] sm:$0xf] }
  0x70   : > { %v11856_v23 = vor.u32 %v13835_v21, %v11855_v20  ;;  %3694 = vmatpush.bf16.msra.mxu2 %v12112_v18  ;;  %v10295_v30 = vld [vmem:[%s14380_s23 + $0x80] sm:$0xf]  ;;  %v13451_v18 = vld [vmem:[%s14380_s23 + $0xe4] sm:$0xf]  ;;  %v10343_v20 = vld [vmem:[%s14380_s23 + $0xe8] sm:$0xf] }
  0x71   : > { %3743 = vmatpush.bf16.msra.mxu3 %v10580_v22  ;;  %v14746_v35 = vor.u32 %v13442_v31, %v10295_v30  ;;  %v12079_v36 = vld [vmem:[%s21088_s1 + $0xcc0] sm:$0xf]  ;;  %v13455_v21 = vld [vmem:[%s14380_s23 + $0x100] sm:$0xf0]  ;;  %v13452_v22 = vld [vmem:[%s14380_s23 + $0xec] sm:$0xf] }
  0x72   : > { %3645 = vmatpush.bf16.msra.mxu1 %v11856_v23  ;;  %v13891_v37 = vld [vmem:[%s21088_s1 + $0xcdc] sm:$0xf0]  ;;  %v10345_v23 = vld [vmem:[%s14380_s23 + $0x104] sm:$0xf0]  ;;  %v14818_v27 = vor.u32 %v13455_v21, %v10343_v20  ;;  %v13599_v30 = vld [vmem:[%s21088_s1 + $0x3c4] sm:$0xf] }
  0x73   : > { %v12080_v41 = vor.u32 %v13891_v37, %v12079_v36  ;;  %v11823_v50 = vld [vmem:[%s21088_s1 + $0xac0] sm:$0xf]  ;;  %v14820_v28 = vor.u32 %v13452_v22, %v10345_v23  ;;  %v10929_v31 = vld [vmem:[%s21088_s1 + $0x3e0] sm:$0xf0]  ;;  %v10393_v62 = vld [vmem:[%s14380_s23 + $0x16c] sm:$0xf0] }
  0x74   : > { %3459 = vmatmul.bf16.gmra.mxu1 %v14702_v11  ;;  %3557 = vmatmul.bf16.gmra.mxu3 %v14706_v13  ;;  %v13827_v51 = vld [vmem:[%s21088_s1 + $0xadc] sm:$0xf0]  ;;  %21305 = vst [vmem:[#allocation19_spill] sm:$0xff] %v14818_v27  ;;  %v10932_v38 = vor.u32 %v13599_v30, %v10929_v31  ;;  %v13567_v23 = vld [vmem:[%s21088_s1 + $0x2c4] sm:$0xf] }
  0x75   : > { %v11824_v56 = vor.u32 %v13827_v51, %v11823_v50  ;;  %3695 = vmatpush.bf16.msra.mxu2 %v12080_v41  ;;  %3744 = vmatpush.bf16.msra.mxu3 %v10548_v52  ;;  %v12047_v5 = vld [vmem:[%s21088_s1 + $0xc80] sm:$0xf]  ;;  %21306 = vst [vmem:[#allocation20_spill] sm:$0xff] %v14820_v28  ;;  %v13487_v41 = vld [vmem:[%s21088_s1 + $0x44] sm:$0xf]  ;;  %v10804_v31 = vor.u32 %v13567_v23, %v10801_v24 }
  0x76   : > { %3606 = vmatmul.bf16.gmra.mxu0 %v14708_v14  ;;  %v13883_v6 = vld [vmem:[%s21088_s1 + $0xc9c] sm:$0xf0]  ;;  %v10481_v50 = vld [vmem:[%s21088_s1 + $0x60] sm:$0xf0] }
  0x77   : > { %3646 = vmatpush.bf16.msra.mxu1 %v11824_v56  ;;  %v12048_v8 = vor.u32 %v13883_v6, %v12047_v5  ;;  %v11791_v10 = vld [vmem:[%s21088_s1 + $0xa80] sm:$0xf]  ;;  %3789 = vmatpush.bf16.msra.mxu0 %v10932_v38  ;;  %v10484_v51 = vor.u32 %v13487_v41, %v10481_v50  ;;  %v13591_v52 = vld [vmem:[%s21088_s1 + $0x384] sm:$0xf]  ;;  %v10365_v5 = vld [vmem:[%s14380_s23 + $0x134] sm:$0xf0] }
  0x78   : > { %v13819_v15 = vld [vmem:[%s21088_s1 + $0xa9c] sm:$0xf0]  ;;  %v10897_v56 = vld [vmem:[%s21088_s1 + $0x3a0] sm:$0xf0] }
  0x79   : > { %v11792_v17 = vor.u32 %v13819_v15, %v11791_v10  ;;  %3696 = vmatpush.bf16.msra.mxu2 %v12048_v8  ;;  %3745 = vmatpush.bf16.msra.mxu3 %v10516_v16  ;;  %v10337_v19 = vld [vmem:[%s14380_s23 + $0xfc] sm:$0xf0]  ;;  %v10900_v59 = vor.u32 %v13591_v52, %v10897_v56  ;;  %v13459_v8 = vld [vmem:[%s14380_s23 + $0x124] sm:$0xf]  ;;  %v10379_v10 = vld [vmem:[%s14380_s23 + $0x128] sm:$0xf]  ;;  %v14872_v16 = vor.u32 %v13458_v0, %v10365_v5 }
  0x7a   : > { %v14816_v26 = vor.u32 %v13451_v18, %v10337_v19  ;;  %v12015_v36 = vld [vmem:[%s21088_s1 + $0xc40] sm:$0xf]  ;;  %v13463_v15 = vld [vmem:[%s14380_s23 + $0x140] sm:$0xf0]  ;;  %v13469_v0 = vld [vmem:[%s14380_s23 + $0x170] sm:$0xf0] }
  0x7b   : > { %3647 = vmatpush.bf16.msra.mxu1 %v11792_v17  ;;  %v13875_v37 = vld [vmem:[%s21088_s1 + $0xc5c] sm:$0xf0]  ;;  %3790 = vmatpush.bf16.msra.mxu0 %v10900_v59  ;;  %21308 = vst [vmem:[#allocation22_spill] sm:$0xff] %v14872_v16  ;;  %v13575_v17 = vld [vmem:[%s21088_s1 + $0x304] sm:$0xf]  ;;  %v14884_v22 = vor.u32 %v13463_v15, %v10379_v10 }
  0x7c   : > { %21304 = vst [vmem:[#allocation18_spill] sm:$0xff] %v14816_v26  ;;  %v12016_v42 = vor.u32 %v13875_v37, %v12015_v36  ;;  %v11759_v57 = vld [vmem:[%s21088_s1 + $0xa40] sm:$0xf]  ;;  %v10833_v18 = vld [vmem:[%s21088_s1 + $0x320] sm:$0xf0] }
  0x7d   : > { %3513 = vmatmul.bf16.gmra.mxu2 %v14742_v33  ;;  %v13811_v58 = vld [vmem:[%s21088_s1 + $0xa5c] sm:$0xf0]  ;;  %3746 = vmatpush.bf16.msra.mxu3 %v10484_v51  ;;  %v10836_v21 = vor.u32 %v13575_v17, %v10833_v18  ;;  %21311 = vst [vmem:[#allocation25_spill] sm:$0xff] %v14884_v22  ;;  %v13479_v36 = vld [vmem:[%s21088_s1 + $0x4] sm:$0xf] }
  0x7e   : > { %3697 = vmatpush.bf16.msra.mxu2 %v12016_v42  ;;  %v11760_v60 = vor.u32 %v13811_v58, %v11759_v57  ;;  %v10371_v6 = vld [vmem:[%s14380_s23 + $0x120] sm:$0xf]  ;;  %v10449_v38 = vld [vmem:[%s21088_s1 + $0x20] sm:$0xf0]  ;;  %v13466_v5 = vld [vmem:[%s14380_s23 + $0x15c] sm:$0xf] }
  0x7f   : > { %v10373_v9 = vld [vmem:[%s14380_s23 + $0x13c] sm:$0xf0]  ;;  %3791 = vmatpush.bf16.msra.mxu0 %v10868_v63  ;;  %v14880_v19 = vor.u32 %v13462_v7, %v10371_v6  ;;  %v10452_v41 = vor.u32 %v13479_v36, %v10449_v38  ;;  %v13559_v42 = vld [vmem:[%s21088_s1 + $0x284] sm:$0xf]  ;;  %v10399_v63 = vld [vmem:[%s14380_s23 + $0x158] sm:$0xf] }
  0x80   : > { %3648 = vmatpush.bf16.msra.mxu1 %v11760_v60  ;;  %v14882_v20 = vor.u32 %v13459_v8, %v10373_v9  ;;  %v11983_v25 = vld [vmem:[%s21088_s1 + $0xc00] sm:$0xf]  ;;  %v10769_v50 = vld [vmem:[%s21088_s1 + $0x2a0] sm:$0xf0]  ;;  %v10401_v6 = vld [vmem:[%s14380_s23 + $0x174] sm:$0xf0]  ;;  %v14934_v9 = vor.u32 %v13465_v61, %v10393_v62 }
  0x81   : > { %21309 = vst [vmem:[#allocation23_spill] sm:$0xff] %v14880_v19  ;;  %v13867_v30 = vld [vmem:[%s21088_s1 + $0xc1c] sm:$0xf0]  ;;  %v10772_v56 = vor.u32 %v13559_v42, %v10769_v50  ;;  %3747 = vmatpush.bf16.msra.mxu3 %v10452_v41  ;;  %v13551_v58 = vld [vmem:[%s21088_s1 + $0x244] sm:$0xf]  ;;  %v14948_v23 = vor.u32 %v13466_v5, %v10401_v6 }
  0x82   : > { %21310 = vst [vmem:[#allocation24_spill] sm:$0xff] %v14882_v20  ;;  %v11984_v37 = vor.u32 %v13867_v30, %v11983_v25  ;;  %v11727_v51 = vld [vmem:[%s21088_s1 + $0xa00] sm:$0xf]  ;;  %v10737_v59 = vld [vmem:[%s21088_s1 + $0x260] sm:$0xf0] }
  0x83   : > { %3792 = vmatpush.bf16.msra.mxu0 %v10836_v21  ;;  %v13803_v52 = vld [vmem:[%s21088_s1 + $0xa1c] sm:$0xf0]  ;;  %v10740_v60 = vor.u32 %v13551_v58, %v10737_v59  ;;  %v13470_v8 = vld [vmem:[%s14380_s23 + $0x178] sm:$0xf0]  ;;  %21312 = vst [vmem:[#allocation26_spill] sm:$0xff] %v14934_v9  ;;  %v14946_v21 = vor.u32 %v13469_v0, %v10399_v63 }
  0x84   : > { %3464 = vmatmul.bf16.gmra.mxu1 %v14740_v32  ;;  %3562 = vmatmul.bf16.gmra.mxu3 %v14744_v34  ;;  %v11728_v57 = vor.u32 %v13803_v52, %v11727_v51  ;;  %v10407_v7 = vld [vmem:[%s14380_s23 + $0x160] sm:$0xf]  ;;  %v13543_v10 = vld [vmem:[%s21088_s1 + $0x204] sm:$0xf]  ;;  %21314 = vst [vmem:[#allocation28_spill] sm:$0xff] %v14948_v23 }
  0x85   : > { %3698 = vmatpush.bf16.msra.mxu2 %v11984_v37  ;;  %v10705_v15 = vld [vmem:[%s21088_s1 + $0x220] sm:$0xf0]  ;;  %21313 = vst [vmem:[#allocation27_spill] sm:$0xff] %v14946_v21  ;;  %v14950_v25 = vor.u32 %v13470_v8, %v10407_v7  ;;  %v13472_v63 = vld [vmem:[%s14380_s23 + $0x18c] sm:$0xf] }
  0x86   : > { %3611 = vmatmul.bf16.gmra.mxu0 %v14746_v35  ;;  %3649 = vmatpush.bf16.msra.mxu1 %v11728_v57  ;;  %v10708_v24 = vor.u32 %v13543_v10, %v10705_v15  ;;  %v14955_v30 = vld [vmem:[%s21089_s2] sm:$0xff]  ;;  %v10421_v0 = vld [vmem:[%s14380_s23 + $0x1a4] sm:$0xf0]  ;;  %v10427_v5 = vld [vmem:[%s14380_s23 + $0x190] sm:$0xf] }
  0x87   : > { %3793 = vmatpush.bf16.msra.mxu0 %v10804_v31  ;;  %21315 = vst [vmem:[#allocation29_spill] sm:$0xff] %v14950_v25  ;;  %v13727_v31 = vld [vmem:[%s21088_s1 + $0x7c4] sm:$0xf]  ;;  %v14971_v38 = vperm.slane %v14955_v30, 0  ;;  %v13476_v6 = vld [vmem:[%s14380_s23 + $0x1a8] sm:$0xf0] }
  0x88   : > { %v11441_v36 = vld [vmem:[%s21088_s1 + $0x7e0] sm:$0xf0]  ;;  %v13473_v7 = vld [vmem:[%s14380_s23 + $0x194] sm:$0xf]  ;;  %v10429_v8 = vld [vmem:[%s14380_s23 + $0x1ac] sm:$0xf0] }
  0x89   : > { %v13791_v37 = vld [vmem:[%s21088_s1 + $0x9c4] sm:$0xf]  ;;  %v11444_v41 = vor.u32 %v13727_v31, %v11441_v36  ;;  %v10435_v10 = vld [vmem:[%s14380_s23 + $0x198] sm:$0xf]  ;;  %v13477_v15 = vld [vmem:[%s14380_s23 + $0x1b0] sm:$0xf0]  ;;  %v15000_v36 = vor.u32 %v13472_v63, %v10421_v0 }
  0x8a   : > { %v11697_v42 = vld [vmem:[%s21088_s1 + $0x9e0] sm:$0xf0] }
  0x8b   : > { %3794 = vmatpush.bf16.msra.mxu0 %v10772_v56  ;;  %v11700_v52 = vor.u32 %v13791_v37, %v11697_v42  ;;  %3887 = vmatpush.bf16.msrb.mxu2 %v11444_v41  ;;  %v11185_v61 = vld [vmem:[%s21088_s1 + $0x5e0] sm:$0xf0]  ;;  %21316 = vst [vmem:[#allocation30_spill] sm:$0xff] %v15000_v36 }
  0x8c   : > { %v13783_v63 = vld [vmem:[%s21088_s1 + $0x984] sm:$0xf] }
  0x8d   : > { %3518 = vmatmul.bf16.gmra.mxu2 %v14780_v2  ;;  %3936 = vmatpush.bf16.msrb.mxu3 %v11700_v52  ;;  %v15014_v52 = vor.u32 %v13473_v7, %v10429_v8 }
  0x8f   : > { %3795 = vmatpush.bf16.msra.mxu0 %v10740_v60  ;;  %v13663_v60 = vld [vmem:[%s21088_s1 + $0x5c4] sm:$0xf]  ;;  %21318 = vst [vmem:[#allocation32_spill] sm:$0xff] %v15014_v52 }
  0x90   : > { %v11188_v62 = vor.u32 %v13663_v60, %v11185_v61  ;;  %v15016_v60 = vor.u32 %v13477_v15, %v10435_v10  ;;  %v13719_v61 = vld [vmem:[%s21088_s1 + $0x784] sm:$0xf] }
  0x92   : > { %3838 = vmatpush.bf16.msrb.mxu1 %v11188_v62  ;;  %21319 = vst [vmem:[#allocation33_spill] sm:$0xff] %v15016_v60  ;;  %v11409_v62 = vld [vmem:[%s21088_s1 + $0x7a0] sm:$0xf0] }
  0x93   : > { %3796 = vmatpush.bf16.msra.mxu0 %v10708_v24  ;;  %v11412_v0 = vor.u32 %v13719_v61, %v11409_v62  ;;  %v13655_v61 = vld [vmem:[%s21088_s1 + $0x584] sm:$0xf] }
  0x94   : > { %3469 = vmatmul.bf16.gmra.mxu1 %v14778_v1  ;;  %3567 = vmatmul.bf16.gmra.mxu3 %v14782_v3  ;;  %v11153_v62 = vld [vmem:[%s21088_s1 + $0x5a0] sm:$0xf0] }
  0x95   : > { %3888 = vmatpush.bf16.msrb.mxu2 %v11412_v0 }
  0x96   : > { %3616 = vmatmul.bf16.gmra.mxu0 %v14784_v4 }
  0x9d   : > { %3523 = vmatmul.bf16.gmra.mxu2 %v14818_v27 }
  0xa4   : > { %3474 = vmatmul.bf16.gmra.mxu1 %v14816_v26  ;;  %3572 = vmatmul.bf16.gmra.mxu3 %v14820_v28 }
  0xa6   : > { %3621 = vmatmul.bf16.gmra.mxu0 %v14822_v29  ;;  %v10269_v29 = vld [vmem:[%s14380_s23 + $0x64] sm:$0xf0] }
  0xab   : > { %v14942_v17 = vpop.f32.mrf.mxu0  ;;  %v14944_v18 = vpop.f32.mrf.mxu1 }
  0xad   : > { %3528 = vmatmul.bf16.gmra.mxu2 %v14880_v19  ;;  %v13432_v19 = vld [vmem:[%s14380_s23 + $0x4c] sm:$0xf] }
  0xb2   : > { %v3426_v50 = vpop.f32.mrf.mxu2 }
  0xb3   : > { %v3436_v51 = vpop.f32.mrf.mxu3  ;;  %v14977_v56 = vadd.f32 %v3426_v50, %v14971_v38  ;;  %v14982_v58 = vpop.f32.mrf.mxu0 }
  0xb4   : > { %3479 = vmatmul.bf16.gmra.mxu1 %v14872_v16  ;;  %3577 = vmatmul.bf16.gmra.mxu3 %v14882_v20  ;;  %v14980_v57 = vadd.f32 %v3436_v51, %v14971_v38  ;;  %v14984_v59 = vpop.f32.mrf.mxu1  ;;  %v15012_v51 = vor.u32 %v13476_v6, %v10427_v5  ;;  %v11665_v5 = vld [vmem:[%s21088_s1 + $0x9a0] sm:$0xf0] }
  0xb5   : > { %v11668_v8 = vor.u32 %v13783_v63, %v11665_v5  ;;  %v11156_v63 = vor.u32 %v13655_v61, %v11153_v62  ;;  %v13425_v5 = vld [vmem:[%s14380_s23 + $0x14] sm:$0xf] }
  0xb6   : > { %3626 = vmatmul.bf16.gmra.mxu0 %v14884_v22  ;;  %21317 = vst [vmem:[#allocation31_spill] sm:$0xff] %v15012_v51 }
  0xb7   : > { %3937 = vmatpush.bf16.msrb.mxu3 %v11668_v8  ;;  %3839 = vmatpush.bf16.msrb.mxu1 %v11156_v63 }
  0xba   : > { %v3428_v24 = vpop.f32.mrf.mxu2 }
  0xbb   : > { %v3438_v31 = vpop.f32.mrf.mxu3  ;;  %v15003_v37 = vadd.f32 %v3428_v24, %v14971_v38  ;;  %v15008_v42 = vpop.f32.mrf.mxu0 }
  0xbc   : > { %v15006_v41 = vadd.f32 %v3438_v31, %v14971_v38  ;;  %v15010_v50 = vpop.f32.mrf.mxu1 }
  0xbd   : > { %3533 = vmatmul.bf16.gmra.mxu2 %v14946_v21 }
  0xc2   : > { %v3431_v6 = vpop.f32.mrf.mxu2 }
  0xc3   : > { %v3441_v7 = vpop.f32.mrf.mxu3  ;;  %v15035_v10 = vadd.f32 %v3431_v6, %v14971_v38  ;;  %v15040_v24 = vpop.f32.mrf.mxu0  ;;  %v10241_v6 = vld [vmem:[%s14380_s23 + $0x2c] sm:$0xf0] }
  0xc4   : > { %3484 = vmatmul.bf16.gmra.mxu1 %v14934_v9  ;;  %3582 = vmatmul.bf16.gmra.mxu3 %v14948_v23  ;;  %v15038_v15 = vadd.f32 %v3441_v7, %v14971_v38  ;;  %v15042_v31 = vpop.f32.mrf.mxu1  ;;  %v3407_v7 = vadd.f32 %v14942_v17, %v14971_v38  ;;  %v15056_v8 = vor.u32 %v13425_v5, %v10241_v6 }
  0xc5   : > { %v3409_v17 = vadd.f32 %v14982_v58, %v14971_v38  ;;  %v11633_v58 = vld [vmem:[%s21088_s1 + $0x960] sm:$0xf0] }
  0xc6   : > { %3631 = vmatmul.bf16.gmra.mxu0 %v14950_v25  ;;  %21320 = vst [vmem:[#allocation34_spill] sm:$0xff] %v15056_v8 }
  0xcb   : > { %v3443_v0 = vpop.f32.mrf.mxu3 }
  0xcc   : > { %v15062_v23 = vadd.f32 %v3443_v0, %v14971_v38 }
  0xcd   : > { %3538 = vmatmul.bf16.gmra.mxu2 %v15012_v51  ;;  %v3433_v51 = vpop.f32.mrf.mxu2 }
  0xce   : > { %v15059_v25 = vadd.f32 %v3433_v51, %v14971_v38  ;;  %v13711_v51 = vld [vmem:[%s21088_s1 + $0x744] sm:$0xf] }
  0xd4   : > { %3489 = vmatmul.bf16.gmra.mxu1 %v15000_v36  ;;  %3587 = vmatmul.bf16.gmra.mxu3 %v15014_v52  ;;  %v13429_v52 = vld [vmem:[%s14380_s23 + $0x30] sm:$0xf0] }
  0xd6   : > { %3636 = vmatmul.bf16.gmra.mxu0 %v15016_v60  ;;  %v10247_v60 = vld [vmem:[%s14380_s23 + $0x18] sm:$0xf] }
  0xd7   : > { %v15064_v61 = vor.u32 %v13429_v52, %v10247_v60  ;;  %v13775_v52 = vld [vmem:[%s21088_s1 + $0x944] sm:$0xf] }
  0xd8   : > { %v11636_v6 = vor.u32 %v13775_v52, %v11633_v58 }
  0xd9   : > { %21321 = vst [vmem:[#allocation35_spill] sm:$0xff] %v15064_v61 }
  0xda   : > { %3938 = vmatpush.bf16.msrb.mxu3 %v11636_v6 }
  0xdd   : > { %3699 = vmatmul.bf16.vlgmr.msra.gmra.mxu2 %v15064_v61 }
  0xdf   : > { %v3504_v63 = vpop.f32.mrf.mxu2 }
  0xe1   : > { %v3455_v21 = vpop.f32.mrf.mxu1 }
  0xe2   : > { %v3456_v62 = vadd.f32 %v3455_v21, %v3407_v7  ;;  %v11377_v21 = vld [vmem:[%s21088_s1 + $0x760] sm:$0xf0] }
  0xe3   : > { %v3602_v22 = vpop.f32.mrf.mxu0  ;;  %v11380_v60 = vor.u32 %v13711_v51, %v11377_v21  ;;  %v13647_v51 = vld [vmem:[%s21088_s1 + $0x544] sm:$0xf] }
  0xe4   : > { %3650 = vmatmul.bf16.vlgmr.msra.gmra.mxu1 %v15056_v8  ;;  %3748 = vmatmul.bf16.vlgmr.msra.gmra.mxu3 %v14423_v43  ;;  %v3505_v7 = vadd.f32 %v3504_v63, %v3456_v62  ;;  %v11121_v21 = vld [vmem:[%s21088_s1 + $0x560] sm:$0xf0]  ;;  %v3412_v62 = vadd.f32 %v15008_v42, %v14971_v38 }
  0xe5   : > { %3889 = vmatpush.bf16.msrb.mxu2 %v11380_v60  ;;  %v11124_v20 = vor.u32 %v13647_v51, %v11121_v21  ;;  %v13436_v60 = vld [vmem:[%s14380_s23 + $0x68] sm:$0xf0]  ;;  %v11601_v42 = vld [vmem:[%s21088_s1 + $0x920] sm:$0xf0] }
  0xe6   : > { %3797 = vmatmul.bf16.vlgmr.msra.gmra.mxu0 %v14658_v45 }
  0xe7   : > { %v3553_v5 = vpop.f32.mrf.mxu3  ;;  %3840 = vmatpush.bf16.msrb.mxu1 %v11124_v20  ;;  %v3506_v58 = vpop.f32.mrf.mxu2  ;;  %v3414_v20 = vadd.f32 %v15040_v24, %v14971_v38 }
  0xe8   : > { %v3554_v43 = vadd.f32 %v3553_v5, %v3505_v7  ;;  %v15098_v5 = vor.u32 %v13432_v19, %v10269_v29  ;;  %v11345_v29 = vld [vmem:[%s21088_s1 + $0x720] sm:$0xf0] }
  0xe9   : > { %v3457_v0 = vpop.f32.mrf.mxu1  ;;  %v13767_v19 = vld [vmem:[%s21088_s1 + $0x904] sm:$0xf] }
  0xea   : > { %v3458_v45 = vadd.f32 %v3457_v0, %v3409_v17  ;;  %v15092_v52 = vadd.f32 %v3602_v22, %v3554_v43  ;;  %v10275_v17 = vld [vmem:[%s14380_s23 + $0x50] sm:$0xf]  ;;  %21322 = vst [vmem:[#allocation36_spill] sm:$0xff] %v15098_v5 }
  0xeb   : > { %v3604_v61 = vpop.f32.mrf.mxu0  ;;  %v15100_v0 = vor.u32 %v13436_v60, %v10275_v17 }
  0xec   : > { %v3507_v6 = vadd.f32 %v3506_v58, %v3458_v45  ;;  %v13703_v45 = vld [vmem:[%s21088_s1 + $0x704] sm:$0xf] }
  0xed   : > { %21323 = vst [vmem:[#allocation37_spill] sm:$0xff] %v15100_v0  ;;  %3704 = vmatmul.bf16.gmra.mxu2 %v15100_v0  ;;  %v11348_v22 = vor.u32 %v13703_v45, %v11345_v29  ;;  %v13439_v29 = vld [vmem:[%s14380_s23 + $0x84] sm:$0xf] }
  0xef   : > { %v3555_v63 = vpop.f32.mrf.mxu3  ;;  %3890 = vmatpush.bf16.msrb.mxu2 %v11348_v22 }
  0xf0   : > { %v3556_v51 = vadd.f32 %v3555_v63, %v3507_v6  ;;  %v3509_v24 = vpop.f32.mrf.mxu2 }
  0xf1   : > { %v3460_v7 = vpop.f32.mrf.mxu1 }
  0xf2   : > { %v3461_v28 = vadd.f32 %v3460_v7, %v3412_v62  ;;  %v15105_v43 = vadd.f32 %v3604_v61, %v3556_v51  ;;  %v11604_v62 = vor.u32 %v13767_v19, %v11601_v42  ;;  %v13639_v7 = vld [vmem:[%s21088_s1 + $0x504] sm:$0xf] }
  0xf3   : > { %v3607_v21 = vpop.f32.mrf.mxu0  ;;  %v11089_v51 = vld [vmem:[%s21088_s1 + $0x520] sm:$0xf0] }
  0xf4   : > { %3655 = vmatmul.bf16.gmra.mxu1 %v15098_v5  ;;  %3753 = vmatmul.bf16.gmra.mxu3 %v14539_v39  ;;  %v3510_v17 = vadd.f32 %v3509_v24, %v3461_v28  ;;  %v11092_v45 = vor.u32 %v13639_v7, %v11089_v51  ;;  %v10303_v28 = vld [vmem:[%s14380_s23 + $0x88] sm:$0xf]  ;;  %v13443_v19 = vld [vmem:[%s14380_s23 + $0xa0] sm:$0xf0] }
  0xf5   : > { %3939 = vmatpush.bf16.msrb.mxu3 %v11604_v62 }
  0xf6   : > { %3802 = vmatmul.bf16.gmra.mxu0 %v14702_v11  ;;  %v10297_v11 = vld [vmem:[%s14380_s23 + $0x9c] sm:$0xf0]  ;;  %3841 = vmatpush.bf16.msrb.mxu1 %v11092_v45  ;;  %v3419_v45 = vadd.f32 %v14984_v59, %v14971_v38  ;;  %v11057_v59 = vld [vmem:[%s21088_s1 + $0x4e0] sm:$0xf0] }
  0xf7   : > { %v3558_v61 = vpop.f32.mrf.mxu3  ;;  %v15136_v24 = vor.u32 %v13439_v29, %v10297_v11  ;;  %v13695_v11 = vld [vmem:[%s21088_s1 + $0x6c4] sm:$0xf] }
  0xf8   : > { %v3559_v63 = vadd.f32 %v3558_v61, %v3510_v17  ;;  %v3511_v22 = vpop.f32.mrf.mxu2  ;;  %v15138_v17 = vor.u32 %v13443_v19, %v10303_v28 }
  0xf9   : > { %v3462_v60 = vpop.f32.mrf.mxu1  ;;  %21324 = vst [vmem:[#allocation38_spill] sm:$0xff] %v15136_v24 }
  0xfa   : > { %v3463_v58 = vadd.f32 %v3462_v60, %v3414_v20  ;;  %v15130_v39 = vadd.f32 %v3607_v21, %v3559_v63  ;;  %v3417_v20 = vadd.f32 %v14944_v18, %v14971_v38  ;;  %21325 = vst [vmem:[#allocation39_spill] sm:$0xff] %v15138_v17  ;;  %v11313_v18 = vld [vmem:[%s21088_s1 + $0x6e0] sm:$0xf0] }
  0xfb   : > { %v3609_v6 = vpop.f32.mrf.mxu0  ;;  %v11316_v63 = vor.u32 %v13695_v11, %v11313_v18  ;;  %v13446_v18 = vld [vmem:[%s14380_s23 + $0xbc] sm:$0xf] }
  0xfc   : > { %v3512_v61 = vadd.f32 %v3511_v22, %v3463_v58  ;;  %v13759_v58 = vld [vmem:[%s21088_s1 + $0x8c4] sm:$0xf] }
  0xfd   : > { %3709 = vmatmul.bf16.gmra.mxu2 %v15138_v17 }
  0xfe   : > { %3891 = vmatpush.bf16.msrb.mxu2 %v11316_v63  ;;  %v3422_v63 = vadd.f32 %v15010_v50, %v14971_v38  ;;  %v11281_v50 = vld [vmem:[%s21088_s1 + $0x6a0] sm:$0xf0] }
  0xff   : > { %v3560_v42 = vpop.f32.mrf.mxu3 }
 0x100   : > { %v3561_v7 = vadd.f32 %v3560_v42, %v3512_v61  ;;  %v3514_v29 = vpop.f32.mrf.mxu2 }
 0x101   : > { %v3465_v62 = vpop.f32.mrf.mxu1 }
 0x102   : > { %v3466_v60 = vadd.f32 %v3465_v62, %v3417_v20  ;;  %v15143_v21 = vadd.f32 %v3609_v6, %v3561_v7  ;;  %v11569_v6 = vld [vmem:[%s21088_s1 + $0x8e0] sm:$0xf0] }
 0x103   : > { %v3612_v51 = vpop.f32.mrf.mxu0  ;;  %v11572_v19 = vor.u32 %v13759_v58, %v11569_v6  ;;  %v13631_v7 = vld [vmem:[%s21088_s1 + $0x4c4] sm:$0xf]  ;;  %v13450_v58 = vld [vmem:[%s14380_s23 + $0xd8] sm:$0xf0] }
 0x104   : > { %3660 = vmatmul.bf16.gmra.mxu1 %v15136_v24  ;;  %3758 = vmatmul.bf16.gmra.mxu3 %v14425_v44  ;;  %v3515_v20 = vadd.f32 %v3514_v29, %v3466_v60  ;;  %v11060_v11 = vor.u32 %v13631_v7, %v11057_v59  ;;  %v10331_v60 = vld [vmem:[%s14380_s23 + $0xc0] sm:$0xf] }
 0x105   : > { %3940 = vmatpush.bf16.msrb.mxu3 %v11572_v19 }
 0x106   : > { %3807 = vmatmul.bf16.gmra.mxu0 %v14740_v32  ;;  %v10325_v32 = vld [vmem:[%s14380_s23 + $0xd4] sm:$0xf0]  ;;  %3842 = vmatpush.bf16.msrb.mxu1 %v11060_v11  ;;  %v3424_v11 = vadd.f32 %v15042_v31, %v14971_v38  ;;  %v11025_v38 = vld [vmem:[%s21088_s1 + $0x4a0] sm:$0xf0] }
 0x107   : > { %v3563_v28 = vpop.f32.mrf.mxu3  ;;  %v15174_v29 = vor.u32 %v13446_v18, %v10325_v32  ;;  %v13687_v32 = vld [vmem:[%s21088_s1 + $0x684] sm:$0xf] }
 0x108   : > { %v3564_v61 = vadd.f32 %v3563_v28, %v3515_v20  ;;  %v3516_v6 = vpop.f32.mrf.mxu2  ;;  %v15176_v20 = vor.u32 %v13450_v58, %v10331_v60 }
 0x109   : > { %v3467_v22 = vpop.f32.mrf.mxu1  ;;  %21326 = vst [vmem:[#allocation40_spill] sm:$0xff] %v15174_v29 }
 0x10a   : > { %v3468_v42 = vadd.f32 %v3467_v22, %v3419_v45  ;;  %v15168_v44 = vadd.f32 %v3612_v51, %v3564_v61  ;;  %21327 = vst [vmem:[#allocation41_spill] sm:$0xff] %v15176_v20  ;;  %v11284_v61 = vor.u32 %v13687_v32, %v11281_v50  ;;  %v13453_v32 = vld [vmem:[%s14380_s23 + $0xf4] sm:$0xf]  ;;  %v10353_v50 = vld [vmem:[%s14380_s23 + $0x10c] sm:$0xf0] }
 0x10b   : > { %v3614_v62 = vpop.f32.mrf.mxu0 }
 0x10c   : > { %v3517_v28 = vadd.f32 %v3516_v6, %v3468_v42  ;;  %v13751_v42 = vld [vmem:[%s21088_s1 + $0x884] sm:$0xf]  ;;  %3892 = vmatpush.bf16.msrb.mxu2 %v11284_v61 }
 0x10d   : > { %3714 = vmatmul.bf16.gmra.mxu2 %v15176_v20 }
 0x10f   : > { %v3565_v45 = vpop.f32.mrf.mxu3 }
 0x110   : > { %v3566_v7 = vadd.f32 %v3565_v45, %v3517_v28  ;;  %v3519_v18 = vpop.f32.mrf.mxu2 }
 0x111   : > { %v3470_v19 = vpop.f32.mrf.mxu1 }
 0x112   : > { %v3471_v22 = vadd.f32 %v3470_v19, %v3422_v63  ;;  %v15181_v51 = vadd.f32 %v3614_v62, %v3566_v7  ;;  %v11537_v62 = vld [vmem:[%s21088_s1 + $0x8a0] sm:$0xf0] }
 0x113   : > { %v3617_v59 = vpop.f32.mrf.mxu0  ;;  %v11540_v58 = vor.u32 %v13751_v42, %v11537_v62  ;;  %v13623_v7 = vld [vmem:[%s21088_s1 + $0x484] sm:$0xf]  ;;  %v13457_v42 = vld [vmem:[%s14380_s23 + $0x110] sm:$0xf0] }
 0x114   : > { %3665 = vmatmul.bf16.gmra.mxu1 %v15174_v29  ;;  %3763 = vmatmul.bf16.gmra.mxu3 %v14541_v40  ;;  %v3520_v63 = vadd.f32 %v3519_v18, %v3471_v22  ;;  %v11028_v31 = vor.u32 %v13623_v7, %v11025_v38  ;;  %v10359_v22 = vld [vmem:[%s14380_s23 + $0xf8] sm:$0xf]  ;;  %v11249_v38 = vld [vmem:[%s21088_s1 + $0x660] sm:$0xf0] }
 0x115   : > { %3941 = vmatpush.bf16.msrb.mxu3 %v11540_v58  ;;  %v15212_v58 = vor.u32 %v13457_v42, %v10359_v22 }
 0x116   : > { %3812 = vmatmul.bf16.gmra.mxu0 %v14778_v1  ;;  %3843 = vmatpush.bf16.msrb.mxu1 %v11028_v31  ;;  %v13743_v31 = vld [vmem:[%s21088_s1 + $0x844] sm:$0xf] }
 0x117   : > { %v3568_v60 = vpop.f32.mrf.mxu3  ;;  %21329 = vst [vmem:[#allocation43_spill] sm:$0xff] %v15212_v58 }
 0x118   : > { %v3569_v28 = vadd.f32 %v3568_v60, %v3520_v63  ;;  %v3521_v61 = vpop.f32.mrf.mxu2 }
 0x119   : > { %v3472_v6 = vpop.f32.mrf.mxu1 }
 0x11a   : > { %v3473_v45 = vadd.f32 %v3472_v6, %v3424_v11  ;;  %v15206_v1 = vadd.f32 %v3617_v59, %v3569_v28  ;;  %v15210_v11 = vor.u32 %v13453_v32, %v10353_v50  ;;  %v13855_v59 = vld [vmem:[%s21088_s1 + $0xbc4] sm:$0xf] }
 0x11b   : > { %v3619_v19 = vpop.f32.mrf.mxu0  ;;  %v11953_v28 = vld [vmem:[%s21088_s1 + $0xbe0] sm:$0xf0] }
 0x11c   : > { %21328 = vst [vmem:[#allocation42_spill] sm:$0xff] %v15210_v11  ;;  %v3522_v18 = vadd.f32 %v3521_v61, %v3473_v45  ;;  %v11956_v45 = vor.u32 %v13855_v59, %v11953_v28  ;;  %v13847_v61 = vld [vmem:[%s21088_s1 + $0xb84] sm:$0xf] }
 0x11d   : > { %3719 = vmatmul.bf16.gmra.mxu2 %v15212_v58 }
 0x11e   : > { %3985 = vmatpush.bf16.msrb.mxu0 %v11956_v45 }
 0x11f   : > { %v3570_v62 = vpop.f32.mrf.mxu3 }
 0x120   : > { %v3571_v6 = vadd.f32 %v3570_v62, %v3522_v18  ;;  %v3524_v50 = vpop.f32.mrf.mxu2  ;;  %v11921_v62 = vld [vmem:[%s21088_s1 + $0xba0] sm:$0xf0] }
 0x121   : > { %v3475_v60 = vpop.f32.mrf.mxu1 }
 0x122   : > { %v3476_v63 = vadd.f32 %v3475_v60, %v14977_v56  ;;  %v15224_v7 = vadd.f32 %v3619_v19, %v3571_v6  ;;  %v13679_v56 = vld [vmem:[%s21088_s1 + $0x644] sm:$0xf]  ;;  %v11924_v6 = vor.u32 %v13847_v61, %v11921_v62  ;;  %v13464_v61 = vld [vmem:[%s14380_s23 + $0x148] sm:$0xf0] }
 0x123   : > { %v3622_v40 = vpop.f32.mrf.mxu0  ;;  %v11252_v32 = vor.u32 %v13679_v56, %v11249_v38  ;;  %v11505_v19 = vld [vmem:[%s21088_s1 + $0x860] sm:$0xf0] }
 0x124   : > { %3670 = vmatmul.bf16.gmra.mxu1 %v15210_v11  ;;  %3768 = vmatmul.bf16.gmra.mxu3 %v14436_v48  ;;  %v11508_v42 = vor.u32 %v13743_v31, %v11505_v19  ;;  %v3525_v18 = vadd.f32 %v3524_v50, %v3476_v63  ;;  %v13615_v56 = vld [vmem:[%s21088_s1 + $0x444] sm:$0xf]  ;;  %v10381_v19 = vld [vmem:[%s14380_s23 + $0x144] sm:$0xf0] }
 0x125   : > { %3893 = vmatpush.bf16.msrb.mxu2 %v11252_v32  ;;  %v10993_v38 = vld [vmem:[%s21088_s1 + $0x460] sm:$0xf0]  ;;  %3986 = vmatpush.bf16.msrb.mxu0 %v11924_v6  ;;  %v13460_v32 = vld [vmem:[%s14380_s23 + $0x12c] sm:$0xf] }
 0x126   : > { %3817 = vmatmul.bf16.gmra.mxu0 %v14816_v26  ;;  %3942 = vmatpush.bf16.msrb.mxu3 %v11508_v42  ;;  %v13839_v63 = vld [vmem:[%s21088_s1 + $0xb44] sm:$0xf]  ;;  %v10996_v31 = vor.u32 %v13615_v56, %v10993_v38  ;;  %v10387_v42 = vld [vmem:[%s14380_s23 + $0x130] sm:$0xf] }
 0x127   : > { %v3573_v22 = vpop.f32.mrf.mxu3  ;;  %v13831_v6 = vld [vmem:[%s21088_s1 + $0xb04] sm:$0xf] }
 0x128   : > { %v3574_v28 = vadd.f32 %v3573_v22, %v3525_v18  ;;  %3844 = vmatpush.bf16.msrb.mxu1 %v10996_v31  ;;  %v3526_v62 = vpop.f32.mrf.mxu2  ;;  %v11857_v56 = vld [vmem:[%s21088_s1 + $0xb20] sm:$0xf0] }
 0x129   : > { %v3477_v60 = vpop.f32.mrf.mxu1 }
 0x12a   : > { %v3478_v59 = vadd.f32 %v3477_v60, %v15003_v37  ;;  %v11889_v37 = vld [vmem:[%s21088_s1 + $0xb60] sm:$0xf0]  ;;  %v15260_v22 = vadd.f32 %v3622_v40, %v3574_v28  ;;  %v15264_v60 = vor.u32 %v13460_v32, %v10381_v19  ;;  %v15272_v40 = vor.u32 %v13464_v61, %v10387_v42 }
 0x12b   : > { %v3624_v45 = vpop.f32.mrf.mxu0  ;;  %v11892_v50 = vor.u32 %v13839_v63, %v11889_v37  ;;  %v11860_v28 = vor.u32 %v13831_v6, %v11857_v56  ;;  %v13823_v32 = vld [vmem:[%s21088_s1 + $0xac4] sm:$0xf] }
 0x12c   : > { %21330 = vst [vmem:[#allocation44_spill] sm:$0xff] %v15264_v60  ;;  %v3527_v38 = vadd.f32 %v3526_v62, %v3478_v59  ;;  %v11825_v19 = vld [vmem:[%s21088_s1 + $0xae0] sm:$0xf0] }
 0x12d   : > { %3987 = vmatpush.bf16.msrb.mxu0 %v11892_v50  ;;  %21331 = vst [vmem:[#allocation45_spill] sm:$0xff] %v15272_v40  ;;  %3724 = vmatmul.bf16.gmra.mxu2 %v15272_v40  ;;  %v11828_v59 = vor.u32 %v13823_v32, %v11825_v19  ;;  %v11217_v61 = vld [vmem:[%s21088_s1 + $0x620] sm:$0xf0] }
 0x12e   : > { %v13735_v62 = vld [vmem:[%s21088_s1 + $0x804] sm:$0xf] }
 0x12f   : > { %v3575_v18 = vpop.f32.mrf.mxu3 }
 0x130   : > { %v3576_v37 = vadd.f32 %v3575_v18, %v3527_v38  ;;  %v3529_v6 = vpop.f32.mrf.mxu2 }
 0x131   : > { %v3480_v63 = vpop.f32.mrf.mxu1  ;;  %3988 = vmatpush.bf16.msrb.mxu0 %v11860_v28  ;;  %v11793_v28 = vld [vmem:[%s21088_s1 + $0xaa0] sm:$0xf0] }
 0x132   : > { %v3481_v31 = vadd.f32 %v3480_v63, %v15035_v10  ;;  %v15284_v42 = vadd.f32 %v3624_v45, %v3576_v37  ;;  %v13671_v10 = vld [vmem:[%s21088_s1 + $0x604] sm:$0xf] }
 0x133   : > { %v3627_v50 = vpop.f32.mrf.mxu0  ;;  %v11220_v18 = vor.u32 %v13671_v10, %v11217_v61  ;;  %v11473_v45 = vld [vmem:[%s21088_s1 + $0x820] sm:$0xf0] }
 0x134   : > { %3675 = vmatmul.bf16.gmra.mxu1 %v15264_v60  ;;  %3773 = vmatmul.bf16.gmra.mxu3 %v14552_v46  ;;  %v11476_v38 = vor.u32 %v13735_v62, %v11473_v45  ;;  %v13815_v63 = vld [vmem:[%s21088_s1 + $0xa84] sm:$0xf]  ;;  %v3530_v37 = vadd.f32 %v3529_v6, %v3481_v31 }
 0x135   : > { %3989 = vmatpush.bf16.msrb.mxu0 %v11828_v59  ;;  %3894 = vmatpush.bf16.msrb.mxu2 %v11220_v18  ;;  %v11796_v19 = vor.u32 %v13815_v63, %v11793_v28  ;;  %v13607_v62 = vld [vmem:[%s21088_s1 + $0x404] sm:$0xf]  ;;  %v10415_v28 = vld [vmem:[%s14380_s23 + $0x168] sm:$0xf] }
 0x136   : > { %3822 = vmatmul.bf16.gmra.mxu0 %v14872_v16  ;;  %3943 = vmatpush.bf16.msrb.mxu3 %v11476_v38  ;;  %v10961_v45 = vld [vmem:[%s21088_s1 + $0x420] sm:$0xf0] }
 0x137   : > { %v3578_v56 = vpop.f32.mrf.mxu3  ;;  %v13807_v31 = vld [vmem:[%s21088_s1 + $0xa44] sm:$0xf]  ;;  %v10964_v18 = vor.u32 %v13607_v62, %v10961_v45 }
 0x138   : > { %v3579_v10 = vadd.f32 %v3578_v56, %v3530_v37  ;;  %v13467_v6 = vld [vmem:[%s14380_s23 + $0x164] sm:$0xf]  ;;  %v10409_v56 = vld [vmem:[%s14380_s23 + $0x17c] sm:$0xf0] }
 0x139   : > { %v3482_v32 = vpop.f32.mrf.mxu1  ;;  %3990 = vmatpush.bf16.msrb.mxu0 %v11796_v19  ;;  %v13471_v37 = vld [vmem:[%s14380_s23 + $0x180] sm:$0xf0]  ;;  %3845 = vmatpush.bf16.msrb.mxu1 %v10964_v18  ;;  %v15324_v16 = vor.u32 %v13467_v6, %v10409_v56 }
 0x13a   : > { %v3483_v59 = vadd.f32 %v3482_v32, %v15059_v25  ;;  %v11761_v25 = vld [vmem:[%s21088_s1 + $0xa60] sm:$0xf0]  ;;  %v15320_v63 = vadd.f32 %v3627_v50, %v3579_v10  ;;  %v3531_v32 = vpop.f32.mrf.mxu2  ;;  %v15332_v50 = vor.u32 %v13471_v37, %v10415_v28 }
 0x13b   : > { %v3629_v61 = vpop.f32.mrf.mxu0  ;;  %v11764_v38 = vor.u32 %v13807_v31, %v11761_v25  ;;  %21332 = vst [vmem:[#allocation46_spill] sm:$0xff] %v15324_v16  ;;  %v13799_v62 = vld [vmem:[%s21088_s1 + $0xa04] sm:$0xf] }
 0x13c   : > { %v11729_v45 = vld [vmem:[%s21088_s1 + $0xa20] sm:$0xf0]  ;;  %v3532_v46 = vadd.f32 %v3531_v32, %v3483_v59  ;;  %21333 = vst [vmem:[#allocation47_spill] sm:$0xff] %v15332_v50  ;;  %v10679_v59 = vld [vmem:[%s21088_s1 + $0x1c8] sm:$0xf] }
 0x13d   : > { %3991 = vmatpush.bf16.msrb.mxu0 %v11764_v38  ;;  %v11732_v10 = vor.u32 %v13799_v62, %v11729_v45  ;;  %3729 = vmatmul.bf16.gmra.mxu2 %v15332_v50 }
 0x13f   : > { %v3580_v19 = vpop.f32.mrf.mxu3 }
 0x140   : > { %v3581_v25 = vadd.f32 %v3580_v19, %v3532_v46  ;;  %v13540_v46 = vld [vmem:[%s21088_s1 + $0x1e4] sm:$0xf0] }
 0x141   : > { %v3485_v31 = vpop.f32.mrf.mxu1  ;;  %3992 = vmatpush.bf16.msrb.mxu0 %v11732_v10  ;;  %v10680_v56 = vor.u32 %v13540_v46, %v10679_v59  ;;  %v12209_v59 = vld [vmem:[%s21088_s1 + $0xde0] sm:$0xf0] }
 0x142   : > { %v3486_v18 = vadd.f32 %v3485_v31, %v14980_v57  ;;  %v15338_v6 = vadd.f32 %v3629_v61, %v3581_v25  ;;  %v10935_v57 = vld [vmem:[%s21088_s1 + $0x3c8] sm:$0xf]  ;;  %v3534_v28 = vpop.f32.mrf.mxu2  ;;  %v13919_v25 = vld [vmem:[%s21088_s1 + $0xdc4] sm:$0xf] }
 0x143   : > { %v3632_v38 = vpop.f32.mrf.mxu0  ;;  %v13604_v61 = vld [vmem:[%s21088_s1 + $0x3e4] sm:$0xf0]  ;;  %4083 = vmatpush.bf16.msra.mxu2 %v10680_v56  ;;  %v12212_v46 = vor.u32 %v13919_v25, %v12209_v59  ;;  %v13478_v56 = vld [vmem:[%s14380_s23 + $0x1b8] sm:$0xf0] }
 0x144   : > { %3680 = vmatmul.bf16.gmra.mxu1 %v15324_v16  ;;  %3778 = vmatmul.bf16.gmra.mxu3 %v14438_v49  ;;  %v10936_v32 = vor.u32 %v13604_v61, %v10935_v57  ;;  %v3535_v19 = vadd.f32 %v3534_v28, %v3486_v18  ;;  %v10437_v49 = vld [vmem:[%s14380_s23 + $0x1b4] sm:$0xf0]  ;;  %v10443_v18 = vld [vmem:[%s14380_s23 + $0x1a0] sm:$0xf] }
 0x145   : > { %4034 = vmatpush.bf16.msra.mxu1 %v12212_v46 }
 0x146   : > { %3827 = vmatmul.bf16.gmra.mxu0 %v14934_v9  ;;  %4132 = vmatpush.bf16.msra.mxu3 %v10936_v32  ;;  %v13474_v9 = vld [vmem:[%s14380_s23 + $0x19c] sm:$0xf] }
 0x147   : > { %v3583_v37 = vpop.f32.mrf.mxu3  ;;  %v15366_v28 = vor.u32 %v13474_v9, %v10437_v49  ;;  %v10647_v49 = vld [vmem:[%s21088_s1 + $0x188] sm:$0xf] }
 0x148   : > { %v3584_v31 = vadd.f32 %v3583_v37, %v3535_v19  ;;  %v15368_v19 = vor.u32 %v13478_v56, %v10443_v18  ;;  %v13532_v9 = vld [vmem:[%s21088_s1 + $0x1a4] sm:$0xf0] }
 0x149   : > { %v3487_v62 = vpop.f32.mrf.mxu1  ;;  %21334 = vst [vmem:[#allocation48_spill] sm:$0xff] %v15366_v28 }
 0x14a   : > { %v3488_v45 = vadd.f32 %v3487_v62, %v15006_v41  ;;  %v15362_v57 = vadd.f32 %v3632_v38, %v3584_v31  ;;  %v3536_v41 = vpop.f32.mrf.mxu2  ;;  %21335 = vst [vmem:[#allocation49_spill] sm:$0xff] %v15368_v19 }
 0x14b   : > { %v3634_v10 = vpop.f32.mrf.mxu0 }
 0x14c   : > { %v3537_v37 = vadd.f32 %v3536_v41, %v3488_v45  ;;  %v10648_v45 = vor.u32 %v13532_v9, %v10647_v49 }
 0x14d   : > { %3734 = vmatmul.bf16.gmra.mxu2 %v15368_v19 }
 0x14e   : > { %4084 = vmatpush.bf16.msra.mxu2 %v10648_v45 }
 0x14f   : > { %v3585_v61 = vpop.f32.mrf.mxu3 }
 0x150   : > { %v3586_v50 = vadd.f32 %v3585_v61, %v3537_v37  ;;  %v13911_v61 = vld [vmem:[%s21088_s1 + $0xd84] sm:$0xf] }
 0x151   : > { %v3490_v32 = vpop.f32.mrf.mxu1  ;;  %v12177_v37 = vld [vmem:[%s21088_s1 + $0xda0] sm:$0xf0] }
 0x152   : > { %v3491_v62 = vadd.f32 %v3490_v32, %v15038_v15  ;;  %v15374_v38 = vadd.f32 %v3634_v10, %v3586_v50  ;;  %v10903_v15 = vld [vmem:[%s21088_s1 + $0x388] sm:$0xf]  ;;  %v3539_v31 = vpop.f32.mrf.mxu2  ;;  %v12180_v32 = vor.u32 %v13911_v61, %v12177_v37 }
 0x153   : > { %v3637_v40 = vpop.f32.mrf.mxu0  ;;  %v13596_v50 = vld [vmem:[%s21088_s1 + $0x3a4] sm:$0xf0] }
 0x154   : > { %3685 = vmatmul.bf16.gmra.mxu1 %v15366_v28  ;;  %3783 = vmatmul.bf16.gmra.mxu3 %v14554_v47  ;;  %v10904_v25 = vor.u32 %v13596_v50, %v10903_v15  ;;  %v3540_v59 = vadd.f32 %v3539_v31, %v3491_v62 }
 0x155   : > { %4035 = vmatpush.bf16.msra.mxu1 %v12180_v32 }
 0x156   : > { %3832 = vmatmul.bf16.gmra.mxu0 %v15000_v36  ;;  %4133 = vmatpush.bf16.msra.mxu3 %v10904_v25  ;;  %v10615_v25 = vld [vmem:[%s21088_s1 + $0x148] sm:$0xf] }
 0x157   : > { %v3588_v10 = vpop.f32.mrf.mxu3 }
 0x158   : > { %v3589_v56 = vadd.f32 %v3588_v10, %v3540_v59  ;;  %v15403_v10 = vperm.slane %v14955_v30, 1  ;;  %v10871_v59 = vld [vmem:[%s21088_s1 + $0x348] sm:$0xf] }
 0x159   : > { %v3492_v46 = vpop.f32.mrf.mxu1  ;;  %v13588_v30 = vld [vmem:[%s21088_s1 + $0x364] sm:$0xf0] }
 0x15a   : > { %v3493_v18 = vadd.f32 %v3492_v46, %v15062_v23  ;;  %v15396_v49 = vadd.f32 %v3637_v40, %v3589_v56  ;;  %v3541_v62 = vpop.f32.mrf.mxu2 }
 0x15b   : > { %v3639_v41 = vpop.f32.mrf.mxu0 }
 0x15c   : > { %v3542_v15 = vadd.f32 %v3541_v62, %v3493_v18 }
 0x15d   : > { %3895 = vmatmul.bf16.vlgmr.msrb.gmra.mxu2 %v14668_v54 }
 0x15f   : > { %v3590_v9 = vpop.f32.mrf.mxu3 }
 0x160   : > { %v3591_v50 = vadd.f32 %v3590_v9, %v3542_v15  ;;  %v13903_v15 = vld [vmem:[%s21088_s1 + $0xd44] sm:$0xf] }
 0x161   : > { %v3651_v45 = vpop.f32.mrf.mxu1 }
 0x162   : > { %v3652_v23 = vadd.f32 %v3651_v45, %v15092_v52  ;;  %v15405_v40 = vadd.f32 %v3639_v41, %v3591_v50  ;;  %v13524_v52 = vld [vmem:[%s21088_s1 + $0x164] sm:$0xf0]  ;;  %v3700_v18 = vpop.f32.mrf.mxu2  ;;  %v10872_v41 = vor.u32 %v13588_v30, %v10871_v59  ;;  %v12145_v45 = vld [vmem:[%s21088_s1 + $0xd60] sm:$0xf0] }
 0x163   : > { %v3798_v31 = vpop.f32.mrf.mxu0  ;;  %v10616_v46 = vor.u32 %v13524_v52, %v10615_v25  ;;  %v12148_v25 = vor.u32 %v13903_v15, %v12145_v45 }
 0x164   : > { %3846 = vmatmul.bf16.vlgmr.msrb.gmra.mxu1 %v14666_v53  ;;  %3944 = vmatmul.bf16.vlgmr.msrb.gmra.mxu3 %v14670_v55  ;;  %v3701_v61 = vadd.f32 %v3700_v18, %v3652_v23 }
 0x165   : > { %4085 = vmatpush.bf16.msra.mxu2 %v10616_v46  ;;  %4134 = vmatpush.bf16.msra.mxu3 %v10872_v41 }
 0x166   : > { %3993 = vmatmul.bf16.vlgmr.msrb.gmra.mxu0 %v15056_v8  ;;  %4036 = vmatpush.bf16.msra.mxu1 %v12148_v25  ;;  %v6141_v18 = vmax.f32 %v3701_v61, 0.0  ;;  %v10839_v61 = vld [vmem:[%s21088_s1 + $0x308] sm:$0xf] }
 0x167   : > { %v3749_v56 = vpop.f32.mrf.mxu3 }
 0x168   : > { %v3750_v37 = vadd.f32 %v3749_v56, %v15403_v10 }
 0x169   : > { %v3653_v32 = vpop.f32.mrf.mxu1 }
 0x16a   : > { %v3654_v62 = vadd.f32 %v3653_v32, %v15105_v43  ;;  %v15428_v50 = vadd.f32 %v3798_v31, %v3750_v37  ;;  %v3702_v23 = vpop.f32.mrf.mxu2  ;;  %v10583_v31 = vld [vmem:[%s21088_s1 + $0x108] sm:$0xf] }
 0x16b   : > { %v3800_v9 = vpop.f32.mrf.mxu0 }
 0x16c   : > { %v3703_v59 = vadd.f32 %v3702_v23, %v3654_v62  ;;  %v13580_v62 = vld [vmem:[%s21088_s1 + $0x324] sm:$0xf0] }
 0x16d   : > { %3900 = vmatmul.bf16.gmra.mxu2 %v14706_v13  ;;  %v10840_v45 = vor.u32 %v13580_v62, %v10839_v61 }
 0x16e   : > { %v6149_v56 = vmax.f32 %v3703_v59, 0.0 }
 0x16f   : > { %v3751_v52 = vpop.f32.mrf.mxu3  ;;  %4135 = vmatpush.bf16.msra.mxu3 %v10840_v45 }
 0x170   : > { %v3752_v46 = vadd.f32 %v3751_v52, %v15403_v10  ;;  %v15435_v8 = vpack.c.bf16 %v6149_v56, %v6141_v18  ;;  %v12113_v18 = vld [vmem:[%s21088_s1 + $0xd20] sm:$0xf0] }
 0x171   : > { %v3656_v43 = vpop.f32.mrf.mxu1 }
 0x172   : > { %v3657_v30 = vadd.f32 %v3656_v43, %v15130_v39  ;;  %v15432_v32 = vadd.f32 %v3800_v9, %v3752_v46  ;;  %21336 = vst [vmem:[#allocation50_spill] sm:$0xff] %v15435_v8  ;;  %v13516_v39 = vld [vmem:[%s21088_s1 + $0x124] sm:$0xf0]  ;;  %v3705_v9 = vpop.f32.mrf.mxu2  ;;  %v13895_v43 = vld [vmem:[%s21088_s1 + $0xd04] sm:$0xf] }
 0x173   : > { %v3803_v41 = vpop.f32.mrf.mxu0  ;;  %v10584_v37 = vor.u32 %v13516_v39, %v10583_v31  ;;  %v12116_v31 = vor.u32 %v13895_v43, %v12113_v18 }
 0x174   : > { %3851 = vmatmul.bf16.gmra.mxu1 %v14704_v12  ;;  %3949 = vmatmul.bf16.gmra.mxu3 %v14708_v14  ;;  %v3706_v25 = vadd.f32 %v3705_v9, %v3657_v30 }
 0x175   : > { %4086 = vmatpush.bf16.msra.mxu2 %v10584_v37  ;;  %4037 = vmatpush.bf16.msra.mxu1 %v12116_v31 }
 0x176   : > { %3998 = vmatmul.bf16.gmra.mxu0 %v15098_v5  ;;  %v6157_v9 = vmax.f32 %v3706_v25, 0.0  ;;  %v10807_v25 = vld [vmem:[%s21088_s1 + $0x2c8] sm:$0xf] }
 0x177   : > { %v3754_v15 = vpop.f32.mrf.mxu3 }
 0x178   : > { %v3755_v23 = vadd.f32 %v3754_v15, %v15403_v10 }
 0x179   : > { %v3658_v52 = vpop.f32.mrf.mxu1 }
 0x17a   : > { %v3659_v59 = vadd.f32 %v3658_v52, %v15143_v21  ;;  %v15460_v56 = vadd.f32 %v3803_v41, %v3755_v23  ;;  %v3707_v30 = vpop.f32.mrf.mxu2  ;;  %v10551_v41 = vld [vmem:[%s21088_s1 + $0xc8] sm:$0xf] }
 0x17b   : > { %v3805_v46 = vpop.f32.mrf.mxu0 }
 0x17c   : > { %v3708_v61 = vadd.f32 %v3707_v30, %v3659_v59  ;;  %v13572_v59 = vld [vmem:[%s21088_s1 + $0x2e4] sm:$0xf0] }
 0x17d   : > { %3905 = vmatmul.bf16.gmra.mxu2 %v14744_v34  ;;  %v10808_v18 = vor.u32 %v13572_v59, %v10807_v25 }
 0x17e   : > { %v6165_v15 = vmax.f32 %v3708_v61, 0.0 }
 0x17f   : > { %v3756_v39 = vpop.f32.mrf.mxu3  ;;  %4136 = vmatpush.bf16.msra.mxu3 %v10808_v18 }
 0x180   : > { %v3757_v37 = vadd.f32 %v3756_v39, %v15403_v10  ;;  %v15467_v8 = vpack.c.bf16 %v6165_v15, %v6157_v9  ;;  %v12081_v9 = vld [vmem:[%s21088_s1 + $0xce0] sm:$0xf0] }
 0x181   : > { %v3661_v21 = vpop.f32.mrf.mxu1 }
 0x182   : > { %v3662_v62 = vadd.f32 %v3661_v21, %v15168_v44  ;;  %v15464_v52 = vadd.f32 %v3805_v46, %v3757_v37  ;;  %21337 = vst [vmem:[#allocation51_spill] sm:$0xff] %v15467_v8  ;;  %v13508_v44 = vld [vmem:[%s21088_s1 + $0xe4] sm:$0xf0]  ;;  %v3710_v46 = vpop.f32.mrf.mxu2  ;;  %v13887_v21 = vld [vmem:[%s21088_s1 + $0xcc4] sm:$0xf] }
 0x183   : > { %v3808_v45 = vpop.f32.mrf.mxu0  ;;  %v10552_v23 = vor.u32 %v13508_v44, %v10551_v41  ;;  %v12084_v41 = vor.u32 %v13887_v21, %v12081_v9 }
 0x184   : > { %3856 = vmatmul.bf16.gmra.mxu1 %v14742_v33  ;;  %3954 = vmatmul.bf16.gmra.mxu3 %v14746_v35  ;;  %v3711_v31 = vadd.f32 %v3710_v46, %v3662_v62 }
 0x185   : > { %4087 = vmatpush.bf16.msra.mxu2 %v10552_v23  ;;  %4038 = vmatpush.bf16.msra.mxu1 %v12084_v41 }
 0x186   : > { %4003 = vmatmul.bf16.gmra.mxu0 %v15136_v24  ;;  %v6173_v46 = vmax.f32 %v3711_v31, 0.0  ;;  %v10775_v31 = vld [vmem:[%s21088_s1 + $0x288] sm:$0xf] }
 0x187   : > { %v3759_v43 = vpop.f32.mrf.mxu3 }
 0x188   : > { %v3760_v30 = vadd.f32 %v3759_v43, %v15403_v10 }
 0x189   : > { %v3663_v39 = vpop.f32.mrf.mxu1 }
 0x18a   : > { %v3664_v61 = vadd.f32 %v3663_v39, %v15181_v51  ;;  %v15492_v15 = vadd.f32 %v3808_v45, %v3760_v30  ;;  %v3712_v62 = vpop.f32.mrf.mxu2  ;;  %v10519_v45 = vld [vmem:[%s21088_s1 + $0x88] sm:$0xf] }
 0x18b   : > { %v3810_v37 = vpop.f32.mrf.mxu0 }
 0x18c   : > { %v3713_v25 = vadd.f32 %v3712_v62, %v3664_v61  ;;  %v13564_v61 = vld [vmem:[%s21088_s1 + $0x2a4] sm:$0xf0] }
 0x18d   : > { %3910 = vmatmul.bf16.gmra.mxu2 %v14782_v3  ;;  %v10776_v9 = vor.u32 %v13564_v61, %v10775_v31 }
 0x18e   : > { %v6181_v43 = vmax.f32 %v3713_v25, 0.0 }
 0x18f   : > { %v3761_v44 = vpop.f32.mrf.mxu3  ;;  %4137 = vmatpush.bf16.msra.mxu3 %v10776_v9 }
 0x190   : > { %v3762_v23 = vadd.f32 %v3761_v44, %v15403_v10  ;;  %v15499_v8 = vpack.c.bf16 %v6181_v43, %v6173_v46  ;;  %v12049_v46 = vld [vmem:[%s21088_s1 + $0xca0] sm:$0xf0] }
 0x191   : > { %v3666_v51 = vpop.f32.mrf.mxu1 }
 0x192   : > { %v3667_v59 = vadd.f32 %v3666_v51, %v15206_v1  ;;  %v15496_v39 = vadd.f32 %v3810_v37, %v3762_v23  ;;  %21338 = vst [vmem:[#allocation52_spill] sm:$0xff] %v15499_v8  ;;  %v13500_v1 = vld [vmem:[%s21088_s1 + $0xa4] sm:$0xf0]  ;;  %v3715_v37 = vpop.f32.mrf.mxu2  ;;  %v13879_v51 = vld [vmem:[%s21088_s1 + $0xc84] sm:$0xf] }
 0x193   : > { %v3813_v18 = vpop.f32.mrf.mxu0  ;;  %v10520_v30 = vor.u32 %v13500_v1, %v10519_v45  ;;  %v12052_v45 = vor.u32 %v13879_v51, %v12049_v46  ;;  %v21340_v51 = vld [vmem:[#allocation20_spill] sm:$0xff]  ;;  %v13492_v46 = vld [vmem:[%s21088_s1 + $0x64] sm:$0xf0] }
 0x194   : > { %3861 = vmatmul.bf16.gmra.mxu1 %v14780_v2  ;;  %3959 = vmatmul.bf16.gmra.mxu3 %v14784_v4  ;;  %v3716_v41 = vadd.f32 %v3715_v37, %v3667_v59 }
 0x195   : > { %4088 = vmatpush.bf16.msra.mxu2 %v10520_v30  ;;  %4039 = vmatpush.bf16.msra.mxu1 %v12052_v45  ;;  %v10743_v45 = vld [vmem:[%s21088_s1 + $0x248] sm:$0xf] }
 0x196   : > { %4008 = vmatmul.bf16.gmra.mxu0 %v15174_v29  ;;  %v6189_v37 = vmax.f32 %v3716_v41, 0.0 }
 0x197   : > { %v3764_v21 = vpop.f32.mrf.mxu3 }
 0x198   : > { %v3765_v62 = vadd.f32 %v3764_v21, %v15403_v10 }
 0x199   : > { %v3668_v44 = vpop.f32.mrf.mxu1 }
 0x19a   : > { %v3669_v25 = vadd.f32 %v3668_v44, %v15224_v7  ;;  %v15524_v43 = vadd.f32 %v3813_v18, %v3765_v62  ;;  %v3717_v59 = vpop.f32.mrf.mxu2  ;;  %v11191_v18 = vld [vmem:[%s21088_s1 + $0x5c8] sm:$0xf] }
 0x19b   : > { %v3815_v23 = vpop.f32.mrf.mxu0  ;;  %v13668_v62 = vld [vmem:[%s21088_s1 + $0x5e4] sm:$0xf0] }
 0x19c   : > { %v3718_v31 = vadd.f32 %v3717_v59, %v3669_v25  ;;  %v11192_v41 = vor.u32 %v13668_v62, %v11191_v18 }
 0x19d   : > { %3915 = vmatmul.bf16.gmra.mxu2 %v21340_v51  ;;  %v21349_v51 = vld [vmem:[#allocation29_spill] sm:$0xff] }
 0x19e   : > { %v6197_v21 = vmax.f32 %v3718_v31, 0.0  ;;  %4181 = vmatpush.bf16.msra.mxu0 %v11192_v41 }
 0x19f   : > { %v3766_v1 = vpop.f32.mrf.mxu3 }
 0x1a0   : > { %v3767_v30 = vadd.f32 %v3766_v1, %v15403_v10  ;;  %v15537_v25 = vpack.c.bf16 %v6197_v21, %v6189_v37  ;;  %v13556_v1 = vld [vmem:[%s21088_s1 + $0x264] sm:$0xf0] }
 0x1a1   : > { %v3671_v7 = vpop.f32.mrf.mxu1  ;;  %v11159_v37 = vld [vmem:[%s21088_s1 + $0x588] sm:$0xf] }
 0x1a2   : > { %v3672_v61 = vadd.f32 %v3671_v7, %v15260_v22  ;;  %v15528_v44 = vadd.f32 %v3815_v23, %v3767_v30  ;;  %21339 = vst [vmem:[#allocation53_spill] sm:$0xff] %v15537_v25  ;;  %v21341_v22 = vld [vmem:[#allocation21_spill] sm:$0xff]  ;;  %v10487_v23 = vld [vmem:[%s21088_s1 + $0x48] sm:$0xf]  ;;  %v3720_v31 = vpop.f32.mrf.mxu2  ;;  %v10744_v7 = vor.u32 %v13556_v1, %v10743_v45  ;;  %v13871_v45 = vld [vmem:[%s21088_s1 + $0xc44] sm:$0xf] }
 0x1a3   : > { %v3818_v9 = vpop.f32.mrf.mxu0  ;;  %v10488_v59 = vor.u32 %v13492_v46, %v10487_v23  ;;  %v13660_v21 = vld [vmem:[%s21088_s1 + $0x5a4] sm:$0xf0]  ;;  %v12017_v1 = vld [vmem:[%s21088_s1 + $0xc60] sm:$0xf0] }
 0x1a4   : > { %3866 = vmatmul.bf16.gmra.mxu1 %v14818_v27  ;;  %3964 = vmatmul.bf16.gmra.mxu3 %v21341_v22  ;;  %v3721_v18 = vadd.f32 %v3720_v31, %v3672_v61  ;;  %v11160_v41 = vor.u32 %v13660_v21, %v11159_v37  ;;  %v12020_v61 = vor.u32 %v13871_v45, %v12017_v1  ;;  %v11095_v37 = vld [vmem:[%s21088_s1 + $0x508] sm:$0xf]  ;;  %v21348_v22 = vld [vmem:[#allocation28_spill] sm:$0xff] }
 0x1a5   : > { %4089 = vmatpush.bf16.msra.mxu2 %v10488_v59  ;;  %4138 = vmatpush.bf16.msra.mxu3 %v10744_v7  ;;  %v11127_v59 = vld [vmem:[%s21088_s1 + $0x548] sm:$0xf] }
 0x1a6   : > { %4013 = vmatmul.bf16.gmra.mxu0 %v15210_v11  ;;  %4040 = vmatpush.bf16.msra.mxu1 %v12020_v61  ;;  %v6205_v1 = vmax.f32 %v3721_v18, 0.0  ;;  %v11063_v11 = vld [vmem:[%s21088_s1 + $0x4c8] sm:$0xf] }
 0x1a7   : > { %v3769_v30 = vpop.f32.mrf.mxu3  ;;  %4182 = vmatpush.bf16.msra.mxu0 %v11160_v41 }
 0x1a8   : > { %v3770_v62 = vadd.f32 %v3769_v30, %v15403_v10 }
 0x1a9   : > { %v3673_v23 = vpop.f32.mrf.mxu1 }
 0x1aa   : > { %v3674_v46 = vadd.f32 %v3673_v23, %v15284_v42  ;;  %v15568_v8 = vadd.f32 %v3818_v9, %v3770_v62  ;;  %v13652_v42 = vld [vmem:[%s21088_s1 + $0x564] sm:$0xf0]  ;;  %v3722_v30 = vpop.f32.mrf.mxu2 }
 0x1ab   : > { %v3820_v25 = vpop.f32.mrf.mxu0  ;;  %v11128_v31 = vor.u32 %v13652_v42, %v11127_v59  ;;  %v13644_v9 = vld [vmem:[%s21088_s1 + $0x524] sm:$0xf0] }
 0x1ac   : > { %v3723_v21 = vadd.f32 %v3722_v30, %v3674_v46  ;;  %v11096_v41 = vor.u32 %v13644_v9, %v11095_v37  ;;  %v13636_v46 = vld [vmem:[%s21088_s1 + $0x4e4] sm:$0xf0] }
 0x1ad   : > { %4183 = vmatpush.bf16.msra.mxu0 %v11128_v31  ;;  %v21342_v31 = vld [vmem:[#allocation23_spill] sm:$0xff]  ;;  %v11064_v18 = vor.u32 %v13636_v46, %v11063_v11 }
 0x1ae   : > { %v6213_v61 = vmax.f32 %v3723_v21, 0.0  ;;  %v13484_v37 = vld [vmem:[%s21088_s1 + $0x24] sm:$0xf0] }
 0x1af   : > { %v3771_v7 = vpop.f32.mrf.mxu3  ;;  %v10711_v9 = vld [vmem:[%s21088_s1 + $0x208] sm:$0xf] }
 0x1b0   : > { %v3772_v62 = vadd.f32 %v3771_v7, %v15403_v10  ;;  %v15593_v30 = vpack.c.bf16 %v6213_v61, %v6205_v1  ;;  %v21344_v7 = vld [vmem:[#allocation24_spill] sm:$0xff]  ;;  %v13548_v11 = vld [vmem:[%s21088_s1 + $0x224] sm:$0xf0] }
 0x1b1   : > { %v3676_v23 = vpop.f32.mrf.mxu1  ;;  %4184 = vmatpush.bf16.msra.mxu0 %v11096_v41  ;;  %3920 = vmatmul.bf16.gmra.mxu2 %v21344_v7  ;;  %v10712_v41 = vor.u32 %v13548_v11, %v10711_v9  ;;  %v11031_v1 = vld [vmem:[%s21088_s1 + $0x488] sm:$0xf]  ;;  %v13863_v9 = vld [vmem:[%s21088_s1 + $0xc04] sm:$0xf] }
 0x1b2   : > { %v3677_v45 = vadd.f32 %v3676_v23, %v15320_v63  ;;  %v15584_v42 = vadd.f32 %v3820_v25, %v3772_v62  ;;  %21343 = vst [vmem:[#allocation54_spill] sm:$0xff] %v15593_v30  ;;  %v21345_v63 = vld [vmem:[#allocation25_spill] sm:$0xff]  ;;  %v10455_v25 = vld [vmem:[%s21088_s1 + $0x8] sm:$0xf]  ;;  %v3725_v62 = vpop.f32.mrf.mxu2  ;;  %v11985_v11 = vld [vmem:[%s21088_s1 + $0xc20] sm:$0xf0] }
 0x1b3   : > { %v3823_v59 = vpop.f32.mrf.mxu0  ;;  %v10456_v21 = vor.u32 %v13484_v37, %v10455_v25  ;;  %v13628_v61 = vld [vmem:[%s21088_s1 + $0x4a4] sm:$0xf0]  ;;  %4139 = vmatpush.bf16.msra.mxu3 %v10712_v41 }
 0x1b4   : > { %3871 = vmatmul.bf16.gmra.mxu1 %v21342_v31  ;;  %3969 = vmatmul.bf16.gmra.mxu3 %v21345_v63  ;;  %v3726_v46 = vadd.f32 %v3725_v62, %v3677_v45  ;;  %v11988_v45 = vor.u32 %v13863_v9, %v11985_v11 }
 0x1b5   : > { %4185 = vmatpush.bf16.msra.mxu0 %v11064_v18  ;;  %4090 = vmatpush.bf16.msra.mxu2 %v10456_v21  ;;  %v11032_v18 = vor.u32 %v13628_v61, %v11031_v1  ;;  %v10999_v21 = vld [vmem:[%s21088_s1 + $0x448] sm:$0xf] }
 0x1b6   : > { %4018 = vmatmul.bf16.gmra.mxu0 %v15264_v60  ;;  %4041 = vmatpush.bf16.msra.mxu1 %v11988_v45  ;;  %v10967_v1 = vld [vmem:[%s21088_s1 + $0x408] sm:$0xf]  ;;  %v6221_v11 = vmax.f32 %v3726_v46, 0.0 }
 0x1b7   : > { %v3774_v23 = vpop.f32.mrf.mxu3  ;;  %v13796_v46 = vld [vmem:[%s21088_s1 + $0x9e4] sm:$0xf0] }
 0x1b8   : > { %v3775_v30 = vadd.f32 %v3774_v23, %v15403_v10 }
 0x1b9   : > { %v3678_v25 = vpop.f32.mrf.mxu1  ;;  %4186 = vmatpush.bf16.msra.mxu0 %v11032_v18 }
 0x1ba   : > { %v3679_v37 = vadd.f32 %v3678_v25, %v15338_v6  ;;  %v15624_v63 = vadd.f32 %v3823_v59, %v3775_v30  ;;  %v13620_v6 = vld [vmem:[%s21088_s1 + $0x464] sm:$0xf0]  ;;  %v3727_v23 = vpop.f32.mrf.mxu2 }
 0x1bb   : > { %v3825_v60 = vpop.f32.mrf.mxu0  ;;  %v11000_v62 = vor.u32 %v13620_v6, %v10999_v21  ;;  %v13612_v59 = vld [vmem:[%s21088_s1 + $0x424] sm:$0xf0] }
 0x1bc   : > { %v3728_v30 = vadd.f32 %v3727_v23, %v3679_v37  ;;  %v10968_v18 = vor.u32 %v13612_v59, %v10967_v1  ;;  %v13860_v23 = vld [vmem:[%s21088_s1 + $0xbe4] sm:$0xf0] }
 0x1bd   : > { %4187 = vmatpush.bf16.msra.mxu0 %v11000_v62  ;;  %v21346_v62 = vld [vmem:[#allocation27_spill] sm:$0xff] }
 0x1be   : > { %v6229_v45 = vmax.f32 %v3728_v30, 0.0 }
 0x1bf   : > { %v3776_v41 = vpop.f32.mrf.mxu3 }
 0x1c0   : > { %v3777_v61 = vadd.f32 %v3776_v41, %v15403_v10  ;;  %v15643_v7 = vpack.c.bf16 %v6229_v45, %v6221_v11  ;;  %v11447_v45 = vld [vmem:[%s21088_s1 + $0x7c8] sm:$0xf] }
 0x1c1   : > { %v3681_v25 = vpop.f32.mrf.mxu1  ;;  %4188 = vmatpush.bf16.msra.mxu0 %v10968_v18  ;;  %3925 = vmatmul.bf16.gmra.mxu2 %v21348_v22 }
 0x1c2   : > { %v3682_v9 = vadd.f32 %v3681_v25, %v15362_v57  ;;  %v15640_v6 = vadd.f32 %v3825_v60, %v3777_v61  ;;  %21347 = vst [vmem:[#allocation55_spill] sm:$0xff] %v15643_v7  ;;  %v11703_v57 = vld [vmem:[%s21088_s1 + $0x9c8] sm:$0xf]  ;;  %v3730_v41 = vpop.f32.mrf.mxu2 }
 0x1c3   : > { %v3828_v21 = vpop.f32.mrf.mxu0  ;;  %v11959_v60 = vld [vmem:[%s21088_s1 + $0xbc8] sm:$0xf]  ;;  %v11704_v37 = vor.u32 %v13796_v46, %v11703_v57 }
 0x1c4   : > { %3876 = vmatmul.bf16.gmra.mxu1 %v21346_v62  ;;  %3974 = vmatmul.bf16.gmra.mxu3 %v21349_v51  ;;  %v11960_v59 = vor.u32 %v13860_v23, %v11959_v60  ;;  %v3731_v30 = vadd.f32 %v3730_v41, %v3682_v9  ;;  %v13732_v57 = vld [vmem:[%s21088_s1 + $0x7e4] sm:$0xf0] }
 0x1c5   : > { %4279 = vmatpush.bf16.msrb.mxu2 %v11704_v37  ;;  %v11448_v60 = vor.u32 %v13732_v57, %v11447_v45  ;;  %v21350_v51 = vld [vmem:[#allocation31_spill] sm:$0xff] }
 0x1c6   : > { %4023 = vmatmul.bf16.gmra.mxu0 %v15324_v16  ;;  %4328 = vmatpush.bf16.msrb.mxu3 %v11960_v59  ;;  %v6237_v59 = vmax.f32 %v3731_v30, 0.0  ;;  %v11927_v30 = vld [vmem:[%s21088_s1 + $0xb88] sm:$0xf] }
 0x1c7   : > { %v3779_v1 = vpop.f32.mrf.mxu3  ;;  %4230 = vmatpush.bf16.msrb.mxu1 %v11448_v60  ;;  %v13852_v45 = vld [vmem:[%s21088_s1 + $0xba4] sm:$0xf0] }
 0x1c8   : > { %v3780_v61 = vadd.f32 %v3779_v1, %v15403_v10 }
 0x1c9   : > { %v3683_v25 = vpop.f32.mrf.mxu1 }
 0x1ca   : > { %v3684_v18 = vadd.f32 %v3683_v25, %v15374_v38  ;;  %v15668_v46 = vadd.f32 %v3828_v21, %v3780_v61  ;;  %v3732_v9 = vpop.f32.mrf.mxu2  ;;  %v21352_v21 = vld [vmem:[#allocation32_spill] sm:$0xff]  ;;  %v21353_v61 = vld [vmem:[#allocation33_spill] sm:$0xff] }
 0x1cb   : > { %v3830_v11 = vpop.f32.mrf.mxu0 }
 0x1cc   : > { %v3733_v41 = vadd.f32 %v3732_v9, %v3684_v18  ;;  %v11671_v18 = vld [vmem:[%s21088_s1 + $0x988] sm:$0xf]  ;;  %v11928_v9 = vor.u32 %v13852_v45, %v11927_v30 }
 0x1ce   : > { %v6245_v25 = vmax.f32 %v3733_v41, 0.0  ;;  %4329 = vmatpush.bf16.msrb.mxu3 %v11928_v9 }
 0x1cf   : > { %v3781_v23 = vpop.f32.mrf.mxu3 }
 0x1d0   : > { %v3782_v37 = vadd.f32 %v3781_v23, %v15403_v10  ;;  %v15675_v22 = vpack.c.bf16 %v6245_v25, %v6237_v59  ;;  %v11415_v25 = vld [vmem:[%s21088_s1 + $0x788] sm:$0xf] }
 0x1d1   : > { %v3686_v38 = vpop.f32.mrf.mxu1  ;;  %3930 = vmatmul.bf16.gmra.mxu2 %v21352_v21 }
 0x1d2   : > { %v3687_v1 = vadd.f32 %v3686_v38, %v15396_v49  ;;  %v15672_v16 = vadd.f32 %v3830_v11, %v3782_v37  ;;  %21351 = vst [vmem:[#allocation56_spill] sm:$0xff] %v15675_v22  ;;  %v13788_v49 = vld [vmem:[%s21088_s1 + $0x9a4] sm:$0xf0]  ;;  %v3735_v57 = vpop.f32.mrf.mxu2 }
 0x1d3   : > { %v3833_v7 = vpop.f32.mrf.mxu0  ;;  %v11672_v11 = vor.u32 %v13788_v49, %v11671_v18  ;;  %v13724_v18 = vld [vmem:[%s21088_s1 + $0x7a4] sm:$0xf0] }
 0x1d4   : > { %3881 = vmatmul.bf16.gmra.mxu1 %v21350_v51  ;;  %3979 = vmatmul.bf16.gmra.mxu3 %v21353_v61  ;;  %v3736_v23 = vadd.f32 %v3735_v57, %v3687_v1  ;;  %v11416_v30 = vor.u32 %v13724_v18, %v11415_v25  ;;  %v21354_v61 = vld [vmem:[#allocation35_spill] sm:$0xff] }
 0x1d5   : > { %4280 = vmatpush.bf16.msrb.mxu2 %v11672_v11 }
 0x1d6   : > { %4028 = vmatmul.bf16.gmra.mxu0 %v15366_v28  ;;  %4231 = vmatpush.bf16.msrb.mxu1 %v11416_v30  ;;  %v6253_v9 = vmax.f32 %v3736_v23, 0.0  ;;  %v11895_v23 = vld [vmem:[%s21088_s1 + $0xb48] sm:$0xf] }
 0x1d7   : > { %v3784_v60 = vpop.f32.mrf.mxu3 }
 0x1d8   : > { %v3785_v41 = vadd.f32 %v3784_v60, %v15403_v10 }
 0x1d9   : > { %v3688_v37 = vpop.f32.mrf.mxu1 }
 0x1da   : > { %v3689_v38 = vadd.f32 %v3688_v37, %v15405_v40  ;;  %v15700_v49 = vadd.f32 %v3833_v7, %v3785_v41  ;;  %v3737_v1 = vpop.f32.mrf.mxu2  ;;  %v21356_v7 = vld [vmem:[#allocation2_spill] sm:$0xff] }
 0x1db   : > { %v3835_v59 = vpop.f32.mrf.mxu0  ;;  %v21357_v41 = vld [vmem:[#allocation10_spill] sm:$0xff] }
 0x1dc   : > { %v3738_v57 = vadd.f32 %v3737_v1, %v3689_v38 }
 0x1de   : > { %v6261_v37 = vmax.f32 %v3738_v57, 0.0 }
 0x1df   : > { %v3786_v45 = vpop.f32.mrf.mxu3 }
 0x1e0   : > { %v3787_v11 = vadd.f32 %v3786_v45, %v15403_v10  ;;  %v15707_v21 = vpack.c.bf16 %v6261_v37, %v6253_v9  ;;  %v11639_v10 = vld [vmem:[%s21088_s1 + $0x948] sm:$0xf] }
 0x1e1   : > { %v3847_v40 = vpop.f32.mrf.mxu1  ;;  %4091 = vmatmul.bf16.vlgmr.msra.gmra.mxu2 %v21356_v7  ;;  %v11383_v9 = vld [vmem:[%s21088_s1 + $0x748] sm:$0xf] }
 0x1e2   : > { %v3848_v60 = vadd.f32 %v3847_v40, %v15428_v50  ;;  %v15704_v28 = vadd.f32 %v3835_v59, %v3787_v11  ;;  %21355 = vst [vmem:[#allocation57_spill] sm:$0xff] %v15707_v21  ;;  %v13780_v50 = vld [vmem:[%s21088_s1 + $0x964] sm:$0xf0]  ;;  %v3896_v25 = vpop.f32.mrf.mxu2 }
 0x1e3   : > { %v3994_v22 = vpop.f32.mrf.mxu0  ;;  %v11640_v38 = vor.u32 %v13780_v50, %v11639_v10  ;;  %v13844_v59 = vld [vmem:[%s21088_s1 + $0xb64] sm:$0xf0] }
 0x1e4   : > { %4042 = vmatmul.bf16.vlgmr.msra.gmra.mxu1 %v21354_v61  ;;  %4140 = vmatmul.bf16.vlgmr.msra.gmra.mxu3 %v21357_v41  ;;  %v11896_v30 = vor.u32 %v13844_v59, %v11895_v23  ;;  %v3897_v1 = vadd.f32 %v3896_v25, %v3848_v60  ;;  %v13716_v37 = vld [vmem:[%s21088_s1 + $0x764] sm:$0xf0] }
 0x1e5   : > { %4281 = vmatpush.bf16.msrb.mxu2 %v11640_v38  ;;  %v11384_v10 = vor.u32 %v13716_v37, %v11383_v9  ;;  %v11351_v21 = vld [vmem:[%s21088_s1 + $0x708] sm:$0xf] }
 0x1e6   : > { %4189 = vmatmul.bf16.vlgmr.msra.gmra.mxu0 %v14666_v53  ;;  %4330 = vmatpush.bf16.msrb.mxu3 %v11896_v30  ;;  %v21358_v30 = vld [vmem:[#allocation6_spill] sm:$0xff] }
 0x1e7   : > { %v3945_v18 = vpop.f32.mrf.mxu3  ;;  %4232 = vmatpush.bf16.msrb.mxu1 %v11384_v10 }
 0x1e8   : > { %v3946_v11 = vadd.f32 %v3945_v18, %v3897_v1  ;;  %v21359_v1 = vld [vmem:[#allocation12_spill] sm:$0xff] }
 0x1e9   : > { %v3849_v45 = vpop.f32.mrf.mxu1 }
 0x1ea   : > { %v3850_v57 = vadd.f32 %v3849_v45, %v15432_v32  ;;  %v15731_v50 = vadd.f32 %v3994_v22, %v3946_v11  ;;  %v3898_v60 = vpop.f32.mrf.mxu2  ;;  %v11607_v22 = vld [vmem:[%s21088_s1 + $0x908] sm:$0xf] }
 0x1eb   : > { %v3996_v40 = vpop.f32.mrf.mxu0 }
 0x1ec   : > { %v3899_v38 = vadd.f32 %v3898_v60, %v3850_v57  ;;  %v11863_v57 = vld [vmem:[%s21088_s1 + $0xb08] sm:$0xf] }
 0x1ef   : > { %v3947_v23 = vpop.f32.mrf.mxu3 }
 0x1f0   : > { %v3948_v25 = vadd.f32 %v3947_v23, %v3899_v38 }
 0x1f1   : > { %v3852_v59 = vpop.f32.mrf.mxu1  ;;  %4096 = vmatmul.bf16.gmra.mxu2 %v21358_v30 }
 0x1f2   : > { %v3853_v32 = vadd.f32 %v3852_v59, %v15460_v56  ;;  %v15737_v45 = vadd.f32 %v3996_v40, %v3948_v25  ;;  %v13772_v56 = vld [vmem:[%s21088_s1 + $0x924] sm:$0xf0]  ;;  %v3901_v9 = vpop.f32.mrf.mxu2 }
 0x1f3   : > { %v3999_v18 = vpop.f32.mrf.mxu0  ;;  %v11608_v11 = vor.u32 %v13772_v56, %v11607_v22  ;;  %v13836_v40 = vld [vmem:[%s21088_s1 + $0xb24] sm:$0xf0] }
 0x1f4   : > { %4047 = vmatmul.bf16.gmra.mxu1 %v15100_v0  ;;  %4145 = vmatmul.bf16.gmra.mxu3 %v21359_v1  ;;  %v11864_v10 = vor.u32 %v13836_v40, %v11863_v57  ;;  %v3902_v60 = vadd.f32 %v3901_v9, %v3853_v32  ;;  %v13708_v22 = vld [vmem:[%s21088_s1 + $0x724] sm:$0xf0] }
 0x1f5   : > { %4282 = vmatpush.bf16.msrb.mxu2 %v11608_v11  ;;  %v11352_v56 = vor.u32 %v13708_v22, %v11351_v21  ;;  %v11575_v21 = vld [vmem:[%s21088_s1 + $0x8c8] sm:$0xf] }
 0x1f6   : > { %4194 = vmatmul.bf16.gmra.mxu0 %v14704_v12  ;;  %4331 = vmatpush.bf16.msrb.mxu3 %v11864_v10  ;;  %v21360_v10 = vld [vmem:[#allocation3_spill] sm:$0xff] }
 0x1f7   : > { %v3950_v37 = vpop.f32.mrf.mxu3  ;;  %4233 = vmatpush.bf16.msrb.mxu1 %v11352_v56 }
 0x1f8   : > { %v3951_v59 = vadd.f32 %v3950_v37, %v3902_v60  ;;  %v21361_v60 = vld [vmem:[#allocation14_spill] sm:$0xff] }
 0x1f9   : > { %v3854_v23 = vpop.f32.mrf.mxu1 }
 0x1fa   : > { %v3855_v38 = vadd.f32 %v3854_v23, %v15464_v52  ;;  %v15759_v12 = vadd.f32 %v3999_v18, %v3951_v59  ;;  %v3903_v32 = vpop.f32.mrf.mxu2  ;;  %v11831_v18 = vld [vmem:[%s21088_s1 + $0xac8] sm:$0xf] }
 0x1fb   : > { %v4001_v25 = vpop.f32.mrf.mxu0  ;;  %v13828_v59 = vld [vmem:[%s21088_s1 + $0xae4] sm:$0xf0] }
 0x1fc   : > { %v3904_v11 = vadd.f32 %v3903_v32, %v3855_v38  ;;  %v11832_v56 = vor.u32 %v13828_v59, %v11831_v18 }
 0x1fe   : > { %4332 = vmatpush.bf16.msrb.mxu3 %v11832_v56  ;;  %v21362_v56 = vld [vmem:[#allocation7_spill] sm:$0xff] }
 0x1ff   : > { %v3952_v57 = vpop.f32.mrf.mxu3 }
 0x200   : > { %v3953_v9 = vadd.f32 %v3952_v57, %v3904_v11 }
 0x201   : > { %v3857_v40 = vpop.f32.mrf.mxu1  ;;  %4101 = vmatmul.bf16.gmra.mxu2 %v21360_v10 }
 0x202   : > { %v3858_v52 = vadd.f32 %v3857_v40, %v15492_v15  ;;  %v15765_v23 = vadd.f32 %v4001_v25, %v3953_v9  ;;  %v13764_v15 = vld [vmem:[%s21088_s1 + $0x8e4] sm:$0xf0]  ;;  %v3906_v25 = vpop.f32.mrf.mxu2 }
 0x203   : > { %v4004_v37 = vpop.f32.mrf.mxu0  ;;  %v11576_v38 = vor.u32 %v13764_v15, %v11575_v21  ;;  %v13700_v21 = vld [vmem:[%s21088_s1 + $0x6e4] sm:$0xf0] }
 0x204   : > { %4052 = vmatmul.bf16.gmra.mxu1 %v15138_v17  ;;  %4150 = vmatmul.bf16.gmra.mxu3 %v21361_v60  ;;  %v3907_v32 = vadd.f32 %v3906_v25, %v3858_v52 }
 0x205   : > { %4283 = vmatpush.bf16.msrb.mxu2 %v11576_v38 }
 0x206   : > { %4199 = vmatmul.bf16.gmra.mxu0 %v14742_v33  ;;  %v11319_v33 = vld [vmem:[%s21088_s1 + $0x6c8] sm:$0xf] }
 0x207   : > { %v3955_v22 = vpop.f32.mrf.mxu3  ;;  %v11320_v15 = vor.u32 %v13700_v21, %v11319_v33  ;;  %v11543_v33 = vld [vmem:[%s21088_s1 + $0x888] sm:$0xf] }
 0x208   : > { %v3956_v40 = vadd.f32 %v3955_v22, %v3907_v32  ;;  %v21363_v32 = vld [vmem:[#allocation16_spill] sm:$0xff] }
 0x209   : > { %v3859_v57 = vpop.f32.mrf.mxu1  ;;  %4234 = vmatpush.bf16.msrb.mxu1 %v11320_v15 }
 0x20a   : > { %v3860_v11 = vadd.f32 %v3859_v57, %v15496_v39  ;;  %v15787_v60 = vadd.f32 %v4004_v37, %v3956_v40  ;;  %v3908_v52 = vpop.f32.mrf.mxu2  ;;  %v11799_v37 = vld [vmem:[%s21088_s1 + $0xa88] sm:$0xf] }
 0x20b   : > { %v4006_v9 = vpop.f32.mrf.mxu0  ;;  %v13820_v40 = vld [vmem:[%s21088_s1 + $0xaa4] sm:$0xf0] }
 0x20c   : > { %v3909_v38 = vadd.f32 %v3908_v52, %v3860_v11  ;;  %v11800_v15 = vor.u32 %v13820_v40, %v11799_v37 }
 0x20e   : > { %4333 = vmatpush.bf16.msrb.mxu3 %v11800_v15  ;;  %v12215_v15 = vld [vmem:[%s21088_s1 + $0xdc8] sm:$0xf] }
 0x20f   : > { %v3957_v18 = vpop.f32.mrf.mxu3 }
 0x210   : > { %v3958_v25 = vadd.f32 %v3957_v18, %v3909_v38 }
 0x211   : > { %v3862_v59 = vpop.f32.mrf.mxu1  ;;  %4106 = vmatmul.bf16.gmra.mxu2 %v21362_v56 }
 0x212   : > { %v3863_v39 = vadd.f32 %v3862_v59, %v15524_v43  ;;  %v15793_v57 = vadd.f32 %v4006_v9, %v3958_v25  ;;  %v13756_v43 = vld [vmem:[%s21088_s1 + $0x8a4] sm:$0xf0]  ;;  %v3911_v9 = vpop.f32.mrf.mxu2 }
 0x213   : > { %v4009_v22 = vpop.f32.mrf.mxu0  ;;  %v11544_v11 = vor.u32 %v13756_v43, %v11543_v33  ;;  %v13692_v33 = vld [vmem:[%s21088_s1 + $0x6a4] sm:$0xf0] }
 0x214   : > { %4057 = vmatmul.bf16.gmra.mxu1 %v15176_v20  ;;  %4155 = vmatmul.bf16.gmra.mxu3 %v21363_v32  ;;  %v3912_v52 = vadd.f32 %v3911_v9, %v3863_v39 }
 0x215   : > { %4284 = vmatpush.bf16.msrb.mxu2 %v11544_v11 }
 0x216   : > { %4204 = vmatmul.bf16.gmra.mxu0 %v14780_v2  ;;  %v11287_v2 = vld [vmem:[%s21088_s1 + $0x688] sm:$0xf] }
 0x217   : > { %v3960_v21 = vpop.f32.mrf.mxu3  ;;  %v11288_v43 = vor.u32 %v13692_v33, %v11287_v2  ;;  %v13924_v2 = vld [vmem:[%s21088_s1 + $0xde4] sm:$0xf0] }
 0x218   : > { %v3961_v59 = vadd.f32 %v3960_v21, %v3912_v52 }
 0x219   : > { %v3864_v18 = vpop.f32.mrf.mxu1  ;;  %4235 = vmatpush.bf16.msrb.mxu1 %v11288_v43 }
 0x21a   : > { %v3865_v38 = vadd.f32 %v3864_v18, %v15528_v44  ;;  %v15815_v32 = vadd.f32 %v4009_v22, %v3961_v59  ;;  %v3913_v39 = vpop.f32.mrf.mxu2  ;;  %v12216_v22 = vor.u32 %v13924_v2, %v12215_v15  ;;  %v13748_v18 = vld [vmem:[%s21088_s1 + $0x864] sm:$0xf0] }
 0x21b   : > { %v4011_v25 = vpop.f32.mrf.mxu0 }
 0x21c   : > { %v3914_v11 = vadd.f32 %v3913_v39, %v3865_v38  ;;  %v11767_v38 = vld [vmem:[%s21088_s1 + $0xa48] sm:$0xf]  ;;  %4377 = vmatpush.bf16.msrb.mxu0 %v12216_v22 }
 0x21f   : > { %v3962_v37 = vpop.f32.mrf.mxu3 }
 0x220   : > { %v3963_v9 = vadd.f32 %v3962_v37, %v3914_v11  ;;  %v12183_v37 = vld [vmem:[%s21088_s1 + $0xd88] sm:$0xf] }
 0x221   : > { %v3867_v40 = vpop.f32.mrf.mxu1  ;;  %4111 = vmatmul.bf16.gmra.mxu2 %v14436_v48  ;;  %v13916_v11 = vld [vmem:[%s21088_s1 + $0xda4] sm:$0xf0] }
 0x222   : > { %v3868_v44 = vadd.f32 %v3867_v40, %v15568_v8  ;;  %v15827_v52 = vadd.f32 %v4011_v25, %v3963_v9  ;;  %v11511_v8 = vld [vmem:[%s21088_s1 + $0x848] sm:$0xf]  ;;  %v3916_v33 = vpop.f32.mrf.mxu2  ;;  %v12184_v15 = vor.u32 %v13916_v11, %v12183_v37 }
 0x223   : > { %v4014_v21 = vpop.f32.mrf.mxu0  ;;  %v11512_v59 = vor.u32 %v13748_v18, %v11511_v8  ;;  %v13812_v25 = vld [vmem:[%s21088_s1 + $0xa64] sm:$0xf0] }
 0x224   : > { %4062 = vmatmul.bf16.gmra.mxu1 %v15212_v58  ;;  %4160 = vmatmul.bf16.gmra.mxu3 %v14816_v26  ;;  %v11768_v39 = vor.u32 %v13812_v25, %v11767_v38  ;;  %v3917_v40 = vadd.f32 %v3916_v33, %v3868_v44  ;;  %v11255_v18 = vld [vmem:[%s21088_s1 + $0x648] sm:$0xf] }
 0x225   : > { %4285 = vmatpush.bf16.msrb.mxu2 %v11512_v59  ;;  %v13684_v38 = vld [vmem:[%s21088_s1 + $0x664] sm:$0xf0]  ;;  %4378 = vmatpush.bf16.msrb.mxu0 %v12184_v15 }
 0x226   : > { %4209 = vmatmul.bf16.gmra.mxu0 %v14818_v27  ;;  %4334 = vmatpush.bf16.msrb.mxu3 %v11768_v39  ;;  %v12151_v44 = vld [vmem:[%s21088_s1 + $0xd48] sm:$0xf]  ;;  %v11256_v59 = vor.u32 %v13684_v38, %v11255_v18 }
 0x227   : > { %v3965_v43 = vpop.f32.mrf.mxu3  ;;  %v12119_v37 = vld [vmem:[%s21088_s1 + $0xd08] sm:$0xf] }
 0x228   : > { %v3966_v22 = vadd.f32 %v3965_v43, %v3917_v40  ;;  %4236 = vmatpush.bf16.msrb.mxu1 %v11256_v59  ;;  %v13900_v11 = vld [vmem:[%s21088_s1 + $0xd24] sm:$0xf0] }
 0x229   : > { %v3869_v9 = vpop.f32.mrf.mxu1  ;;  %v12120_v15 = vor.u32 %v13900_v11, %v12119_v37  ;;  %v13892_v59 = vld [vmem:[%s21088_s1 + $0xce4] sm:$0xf0] }
 0x22a   : > { %v3870_v2 = vadd.f32 %v3869_v9, %v15584_v42  ;;  %v13908_v42 = vld [vmem:[%s21088_s1 + $0xd64] sm:$0xf0]  ;;  %v15861_v33 = vadd.f32 %v4014_v21, %v3966_v22  ;;  %v3918_v43 = vpop.f32.mrf.mxu2  ;;  %v21364_v22 = vld [vmem:[#allocation45_spill] sm:$0xff] }
 0x22b   : > { %v4016_v8 = vpop.f32.mrf.mxu0  ;;  %v12152_v25 = vor.u32 %v13908_v42, %v12151_v44  ;;  %v12087_v44 = vld [vmem:[%s21088_s1 + $0xcc8] sm:$0xf]  ;;  %v21365_v42 = vld [vmem:[#allocation8_spill] sm:$0xff] }
 0x22c   : > { %v3919_v40 = vadd.f32 %v3918_v43, %v3870_v2  ;;  %v21366_v2 = vld [vmem:[#allocation22_spill] sm:$0xff]  ;;  %v11735_v37 = vld [vmem:[%s21088_s1 + $0xa08] sm:$0xf] }
 0x22d   : > { %4379 = vmatpush.bf16.msrb.mxu0 %v12152_v25  ;;  %v12088_v25 = vor.u32 %v13892_v59, %v12087_v44  ;;  %v13884_v44 = vld [vmem:[%s21088_s1 + $0xca4] sm:$0xf0] }
 0x22f   : > { %v3967_v39 = vpop.f32.mrf.mxu3 }
 0x230   : > { %v3968_v38 = vadd.f32 %v3967_v39, %v3919_v40  ;;  %v13740_v39 = vld [vmem:[%s21088_s1 + $0x824] sm:$0xf0] }
 0x231   : > { %v3872_v9 = vpop.f32.mrf.mxu1  ;;  %4380 = vmatpush.bf16.msrb.mxu0 %v12120_v15  ;;  %4116 = vmatmul.bf16.gmra.mxu2 %v21365_v42 }
 0x232   : > { %v3873_v18 = vadd.f32 %v3872_v9, %v15624_v63  ;;  %v15879_v43 = vadd.f32 %v4016_v8, %v3968_v38  ;;  %v11479_v63 = vld [vmem:[%s21088_s1 + $0x808] sm:$0xf] }
 0x233   : > { %v4019_v21 = vpop.f32.mrf.mxu0  ;;  %v11480_v11 = vor.u32 %v13740_v39, %v11479_v63  ;;  %v13804_v8 = vld [vmem:[%s21088_s1 + $0xa24] sm:$0xf0] }
 0x234   : > { %4067 = vmatmul.bf16.gmra.mxu1 %v21364_v22  ;;  %4165 = vmatmul.bf16.gmra.mxu3 %v21366_v2  ;;  %v3921_v40 = vpop.f32.mrf.mxu2  ;;  %v11736_v15 = vor.u32 %v13804_v8, %v11735_v37  ;;  %v12055_v38 = vld [vmem:[%s21088_s1 + $0xc88] sm:$0xf] }
 0x235   : > { %4381 = vmatpush.bf16.msrb.mxu0 %v12088_v25  ;;  %v3922_v59 = vadd.f32 %v3921_v40, %v3873_v18  ;;  %4286 = vmatpush.bf16.msrb.mxu2 %v11480_v11  ;;  %v12056_v63 = vor.u32 %v13884_v44, %v12055_v38  ;;  %v11223_v37 = vld [vmem:[%s21088_s1 + $0x608] sm:$0xf] }
 0x236   : > { %4214 = vmatmul.bf16.gmra.mxu0 %v21342_v31  ;;  %4335 = vmatpush.bf16.msrb.mxu3 %v11736_v15  ;;  %v13676_v8 = vld [vmem:[%s21088_s1 + $0x624] sm:$0xf0] }
 0x237   : > { %v3970_v9 = vpop.f32.mrf.mxu3  ;;  %v12023_v18 = vld [vmem:[%s21088_s1 + $0xc48] sm:$0xf]  ;;  %v11224_v11 = vor.u32 %v13676_v8, %v11223_v37 }
 0x238   : > { %v3971_v39 = vadd.f32 %v3970_v9, %v3922_v59  ;;  %v11991_v38 = vld [vmem:[%s21088_s1 + $0xc08] sm:$0xf] }
 0x239   : > { %v3874_v31 = vpop.f32.mrf.mxu1  ;;  %4382 = vmatpush.bf16.msrb.mxu0 %v12056_v63  ;;  %4237 = vmatpush.bf16.msrb.mxu1 %v11224_v11  ;;  %v13868_v44 = vld [vmem:[%s21088_s1 + $0xc24] sm:$0xf0]  ;;  %v21368_v11 = vld [vmem:[#allocation5_spill] sm:$0xff] }
 0x23a   : > { %v3875_v25 = vadd.f32 %v3874_v31, %v15640_v6  ;;  %v13876_v31 = vld [vmem:[%s21088_s1 + $0xc64] sm:$0xf0]  ;;  %v15913_v40 = vadd.f32 %v4019_v21, %v3971_v39  ;;  %v11992_v37 = vor.u32 %v13868_v44, %v11991_v38 }
 0x23b   : > { %v4021_v2 = vpop.f32.mrf.mxu0  ;;  %v12024_v6 = vor.u32 %v13876_v31, %v12023_v18  ;;  %v21367_v39 = vld [vmem:[#allocation47_spill] sm:$0xff]  ;;  %v21369_v31 = vld [vmem:[#allocation26_spill] sm:$0xff] }
 0x23c   : > { %v3923_v9 = vpop.f32.mrf.mxu2 }
 0x23d   : > { %4383 = vmatpush.bf16.msrb.mxu0 %v12024_v6  ;;  %v3924_v59 = vadd.f32 %v3923_v9, %v3875_v25  ;;  %v13600_v25 = vld [vmem:[%s21088_s1 + $0x3cc] sm:$0xf] }
 0x23e   : > { %v13664_v9 = vld [vmem:[%s21088_s1 + $0x5cc] sm:$0xf] }
 0x23f   : > { %v3972_v15 = vpop.f32.mrf.mxu3 }
 0x240   : > { %v3973_v18 = vadd.f32 %v3972_v15, %v3924_v59 }
 0x241   : > { %v3877_v63 = vpop.f32.mrf.mxu1  ;;  %4384 = vmatpush.bf16.msrb.mxu0 %v11992_v37  ;;  %4121 = vmatmul.bf16.gmra.mxu2 %v21368_v11  ;;  %v13536_v11 = vld [vmem:[%s21088_s1 + $0x1cc] sm:$0xf] }
 0x242   : > { %v3878_v8 = vadd.f32 %v3877_v63, %v15668_v46  ;;  %v15925_v6 = vadd.f32 %v4021_v2, %v3973_v18  ;;  %v10937_v46 = vld [vmem:[%s21088_s1 + $0x3e8] sm:$0xf0] }
 0x243   : > { %v4024_v21 = vpop.f32.mrf.mxu0  ;;  %v10940_v15 = vor.u32 %v13600_v25, %v10937_v46  ;;  %v11193_v2 = vld [vmem:[%s21088_s1 + $0x5e8] sm:$0xf0] }
 0x244   : > { %4072 = vmatmul.bf16.gmra.mxu1 %v21367_v39  ;;  %4170 = vmatmul.bf16.gmra.mxu3 %v21369_v31  ;;  %v3926_v38 = vpop.f32.mrf.mxu2  ;;  %v11196_v59 = vor.u32 %v13664_v9, %v11193_v2  ;;  %v10681_v25 = vld [vmem:[%s21088_s1 + $0x1e8] sm:$0xf0] }
 0x245   : > { %v3927_v63 = vadd.f32 %v3926_v38, %v3878_v8  ;;  %4475 = vmatpush.bf16.msra.mxu2 %v10940_v15  ;;  %v10684_v46 = vor.u32 %v13536_v11, %v10681_v25 }
 0x246   : > { %4219 = vmatmul.bf16.gmra.mxu0 %v21346_v62  ;;  %4524 = vmatpush.bf16.msra.mxu3 %v11196_v59 }
 0x247   : > { %v3975_v44 = vpop.f32.mrf.mxu3  ;;  %4426 = vmatpush.bf16.msra.mxu1 %v10684_v46 }
 0x248   : > { %v3976_v62 = vadd.f32 %v3975_v44, %v3927_v63 }
 0x249   : > { %v3879_v37 = vpop.f32.mrf.mxu1 }
 0x24a   : > { %v3880_v18 = vadd.f32 %v3879_v37, %v15672_v16  ;;  %v15947_v42 = vadd.f32 %v4024_v21, %v3976_v62  ;;  %v13592_v62 = vld [vmem:[%s21088_s1 + $0x38c] sm:$0xf] }
 0x24b   : > { %v4026_v31 = vpop.f32.mrf.mxu0  ;;  %v13656_v21 = vld [vmem:[%s21088_s1 + $0x58c] sm:$0xf] }
 0x24c   : > { %v3928_v8 = vpop.f32.mrf.mxu2 }
 0x24d   : > { %v3929_v15 = vadd.f32 %v3928_v8, %v3880_v18 }
 0x24f   : > { %v3977_v9 = vpop.f32.mrf.mxu3 }
 0x250   : > { %v3978_v38 = vadd.f32 %v3977_v9, %v3929_v15 }
 0x251   : > { %v3882_v2 = vpop.f32.mrf.mxu1  ;;  %4126 = vmatmul.bf16.gmra.mxu2 %v14554_v47 }
 0x252   : > { %v3883_v16 = vadd.f32 %v3882_v2, %v15700_v49  ;;  %v15953_v59 = vadd.f32 %v4026_v31, %v3978_v38  ;;  %v10905_v49 = vld [vmem:[%s21088_s1 + $0x3a8] sm:$0xf0] }
 0x253   : > { %v4029_v44 = vpop.f32.mrf.mxu0  ;;  %v10908_v11 = vor.u32 %v13592_v62, %v10905_v49  ;;  %v11161_v31 = vld [vmem:[%s21088_s1 + $0x5a8] sm:$0xf0] }
 0x254   : > { %4077 = vmatmul.bf16.gmra.mxu1 %v15368_v19  ;;  %4175 = vmatmul.bf16.gmra.mxu3 %v15000_v36  ;;  %v3931_v63 = vpop.f32.mrf.mxu2  ;;  %v11164_v18 = vor.u32 %v13656_v21, %v11161_v31  ;;  %v13528_v2 = vld [vmem:[%s21088_s1 + $0x18c] sm:$0xf] }
 0x255   : > { %v3932_v25 = vadd.f32 %v3931_v63, %v3883_v16  ;;  %4476 = vmatpush.bf16.msra.mxu2 %v10908_v11  ;;  %v10649_v38 = vld [vmem:[%s21088_s1 + $0x1a8] sm:$0xf0] }
 0x256   : > { %4224 = vmatmul.bf16.gmra.mxu0 %v21350_v51  ;;  %4525 = vmatpush.bf16.msra.mxu3 %v11164_v18  ;;  %v10652_v62 = vor.u32 %v13528_v2, %v10649_v38  ;;  %v21370_v18 = vld [vmem:[#allocation34_spill] sm:$0xff] }
 0x257   : > { %v3980_v37 = vpop.f32.mrf.mxu3 }
 0x258   : > { %v3981_v9 = vadd.f32 %v3980_v37, %v3932_v25  ;;  %4427 = vmatpush.bf16.msra.mxu1 %v10652_v62 }
 0x259   : > { %v3884_v46 = vpop.f32.mrf.mxu1 }
 0x25a   : > { %v3885_v8 = vadd.f32 %v3884_v46, %v15704_v28  ;;  %v15975_v49 = vadd.f32 %v4029_v44, %v3981_v9  ;;  %v14258_v44 = vld [vmem:[%s21089_s2] sm:$0xff]  ;;  %v13648_v9 = vld [vmem:[%s21088_s1 + $0x54c] sm:$0xf] }
 0x25b   : > { %v4031_v15 = vpop.f32.mrf.mxu0  ;;  %v15984_v25 = vperm.slane %v14258_v44, 2 }
 0x25c   : > { %v3933_v16 = vpop.f32.mrf.mxu2 }
 0x25d   : > { %v3934_v11 = vadd.f32 %v3933_v16, %v3885_v8  ;;  %v10873_v8 = vld [vmem:[%s21088_s1 + $0x368] sm:$0xf0] }
 0x25f   : > { %v3982_v21 = vpop.f32.mrf.mxu3 }
 0x260   : > { %v3983_v63 = vadd.f32 %v3982_v21, %v3934_v11 }
 0x261   : > { %v4043_v31 = vpop.f32.mrf.mxu1  ;;  %4287 = vmatmul.bf16.vlgmr.msrb.gmra.mxu2 %v14670_v55 }
 0x262   : > { %v4044_v28 = vadd.f32 %v4043_v31, %v15731_v50  ;;  %v15986_v46 = vadd.f32 %v4031_v15, %v3983_v63  ;;  %v13584_v50 = vld [vmem:[%s21088_s1 + $0x34c] sm:$0xf] }
 0x263   : > { %v4190_v37 = vpop.f32.mrf.mxu0  ;;  %v10876_v2 = vor.u32 %v13584_v50, %v10873_v8  ;;  %v11129_v15 = vld [vmem:[%s21088_s1 + $0x568] sm:$0xf0] }
 0x264   : > { %4238 = vmatmul.bf16.vlgmr.msrb.gmra.mxu1 %v14668_v54  ;;  %4336 = vmatmul.bf16.vlgmr.msrb.gmra.mxu3 %v21370_v18  ;;  %v4092_v38 = vpop.f32.mrf.mxu2  ;;  %v11132_v16 = vor.u32 %v13648_v9, %v11129_v15  ;;  %v13520_v50 = vld [vmem:[%s21088_s1 + $0x14c] sm:$0xf] }
 0x265   : > { %v4093_v21 = vadd.f32 %v4092_v38, %v15984_v25  ;;  %4477 = vmatpush.bf16.msra.mxu2 %v10876_v2  ;;  %v10617_v8 = vld [vmem:[%s21088_s1 + $0x168] sm:$0xf0] }
 0x266   : > { %4385 = vmatmul.bf16.vlgmr.msrb.gmra.mxu0 %v21354_v61  ;;  %4526 = vmatpush.bf16.msra.mxu3 %v11132_v16  ;;  %v6142_v61 = vmax.f32 %v4044_v28, 0.0  ;;  %v10620_v9 = vor.u32 %v13520_v50, %v10617_v8 }
 0x267   : > { %v4141_v62 = vpop.f32.mrf.mxu3 }
 0x268   : > { %v4142_v63 = vadd.f32 %v4141_v62, %v4093_v21  ;;  %4428 = vmatpush.bf16.msra.mxu1 %v10620_v9 }
 0x269   : > { %v4045_v11 = vpop.f32.mrf.mxu1 }
 0x26a   : > { %v4046_v31 = vadd.f32 %v4045_v11, %v15737_v45  ;;  %v16009_v15 = vadd.f32 %v4190_v37, %v4142_v63  ;;  %v13640_v37 = vld [vmem:[%s21088_s1 + $0x50c] sm:$0xf] }
 0x26b   : > { %v4192_v44 = vpop.f32.mrf.mxu0 }
 0x26c   : > { %v6150_v18 = vmax.f32 %v4046_v31, 0.0  ;;  %v4094_v45 = vpop.f32.mrf.mxu2  ;;  %v11097_v31 = vld [vmem:[%s21088_s1 + $0x528] sm:$0xf0] }
 0x26d   : > { %v4095_v62 = vadd.f32 %v4094_v45, %v15984_v25  ;;  %v11100_v50 = vor.u32 %v13640_v37, %v11097_v31 }
 0x26e   : > { %v16011_v38 = vpack.c.bf16 %v6150_v18, %v6142_v61  ;;  %v13576_v61 = vld [vmem:[%s21088_s1 + $0x30c] sm:$0xf] }
 0x26f   : > { %v4143_v2 = vpop.f32.mrf.mxu3  ;;  %4527 = vmatpush.bf16.msra.mxu3 %v11100_v50 }
 0x270   : > { %21371 = vst [vmem:[#allocation58_spill] sm:$0xff] %v16011_v38  ;;  %v4144_v11 = vadd.f32 %v4143_v2, %v4095_v62 }
 0x271   : > { %v4048_v16 = vpop.f32.mrf.mxu1  ;;  %4292 = vmatmul.bf16.gmra.mxu2 %v14708_v14 }
 0x272   : > { %v4049_v21 = vadd.f32 %v4048_v16, %v15759_v12  ;;  %v16018_v28 = vadd.f32 %v4192_v44, %v4144_v11  ;;  %v10841_v12 = vld [vmem:[%s21088_s1 + $0x328] sm:$0xf0] }
 0x273   : > { %v4195_v55 = vpop.f32.mrf.mxu0  ;;  %v10844_v18 = vor.u32 %v13576_v61, %v10841_v12  ;;  %v13512_v16 = vld [vmem:[%s21088_s1 + $0x10c] sm:$0xf] }
 0x274   : > { %4243 = vmatmul.bf16.gmra.mxu1 %v14706_v13  ;;  %4341 = vmatmul.bf16.gmra.mxu3 %v15098_v5  ;;  %v4097_v63 = vpop.f32.mrf.mxu2  ;;  %v10585_v11 = vld [vmem:[%s21088_s1 + $0x128] sm:$0xf0]  ;;  %v6158_v61 = vmax.f32 %v4049_v21, 0.0 }
 0x275   : > { %v4098_v8 = vadd.f32 %v4097_v63, %v15984_v25  ;;  %4478 = vmatpush.bf16.msra.mxu2 %v10844_v18  ;;  %v10588_v37 = vor.u32 %v13512_v16, %v10585_v11  ;;  %v13568_v21 = vld [vmem:[%s21088_s1 + $0x2cc] sm:$0xf] }
 0x276   : > { %4390 = vmatmul.bf16.gmra.mxu0 %v15100_v0 }
 0x277   : > { %v4146_v44 = vpop.f32.mrf.mxu3  ;;  %4429 = vmatpush.bf16.msra.mxu1 %v10588_v37 }
 0x278   : > { %v4147_v2 = vadd.f32 %v4146_v44, %v4098_v8 }
 0x279   : > { %v4050_v9 = vpop.f32.mrf.mxu1 }
 0x27a   : > { %v4051_v45 = vadd.f32 %v4050_v9, %v15765_v23  ;;  %v16041_v31 = vadd.f32 %v4195_v55, %v4147_v2 }
 0x27b   : > { %v4197_v62 = vpop.f32.mrf.mxu0 }
 0x27c   : > { %v6166_v12 = vmax.f32 %v4051_v45, 0.0  ;;  %v4099_v23 = vpop.f32.mrf.mxu2  ;;  %v13632_v45 = vld [vmem:[%s21088_s1 + $0x4cc] sm:$0xf] }
 0x27d   : > { %v4100_v44 = vadd.f32 %v4099_v23, %v15984_v25 }
 0x27e   : > { %v16043_v63 = vpack.c.bf16 %v6166_v12, %v6158_v61 }
 0x27f   : > { %v4148_v18 = vpop.f32.mrf.mxu3 }
 0x280   : > { %21372 = vst [vmem:[#allocation59_spill] sm:$0xff] %v16043_v63  ;;  %v4149_v9 = vadd.f32 %v4148_v18, %v4100_v44 }
 0x281   : > { %v4053_v50 = vpop.f32.mrf.mxu1  ;;  %4297 = vmatmul.bf16.gmra.mxu2 %v14746_v35 }
 0x282   : > { %v4054_v8 = vadd.f32 %v4053_v50, %v15787_v60  ;;  %v16050_v55 = vadd.f32 %v4197_v62, %v4149_v9  ;;  %v10809_v60 = vld [vmem:[%s21088_s1 + $0x2e8] sm:$0xf0] }
 0x283   : > { %v4200_v38 = vpop.f32.mrf.mxu0  ;;  %v10812_v2 = vor.u32 %v13568_v21, %v10809_v60  ;;  %v11065_v62 = vld [vmem:[%s21088_s1 + $0x4e8] sm:$0xf0] }
 0x284   : > { %4248 = vmatmul.bf16.gmra.mxu1 %v14744_v34  ;;  %4346 = vmatmul.bf16.gmra.mxu3 %v15136_v24  ;;  %v4102_v16 = vpop.f32.mrf.mxu2  ;;  %v11068_v61 = vor.u32 %v13632_v45, %v11065_v62  ;;  %v13504_v50 = vld [vmem:[%s21088_s1 + $0xcc] sm:$0xf]  ;;  %v6174_v21 = vmax.f32 %v4054_v8, 0.0 }
 0x285   : > { %v4103_v12 = vadd.f32 %v4102_v16, %v15984_v25  ;;  %4479 = vmatpush.bf16.msra.mxu2 %v10812_v2  ;;  %v10553_v9 = vld [vmem:[%s21088_s1 + $0xe8] sm:$0xf0] }
 0x286   : > { %4395 = vmatmul.bf16.gmra.mxu0 %v15138_v17  ;;  %4528 = vmatpush.bf16.msra.mxu3 %v11068_v61  ;;  %v10556_v45 = vor.u32 %v13504_v50, %v10553_v9  ;;  %v13560_v8 = vld [vmem:[%s21088_s1 + $0x28c] sm:$0xf] }
 0x287   : > { %v4151_v11 = vpop.f32.mrf.mxu3 }
 0x288   : > { %v4152_v18 = vadd.f32 %v4151_v11, %v4103_v12  ;;  %4430 = vmatpush.bf16.msra.mxu1 %v10556_v45 }
 0x289   : > { %v4055_v37 = vpop.f32.mrf.mxu1 }
 0x28a   : > { %v4056_v23 = vadd.f32 %v4055_v37, %v15793_v57  ;;  %v16073_v62 = vadd.f32 %v4200_v38, %v4152_v18 }
 0x28b   : > { %v4202_v44 = vpop.f32.mrf.mxu0 }
 0x28c   : > { %v6182_v60 = vmax.f32 %v4056_v23, 0.0  ;;  %v4104_v57 = vpop.f32.mrf.mxu2  ;;  %v13624_v23 = vld [vmem:[%s21088_s1 + $0x48c] sm:$0xf] }
 0x28d   : > { %v4105_v11 = vadd.f32 %v4104_v57, %v15984_v25 }
 0x28e   : > { %v16075_v16 = vpack.c.bf16 %v6182_v60, %v6174_v21 }
 0x28f   : > { %v4153_v2 = vpop.f32.mrf.mxu3 }
 0x290   : > { %21373 = vst [vmem:[#allocation60_spill] sm:$0xff] %v16075_v16  ;;  %v4154_v37 = vadd.f32 %v4153_v2, %v4105_v11 }
 0x291   : > { %v4058_v61 = vpop.f32.mrf.mxu1  ;;  %4302 = vmatmul.bf16.gmra.mxu2 %v14784_v4 }
 0x292   : > { %v4059_v12 = vadd.f32 %v4058_v61, %v15815_v32  ;;  %v16082_v38 = vadd.f32 %v4202_v44, %v4154_v37  ;;  %v10777_v32 = vld [vmem:[%s21088_s1 + $0x2a8] sm:$0xf0] }
 0x293   : > { %v4205_v63 = vpop.f32.mrf.mxu0  ;;  %v10780_v18 = vor.u32 %v13560_v8, %v10777_v32  ;;  %v11033_v44 = vld [vmem:[%s21088_s1 + $0x4a8] sm:$0xf0] }
 0x294   : > { %4253 = vmatmul.bf16.gmra.mxu1 %v14782_v3  ;;  %4351 = vmatmul.bf16.gmra.mxu3 %v15174_v29  ;;  %v4107_v50 = vpop.f32.mrf.mxu2  ;;  %v11036_v21 = vor.u32 %v13624_v23, %v11033_v44  ;;  %v13496_v61 = vld [vmem:[%s21088_s1 + $0x8c] sm:$0xf]  ;;  %v6190_v8 = vmax.f32 %v4059_v12, 0.0 }
 0x295   : > { %v4108_v60 = vadd.f32 %v4107_v50, %v15984_v25  ;;  %4480 = vmatpush.bf16.msra.mxu2 %v10780_v18  ;;  %v10521_v37 = vld [vmem:[%s21088_s1 + $0xa8] sm:$0xf0] }
 0x296   : > { %4400 = vmatmul.bf16.gmra.mxu0 %v15176_v20  ;;  %4529 = vmatpush.bf16.msra.mxu3 %v11036_v21  ;;  %v10524_v23 = vor.u32 %v13496_v61, %v10521_v37  ;;  %v21375_v20 = vld [vmem:[#allocation20_spill] sm:$0xff]  ;;  %v13728_v12 = vld [vmem:[%s21088_s1 + $0x7cc] sm:$0xf] }
 0x297   : > { %v4156_v9 = vpop.f32.mrf.mxu3 }
 0x298   : > { %v4157_v2 = vadd.f32 %v4156_v9, %v4108_v60  ;;  %4431 = vmatpush.bf16.msra.mxu1 %v10524_v23 }
 0x299   : > { %v4060_v45 = vpop.f32.mrf.mxu1 }
 0x29a   : > { %v4061_v57 = vadd.f32 %v4060_v45, %v15827_v52  ;;  %v16105_v44 = vadd.f32 %v4205_v63, %v4157_v2  ;;  %v11449_v63 = vld [vmem:[%s21088_s1 + $0x7e8] sm:$0xf0]  ;;  %v21377_v2 = vld [vmem:[#allocation42_spill] sm:$0xff] }
 0x29b   : > { %v4207_v11 = vpop.f32.mrf.mxu0  ;;  %v11452_v61 = vor.u32 %v13728_v12, %v11449_v63 }
 0x29c   : > { %v6198_v32 = vmax.f32 %v4061_v57, 0.0  ;;  %v4109_v52 = vpop.f32.mrf.mxu2  ;;  %v21376_v57 = vld [vmem:[#allocation21_spill] sm:$0xff] }
 0x29d   : > { %v4110_v9 = vadd.f32 %v4109_v52, %v15984_v25  ;;  %4573 = vmatpush.bf16.msra.mxu0 %v11452_v61 }
 0x29e   : > { %v16107_v50 = vpack.c.bf16 %v6198_v32, %v6190_v8  ;;  %v10745_v8 = vld [vmem:[%s21088_s1 + $0x268] sm:$0xf0] }
 0x29f   : > { %v4158_v18 = vpop.f32.mrf.mxu3  ;;  %v13616_v32 = vld [vmem:[%s21088_s1 + $0x44c] sm:$0xf] }
 0x2a0   : > { %21374 = vst [vmem:[#allocation61_spill] sm:$0xff] %v16107_v50  ;;  %v4159_v45 = vadd.f32 %v4158_v18, %v4110_v9 }
 0x2a1   : > { %v4063_v21 = vpop.f32.mrf.mxu1  ;;  %4307 = vmatmul.bf16.gmra.mxu2 %v21376_v57 }
 0x2a2   : > { %v4064_v60 = vadd.f32 %v4063_v21, %v15861_v33  ;;  %v16120_v37 = vadd.f32 %v4207_v11, %v4159_v45  ;;  %v13552_v33 = vld [vmem:[%s21088_s1 + $0x24c] sm:$0xf] }
 0x2a3   : > { %v4210_v16 = vpop.f32.mrf.mxu0  ;;  %v10748_v23 = vor.u32 %v13552_v33, %v10745_v8  ;;  %v11001_v11 = vld [vmem:[%s21088_s1 + $0x468] sm:$0xf0] }
 0x2a4   : > { %4258 = vmatmul.bf16.gmra.mxu1 %v21375_v20  ;;  %4356 = vmatmul.bf16.gmra.mxu3 %v21377_v2  ;;  %v4112_v52 = vpop.f32.mrf.mxu2  ;;  %v11004_v9 = vor.u32 %v13616_v32, %v11001_v11  ;;  %v13720_v21 = vld [vmem:[%s21088_s1 + $0x78c] sm:$0xf] }
 0x2a5   : > { %v11417_v45 = vld [vmem:[%s21088_s1 + $0x7a8] sm:$0xf0]  ;;  %v4113_v12 = vadd.f32 %v4112_v52, %v15984_v25  ;;  %4481 = vmatpush.bf16.msra.mxu2 %v10748_v23 }
 0x2a6   : > { %4405 = vmatmul.bf16.gmra.mxu0 %v15212_v58  ;;  %v11420_v61 = vor.u32 %v13720_v21, %v11417_v45  ;;  %4530 = vmatpush.bf16.msra.mxu3 %v11004_v9  ;;  %v13488_v32 = vld [vmem:[%s21088_s1 + $0x4c] sm:$0xf]  ;;  %v6206_v58 = vmax.f32 %v4064_v60, 0.0 }
 0x2a7   : > { %v4161_v18 = vpop.f32.mrf.mxu3  ;;  %v10489_v11 = vld [vmem:[%s21088_s1 + $0x68] sm:$0xf0] }
 0x2a8   : > { %v4162_v8 = vadd.f32 %v4161_v18, %v4113_v12  ;;  %4574 = vmatpush.bf16.msra.mxu0 %v11420_v61  ;;  %v10492_v52 = vor.u32 %v13488_v32, %v10489_v11  ;;  %v13712_v23 = vld [vmem:[%s21088_s1 + $0x74c] sm:$0xf] }
 0x2a9   : > { %v4065_v63 = vpop.f32.mrf.mxu1  ;;  %v13704_v60 = vld [vmem:[%s21088_s1 + $0x70c] sm:$0xf] }
 0x2aa   : > { %v4066_v33 = vadd.f32 %v4065_v63, %v15879_v43  ;;  %v11385_v43 = vld [vmem:[%s21088_s1 + $0x768] sm:$0xf0]  ;;  %v16155_v9 = vadd.f32 %v4210_v16, %v4162_v8  ;;  %4432 = vmatpush.bf16.msra.mxu1 %v10492_v52  ;;  %v21379_v8 = vld [vmem:[#allocation24_spill] sm:$0xff] }
 0x2ab   : > { %v4212_v50 = vpop.f32.mrf.mxu0  ;;  %v11388_v18 = vor.u32 %v13712_v23, %v11385_v43  ;;  %v11353_v63 = vld [vmem:[%s21088_s1 + $0x728] sm:$0xf0]  ;;  %v21380_v23 = vld [vmem:[#allocation25_spill] sm:$0xff]  ;;  %v21381_v43 = vld [vmem:[#allocation44_spill] sm:$0xff] }
 0x2ac   : > { %v6214_v2 = vmax.f32 %v4066_v33, 0.0  ;;  %v4114_v45 = vpop.f32.mrf.mxu2  ;;  %v11356_v32 = vor.u32 %v13704_v60, %v11353_v63  ;;  %v13696_v11 = vld [vmem:[%s21088_s1 + $0x6cc] sm:$0xf] }
 0x2ad   : > { %4575 = vmatpush.bf16.msra.mxu0 %v11388_v18  ;;  %v4115_v61 = vadd.f32 %v4114_v45, %v15984_v25  ;;  %v11321_v52 = vld [vmem:[%s21088_s1 + $0x6e8] sm:$0xf0] }
 0x2ae   : > { %v16157_v21 = vpack.c.bf16 %v6214_v2, %v6206_v58  ;;  %v11324_v18 = vor.u32 %v13696_v11, %v11321_v52  ;;  %v13608_v60 = vld [vmem:[%s21088_s1 + $0x40c] sm:$0xf] }
 0x2af   : > { %v4163_v12 = vpop.f32.mrf.mxu3  ;;  %v11289_v11 = vld [vmem:[%s21088_s1 + $0x6a8] sm:$0xf0] }
 0x2b0   : > { %21378 = vst [vmem:[#allocation20_spill] sm:$0xff] %v16157_v21  ;;  %v4164_v58 = vadd.f32 %v4163_v12, %v4115_v61  ;;  %v10713_v12 = vld [vmem:[%s21088_s1 + $0x228] sm:$0xf0] }
 0x2b1   : > { %v4068_v33 = vpop.f32.mrf.mxu1  ;;  %4576 = vmatpush.bf16.msra.mxu0 %v11356_v32  ;;  %4312 = vmatmul.bf16.gmra.mxu2 %v21380_v23 }
 0x2b2   : > { %v4069_v16 = vadd.f32 %v4068_v33, %v15913_v40  ;;  %v16176_v45 = vadd.f32 %v4212_v50, %v4164_v58  ;;  %v13544_v40 = vld [vmem:[%s21088_s1 + $0x20c] sm:$0xf] }
 0x2b3   : > { %v4215_v2 = vpop.f32.mrf.mxu0  ;;  %v10716_v63 = vor.u32 %v13544_v40, %v10713_v12  ;;  %v10969_v50 = vld [vmem:[%s21088_s1 + $0x428] sm:$0xf0] }
 0x2b4   : > { %4263 = vmatmul.bf16.gmra.mxu1 %v21379_v8  ;;  %4361 = vmatmul.bf16.gmra.mxu3 %v21381_v43  ;;  %v4117_v61 = vpop.f32.mrf.mxu2  ;;  %v10972_v32 = vor.u32 %v13608_v60, %v10969_v50  ;;  %v13688_v58 = vld [vmem:[%s21088_s1 + $0x68c] sm:$0xf]  ;;  %v6222_v43 = vmax.f32 %v4069_v16, 0.0 }
 0x2b5   : > { %4577 = vmatpush.bf16.msra.mxu0 %v11324_v18  ;;  %v4118_v52 = vadd.f32 %v4117_v61, %v15984_v25  ;;  %4482 = vmatpush.bf16.msra.mxu2 %v10716_v63  ;;  %v11292_v18 = vor.u32 %v13688_v58, %v11289_v11  ;;  %v13480_v60 = vld [vmem:[%s21088_s1 + $0xc] sm:$0xf] }
 0x2b6   : > { %4410 = vmatmul.bf16.gmra.mxu0 %v21364_v22  ;;  %4531 = vmatpush.bf16.msra.mxu3 %v10972_v32  ;;  %v10457_v50 = vld [vmem:[%s21088_s1 + $0x28] sm:$0xf0] }
 0x2b7   : > { %v4166_v33 = vpop.f32.mrf.mxu3  ;;  %v10460_v61 = vor.u32 %v13480_v60, %v10457_v50  ;;  %v13680_v63 = vld [vmem:[%s21088_s1 + $0x64c] sm:$0xf]  ;;  %v21384_v50 = vld [vmem:[#allocation29_spill] sm:$0xff] }
 0x2b8   : > { %v4167_v12 = vadd.f32 %v4166_v33, %v4118_v52  ;;  %v13672_v16 = vld [vmem:[%s21088_s1 + $0x60c] sm:$0xf] }
 0x2b9   : > { %v4070_v21 = vpop.f32.mrf.mxu1  ;;  %4578 = vmatpush.bf16.msra.mxu0 %v11292_v18  ;;  %4433 = vmatpush.bf16.msra.mxu1 %v10460_v61  ;;  %v11225_v52 = vld [vmem:[%s21088_s1 + $0x628] sm:$0xf0]  ;;  %v21385_v61 = vld [vmem:[#allocation46_spill] sm:$0xff] }
 0x2ba   : > { %v4071_v40 = vadd.f32 %v4070_v21, %v15925_v6  ;;  %v11257_v6 = vld [vmem:[%s21088_s1 + $0x668] sm:$0xf0]  ;;  %v16211_v33 = vadd.f32 %v4215_v2, %v4167_v12  ;;  %v11228_v60 = vor.u32 %v13672_v16, %v11225_v52  ;;  %v21383_v12 = vld [vmem:[#allocation28_spill] sm:$0xff] }
 0x2bb   : > { %v4217_v22 = vpop.f32.mrf.mxu0  ;;  %v11260_v21 = vor.u32 %v13680_v63, %v11257_v6  ;;  %v13856_v6 = vld [vmem:[%s21088_s1 + $0xbcc] sm:$0xf] }
 0x2bc   : > { %v6230_v23 = vmax.f32 %v4071_v40, 0.0  ;;  %v4119_v58 = vpop.f32.mrf.mxu2 }
 0x2bd   : > { %4579 = vmatpush.bf16.msra.mxu0 %v11260_v21  ;;  %v4120_v18 = vadd.f32 %v4119_v58, %v15984_v25  ;;  %v13920_v21 = vld [vmem:[%s21088_s1 + $0xdcc] sm:$0xf] }
 0x2be   : > { %v16213_v32 = vpack.c.bf16 %v6230_v23, %v6222_v43 }
 0x2bf   : > { %v4168_v11 = vpop.f32.mrf.mxu3 }
 0x2c0   : > { %21382 = vst [vmem:[#allocation24_spill] sm:$0xff] %v16213_v32  ;;  %v4169_v23 = vadd.f32 %v4168_v11, %v4120_v18 }
 0x2c1   : > { %v4073_v40 = vpop.f32.mrf.mxu1  ;;  %4580 = vmatpush.bf16.msra.mxu0 %v11228_v60  ;;  %4317 = vmatmul.bf16.gmra.mxu2 %v21384_v50 }
 0x2c2   : > { %v4074_v2 = vadd.f32 %v4073_v40, %v15947_v42  ;;  %v16226_v63 = vadd.f32 %v4217_v22, %v4169_v23  ;;  %v11961_v42 = vld [vmem:[%s21088_s1 + $0xbe8] sm:$0xf0] }
 0x2c3   : > { %v4220_v43 = vpop.f32.mrf.mxu0  ;;  %v11964_v58 = vor.u32 %v13856_v6, %v11961_v42  ;;  %v12217_v22 = vld [vmem:[%s21088_s1 + $0xde8] sm:$0xf0] }
 0x2c4   : > { %4268 = vmatmul.bf16.gmra.mxu1 %v21383_v12  ;;  %4366 = vmatmul.bf16.gmra.mxu3 %v21385_v61  ;;  %v4122_v11 = vpop.f32.mrf.mxu2  ;;  %v12220_v52 = vor.u32 %v13920_v21, %v12217_v22  ;;  %v13792_v42 = vld [vmem:[%s21088_s1 + $0x9cc] sm:$0xf] }
 0x2c5   : > { %v4123_v18 = vadd.f32 %v4122_v11, %v15984_v25  ;;  %4671 = vmatpush.bf16.msrb.mxu2 %v11964_v58  ;;  %v11705_v21 = vld [vmem:[%s21088_s1 + $0x9e8] sm:$0xf0] }
 0x2c6   : > { %4415 = vmatmul.bf16.gmra.mxu0 %v21367_v39  ;;  %4720 = vmatpush.bf16.msrb.mxu3 %v12220_v52  ;;  %v6238_v39 = vmax.f32 %v4074_v2, 0.0  ;;  %v21388_v52 = vld [vmem:[#allocation33_spill] sm:$0xff] }
 0x2c7   : > { %v4171_v16 = vpop.f32.mrf.mxu3 }
 0x2c8   : > { %v4172_v23 = vadd.f32 %v4171_v16, %v4123_v18  ;;  %v21389_v18 = vld [vmem:[#allocation48_spill] sm:$0xff] }
 0x2c9   : > { %v4075_v40 = vpop.f32.mrf.mxu1 }
 0x2ca   : > { %v4076_v60 = vadd.f32 %v4075_v40, %v15953_v59  ;;  %v16243_v50 = vadd.f32 %v4220_v43, %v4172_v23  ;;  %v11708_v59 = vor.u32 %v13792_v42, %v11705_v21 }
 0x2cb   : > { %v4222_v32 = vpop.f32.mrf.mxu0 }
 0x2cc   : > { %v6246_v61 = vmax.f32 %v4076_v60, 0.0  ;;  %v4124_v58 = vpop.f32.mrf.mxu2  ;;  %4622 = vmatpush.bf16.msrb.mxu1 %v11708_v59 }
 0x2cd   : > { %v4125_v11 = vadd.f32 %v4124_v58, %v15984_v25  ;;  %v11929_v58 = vld [vmem:[%s21088_s1 + $0xba8] sm:$0xf0] }
 0x2ce   : > { %v16245_v6 = vpack.c.bf16 %v6246_v61, %v6238_v39  ;;  %v21387_v61 = vld [vmem:[#allocation32_spill] sm:$0xff] }
 0x2cf   : > { %v4173_v22 = vpop.f32.mrf.mxu3 }
 0x2d0   : > { %21386 = vst [vmem:[#allocation28_spill] sm:$0xff] %v16245_v6  ;;  %v4174_v43 = vadd.f32 %v4173_v22, %v4125_v11  ;;  %v12185_v11 = vld [vmem:[%s21088_s1 + $0xda8] sm:$0xf0] }
 0x2d1   : > { %v4078_v16 = vpop.f32.mrf.mxu1  ;;  %4322 = vmatmul.bf16.gmra.mxu2 %v21388_v52 }
 0x2d2   : > { %v4079_v2 = vadd.f32 %v4078_v16, %v15975_v49  ;;  %v16258_v40 = vadd.f32 %v4222_v32, %v4174_v43  ;;  %v13848_v49 = vld [vmem:[%s21088_s1 + $0xb8c] sm:$0xf] }
 0x2d3   : > { %v4225_v39 = vpop.f32.mrf.mxu0  ;;  %v13912_v32 = vld [vmem:[%s21088_s1 + $0xd8c] sm:$0xf]  ;;  %v11932_v59 = vor.u32 %v13848_v49, %v11929_v58 }
 0x2d4   : > { %4273 = vmatmul.bf16.gmra.mxu1 %v21387_v61  ;;  %4371 = vmatmul.bf16.gmra.mxu3 %v21389_v18  ;;  %v4127_v60 = vpop.f32.mrf.mxu2  ;;  %v6254_v6 = vmax.f32 %v4079_v2, 0.0 }
 0x2d5   : > { %v4128_v42 = vadd.f32 %v4127_v60, %v15984_v25  ;;  %v12188_v60 = vor.u32 %v13912_v32, %v12185_v11  ;;  %4672 = vmatpush.bf16.msrb.mxu2 %v11932_v59 }
 0x2d6   : > { %4420 = vmatmul.bf16.gmra.mxu0 %v15368_v19 }
 0x2d7   : > { %v4176_v23 = vpop.f32.mrf.mxu3  ;;  %4721 = vmatpush.bf16.msrb.mxu3 %v12188_v60  ;;  %v13904_v60 = vld [vmem:[%s21088_s1 + $0xd4c] sm:$0xf] }
 0x2d8   : > { %v4177_v16 = vadd.f32 %v4176_v23, %v4128_v42 }
 0x2d9   : > { %v4080_v21 = vpop.f32.mrf.mxu1 }
 0x2da   : > { %v4081_v22 = vadd.f32 %v4080_v21, %v15986_v46  ;;  %v16275_v18 = vadd.f32 %v4225_v39, %v4177_v16  ;;  %v13784_v46 = vld [vmem:[%s21088_s1 + $0x98c] sm:$0xf] }
 0x2db   : > { %v4227_v43 = vpop.f32.mrf.mxu0  ;;  %v11673_v21 = vld [vmem:[%s21088_s1 + $0x9a8] sm:$0xf0] }
 0x2dc   : > { %v6262_v19 = vmax.f32 %v4081_v22, 0.0  ;;  %v4129_v49 = vpop.f32.mrf.mxu2  ;;  %v11676_v42 = vor.u32 %v13784_v46, %v11673_v21  ;;  %v11897_v16 = vld [vmem:[%s21088_s1 + $0xb68] sm:$0xf0] }
 0x2dd   : > { %v4130_v2 = vadd.f32 %v4129_v49, %v15984_v25  ;;  %v12153_v21 = vld [vmem:[%s21088_s1 + $0xd68] sm:$0xf0] }
 0x2de   : > { %v16277_v52 = vpack.c.bf16 %v6262_v19, %v6254_v6  ;;  %4623 = vmatpush.bf16.msrb.mxu1 %v11676_v42  ;;  %v12156_v42 = vor.u32 %v13904_v60, %v12153_v21  ;;  %v21391_v60 = vld [vmem:[#allocation13_spill] sm:$0xff] }
 0x2df   : > { %v4178_v23 = vpop.f32.mrf.mxu3 }
 0x2e0   : > { %21390 = vst [vmem:[#allocation62_spill] sm:$0xff] %v16277_v52  ;;  %v4179_v39 = vadd.f32 %v4178_v23, %v4130_v2  ;;  %4722 = vmatpush.bf16.msrb.mxu3 %v12156_v42 }
 0x2e1   : > { %v4239_v58 = vpop.f32.mrf.mxu1  ;;  %4483 = vmatmul.bf16.vlgmr.msra.gmra.mxu2 %v21357_v41 }
 0x2e2   : > { %v4240_v32 = vadd.f32 %v4239_v58, %v16009_v15  ;;  %v16290_v6 = vadd.f32 %v4227_v43, %v4179_v39  ;;  %v13840_v15 = vld [vmem:[%s21088_s1 + $0xb4c] sm:$0xf] }
 0x2e3   : > { %v4386_v19 = vpop.f32.mrf.mxu0  ;;  %v11900_v46 = vor.u32 %v13840_v15, %v11897_v16  ;;  %v13776_v58 = vld [vmem:[%s21088_s1 + $0x94c] sm:$0xf] }
 0x2e4   : > { %4434 = vmatmul.bf16.vlgmr.msra.gmra.mxu1 %v21356_v7  ;;  %4532 = vmatmul.bf16.vlgmr.msra.gmra.mxu3 %v14666_v53  ;;  %v4288_v22 = vpop.f32.mrf.mxu2 }
 0x2e5   : > { %v4289_v11 = vadd.f32 %v4288_v22, %v4240_v32  ;;  %4673 = vmatpush.bf16.msrb.mxu2 %v11900_v46  ;;  %v11641_v32 = vld [vmem:[%s21088_s1 + $0x968] sm:$0xf0] }
 0x2e6   : > { %4581 = vmatmul.bf16.vlgmr.msra.gmra.mxu0 %v14668_v54  ;;  %v11644_v22 = vor.u32 %v13776_v58, %v11641_v32  ;;  %v13832_v32 = vld [vmem:[%s21088_s1 + $0xb0c] sm:$0xf] }
 0x2e7   : > { %v4337_v59 = vpop.f32.mrf.mxu3 }
 0x2e8   : > { %v4338_v49 = vadd.f32 %v4337_v59, %v4289_v11  ;;  %4624 = vmatpush.bf16.msrb.mxu1 %v11644_v22  ;;  %v12121_v22 = vld [vmem:[%s21088_s1 + $0xd28] sm:$0xf0] }
 0x2e9   : > { %v4241_v25 = vpop.f32.mrf.mxu1 }
 0x2ea   : > { %v4242_v43 = vadd.f32 %v4241_v25, %v16018_v28  ;;  %v4387_v2 = vadd.f32 %v4386_v19, %v4338_v49 }
 0x2eb   : > { %v4388_v23 = vpop.f32.mrf.mxu0 }
 0x2ec   : > { %v4290_v28 = vpop.f32.mrf.mxu2  ;;  %v6143_v46 = vmax.f32 %v4387_v2, 0.0 }
 0x2ed   : > { %v4291_v25 = vadd.f32 %v4290_v28, %v4242_v43  ;;  %v13896_v28 = vld [vmem:[%s21088_s1 + $0xd0c] sm:$0xf] }
 0x2ef   : > { %v4339_v39 = vpop.f32.mrf.mxu3 }
 0x2f0   : > { %v4340_v11 = vadd.f32 %v4339_v39, %v4291_v25 }
 0x2f1   : > { %v4244_v15 = vpop.f32.mrf.mxu1  ;;  %4488 = vmatmul.bf16.gmra.mxu2 %v21359_v1 }
 0x2f2   : > { %v4245_v59 = vadd.f32 %v4244_v15, %v16041_v31  ;;  %v4389_v19 = vadd.f32 %v4388_v23, %v4340_v11  ;;  %v11865_v23 = vld [vmem:[%s21088_s1 + $0xb28] sm:$0xf0] }
 0x2f3   : > { %v4391_v16 = vpop.f32.mrf.mxu0  ;;  %v11868_v39 = vor.u32 %v13832_v32, %v11865_v23 }
 0x2f4   : > { %4439 = vmatmul.bf16.gmra.mxu1 %v21358_v30  ;;  %4537 = vmatmul.bf16.gmra.mxu3 %v21391_v60  ;;  %v6151_v21 = vmax.f32 %v4389_v19, 0.0  ;;  %v4293_v49 = vpop.f32.mrf.mxu2  ;;  %v13768_v19 = vld [vmem:[%s21088_s1 + $0x90c] sm:$0xf] }
 0x2f5   : > { %v4294_v58 = vadd.f32 %v4293_v49, %v4245_v59  ;;  %v12124_v59 = vor.u32 %v13896_v28, %v12121_v22  ;;  %4674 = vmatpush.bf16.msrb.mxu2 %v11868_v39  ;;  %v21393_v28 = vld [vmem:[#allocation14_spill] sm:$0xff]  ;;  %v21394_v39 = vld [vmem:[#allocation15_spill] sm:$0xff] }
 0x2f6   : > { %4586 = vmatmul.bf16.gmra.mxu0 %v14706_v13  ;;  %v16317_v43 = vpack.c.bf16 %v6151_v21, %v6143_v46  ;;  %v11609_v46 = vld [vmem:[%s21088_s1 + $0x928] sm:$0xf0] }
 0x2f7   : > { %v4342_v42 = vpop.f32.mrf.mxu3  ;;  %4723 = vmatpush.bf16.msrb.mxu3 %v12124_v59  ;;  %v11612_v49 = vor.u32 %v13768_v19, %v11609_v46 }
 0x2f8   : > { %21392 = vst [vmem:[#allocation63_spill] sm:$0xff] %v16317_v43  ;;  %v4343_v25 = vadd.f32 %v4342_v42, %v4294_v58 }
 0x2f9   : > { %v4246_v31 = vpop.f32.mrf.mxu1  ;;  %4625 = vmatpush.bf16.msrb.mxu1 %v11612_v49 }
 0x2fa   : > { %v4247_v2 = vadd.f32 %v4246_v31, %v16050_v55  ;;  %v4392_v11 = vadd.f32 %v4391_v16, %v4343_v25 }
 0x2fb   : > { %v4393_v15 = vpop.f32.mrf.mxu0 }
 0x2fc   : > { %v4295_v55 = vpop.f32.mrf.mxu2  ;;  %v6159_v22 = vmax.f32 %v4392_v11, 0.0 }
 0x2fd   : > { %v4296_v31 = vadd.f32 %v4295_v55, %v4247_v2  ;;  %v13824_v55 = vld [vmem:[%s21088_s1 + $0xacc] sm:$0xf] }
 0x2ff   : > { %v4344_v21 = vpop.f32.mrf.mxu3 }
 0x300   : > { %v4345_v58 = vadd.f32 %v4344_v21, %v4296_v31  ;;  %v13888_v21 = vld [vmem:[%s21088_s1 + $0xccc] sm:$0xf] }
 0x301   : > { %v4249_v32 = vpop.f32.mrf.mxu1  ;;  %4493 = vmatmul.bf16.gmra.mxu2 %v21393_v28  ;;  %v12089_v31 = vld [vmem:[%s21088_s1 + $0xce8] sm:$0xf0] }
 0x302   : > { %v4250_v42 = vadd.f32 %v4249_v32, %v16073_v62  ;;  %v4394_v16 = vadd.f32 %v4393_v15, %v4345_v58  ;;  %v11833_v15 = vld [vmem:[%s21088_s1 + $0xae8] sm:$0xf0]  ;;  %v12092_v58 = vor.u32 %v13888_v21, %v12089_v31  ;;  %v21397_v31 = vld [vmem:[#allocation17_spill] sm:$0xff] }
 0x303   : > { %v4396_v23 = vpop.f32.mrf.mxu0  ;;  %v11836_v49 = vor.u32 %v13824_v55, %v11833_v15 }
 0x304   : > { %4444 = vmatmul.bf16.gmra.mxu1 %v21360_v10  ;;  %4542 = vmatmul.bf16.gmra.mxu3 %v21394_v39  ;;  %v6167_v25 = vmax.f32 %v4394_v16, 0.0  ;;  %v4298_v59 = vpop.f32.mrf.mxu2 }
 0x305   : > { %v4299_v46 = vadd.f32 %v4298_v59, %v4250_v42  ;;  %4675 = vmatpush.bf16.msrb.mxu2 %v11836_v49  ;;  %4724 = vmatpush.bf16.msrb.mxu3 %v12092_v58  ;;  %v21396_v49 = vld [vmem:[#allocation16_spill] sm:$0xff] }
 0x306   : > { %4591 = vmatmul.bf16.gmra.mxu0 %v14744_v34  ;;  %v16343_v2 = vpack.c.bf16 %v6167_v25, %v6159_v22  ;;  %v13760_v22 = vld [vmem:[%s21088_s1 + $0x8cc] sm:$0xf] }
 0x307   : > { %v4347_v19 = vpop.f32.mrf.mxu3  ;;  %v11577_v25 = vld [vmem:[%s21088_s1 + $0x8e8] sm:$0xf0] }
 0x308   : > { %21395 = vst [vmem:[#allocation64_spill] sm:$0xff] %v16343_v2  ;;  %v4348_v32 = vadd.f32 %v4347_v19, %v4299_v46 }
 0x309   : > { %v4251_v62 = vpop.f32.mrf.mxu1 }
 0x30a   : > { %v4252_v11 = vadd.f32 %v4251_v62, %v16082_v38  ;;  %v4397_v16 = vadd.f32 %v4396_v23, %v4348_v32  ;;  %v11580_v62 = vor.u32 %v13760_v22, %v11577_v25 }
 0x30b   : > { %v4398_v42 = vpop.f32.mrf.mxu0 }
 0x30c   : > { %v4300_v38 = vpop.f32.mrf.mxu2  ;;  %4626 = vmatpush.bf16.msrb.mxu1 %v11580_v62  ;;  %v6175_v32 = vmax.f32 %v4397_v16, 0.0 }
 0x30d   : > { %v4301_v55 = vadd.f32 %v4300_v38, %v4252_v11  ;;  %v13816_v38 = vld [vmem:[%s21088_s1 + $0xa8c] sm:$0xf] }
 0x30f   : > { %v4349_v59 = vpop.f32.mrf.mxu3 }
 0x310   : > { %v4350_v46 = vadd.f32 %v4349_v59, %v4301_v55  ;;  %v13880_v59 = vld [vmem:[%s21088_s1 + $0xc8c] sm:$0xf] }
 0x311   : > { %v4254_v15 = vpop.f32.mrf.mxu1  ;;  %4498 = vmatmul.bf16.gmra.mxu2 %v21396_v49 }
 0x312   : > { %v4255_v19 = vadd.f32 %v4254_v15, %v16105_v44  ;;  %v4399_v23 = vadd.f32 %v4398_v42, %v4350_v46  ;;  %v11801_v42 = vld [vmem:[%s21088_s1 + $0xaa8] sm:$0xf0] }
 0x313   : > { %v4401_v21 = vpop.f32.mrf.mxu0  ;;  %v11804_v62 = vor.u32 %v13816_v38, %v11801_v42 }
 0x314   : > { %4449 = vmatmul.bf16.gmra.mxu1 %v21362_v56  ;;  %4547 = vmatmul.bf16.gmra.mxu3 %v21397_v31  ;;  %v6183_v58 = vmax.f32 %v4399_v23, 0.0  ;;  %v4303_v52 = vpop.f32.mrf.mxu2  ;;  %v13752_v23 = vld [vmem:[%s21088_s1 + $0x88c] sm:$0xf] }
 0x315   : > { %v4304_v25 = vadd.f32 %v4303_v52, %v4255_v19  ;;  %v12057_v52 = vld [vmem:[%s21088_s1 + $0xca8] sm:$0xf0]  ;;  %4676 = vmatpush.bf16.msrb.mxu2 %v11804_v62  ;;  %v13541_v62 = vld [vmem:[%s21088_s1 + $0x1ec] sm:$0xf0] }
 0x316   : > { %4596 = vmatmul.bf16.gmra.mxu0 %v14782_v3  ;;  %v16369_v11 = vpack.c.bf16 %v6183_v58, %v6175_v32  ;;  %v12060_v19 = vor.u32 %v13880_v59, %v12057_v52  ;;  %v11545_v32 = vld [vmem:[%s21088_s1 + $0x8a8] sm:$0xf0] }
 0x317   : > { %v4352_v22 = vpop.f32.mrf.mxu3 }
 0x318   : > { %21398 = vst [vmem:[#allocation65_spill] sm:$0xff] %v16369_v11  ;;  %v4353_v55 = vadd.f32 %v4352_v22, %v4304_v25  ;;  %4725 = vmatpush.bf16.msrb.mxu3 %v12060_v19 }
 0x319   : > { %v4256_v44 = vpop.f32.mrf.mxu1 }
 0x31a   : > { %v4257_v16 = vadd.f32 %v4256_v44, %v16120_v37  ;;  %v4402_v46 = vadd.f32 %v4401_v21, %v4353_v55  ;;  %v11548_v44 = vor.u32 %v13752_v23, %v11545_v32  ;;  %v10687_v21 = vld [vmem:[%s21088_s1 + $0x1d0] sm:$0xf] }
 0x31b   : > { %v4403_v15 = vpop.f32.mrf.mxu0  ;;  %v10655_v32 = vld [vmem:[%s21088_s1 + $0x190] sm:$0xf] }
 0x31c   : > { %v4305_v37 = vpop.f32.mrf.mxu2  ;;  %4627 = vmatpush.bf16.msrb.mxu1 %v11548_v44 }
 0x31d   : > { %v4306_v38 = vadd.f32 %v4305_v37, %v4257_v16  ;;  %v10688_v16 = vor.u32 %v13541_v62, %v10687_v21 }
 0x31f   : > { %v4354_v58 = vpop.f32.mrf.mxu3  ;;  %4769 = vmatpush.bf16.msrb.mxu0 %v10688_v16 }
 0x320   : > { %v4355_v25 = vadd.f32 %v4354_v58, %v4306_v38  ;;  %v11769_v38 = vld [vmem:[%s21088_s1 + $0xa68] sm:$0xf0] }
 0x321   : > { %v4259_v42 = vpop.f32.mrf.mxu1  ;;  %4503 = vmatmul.bf16.gmra.mxu2 %v14816_v26 }
 0x322   : > { %v4260_v22 = vadd.f32 %v4259_v42, %v16155_v9  ;;  %v4404_v52 = vadd.f32 %v4403_v15, %v4355_v25  ;;  %v6191_v9 = vmax.f32 %v4402_v46, 0.0  ;;  %v13533_v15 = vld [vmem:[%s21088_s1 + $0x1ac] sm:$0xf0]  ;;  %v13808_v46 = vld [vmem:[%s21088_s1 + $0xa4c] sm:$0xf] }
 0x323   : > { %v4406_v59 = vpop.f32.mrf.mxu0  ;;  %v13872_v42 = vld [vmem:[%s21088_s1 + $0xc4c] sm:$0xf]  ;;  %v10656_v25 = vor.u32 %v13533_v15, %v10655_v32  ;;  %v11772_v62 = vor.u32 %v13808_v46, %v11769_v38  ;;  %v10591_v38 = vld [vmem:[%s21088_s1 + $0x110] sm:$0xf] }
 0x324   : > { %4454 = vmatmul.bf16.gmra.mxu1 %v14436_v48  ;;  %4552 = vmatmul.bf16.gmra.mxu3 %v14818_v27  ;;  %v6199_v55 = vmax.f32 %v4404_v52, 0.0  ;;  %v4308_v19 = vpop.f32.mrf.mxu2  ;;  %v13744_v15 = vld [vmem:[%s21088_s1 + $0x84c] sm:$0xf] }
 0x325   : > { %v4309_v58 = vadd.f32 %v4308_v19, %v4260_v22  ;;  %v12025_v22 = vld [vmem:[%s21088_s1 + $0xc68] sm:$0xf0]  ;;  %4770 = vmatpush.bf16.msrb.mxu0 %v10656_v25  ;;  %4677 = vmatpush.bf16.msrb.mxu2 %v11772_v62  ;;  %v13525_v19 = vld [vmem:[%s21088_s1 + $0x16c] sm:$0xf0] }
 0x326   : > { %4601 = vmatmul.bf16.gmra.mxu0 %v21375_v20  ;;  %v16407_v37 = vpack.c.bf16 %v6199_v55, %v6191_v9  ;;  %v12028_v9 = vor.u32 %v13872_v42, %v12025_v22  ;;  %v10623_v55 = vld [vmem:[%s21088_s1 + $0x150] sm:$0xf] }
 0x327   : > { %v4357_v23 = vpop.f32.mrf.mxu3 }
 0x328   : > { %21399 = vst [vmem:[#allocation66_spill] sm:$0xff] %v16407_v37  ;;  %v4358_v52 = vadd.f32 %v4357_v23, %v4309_v58  ;;  %4726 = vmatpush.bf16.msrb.mxu3 %v12028_v9  ;;  %v11513_v23 = vld [vmem:[%s21088_s1 + $0x868] sm:$0xf0] }
 0x329   : > { %v4261_v44 = vpop.f32.mrf.mxu1  ;;  %v11516_v46 = vor.u32 %v13744_v15, %v11513_v23  ;;  %v21402_v23 = vld [vmem:[#allocation23_spill] sm:$0xff] }
 0x32a   : > { %v4262_v21 = vadd.f32 %v4261_v44, %v16176_v45  ;;  %v4407_v32 = vadd.f32 %v4406_v59, %v4358_v52  ;;  %v10624_v45 = vor.u32 %v13525_v19, %v10623_v55  ;;  %v13517_v59 = vld [vmem:[%s21088_s1 + $0x12c] sm:$0xf0] }
 0x32b   : > { %v4408_v16 = vpop.f32.mrf.mxu0  ;;  %v10592_v62 = vor.u32 %v13517_v59, %v10591_v38  ;;  %4628 = vmatpush.bf16.msrb.mxu1 %v11516_v46  ;;  %v21400_v55 = vld [vmem:[#allocation8_spill] sm:$0xff] }
 0x32c   : > { %4771 = vmatpush.bf16.msrb.mxu0 %v10624_v45  ;;  %v4310_v58 = vpop.f32.mrf.mxu2  ;;  %v10559_v19 = vld [vmem:[%s21088_s1 + $0xd0] sm:$0xf] }
 0x32d   : > { %v4311_v42 = vadd.f32 %v4310_v58, %v4262_v21  ;;  %v13509_v45 = vld [vmem:[%s21088_s1 + $0xec] sm:$0xf0]  ;;  %v21401_v21 = vld [vmem:[#allocation22_spill] sm:$0xff]  ;;  %v6207_v58 = vmax.f32 %v4407_v32, 0.0  ;;  %v13800_v32 = vld [vmem:[%s21088_s1 + $0xa0c] sm:$0xf] }
 0x32e   : > { %v10527_v59 = vld [vmem:[%s21088_s1 + $0x90] sm:$0xf] }
 0x32f   : > { %v4359_v44 = vpop.f32.mrf.mxu3 }
 0x330   : > { %v4360_v52 = vadd.f32 %v4359_v44, %v4311_v42  ;;  %4772 = vmatpush.bf16.msrb.mxu0 %v10592_v62 }
 0x331   : > { %v4264_v25 = vpop.f32.mrf.mxu1  ;;  %4508 = vmatmul.bf16.gmra.mxu2 %v21401_v21 }
 0x332   : > { %v4265_v22 = vadd.f32 %v4264_v25, %v16211_v33  ;;  %v4409_v15 = vadd.f32 %v4408_v16, %v4360_v52  ;;  %v10560_v33 = vor.u32 %v13509_v45, %v10559_v19  ;;  %v13501_v16 = vld [vmem:[%s21088_s1 + $0xac] sm:$0xf0]  ;;  %v11737_v52 = vld [vmem:[%s21088_s1 + $0xa28] sm:$0xf0] }
 0x333   : > { %v4411_v9 = vpop.f32.mrf.mxu0  ;;  %v13864_v19 = vld [vmem:[%s21088_s1 + $0xc0c] sm:$0xf]  ;;  %v10528_v45 = vor.u32 %v13501_v16, %v10527_v59  ;;  %v13493_v59 = vld [vmem:[%s21088_s1 + $0x6c] sm:$0xf0] }
 0x334   : > { %4459 = vmatmul.bf16.gmra.mxu1 %v21400_v55  ;;  %4557 = vmatmul.bf16.gmra.mxu3 %v21402_v23  ;;  %v6215_v44 = vmax.f32 %v4409_v15, 0.0  ;;  %v4313_v46 = vpop.f32.mrf.mxu2 }
 0x335   : > { %4773 = vmatpush.bf16.msrb.mxu0 %v10560_v33  ;;  %v4314_v25 = vadd.f32 %v4313_v46, %v4265_v22  ;;  %v11740_v33 = vor.u32 %v13800_v32, %v11737_v52  ;;  %v11993_v22 = vld [vmem:[%s21088_s1 + $0xc28] sm:$0xf0] }
 0x336   : > { %4606 = vmatmul.bf16.gmra.mxu0 %v21379_v8  ;;  %v16457_v42 = vpack.c.bf16 %v6215_v44, %v6207_v58  ;;  %v11996_v46 = vor.u32 %v13864_v19, %v11993_v22  ;;  %v10463_v19 = vld [vmem:[%s21088_s1 + $0x10] sm:$0xf] }
 0x337   : > { %v4362_v38 = vpop.f32.mrf.mxu3  ;;  %4678 = vmatpush.bf16.msrb.mxu2 %v11740_v33 }
 0x338   : > { %21403 = vst [vmem:[#allocation67_spill] sm:$0xff] %v16457_v42  ;;  %v4363_v58 = vadd.f32 %v4362_v38, %v4314_v25  ;;  %v10495_v42 = vld [vmem:[%s21088_s1 + $0x50] sm:$0xf]  ;;  %4727 = vmatpush.bf16.msrb.mxu3 %v11996_v46  ;;  %v11481_v38 = vld [vmem:[%s21088_s1 + $0x828] sm:$0xf0] }
 0x339   : > { %v4266_v62 = vpop.f32.mrf.mxu1  ;;  %4774 = vmatpush.bf16.msrb.mxu0 %v10528_v45 }
 0x33a   : > { %v4267_v15 = vadd.f32 %v4266_v62, %v16226_v63  ;;  %v4412_v16 = vadd.f32 %v4411_v9, %v4363_v58  ;;  %v10496_v63 = vor.u32 %v13493_v59, %v10495_v42  ;;  %v13736_v62 = vld [vmem:[%s21088_s1 + $0x80c] sm:$0xf]  ;;  %v13485_v9 = vld [vmem:[%s21088_s1 + $0x2c] sm:$0xf0]  ;;  %v21404_v59 = vld [vmem:[#allocation5_spill] sm:$0xff] }
 0x33b   : > { %v4413_v44 = vpop.f32.mrf.mxu0  ;;  %v11484_v52 = vor.u32 %v13736_v62, %v11481_v38  ;;  %v10464_v33 = vor.u32 %v13485_v9, %v10463_v19  ;;  %v21405_v62 = vld [vmem:[#allocation26_spill] sm:$0xff]  ;;  %v21406_v38 = vld [vmem:[#allocation27_spill] sm:$0xff]  ;;  %v11455_v9 = vld [vmem:[%s21088_s1 + $0x7d0] sm:$0xf] }
 0x33c   : > { %v4315_v25 = vpop.f32.mrf.mxu2  ;;  %v6223_v37 = vmax.f32 %v4412_v16, 0.0 }
 0x33d   : > { %4775 = vmatpush.bf16.msrb.mxu0 %v10496_v63  ;;  %v4316_v42 = vadd.f32 %v4315_v25, %v4267_v15  ;;  %4629 = vmatpush.bf16.msrb.mxu1 %v11484_v52 }
 0x33f   : > { %v4364_v32 = vpop.f32.mrf.mxu3 }
 0x340   : > { %v4365_v58 = vadd.f32 %v4364_v32, %v4316_v42  ;;  %v11199_v32 = vld [vmem:[%s21088_s1 + $0x5d0] sm:$0xf] }
 0x341   : > { %v4269_v45 = vpop.f32.mrf.mxu1  ;;  %4776 = vmatpush.bf16.msrb.mxu0 %v10464_v33  ;;  %4513 = vmatmul.bf16.gmra.mxu2 %v21405_v62 }
 0x342   : > { %v4270_v22 = vadd.f32 %v4269_v45, %v16243_v50  ;;  %v4414_v63 = vadd.f32 %v4413_v44, %v4365_v58  ;;  %v13669_v44 = vld [vmem:[%s21088_s1 + $0x5ec] sm:$0xf0] }
 0x343   : > { %v4416_v46 = vpop.f32.mrf.mxu0  ;;  %v11200_v42 = vor.u32 %v13669_v44, %v11199_v32  ;;  %v13605_v58 = vld [vmem:[%s21088_s1 + $0x3ec] sm:$0xf0] }
 0x344   : > { %4464 = vmatmul.bf16.gmra.mxu1 %v21404_v59  ;;  %4562 = vmatmul.bf16.gmra.mxu3 %v21406_v38  ;;  %v6231_v11 = vmax.f32 %v4414_v63, 0.0  ;;  %v4318_v15 = vpop.f32.mrf.mxu2 }
 0x345   : > { %v4319_v50 = vadd.f32 %v4318_v15, %v4270_v22  ;;  %v10943_v22 = vld [vmem:[%s21088_s1 + $0x3d0] sm:$0xf]  ;;  %4867 = vmatpush.bf16.msra.mxu2 %v11200_v42 }
 0x346   : > { %4611 = vmatmul.bf16.gmra.mxu0 %v21383_v12  ;;  %v16495_v19 = vpack.c.bf16 %v6231_v11, %v6223_v37  ;;  %v13733_v11 = vld [vmem:[%s21088_s1 + $0x7ec] sm:$0xf0]  ;;  %v10944_v63 = vor.u32 %v13605_v58, %v10943_v22 }
 0x347   : > { %v4367_v25 = vpop.f32.mrf.mxu3  ;;  %v11456_v33 = vor.u32 %v13733_v11, %v11455_v9 }
 0x348   : > { %21407 = vst [vmem:[#allocation68_spill] sm:$0xff] %v16495_v19  ;;  %v4368_v37 = vadd.f32 %v4367_v25, %v4319_v50  ;;  %4818 = vmatpush.bf16.msra.mxu1 %v10944_v63 }
 0x349   : > { %v4271_v52 = vpop.f32.mrf.mxu1  ;;  %4916 = vmatpush.bf16.msra.mxu3 %v11456_v33  ;;  %v13725_v33 = vld [vmem:[%s21088_s1 + $0x7ac] sm:$0xf0] }
 0x34a   : > { %v4272_v16 = vadd.f32 %v4271_v52, %v16258_v40  ;;  %v4417_v15 = vadd.f32 %v4416_v46, %v4368_v37  ;;  %v11167_v46 = vld [vmem:[%s21088_s1 + $0x590] sm:$0xf] }
 0x34b   : > { %v4418_v45 = vpop.f32.mrf.mxu0 }
 0x34c   : > { %v4320_v40 = vpop.f32.mrf.mxu2  ;;  %v6239_v42 = vmax.f32 %v4417_v15, 0.0  ;;  %v10911_v15 = vld [vmem:[%s21088_s1 + $0x390] sm:$0xf] }
 0x34d   : > { %v4321_v32 = vadd.f32 %v4320_v40, %v4272_v16  ;;  %v13661_v16 = vld [vmem:[%s21088_s1 + $0x5ac] sm:$0xf0] }
 0x34f   : > { %v4369_v52 = vpop.f32.mrf.mxu3 }
 0x350   : > { %v4370_v50 = vadd.f32 %v4369_v52, %v4321_v32 }
 0x351   : > { %v4274_v44 = vpop.f32.mrf.mxu1  ;;  %4518 = vmatmul.bf16.gmra.mxu2 %v15000_v36 }
 0x352   : > { %v4275_v25 = vadd.f32 %v4274_v44, %v16275_v18  ;;  %v4419_v11 = vadd.f32 %v4418_v45, %v4370_v50  ;;  %v11423_v18 = vld [vmem:[%s21088_s1 + $0x790] sm:$0xf]  ;;  %v11168_v45 = vor.u32 %v13661_v16, %v11167_v46 }
 0x353   : > { %v4421_v9 = vpop.f32.mrf.mxu0  ;;  %v11424_v63 = vor.u32 %v13725_v33, %v11423_v18 }
 0x354   : > { %4469 = vmatmul.bf16.gmra.mxu1 %v14554_v47  ;;  %4567 = vmatmul.bf16.gmra.mxu3 %v21350_v51  ;;  %v6247_v37 = vmax.f32 %v4419_v11, 0.0  ;;  %v4323_v22 = vpop.f32.mrf.mxu2  ;;  %v13597_v11 = vld [vmem:[%s21088_s1 + $0x3ac] sm:$0xf0] }
 0x355   : > { %v4324_v52 = vadd.f32 %v4323_v22, %v4275_v25  ;;  %4868 = vmatpush.bf16.msra.mxu2 %v11168_v45  ;;  %4917 = vmatpush.bf16.msra.mxu3 %v11424_v63  ;;  %v10912_v46 = vor.u32 %v13597_v11, %v10911_v15 }
 0x356   : > { %4616 = vmatmul.bf16.gmra.mxu0 %v21387_v61  ;;  %v16533_v40 = vpack.c.bf16 %v6247_v37, %v6239_v42 }
 0x357   : > { %v4372_v58 = vpop.f32.mrf.mxu3  ;;  %4819 = vmatpush.bf16.msra.mxu1 %v10912_v46 }
 0x358   : > { %21408 = vst [vmem:[#allocation69_spill] sm:$0xff] %v16533_v40  ;;  %v4373_v50 = vadd.f32 %v4372_v58, %v4324_v52  ;;  %v21409_v58 = vld [vmem:[#allocation11_spill] sm:$0xff] }
 0x359   : > { %v4276_v32 = vpop.f32.mrf.mxu1 }
 0x35a   : > { %v4277_v44 = vadd.f32 %v4276_v32, %v16290_v6  ;;  %v4422_v16 = vadd.f32 %v4421_v9, %v4373_v50  ;;  %v14259_v6 = vld [vmem:[%s21089_s2] sm:$0xff]  ;;  %v21411_v9 = vld [vmem:[#allocation35_spill] sm:$0xff]  ;;  %v13653_v50 = vld [vmem:[%s21088_s1 + $0x56c] sm:$0xf0] }
 0x35b   : > { %v4423_v19 = vpop.f32.mrf.mxu0  ;;  %v16545_v37 = vperm.slane %v14259_v6, 3  ;;  %v21410_v32 = vld [vmem:[#allocation34_spill] sm:$0xff] }
 0x35c   : > { %v4325_v18 = vpop.f32.mrf.mxu2  ;;  %v6255_v15 = vmax.f32 %v4422_v16, 0.0  ;;  %v10879_v16 = vld [vmem:[%s21088_s1 + $0x350] sm:$0xf] }
 0x35d   : > { %v4326_v42 = vadd.f32 %v4325_v18, %v4277_v44  ;;  %v11135_v44 = vld [vmem:[%s21088_s1 + $0x550] sm:$0xf] }
 0x35e   : > { %v11136_v46 = vor.u32 %v13653_v50, %v11135_v44  ;;  %v13717_v18 = vld [vmem:[%s21088_s1 + $0x76c] sm:$0xf0] }
 0x35f   : > { %v4374_v25 = vpop.f32.mrf.mxu3 }
 0x360   : > { %v4375_v33 = vadd.f32 %v4374_v25, %v4326_v42  ;;  %4869 = vmatpush.bf16.msra.mxu2 %v11136_v46 }
 0x361   : > { %v4435_v45 = vpop.f32.mrf.mxu1  ;;  %4679 = vmatmul.bf16.vlgmr.msrb.gmra.mxu2 %v21410_v32  ;;  %v21424_v32 = vld [vmem:[#allocation49_spill] sm:$0xff] }
 0x362   : > { %v4424_v63 = vadd.f32 %v4423_v19, %v4375_v33  ;;  %v4436_v52 = vadd.f32 %v4435_v45, %v16545_v37  ;;  %v11391_v19 = vld [vmem:[%s21088_s1 + $0x750] sm:$0xf] }
 0x363   : > { %v4582_v22 = vpop.f32.mrf.mxu0  ;;  %v11392_v6 = vor.u32 %v13717_v18, %v11391_v19 }
 0x364   : > { %4630 = vmatmul.bf16.vlgmr.msrb.gmra.mxu1 %v21409_v58  ;;  %4728 = vmatmul.bf16.vlgmr.msrb.gmra.mxu3 %v21411_v9  ;;  %v6263_v11 = vmax.f32 %v4424_v63, 0.0  ;;  %v4484_v25 = vpop.f32.mrf.mxu2  ;;  %v13589_v63 = vld [vmem:[%s21088_s1 + $0x36c] sm:$0xf0] }
 0x365   : > { %v4485_v33 = vadd.f32 %v4484_v25, %v4436_v52  ;;  %4918 = vmatpush.bf16.msra.mxu3 %v11392_v6  ;;  %v10880_v44 = vor.u32 %v13589_v63, %v10879_v16  ;;  %v21423_v9 = vld [vmem:[#allocation48_spill] sm:$0xff] }
 0x366   : > { %4777 = vmatmul.bf16.vlgmr.msrb.gmra.mxu0 %v21356_v7  ;;  %v16564_v45 = vpack.c.bf16 %v6263_v11, %v6255_v15 }
 0x367   : > { %v4533_v42 = vpop.f32.mrf.mxu3  ;;  %4820 = vmatpush.bf16.msra.mxu1 %v10880_v44 }
 0x368   : > { %21412 = vst [vmem:[#allocation70_spill] sm:$0xff] %v16564_v45  ;;  %v4534_v2 = vadd.f32 %v4533_v42, %v4485_v33  ;;  %v10815_v45 = vld [vmem:[%s21088_s1 + $0x2d0] sm:$0xf] }
 0x369   : > { %v4437_v40 = vpop.f32.mrf.mxu1 }
 0x36a   : > { %v16572_v50 = vadd.f32 %v4582_v22, %v4534_v2  ;;  %v4438_v19 = vadd.f32 %v4437_v40, %v16545_v37  ;;  %v11103_v2 = vld [vmem:[%s21088_s1 + $0x510] sm:$0xf] }
 0x36b   : > { %v4584_v43 = vpop.f32.mrf.mxu0  ;;  %v13645_v40 = vld [vmem:[%s21088_s1 + $0x52c] sm:$0xf0] }
 0x36c   : > { %v4486_v52 = vpop.f32.mrf.mxu2  ;;  %v11359_v22 = vld [vmem:[%s21088_s1 + $0x710] sm:$0xf]  ;;  %v11104_v33 = vor.u32 %v13645_v40, %v11103_v2 }
 0x36d   : > { %v4487_v11 = vadd.f32 %v4486_v52, %v4438_v19 }
 0x36e   : > { %4870 = vmatpush.bf16.msra.mxu2 %v11104_v33 }
 0x36f   : > { %v4535_v15 = vpop.f32.mrf.mxu3 }
 0x370   : > { %v4536_v18 = vadd.f32 %v4535_v15, %v4487_v11 }
 0x371   : > { %v4440_v46 = vpop.f32.mrf.mxu1  ;;  %4684 = vmatmul.bf16.gmra.mxu2 %v15098_v5 }
 0x372   : > { %v4441_v42 = vadd.f32 %v4440_v46, %v16545_v37  ;;  %v16579_v6 = vadd.f32 %v4584_v43, %v4536_v18  ;;  %v13709_v43 = vld [vmem:[%s21088_s1 + $0x72c] sm:$0xf0] }
 0x373   : > { %v4587_v25 = vpop.f32.mrf.mxu0  ;;  %v11360_v44 = vor.u32 %v13709_v43, %v11359_v22  ;;  %v10847_v46 = vld [vmem:[%s21088_s1 + $0x310] sm:$0xf] }
 0x374   : > { %4635 = vmatmul.bf16.gmra.mxu1 %v14708_v14  ;;  %4733 = vmatmul.bf16.gmra.mxu3 %v15100_v0  ;;  %v4489_v16 = vpop.f32.mrf.mxu2  ;;  %v13581_v18 = vld [vmem:[%s21088_s1 + $0x32c] sm:$0xf0] }
 0x375   : > { %v4490_v19 = vadd.f32 %v4489_v16, %v4441_v42  ;;  %4919 = vmatpush.bf16.msra.mxu3 %v11360_v44  ;;  %v10848_v2 = vor.u32 %v13581_v18, %v10847_v46 }
 0x376   : > { %4782 = vmatmul.bf16.gmra.mxu0 %v21358_v30  ;;  %v10719_v30 = vld [vmem:[%s21088_s1 + $0x210] sm:$0xf] }
 0x377   : > { %v4538_v63 = vpop.f32.mrf.mxu3  ;;  %4821 = vmatpush.bf16.msra.mxu1 %v10848_v2 }
 0x378   : > { %v4539_v15 = vadd.f32 %v4538_v63, %v4490_v19 }
 0x379   : > { %v4442_v52 = vpop.f32.mrf.mxu1 }
 0x37a   : > { %v16600_v40 = vadd.f32 %v4587_v25, %v4539_v15  ;;  %v4443_v22 = vadd.f32 %v4442_v52, %v16545_v37  ;;  %v11071_v25 = vld [vmem:[%s21088_s1 + $0x4d0] sm:$0xf] }
 0x37b   : > { %v4589_v11 = vpop.f32.mrf.mxu0  ;;  %v13637_v52 = vld [vmem:[%s21088_s1 + $0x4ec] sm:$0xf0] }
 0x37c   : > { %v4491_v42 = vpop.f32.mrf.mxu2  ;;  %v11327_v15 = vld [vmem:[%s21088_s1 + $0x6d0] sm:$0xf]  ;;  %v11072_v18 = vor.u32 %v13637_v52, %v11071_v25 }
 0x37d   : > { %v4492_v33 = vadd.f32 %v4491_v42, %v4443_v22  ;;  %v13573_v25 = vld [vmem:[%s21088_s1 + $0x2ec] sm:$0xf0] }
 0x37e   : > { %4871 = vmatpush.bf16.msra.mxu2 %v11072_v18  ;;  %v10816_v52 = vor.u32 %v13573_v25, %v10815_v45 }
 0x37f   : > { %v4540_v43 = vpop.f32.mrf.mxu3 }
 0x380   : > { %v4541_v63 = vadd.f32 %v4540_v43, %v4492_v33  ;;  %4822 = vmatpush.bf16.msra.mxu1 %v10816_v52 }
 0x381   : > { %v4445_v16 = vpop.f32.mrf.mxu1  ;;  %4689 = vmatmul.bf16.gmra.mxu2 %v15136_v24 }
 0x382   : > { %v4446_v19 = vadd.f32 %v4445_v16, %v16545_v37  ;;  %v16607_v46 = vadd.f32 %v4589_v11, %v4541_v63  ;;  %v13701_v11 = vld [vmem:[%s21088_s1 + $0x6ec] sm:$0xf0] }
 0x383   : > { %v4592_v44 = vpop.f32.mrf.mxu0  ;;  %v11328_v42 = vor.u32 %v13701_v11, %v11327_v15 }
 0x384   : > { %4640 = vmatmul.bf16.gmra.mxu1 %v14746_v35  ;;  %4738 = vmatmul.bf16.gmra.mxu3 %v15138_v17  ;;  %v4494_v2 = vpop.f32.mrf.mxu2  ;;  %v21413_v17 = vld [vmem:[#allocation41_spill] sm:$0xff] }
 0x385   : > { %v4495_v43 = vadd.f32 %v4494_v2, %v4446_v19  ;;  %4920 = vmatpush.bf16.msra.mxu3 %v11328_v42 }
 0x386   : > { %4787 = vmatmul.bf16.gmra.mxu0 %v21360_v10 }
 0x387   : > { %v4543_v22 = vpop.f32.mrf.mxu3 }
 0x388   : > { %v4544_v16 = vadd.f32 %v4543_v22, %v4495_v43 }
 0x389   : > { %v4447_v33 = vpop.f32.mrf.mxu1 }
 0x38a   : > { %v16628_v10 = vadd.f32 %v4592_v44, %v4544_v16  ;;  %v4448_v15 = vadd.f32 %v4447_v33, %v16545_v37  ;;  %v11039_v44 = vld [vmem:[%s21088_s1 + $0x490] sm:$0xf] }
 0x38b   : > { %v4594_v63 = vpop.f32.mrf.mxu0  ;;  %v13629_v33 = vld [vmem:[%s21088_s1 + $0x4ac] sm:$0xf0] }
 0x38c   : > { %v4496_v19 = vpop.f32.mrf.mxu2  ;;  %v11295_v16 = vld [vmem:[%s21088_s1 + $0x690] sm:$0xf]  ;;  %v11040_v25 = vor.u32 %v13629_v33, %v11039_v44 }
 0x38d   : > { %v4497_v18 = vadd.f32 %v4496_v19, %v4448_v15  ;;  %v13565_v44 = vld [vmem:[%s21088_s1 + $0x2ac] sm:$0xf0] }
 0x38e   : > { %4872 = vmatpush.bf16.msra.mxu2 %v11040_v25 }
 0x38f   : > { %v4545_v11 = vpop.f32.mrf.mxu3 }
 0x390   : > { %v4546_v22 = vadd.f32 %v4545_v11, %v4497_v18 }
 0x391   : > { %v4450_v2 = vpop.f32.mrf.mxu1  ;;  %4694 = vmatmul.bf16.gmra.mxu2 %v15174_v29  ;;  %v10751_v29 = vld [vmem:[%s21088_s1 + $0x250] sm:$0xf] }
 0x392   : > { %v4451_v43 = vadd.f32 %v4450_v2, %v16545_v37  ;;  %v16635_v45 = vadd.f32 %v4594_v63, %v4546_v22  ;;  %v13693_v63 = vld [vmem:[%s21088_s1 + $0x6ac] sm:$0xf0] }
 0x393   : > { %v4597_v42 = vpop.f32.mrf.mxu0  ;;  %v11296_v19 = vor.u32 %v13693_v63, %v11295_v16 }
 0x394   : > { %4645 = vmatmul.bf16.gmra.mxu1 %v14784_v4  ;;  %4743 = vmatmul.bf16.gmra.mxu3 %v21413_v17  ;;  %v4499_v52 = vpop.f32.mrf.mxu2 }
 0x395   : > { %v4500_v11 = vadd.f32 %v4499_v52, %v4451_v43  ;;  %4921 = vmatpush.bf16.msra.mxu3 %v11296_v19 }
 0x396   : > { %4792 = vmatmul.bf16.gmra.mxu0 %v21362_v56  ;;  %v10783_v56 = vld [vmem:[%s21088_s1 + $0x290] sm:$0xf] }
 0x397   : > { %v4548_v15 = vpop.f32.mrf.mxu3  ;;  %v10784_v33 = vor.u32 %v13565_v44, %v10783_v56  ;;  %v13797_v56 = vld [vmem:[%s21088_s1 + $0x9ec] sm:$0xf0] }
 0x398   : > { %v4549_v2 = vadd.f32 %v4548_v15, %v4500_v11  ;;  %v11711_v11 = vld [vmem:[%s21088_s1 + $0x9d0] sm:$0xf] }
 0x399   : > { %v4452_v18 = vpop.f32.mrf.mxu1  ;;  %4823 = vmatpush.bf16.msra.mxu1 %v10784_v33  ;;  %v11712_v44 = vor.u32 %v13797_v56, %v11711_v11  ;;  %v11679_v56 = vld [vmem:[%s21088_s1 + $0x990] sm:$0xf] }
 0x39a   : > { %v16656_v17 = vadd.f32 %v4597_v42, %v4549_v2  ;;  %v4453_v16 = vadd.f32 %v4452_v18, %v16545_v37  ;;  %v21414_v2 = vld [vmem:[#allocation42_spill] sm:$0xff]  ;;  %v21415_v18 = vld [vmem:[#allocation43_spill] sm:$0xff] }
 0x39b   : > { %v4599_v22 = vpop.f32.mrf.mxu0  ;;  %4965 = vmatpush.bf16.msra.mxu0 %v11712_v44 }
 0x39c   : > { %v4501_v43 = vpop.f32.mrf.mxu2 }
 0x39d   : > { %v4502_v25 = vadd.f32 %v4501_v43, %v4453_v16  ;;  %v11007_v16 = vld [vmem:[%s21088_s1 + $0x450] sm:$0xf] }
 0x39e   : > { %v13621_v43 = vld [vmem:[%s21088_s1 + $0x46c] sm:$0xf0] }
 0x39f   : > { %v4550_v63 = vpop.f32.mrf.mxu3 }
 0x3a0   : > { %v4551_v15 = vadd.f32 %v4550_v63, %v4502_v25  ;;  %v11263_v63 = vld [vmem:[%s21088_s1 + $0x650] sm:$0xf]  ;;  %v11008_v25 = vor.u32 %v13621_v43, %v11007_v16 }
 0x3a1   : > { %v4455_v52 = vpop.f32.mrf.mxu1  ;;  %4699 = vmatmul.bf16.gmra.mxu2 %v21414_v2 }
 0x3a2   : > { %v4456_v42 = vadd.f32 %v4455_v52, %v16545_v37  ;;  %v16669_v33 = vadd.f32 %v4599_v22, %v4551_v15  ;;  %v13685_v22 = vld [vmem:[%s21088_s1 + $0x66c] sm:$0xf0]  ;;  %4873 = vmatpush.bf16.msra.mxu2 %v11008_v25 }
 0x3a3   : > { %v4602_v19 = vpop.f32.mrf.mxu0  ;;  %v11264_v11 = vor.u32 %v13685_v22, %v11263_v63  ;;  %v13557_v63 = vld [vmem:[%s21088_s1 + $0x26c] sm:$0xf0] }
 0x3a4   : > { %4650 = vmatmul.bf16.gmra.mxu1 %v21376_v57  ;;  %4748 = vmatmul.bf16.gmra.mxu3 %v21415_v18  ;;  %v4504_v52 = vpop.f32.mrf.mxu2  ;;  %v11647_v22 = vld [vmem:[%s21088_s1 + $0x950] sm:$0xf] }
 0x3a5   : > { %v4505_v18 = vadd.f32 %v4504_v52, %v4456_v42  ;;  %4922 = vmatpush.bf16.msra.mxu3 %v11264_v11  ;;  %v10752_v42 = vor.u32 %v13557_v63, %v10751_v29  ;;  %v13773_v29 = vld [vmem:[%s21088_s1 + $0x92c] sm:$0xf0] }
 0x3a6   : > { %4797 = vmatmul.bf16.gmra.mxu0 %v14436_v48  ;;  %v13789_v48 = vld [vmem:[%s21088_s1 + $0x9ac] sm:$0xf0] }
 0x3a7   : > { %v4553_v15 = vpop.f32.mrf.mxu3  ;;  %v11680_v16 = vor.u32 %v13789_v48, %v11679_v56  ;;  %v13781_v48 = vld [vmem:[%s21088_s1 + $0x96c] sm:$0xf0]  ;;  %4824 = vmatpush.bf16.msra.mxu1 %v10752_v42 }
 0x3a8   : > { %v4554_v44 = vadd.f32 %v4553_v15, %v4505_v18  ;;  %v11648_v18 = vor.u32 %v13781_v48, %v11647_v22  ;;  %v11615_v56 = vld [vmem:[%s21088_s1 + $0x910] sm:$0xf] }
 0x3a9   : > { %v4457_v2 = vpop.f32.mrf.mxu1  ;;  %4966 = vmatpush.bf16.msra.mxu0 %v11680_v16  ;;  %v11616_v24 = vor.u32 %v13773_v29, %v11615_v56  ;;  %v13765_v42 = vld [vmem:[%s21088_s1 + $0x8ec] sm:$0xf0] }
 0x3aa   : > { %v16702_v25 = vadd.f32 %v4602_v19, %v4554_v44  ;;  %v4458_v52 = vadd.f32 %v4457_v2, %v16545_v37  ;;  %v21416_v44 = vld [vmem:[#allocation25_spill] sm:$0xff]  ;;  %v11583_v2 = vld [vmem:[%s21088_s1 + $0x8d0] sm:$0xf] }
 0x3ab   : > { %v4604_v43 = vpop.f32.mrf.mxu0  ;;  %v13613_v56 = vld [vmem:[%s21088_s1 + $0x42c] sm:$0xf0] }
 0x3ac   : > { %v4506_v15 = vpop.f32.mrf.mxu2  ;;  %v11231_v29 = vld [vmem:[%s21088_s1 + $0x610] sm:$0xf] }
 0x3ad   : > { %4967 = vmatpush.bf16.msra.mxu0 %v11648_v18  ;;  %v4507_v16 = vadd.f32 %v4506_v15, %v4458_v52  ;;  %v21417_v18 = vld [vmem:[#allocation44_spill] sm:$0xff]  ;;  %v21418_v52 = vld [vmem:[#allocation45_spill] sm:$0xff]  ;;  %v11584_v15 = vor.u32 %v13765_v42, %v11583_v2 }
 0x3ae   : > { %v11551_v42 = vld [vmem:[%s21088_s1 + $0x890] sm:$0xf] }
 0x3af   : > { %v4555_v11 = vpop.f32.mrf.mxu3 }
 0x3b0   : > { %v4556_v22 = vadd.f32 %v4555_v11, %v4507_v16 }
 0x3b1   : > { %v4460_v63 = vpop.f32.mrf.mxu1  ;;  %4968 = vmatpush.bf16.msra.mxu0 %v11616_v24  ;;  %4704 = vmatmul.bf16.gmra.mxu2 %v21417_v18  ;;  %v10975_v24 = vld [vmem:[%s21088_s1 + $0x410] sm:$0xf] }
 0x3b2   : > { %v4461_v48 = vadd.f32 %v4460_v63, %v16545_v37  ;;  %v16721_v11 = vadd.f32 %v4604_v43, %v4556_v22  ;;  %v10976_v16 = vor.u32 %v13613_v56, %v10975_v24  ;;  %v13677_v43 = vld [vmem:[%s21088_s1 + $0x62c] sm:$0xf0] }
 0x3b3   : > { %v4607_v19 = vpop.f32.mrf.mxu0  ;;  %v11232_v2 = vor.u32 %v13677_v43, %v11231_v29  ;;  %v13549_v29 = vld [vmem:[%s21088_s1 + $0x22c] sm:$0xf0] }
 0x3b4   : > { %4655 = vmatmul.bf16.gmra.mxu1 %v21416_v44  ;;  %4753 = vmatmul.bf16.gmra.mxu3 %v21418_v52  ;;  %v4509_v63 = vpop.f32.mrf.mxu2  ;;  %v11519_v43 = vld [vmem:[%s21088_s1 + $0x850] sm:$0xf] }
 0x3b5   : > { %4969 = vmatpush.bf16.msra.mxu0 %v11584_v15  ;;  %v4510_v52 = vadd.f32 %v4509_v63, %v4461_v48  ;;  %4874 = vmatpush.bf16.msra.mxu2 %v10976_v16  ;;  %v10720_v48 = vor.u32 %v13549_v29, %v10719_v30  ;;  %v13741_v30 = vld [vmem:[%s21088_s1 + $0x82c] sm:$0xf0] }
 0x3b6   : > { %4802 = vmatmul.bf16.gmra.mxu0 %v21400_v55  ;;  %v13757_v55 = vld [vmem:[%s21088_s1 + $0x8ac] sm:$0xf0]  ;;  %4923 = vmatpush.bf16.msra.mxu3 %v11232_v2 }
 0x3b7   : > { %v4558_v22 = vpop.f32.mrf.mxu3  ;;  %v11552_v24 = vor.u32 %v13757_v55, %v11551_v42  ;;  %v13749_v55 = vld [vmem:[%s21088_s1 + $0x86c] sm:$0xf0]  ;;  %4825 = vmatpush.bf16.msra.mxu1 %v10720_v48  ;;  %v21420_v48 = vld [vmem:[#allocation46_spill] sm:$0xff] }
 0x3b8   : > { %v4559_v15 = vadd.f32 %v4558_v22, %v4510_v52  ;;  %v11520_v52 = vor.u32 %v13749_v55, %v11519_v43  ;;  %v11487_v42 = vld [vmem:[%s21088_s1 + $0x810] sm:$0xf]  ;;  %v21421_v55 = vld [vmem:[#allocation47_spill] sm:$0xff] }
 0x3b9   : > { %v4462_v18 = vpop.f32.mrf.mxu1  ;;  %4970 = vmatpush.bf16.msra.mxu0 %v11552_v24  ;;  %v11488_v0 = vor.u32 %v13741_v30, %v11487_v42 }
 0x3ba   : > { %v16754_v16 = vadd.f32 %v4607_v19, %v4559_v15  ;;  %v4463_v63 = vadd.f32 %v4462_v18, %v16545_v37  ;;  %v21419_v15 = vld [vmem:[#allocation29_spill] sm:$0xff] }
 0x3bb   : > { %v4609_v56 = vpop.f32.mrf.mxu0 }
 0x3bc   : > { %v4511_v22 = vpop.f32.mrf.mxu2 }
 0x3bd   : > { %4971 = vmatpush.bf16.msra.mxu0 %v11520_v52  ;;  %v4512_v24 = vadd.f32 %v4511_v22, %v4463_v63  ;;  %v12223_v63 = vld [vmem:[%s21088_s1 + $0xdd0] sm:$0xf]  ;;  %v13537_v22 = vld [vmem:[%s21088_s1 + $0x1d4] sm:$0xf] }
 0x3bf   : > { %v4560_v2 = vpop.f32.mrf.mxu3 }
 0x3c0   : > { %v4561_v43 = vadd.f32 %v4560_v2, %v4512_v24 }
 0x3c1   : > { %v4465_v29 = vpop.f32.mrf.mxu1  ;;  %4972 = vmatpush.bf16.msra.mxu0 %v11488_v0  ;;  %4709 = vmatmul.bf16.gmra.mxu2 %v21420_v48  ;;  %v13925_v0 = vld [vmem:[%s21088_s1 + $0xdec] sm:$0xf0] }
 0x3c2   : > { %v4466_v18 = vadd.f32 %v4465_v29, %v16545_v37  ;;  %v16767_v52 = vadd.f32 %v4609_v56, %v4561_v43  ;;  %v12224_v2 = vor.u32 %v13925_v0, %v12223_v63  ;;  %v10689_v56 = vld [vmem:[%s21088_s1 + $0x1f0] sm:$0xf0]  ;;  %v11967_v48 = vld [vmem:[%s21088_s1 + $0xbd0] sm:$0xf] }
 0x3c3   : > { %v4612_v19 = vpop.f32.mrf.mxu0  ;;  %v10692_v24 = vor.u32 %v13537_v22, %v10689_v56  ;;  %v13861_v63 = vld [vmem:[%s21088_s1 + $0xbec] sm:$0xf0] }
 0x3c4   : > { %4660 = vmatmul.bf16.gmra.mxu1 %v21419_v15  ;;  %4758 = vmatmul.bf16.gmra.mxu3 %v21421_v55  ;;  %v4514_v42 = vpop.f32.mrf.mxu2  ;;  %v11968_v5 = vor.u32 %v13861_v63, %v11967_v48 }
 0x3c5   : > { %v4515_v29 = vadd.f32 %v4514_v42, %v4466_v18  ;;  %5063 = vmatpush.bf16.msrb.mxu2 %v12224_v2  ;;  %5112 = vmatpush.bf16.msrb.mxu3 %v10692_v24  ;;  %v21422_v24 = vld [vmem:[#allocation33_spill] sm:$0xff] }
 0x3c6   : > { %4807 = vmatmul.bf16.gmra.mxu0 %v21404_v59  ;;  %5014 = vmatpush.bf16.msrb.mxu1 %v11968_v5  ;;  %v12191_v5 = vld [vmem:[%s21088_s1 + $0xd90] sm:$0xf] }
 0x3c7   : > { %v4563_v30 = vpop.f32.mrf.mxu3 }
 0x3c8   : > { %v4564_v59 = vadd.f32 %v4563_v30, %v4515_v29 }
 0x3c9   : > { %v4467_v43 = vpop.f32.mrf.mxu1 }
 0x3ca   : > { %v16788_v0 = vadd.f32 %v4612_v19, %v4564_v59  ;;  %v4468_v7 = vadd.f32 %v4467_v43, %v16545_v37  ;;  %v13529_v19 = vld [vmem:[%s21088_s1 + $0x194] sm:$0xf] }
 0x3cb   : > { %v4614_v55 = vpop.f32.mrf.mxu0 }
 0x3cc   : > { %v4516_v22 = vpop.f32.mrf.mxu2 }
 0x3cd   : > { %v4517_v2 = vadd.f32 %v4516_v22, %v4468_v7  ;;  %v13917_v7 = vld [vmem:[%s21088_s1 + $0xdac] sm:$0xf0] }
 0x3ce   : > { %v12192_v63 = vor.u32 %v13917_v7, %v12191_v5 }
 0x3cf   : > { %v4565_v18 = vpop.f32.mrf.mxu3 }
 0x3d0   : > { %v4566_v42 = vadd.f32 %v4565_v18, %v4517_v2  ;;  %5064 = vmatpush.bf16.msrb.mxu2 %v12192_v63 }
 0x3d1   : > { %v4470_v56 = vpop.f32.mrf.mxu1  ;;  %4714 = vmatmul.bf16.gmra.mxu2 %v21423_v9 }
 0x3d2   : > { %v4471_v29 = vadd.f32 %v4470_v56, %v16545_v37  ;;  %v16795_v59 = vadd.f32 %v4614_v55, %v4566_v42  ;;  %v10657_v55 = vld [vmem:[%s21088_s1 + $0x1b0] sm:$0xf0] }
 0x3d3   : > { %v4617_v30 = vpop.f32.mrf.mxu0  ;;  %v10660_v2 = vor.u32 %v13529_v19, %v10657_v55 }
 0x3d4   : > { %4665 = vmatmul.bf16.gmra.mxu1 %v21422_v24  ;;  %4763 = vmatmul.bf16.gmra.mxu3 %v21424_v32  ;;  %v4519_v48 = vpop.f32.mrf.mxu2  ;;  %v13853_v32 = vld [vmem:[%s21088_s1 + $0xbac] sm:$0xf0] }
 0x3d5   : > { %v4520_v22 = vadd.f32 %v4519_v48, %v4471_v29  ;;  %5113 = vmatpush.bf16.msrb.mxu3 %v10660_v2  ;;  %v10625_v2 = vld [vmem:[%s21088_s1 + $0x170] sm:$0xf0] }
 0x3d6   : > { %4812 = vmatmul.bf16.gmra.mxu0 %v14554_v47  ;;  %v11935_v47 = vld [vmem:[%s21088_s1 + $0xb90] sm:$0xf] }
 0x3d7   : > { %v4568_v43 = vpop.f32.mrf.mxu3  ;;  %v11936_v7 = vor.u32 %v13853_v32, %v11935_v47  ;;  %v12159_v47 = vld [vmem:[%s21088_s1 + $0xd50] sm:$0xf]  ;;  %v13521_v32 = vld [vmem:[%s21088_s1 + $0x154] sm:$0xf] }
 0x3d8   : > { %v4569_v56 = vadd.f32 %v4568_v43, %v4520_v22 }
 0x3d9   : > { %v4472_v18 = vpop.f32.mrf.mxu1  ;;  %5015 = vmatpush.bf16.msrb.mxu1 %v11936_v7  ;;  %v10628_v7 = vor.u32 %v13521_v32, %v10625_v2 }
 0x3da   : > { %v16816_v5 = vadd.f32 %v4617_v30, %v4569_v56  ;;  %v4473_v9 = vadd.f32 %v4472_v18, %v16545_v37  ;;  %v13909_v37 = vld [vmem:[%s21088_s1 + $0xd6c] sm:$0xf0] }
 0x3db   : > { %v4619_v42 = vpop.f32.mrf.mxu0  ;;  %v12160_v18 = vor.u32 %v13909_v37, %v12159_v47  ;;  %5114 = vmatpush.bf16.msrb.mxu3 %v10628_v7  ;;  %v12127_v7 = vld [vmem:[%s21088_s1 + $0xd10] sm:$0xf] }
 0x3dc   : > { %v4521_v29 = vpop.f32.mrf.mxu2 }
 0x3dd   : > { %v4522_v19 = vadd.f32 %v4521_v29, %v4473_v9  ;;  %5065 = vmatpush.bf16.msrb.mxu2 %v12160_v18 }
 0x3df   : > { %v4570_v48 = vpop.f32.mrf.mxu3 }
 0x3e0   : > { %v4571_v55 = vadd.f32 %v4570_v48, %v4522_v19 }
 0x3e1   : > { %v4631_v43 = vpop.f32.mrf.mxu1  ;;  %4875 = vmatmul.bf16.vlgmr.msra.gmra.mxu2 %v14666_v53 }
 0x3e2   : > { %v4632_v63 = vadd.f32 %v4631_v43, %v16572_v50  ;;  %v16825_v30 = vadd.f32 %v4619_v42, %v4571_v55  ;;  %v11903_v43 = vld [vmem:[%s21088_s1 + $0xb50] sm:$0xf] }
 0x3e3   : > { %v16820_v22 = vpop.f32.mrf.mxu0  ;;  %v13845_v55 = vld [vmem:[%s21088_s1 + $0xb6c] sm:$0xf0] }
 0x3e4   : > { %4826 = vmatmul.bf16.vlgmr.msra.gmra.mxu1 %v21357_v41  ;;  %4924 = vmatmul.bf16.vlgmr.msra.gmra.mxu3 %v14668_v54  ;;  %v4680_v9 = vpop.f32.mrf.mxu2  ;;  %v11904_v47 = vor.u32 %v13845_v55, %v11903_v43 }
 0x3e5   : > { %v4681_v56 = vadd.f32 %v4680_v9, %v4632_v63 }
 0x3e6   : > { %4973 = vmatmul.bf16.vlgmr.msra.gmra.mxu0 %v21409_v58  ;;  %5016 = vmatpush.bf16.msrb.mxu1 %v11904_v47  ;;  %v10593_v47 = vld [vmem:[%s21088_s1 + $0x130] sm:$0xf0] }
 0x3e7   : > { %v4729_v50 = vpop.f32.mrf.mxu3 }
 0x3e8   : > { %v4730_v48 = vadd.f32 %v4729_v50, %v4681_v56 }
 0x3e9   : > { %v4633_v42 = vpop.f32.mrf.mxu1 }
 0x3ea   : > { %v4634_v29 = vadd.f32 %v4633_v42, %v16579_v6  ;;  %v6144_v2 = vmax.f32 %v4730_v48, 0.0 }
 0x3eb   : > { %v16841_v19 = vpop.f32.mrf.mxu0 }
 0x3ec   : > { %v4682_v37 = vpop.f32.mrf.mxu2 }
 0x3ed   : > { %v4683_v32 = vadd.f32 %v4682_v37, %v4634_v29  ;;  %v13513_v29 = vld [vmem:[%s21088_s1 + $0x114] sm:$0xf] }
 0x3ef   : > { %v4731_v63 = vpop.f32.mrf.mxu3 }
 0x3f0   : > { %v4732_v50 = vadd.f32 %v4731_v63, %v4683_v32  ;;  %v10596_v32 = vor.u32 %v13513_v29, %v10593_v47 }
 0x3f1   : > { %v4636_v9 = vpop.f32.mrf.mxu1  ;;  %4880 = vmatmul.bf16.gmra.mxu2 %v21391_v60 }
 0x3f2   : > { %v4637_v6 = vadd.f32 %v4636_v9, %v16600_v40  ;;  %v6152_v56 = vmax.f32 %v4732_v50, 0.0  ;;  %v13901_v40 = vld [vmem:[%s21088_s1 + $0xd2c] sm:$0xf0]  ;;  %5115 = vmatpush.bf16.msrb.mxu3 %v10596_v32  ;;  %v13505_v32 = vld [vmem:[%s21088_s1 + $0xd4] sm:$0xf] }
 0x3f3   : > { %v16850_v18 = vpop.f32.mrf.mxu0  ;;  %v12128_v55 = vor.u32 %v13901_v40, %v12127_v7  ;;  %v13837_v7 = vld [vmem:[%s21088_s1 + $0xb2c] sm:$0xf0] }
 0x3f4   : > { %4831 = vmatmul.bf16.gmra.mxu1 %v21359_v1  ;;  %4929 = vmatmul.bf16.gmra.mxu3 %v14706_v13  ;;  %v16856_v42 = vpack.c.bf16 %v6152_v56, %v6144_v2  ;;  %v4685_v48 = vpop.f32.mrf.mxu2  ;;  %v11871_v56 = vld [vmem:[%s21088_s1 + $0xb10] sm:$0xf] }
 0x3f5   : > { %v4686_v37 = vadd.f32 %v4685_v48, %v4637_v6  ;;  %5066 = vmatpush.bf16.msrb.mxu2 %v12128_v55  ;;  %v11872_v40 = vor.u32 %v13837_v7, %v11871_v56  ;;  %v10561_v7 = vld [vmem:[%s21088_s1 + $0xf0] sm:$0xf0] }
 0x3f6   : > { %4978 = vmatmul.bf16.gmra.mxu0 %v14708_v14  ;;  %21425 = vst [vmem:[#allocation25_spill] sm:$0xff] %v16856_v42 }
 0x3f7   : > { %v4734_v43 = vpop.f32.mrf.mxu3  ;;  %5017 = vmatpush.bf16.msrb.mxu1 %v11872_v40 }
 0x3f8   : > { %v4735_v50 = vadd.f32 %v4734_v43, %v4686_v37 }
 0x3f9   : > { %v4638_v63 = vpop.f32.mrf.mxu1 }
 0x3fa   : > { %v4639_v9 = vadd.f32 %v4638_v63, %v16607_v46  ;;  %v6160_v47 = vmax.f32 %v4735_v50, 0.0 }
 0x3fb   : > { %v16871_v2 = vpop.f32.mrf.mxu0 }
 0x3fc   : > { %v4687_v42 = vpop.f32.mrf.mxu2 }
 0x3fd   : > { %v4688_v29 = vadd.f32 %v4687_v42, %v4639_v9  ;;  %v12095_v42 = vld [vmem:[%s21088_s1 + $0xcd0] sm:$0xf] }
 0x3ff   : > { %v4736_v6 = vpop.f32.mrf.mxu3 }
 0x400   : > { %v4737_v43 = vadd.f32 %v4736_v6, %v4688_v29  ;;  %v10564_v29 = vor.u32 %v13505_v32, %v10561_v7 }
 0x401   : > { %v4641_v48 = vpop.f32.mrf.mxu1  ;;  %4885 = vmatmul.bf16.gmra.mxu2 %v21394_v39 }
 0x402   : > { %v4642_v46 = vadd.f32 %v4641_v48, %v16628_v10  ;;  %v6168_v37 = vmax.f32 %v4737_v43, 0.0  ;;  %v13893_v10 = vld [vmem:[%s21088_s1 + $0xcec] sm:$0xf0]  ;;  %5116 = vmatpush.bf16.msrb.mxu3 %v10564_v29  ;;  %v13497_v29 = vld [vmem:[%s21088_s1 + $0x94] sm:$0xf] }
 0x403   : > { %v16880_v55 = vpop.f32.mrf.mxu0  ;;  %v12096_v56 = vor.u32 %v13893_v10, %v12095_v42  ;;  %v13829_v42 = vld [vmem:[%s21088_s1 + $0xaec] sm:$0xf0] }
 0x404   : > { %4836 = vmatmul.bf16.gmra.mxu1 %v21393_v28  ;;  %4934 = vmatmul.bf16.gmra.mxu3 %v14744_v34  ;;  %v16886_v63 = vpack.c.bf16 %v6168_v37, %v6160_v47  ;;  %v4690_v9 = vpop.f32.mrf.mxu2  ;;  %v11839_v37 = vld [vmem:[%s21088_s1 + $0xad0] sm:$0xf] }
 0x405   : > { %v4691_v40 = vadd.f32 %v4690_v9, %v4642_v46  ;;  %5067 = vmatpush.bf16.msrb.mxu2 %v12096_v56  ;;  %v11840_v10 = vor.u32 %v13829_v42, %v11839_v37  ;;  %v10529_v42 = vld [vmem:[%s21088_s1 + $0xb0] sm:$0xf0] }
 0x406   : > { %4983 = vmatmul.bf16.gmra.mxu0 %v14746_v35  ;;  %21426 = vst [vmem:[#allocation71_spill] sm:$0xff] %v16886_v63 }
 0x407   : > { %v4739_v50 = vpop.f32.mrf.mxu3  ;;  %5018 = vmatpush.bf16.msrb.mxu1 %v11840_v10 }
 0x408   : > { %v4740_v43 = vadd.f32 %v4739_v50, %v4691_v40 }
 0x409   : > { %v4643_v6 = vpop.f32.mrf.mxu1 }
 0x40a   : > { %v4644_v48 = vadd.f32 %v4643_v6, %v16635_v45  ;;  %v6176_v7 = vmax.f32 %v4740_v43, 0.0 }
 0x40b   : > { %v16901_v47 = vpop.f32.mrf.mxu0 }
 0x40c   : > { %v4692_v63 = vpop.f32.mrf.mxu2 }
 0x40d   : > { %v4693_v32 = vadd.f32 %v4692_v63, %v4644_v48  ;;  %v12063_v63 = vld [vmem:[%s21088_s1 + $0xc90] sm:$0xf] }
 0x40f   : > { %v4741_v46 = vpop.f32.mrf.mxu3 }
 0x410   : > { %v4742_v50 = vadd.f32 %v4741_v46, %v4693_v32  ;;  %v10532_v32 = vor.u32 %v13497_v29, %v10529_v42  ;;  %v13601_v42 = vld [vmem:[%s21088_s1 + $0x3d4] sm:$0xf] }
 0x411   : > { %v4646_v9 = vpop.f32.mrf.mxu1  ;;  %4890 = vmatmul.bf16.gmra.mxu2 %v21397_v31 }
 0x412   : > { %v4647_v45 = vadd.f32 %v4646_v9, %v16656_v17  ;;  %v6184_v40 = vmax.f32 %v4742_v50, 0.0  ;;  %v13885_v17 = vld [vmem:[%s21088_s1 + $0xcac] sm:$0xf0]  ;;  %5117 = vmatpush.bf16.msrb.mxu3 %v10532_v32 }
 0x413   : > { %v16910_v56 = vpop.f32.mrf.mxu0  ;;  %v12064_v37 = vor.u32 %v13885_v17, %v12063_v63  ;;  %v13821_v63 = vld [vmem:[%s21088_s1 + $0xaac] sm:$0xf0] }
 0x414   : > { %4841 = vmatmul.bf16.gmra.mxu1 %v21396_v49  ;;  %4939 = vmatmul.bf16.gmra.mxu3 %v14782_v3  ;;  %v16916_v6 = vpack.c.bf16 %v6184_v40, %v6176_v7  ;;  %v4695_v48 = vpop.f32.mrf.mxu2  ;;  %v11807_v40 = vld [vmem:[%s21088_s1 + $0xa90] sm:$0xf] }
 0x415   : > { %v4696_v10 = vadd.f32 %v4695_v48, %v4647_v45  ;;  %5068 = vmatpush.bf16.msrb.mxu2 %v12064_v37  ;;  %v11808_v17 = vor.u32 %v13821_v63, %v11807_v40  ;;  %v13877_v40 = vld [vmem:[%s21088_s1 + $0xc6c] sm:$0xf0] }
 0x416   : > { %4988 = vmatmul.bf16.gmra.mxu0 %v14784_v4  ;;  %21427 = vst [vmem:[#allocation72_spill] sm:$0xff] %v16916_v6 }
 0x417   : > { %v4744_v43 = vpop.f32.mrf.mxu3  ;;  %5019 = vmatpush.bf16.msrb.mxu1 %v11808_v17 }
 0x418   : > { %v4745_v50 = vadd.f32 %v4744_v43, %v4696_v10  ;;  %v10945_v10 = vld [vmem:[%s21088_s1 + $0x3f0] sm:$0xf0] }
 0x419   : > { %v4648_v46 = vpop.f32.mrf.mxu1 }
 0x41a   : > { %v4649_v9 = vadd.f32 %v4648_v46, %v16669_v33  ;;  %v6192_v46 = vmax.f32 %v4745_v50, 0.0  ;;  %v13489_v50 = vld [vmem:[%s21088_s1 + $0x54] sm:$0xf] }
 0x41b   : > { %v16931_v7 = vpop.f32.mrf.mxu0 }
 0x41c   : > { %v4697_v6 = vpop.f32.mrf.mxu2 }
 0x41d   : > { %v4698_v29 = vadd.f32 %v4697_v6, %v4649_v9  ;;  %v12031_v9 = vld [vmem:[%s21088_s1 + $0xc50] sm:$0xf] }
 0x41f   : > { %v4746_v45 = vpop.f32.mrf.mxu3 }
 0x420   : > { %v4747_v43 = vadd.f32 %v4746_v45, %v4698_v29  ;;  %v12032_v45 = vor.u32 %v13877_v40, %v12031_v9  ;;  %v10497_v29 = vld [vmem:[%s21088_s1 + $0x70] sm:$0xf0] }
 0x421   : > { %v4651_v48 = vpop.f32.mrf.mxu1  ;;  %4895 = vmatmul.bf16.gmra.mxu2 %v14818_v27 }
 0x422   : > { %v4652_v33 = vadd.f32 %v4651_v48, %v16702_v25  ;;  %v6200_v32 = vmax.f32 %v4747_v43, 0.0  ;;  %v10948_v25 = vor.u32 %v13601_v42, %v10945_v10  ;;  %v13593_v48 = vld [vmem:[%s21088_s1 + $0x394] sm:$0xf]  ;;  %5069 = vmatpush.bf16.msrb.mxu2 %v12032_v45 }
 0x423   : > { %v16940_v37 = vpop.f32.mrf.mxu0  ;;  %v10913_v43 = vld [vmem:[%s21088_s1 + $0x3b0] sm:$0xf0] }
 0x424   : > { %4846 = vmatmul.bf16.gmra.mxu1 %v14816_v26  ;;  %4944 = vmatmul.bf16.gmra.mxu3 %v21375_v20  ;;  %v16952_v6 = vpack.c.bf16 %v6200_v32, %v6192_v46  ;;  %v4700_v63 = vpop.f32.mrf.mxu2  ;;  %v10500_v46 = vor.u32 %v13489_v50, %v10497_v29  ;;  %v10916_v32 = vor.u32 %v13593_v48, %v10913_v43  ;;  %v13577_v29 = vld [vmem:[%s21088_s1 + $0x314] sm:$0xf] }
 0x425   : > { %5161 = vmatpush.bf16.msrb.mxu0 %v10948_v25  ;;  %v4701_v42 = vadd.f32 %v4700_v63, %v4652_v33  ;;  %v11775_v33 = vld [vmem:[%s21088_s1 + $0xa50] sm:$0xf]  ;;  %v10849_v48 = vld [vmem:[%s21088_s1 + $0x330] sm:$0xf0] }
 0x426   : > { %4993 = vmatmul.bf16.gmra.mxu0 %v21376_v57  ;;  %21428 = vst [vmem:[#allocation73_spill] sm:$0xff] %v16952_v6  ;;  %5118 = vmatpush.bf16.msrb.mxu3 %v10500_v46  ;;  %v13585_v6 = vld [vmem:[%s21088_s1 + $0x354] sm:$0xf] }
 0x427   : > { %v4749_v17 = vpop.f32.mrf.mxu3  ;;  %v10881_v57 = vld [vmem:[%s21088_s1 + $0x370] sm:$0xf0] }
 0x428   : > { %v4750_v9 = vadd.f32 %v4749_v17, %v4701_v42  ;;  %v10884_v50 = vor.u32 %v13585_v6, %v10881_v57  ;;  %v13569_v6 = vld [vmem:[%s21088_s1 + $0x2d4] sm:$0xf] }
 0x429   : > { %v4653_v10 = vpop.f32.mrf.mxu1  ;;  %5162 = vmatpush.bf16.msrb.mxu0 %v10916_v32 }
 0x42a   : > { %v4654_v25 = vadd.f32 %v4653_v10, %v16721_v11  ;;  %v13813_v11 = vld [vmem:[%s21088_s1 + $0xa6c] sm:$0xf0]  ;;  %v10852_v10 = vor.u32 %v13577_v29, %v10849_v48 }
 0x42b   : > { %v16973_v40 = vpop.f32.mrf.mxu0  ;;  %v11776_v63 = vor.u32 %v13813_v11, %v11775_v33  ;;  %v10817_v33 = vld [vmem:[%s21088_s1 + $0x2f0] sm:$0xf0]  ;;  %v6208_v11 = vmax.f32 %v4750_v9, 0.0 }
 0x42c   : > { %v4702_v17 = vpop.f32.mrf.mxu2  ;;  %v13481_v9 = vld [vmem:[%s21088_s1 + $0x14] sm:$0xf] }
 0x42d   : > { %5163 = vmatpush.bf16.msrb.mxu0 %v10884_v50  ;;  %5020 = vmatpush.bf16.msrb.mxu1 %v11776_v63  ;;  %v4703_v43 = vadd.f32 %v4702_v17, %v4654_v25  ;;  %v11999_v63 = vld [vmem:[%s21088_s1 + $0xc10] sm:$0xf] }
 0x42e   : > { %v13869_v17 = vld [vmem:[%s21088_s1 + $0xc2c] sm:$0xf0] }
 0x42f   : > { %v4751_v45 = vpop.f32.mrf.mxu3  ;;  %v12000_v48 = vor.u32 %v13869_v17, %v11999_v63  ;;  %v13553_v17 = vld [vmem:[%s21088_s1 + $0x254] sm:$0xf] }
 0x430   : > { %v4752_v32 = vadd.f32 %v4751_v45, %v4703_v43  ;;  %v10465_v43 = vld [vmem:[%s21088_s1 + $0x30] sm:$0xf0] }
 0x431   : > { %v4656_v42 = vpop.f32.mrf.mxu1  ;;  %5164 = vmatpush.bf16.msrb.mxu0 %v10852_v10  ;;  %4900 = vmatmul.bf16.gmra.mxu2 %v21402_v23  ;;  %v10785_v10 = vld [vmem:[%s21088_s1 + $0x2b0] sm:$0xf0] }
 0x432   : > { %v4657_v46 = vadd.f32 %v4656_v42, %v16754_v16  ;;  %v6216_v25 = vmax.f32 %v4752_v32, 0.0  ;;  %v10820_v16 = vor.u32 %v13569_v6, %v10817_v33  ;;  %v13561_v42 = vld [vmem:[%s21088_s1 + $0x294] sm:$0xf]  ;;  %v10468_v33 = vor.u32 %v13481_v9, %v10465_v43  ;;  %5070 = vmatpush.bf16.msrb.mxu2 %v12000_v48 }
 0x433   : > { %v16994_v57 = vpop.f32.mrf.mxu0  ;;  %v13545_v43 = vld [vmem:[%s21088_s1 + $0x214] sm:$0xf] }
 0x434   : > { %4851 = vmatmul.bf16.gmra.mxu1 %v21401_v21  ;;  %4949 = vmatmul.bf16.gmra.mxu3 %v21379_v8  ;;  %v17006_v50 = vpack.c.bf16 %v6216_v25, %v6208_v11  ;;  %v4705_v45 = vpop.f32.mrf.mxu2  ;;  %v10788_v11 = vor.u32 %v13561_v42, %v10785_v10  ;;  %v10721_v42 = vld [vmem:[%s21088_s1 + $0x230] sm:$0xf0] }
 0x435   : > { %5165 = vmatpush.bf16.msrb.mxu0 %v10820_v16  ;;  %v4706_v32 = vadd.f32 %v4705_v45, %v4657_v46  ;;  %5119 = vmatpush.bf16.msrb.mxu3 %v10468_v33  ;;  %v11743_v46 = vld [vmem:[%s21088_s1 + $0xa10] sm:$0xf] }
 0x436   : > { %4998 = vmatmul.bf16.gmra.mxu0 %v21416_v44  ;;  %21429 = vst [vmem:[#allocation74_spill] sm:$0xff] %v17006_v50  ;;  %v10753_v50 = vld [vmem:[%s21088_s1 + $0x270] sm:$0xf0] }
 0x437   : > { %v4754_v29 = vpop.f32.mrf.mxu3  ;;  %v10756_v9 = vor.u32 %v13553_v17, %v10753_v50 }
 0x438   : > { %v4755_v16 = vadd.f32 %v4754_v29, %v4706_v32 }
 0x439   : > { %v4658_v6 = vpop.f32.mrf.mxu1  ;;  %5166 = vmatpush.bf16.msrb.mxu0 %v10788_v11 }
 0x43a   : > { %v4659_v25 = vadd.f32 %v4658_v6, %v16767_v52  ;;  %v13805_v52 = vld [vmem:[%s21088_s1 + $0xa2c] sm:$0xf0]  ;;  %v10724_v6 = vor.u32 %v13545_v43, %v10721_v42  ;;  %v6224_v17 = vmax.f32 %v4755_v16, 0.0  ;;  %v13793_v16 = vld [vmem:[%s21088_s1 + $0x9d4] sm:$0xf] }
 0x43b   : > { %v17027_v63 = vpop.f32.mrf.mxu0  ;;  %v11744_v45 = vor.u32 %v13805_v52, %v11743_v46 }
 0x43c   : > { %v4707_v29 = vpop.f32.mrf.mxu2 }
 0x43d   : > { %5167 = vmatpush.bf16.msrb.mxu0 %v10756_v9  ;;  %5021 = vmatpush.bf16.msrb.mxu1 %v11744_v45  ;;  %v4708_v10 = vadd.f32 %v4707_v29, %v4659_v25  ;;  %v11457_v25 = vld [vmem:[%s21088_s1 + $0x7f0] sm:$0xf0] }
 0x43f   : > { %v4756_v48 = vpop.f32.mrf.mxu3 }
 0x440   : > { %v4757_v11 = vadd.f32 %v4756_v48, %v4708_v10  ;;  %v11713_v48 = vld [vmem:[%s21088_s1 + $0x9f0] sm:$0xf0] }
 0x441   : > { %v4661_v32 = vpop.f32.mrf.mxu1  ;;  %5168 = vmatpush.bf16.msrb.mxu0 %v10724_v6  ;;  %4905 = vmatmul.bf16.gmra.mxu2 %v21406_v38  ;;  %v11716_v10 = vor.u32 %v13793_v16, %v11713_v48 }
 0x442   : > { %v4662_v33 = vadd.f32 %v4661_v32, %v16788_v0  ;;  %v6232_v46 = vmax.f32 %v4757_v11, 0.0  ;;  %v13729_v0 = vld [vmem:[%s21088_s1 + $0x7d4] sm:$0xf] }
 0x443   : > { %v17048_v50 = vpop.f32.mrf.mxu0  ;;  %v11460_v29 = vor.u32 %v13729_v0, %v11457_v25  ;;  %5308 = vmatpush.bf16.msra.mxu3 %v11716_v10  ;;  %v13785_v10 = vld [vmem:[%s21088_s1 + $0x994] sm:$0xf] }
 0x444   : > { %4856 = vmatmul.bf16.gmra.mxu1 %v21405_v62  ;;  %4954 = vmatmul.bf16.gmra.mxu3 %v21383_v12  ;;  %v17054_v52 = vpack.c.bf16 %v6232_v46, %v6224_v17  ;;  %v4710_v9 = vpop.f32.mrf.mxu2  ;;  %v13665_v17 = vld [vmem:[%s21088_s1 + $0x5d4] sm:$0xf] }
 0x445   : > { %v4711_v43 = vadd.f32 %v4710_v9, %v4662_v33  ;;  %5259 = vmatpush.bf16.msra.mxu2 %v11460_v29  ;;  %v11201_v46 = vld [vmem:[%s21088_s1 + $0x5f0] sm:$0xf0] }
 0x446   : > { %5003 = vmatmul.bf16.gmra.mxu0 %v21419_v15  ;;  %21430 = vst [vmem:[#allocation75_spill] sm:$0xff] %v17054_v52  ;;  %v11204_v0 = vor.u32 %v13665_v17, %v11201_v46  ;;  %v11681_v17 = vld [vmem:[%s21088_s1 + $0x9b0] sm:$0xf0] }
 0x447   : > { %v4759_v45 = vpop.f32.mrf.mxu3 }
 0x448   : > { %v4760_v6 = vadd.f32 %v4759_v45, %v4711_v43  ;;  %5210 = vmatpush.bf16.msra.mxu1 %v11204_v0 }
 0x449   : > { %v4663_v42 = vpop.f32.mrf.mxu1 }
 0x44a   : > { %v4664_v32 = vadd.f32 %v4663_v42, %v16795_v59  ;;  %v6240_v48 = vmax.f32 %v4760_v6, 0.0  ;;  %v13721_v42 = vld [vmem:[%s21088_s1 + $0x794] sm:$0xf] }
 0x44b   : > { %v17069_v11 = vpop.f32.mrf.mxu0 }
 0x44c   : > { %v4712_v33 = vpop.f32.mrf.mxu2 }
 0x44d   : > { %v4713_v16 = vadd.f32 %v4712_v33, %v4664_v32  ;;  %v11684_v33 = vor.u32 %v13785_v10, %v11681_v17 }
 0x44f   : > { %v4761_v25 = vpop.f32.mrf.mxu3  ;;  %5309 = vmatpush.bf16.msra.mxu3 %v11684_v33 }
 0x450   : > { %v4762_v45 = vadd.f32 %v4761_v25, %v4713_v16 }
 0x451   : > { %v4666_v9 = vpop.f32.mrf.mxu1  ;;  %4910 = vmatmul.bf16.gmra.mxu2 %v21350_v51  ;;  %v21434_v51 = vld [vmem:[#allocation2_spill] sm:$0xff] }
 0x452   : > { %v4667_v59 = vadd.f32 %v4666_v9, %v16816_v5  ;;  %v6248_v43 = vmax.f32 %v4762_v45, 0.0  ;;  %v11425_v5 = vld [vmem:[%s21088_s1 + $0x7b0] sm:$0xf0]  ;;  %v17101_v9 = vld [vmem:[%s21089_s2] sm:$0xff] }
 0x453   : > { %v17078_v29 = vpop.f32.mrf.mxu0  ;;  %v11428_v6 = vor.u32 %v13721_v42, %v11425_v5  ;;  %v17104_v45 = vperm.slane %v17101_v9, 4  ;;  %v11169_v5 = vld [vmem:[%s21088_s1 + $0x5b0] sm:$0xf0] }
 0x454   : > { %4861 = vmatmul.bf16.gmra.mxu1 %v15000_v36  ;;  %4959 = vmatmul.bf16.gmra.mxu3 %v21387_v61  ;;  %v17093_v32 = vpack.c.bf16 %v6248_v43, %v6240_v48  ;;  %v4715_v46 = vpop.f32.mrf.mxu2  ;;  %v21433_v61 = vld [vmem:[#allocation35_spill] sm:$0xff] }
 0x455   : > { %v4716_v25 = vadd.f32 %v4715_v46, %v4667_v59  ;;  %5260 = vmatpush.bf16.msra.mxu2 %v11428_v6  ;;  %v13657_v59 = vld [vmem:[%s21088_s1 + $0x594] sm:$0xf]  ;;  %v4779_v6 = vadd.f32 %v16820_v22, %v17104_v45 }
 0x456   : > { %5008 = vmatmul.bf16.gmra.mxu0 %v21422_v24  ;;  %21431 = vst [vmem:[#allocation76_spill] sm:$0xff] %v17093_v32  ;;  %v11172_v10 = vor.u32 %v13657_v59, %v11169_v5  ;;  %v21432_v32 = vld [vmem:[#allocation34_spill] sm:$0xff]  ;;  %v13713_v22 = vld [vmem:[%s21088_s1 + $0x754] sm:$0xf] }
 0x457   : > { %v4764_v0 = vpop.f32.mrf.mxu3  ;;  %v13777_v59 = vld [vmem:[%s21088_s1 + $0x954] sm:$0xf] }
 0x458   : > { %v4765_v43 = vadd.f32 %v4764_v0, %v4716_v25  ;;  %5211 = vmatpush.bf16.msra.mxu1 %v11172_v10  ;;  %v11649_v10 = vld [vmem:[%s21088_s1 + $0x970] sm:$0xf0] }
 0x459   : > { %v4668_v16 = vpop.f32.mrf.mxu1 }
 0x45a   : > { %v4669_v48 = vadd.f32 %v4668_v16, %v16825_v30  ;;  %v6256_v52 = vmax.f32 %v4765_v43, 0.0 }
 0x45b   : > { %v17107_v42 = vpop.f32.mrf.mxu0 }
 0x45c   : > { %v4717_v17 = vpop.f32.mrf.mxu2 }
 0x45d   : > { %v4718_v30 = vadd.f32 %v4717_v17, %v4669_v48  ;;  %v11393_v48 = vld [vmem:[%s21088_s1 + $0x770] sm:$0xf0] }
 0x45e   : > { %v11396_v5 = vor.u32 %v13713_v22, %v11393_v48 }
 0x45f   : > { %v4766_v46 = vpop.f32.mrf.mxu3 }
 0x460   : > { %v4767_v25 = vadd.f32 %v4766_v46, %v4718_v30  ;;  %v11652_v30 = vor.u32 %v13777_v59, %v11649_v10  ;;  %5261 = vmatpush.bf16.msra.mxu2 %v11396_v5 }
 0x461   : > { %v4827_v33 = vpop.f32.mrf.mxu1  ;;  %5071 = vmatmul.bf16.vlgmr.msrb.gmra.mxu2 %v21433_v61 }
 0x462   : > { %v4828_v0 = vadd.f32 %v4827_v33, %v4779_v6  ;;  %v6264_v24 = vmax.f32 %v4767_v25, 0.0  ;;  %v4781_v6 = vadd.f32 %v16841_v19, %v17104_v45  ;;  %5310 = vmatpush.bf16.msra.mxu3 %v11652_v30  ;;  %v21436_v30 = vld [vmem:[#allocation36_spill] sm:$0xff] }
 0x463   : > { %v4974_v16 = vpop.f32.mrf.mxu0 }
 0x464   : > { %5022 = vmatmul.bf16.vlgmr.msrb.gmra.mxu1 %v21432_v32  ;;  %5120 = vmatmul.bf16.vlgmr.msrb.gmra.mxu3 %v21434_v51  ;;  %v17130_v43 = vpack.c.bf16 %v6264_v24, %v6256_v52  ;;  %v4876_v17 = vpop.f32.mrf.mxu2  ;;  %v13649_v24 = vld [vmem:[%s21088_s1 + $0x554] sm:$0xf] }
 0x465   : > { %v4877_v33 = vadd.f32 %v4876_v17, %v4828_v0  ;;  %v11137_v52 = vld [vmem:[%s21088_s1 + $0x570] sm:$0xf0]  ;;  %v4784_v0 = vadd.f32 %v16850_v18, %v17104_v45 }
 0x466   : > { %5169 = vmatmul.bf16.vlgmr.msrb.gmra.mxu0 %v21357_v41  ;;  %21435 = vst [vmem:[#allocation77_spill] sm:$0xff] %v17130_v43  ;;  %v11140_v22 = vor.u32 %v13649_v24, %v11137_v52  ;;  %v13769_v18 = vld [vmem:[%s21088_s1 + $0x914] sm:$0xf]  ;;  %v4786_v52 = vadd.f32 %v16871_v2, %v17104_v45 }
 0x467   : > { %v4925_v46 = vpop.f32.mrf.mxu3 }
 0x468   : > { %v4926_v51 = vadd.f32 %v4925_v46, %v4877_v33  ;;  %5212 = vmatpush.bf16.msra.mxu1 %v11140_v22  ;;  %v21437_v33 = vld [vmem:[#allocation37_spill] sm:$0xff] }
 0x469   : > { %v4829_v25 = vpop.f32.mrf.mxu1 }
 0x46a   : > { %v4830_v41 = vadd.f32 %v4829_v25, %v4781_v6  ;;  %v17143_v19 = vadd.f32 %v4974_v16, %v4926_v51  ;;  %v21438_v25 = vld [vmem:[#allocation6_spill] sm:$0xff]  ;;  %v13705_v51 = vld [vmem:[%s21088_s1 + $0x714] sm:$0xf] }
 0x46b   : > { %v4976_v61 = vpop.f32.mrf.mxu0 }
 0x46c   : > { %v4878_v48 = vpop.f32.mrf.mxu2 }
 0x46d   : > { %v4879_v5 = vadd.f32 %v4878_v48, %v4830_v41  ;;  %v11361_v41 = vld [vmem:[%s21088_s1 + $0x730] sm:$0xf0] }
 0x46e   : > { %v11364_v16 = vor.u32 %v13705_v51, %v11361_v41  ;;  %v13641_v51 = vld [vmem:[%s21088_s1 + $0x514] sm:$0xf] }
 0x46f   : > { %v4927_v59 = vpop.f32.mrf.mxu3  ;;  %v11105_v41 = vld [vmem:[%s21088_s1 + $0x530] sm:$0xf0] }
 0x470   : > { %v4928_v17 = vadd.f32 %v4927_v59, %v4879_v5  ;;  %5262 = vmatpush.bf16.msra.mxu2 %v11364_v16 }
 0x471   : > { %v4832_v10 = vpop.f32.mrf.mxu1  ;;  %5076 = vmatmul.bf16.gmra.mxu2 %v21437_v33 }
 0x472   : > { %v4833_v6 = vadd.f32 %v4832_v10, %v4784_v0  ;;  %v17150_v24 = vadd.f32 %v4976_v61, %v4928_v17  ;;  %v11617_v61 = vld [vmem:[%s21088_s1 + $0x930] sm:$0xf0] }
 0x473   : > { %v4979_v46 = vpop.f32.mrf.mxu0  ;;  %v11620_v48 = vor.u32 %v13769_v18, %v11617_v61 }
 0x474   : > { %5027 = vmatmul.bf16.gmra.mxu1 %v21436_v30  ;;  %5125 = vmatmul.bf16.gmra.mxu3 %v21438_v25  ;;  %v4881_v22 = vpop.f32.mrf.mxu2  ;;  %v21441_v25 = vld [vmem:[#allocation3_spill] sm:$0xff] }
 0x475   : > { %v4882_v59 = vadd.f32 %v4881_v22, %v4833_v6  ;;  %5311 = vmatpush.bf16.msra.mxu3 %v11620_v48  ;;  %v4789_v6 = vadd.f32 %v16880_v55, %v17104_v45  ;;  %v11329_v55 = vld [vmem:[%s21088_s1 + $0x6f0] sm:$0xf0] }
 0x476   : > { %5174 = vmatmul.bf16.gmra.mxu0 %v21359_v1  ;;  %v11108_v1 = vor.u32 %v13641_v51, %v11105_v41 }
 0x477   : > { %v4930_v0 = vpop.f32.mrf.mxu3 }
 0x478   : > { %v4931_v17 = vadd.f32 %v4930_v0, %v4882_v59  ;;  %5213 = vmatpush.bf16.msra.mxu1 %v11108_v1  ;;  %v21439_v59 = vld [vmem:[#allocation38_spill] sm:$0xff]  ;;  %v13697_v1 = vld [vmem:[%s21088_s1 + $0x6d4] sm:$0xf] }
 0x479   : > { %v4834_v5 = vpop.f32.mrf.mxu1 }
 0x47a   : > { %v4835_v10 = vadd.f32 %v4834_v5, %v4786_v52  ;;  %v17173_v2 = vadd.f32 %v4979_v46, %v4931_v17  ;;  %v21440_v5 = vld [vmem:[#allocation39_spill] sm:$0xff]  ;;  %v13761_v46 = vld [vmem:[%s21088_s1 + $0x8d4] sm:$0xf]  ;;  %v4791_v17 = vadd.f32 %v16901_v47, %v17104_v45 }
 0x47b   : > { %v4981_v43 = vpop.f32.mrf.mxu0 }
 0x47c   : > { %v4883_v18 = vpop.f32.mrf.mxu2 }
 0x47d   : > { %v4884_v61 = vadd.f32 %v4883_v18, %v4835_v10  ;;  %v11332_v10 = vor.u32 %v13697_v1, %v11329_v55  ;;  %v13633_v1 = vld [vmem:[%s21088_s1 + $0x4d4] sm:$0xf] }
 0x47e   : > { %v11073_v55 = vld [vmem:[%s21088_s1 + $0x4f0] sm:$0xf0] }
 0x47f   : > { %v4932_v16 = vpop.f32.mrf.mxu3  ;;  %5263 = vmatpush.bf16.msra.mxu2 %v11332_v10 }
 0x480   : > { %v4933_v0 = vadd.f32 %v4932_v16, %v4884_v61 }
 0x481   : > { %v4837_v52 = vpop.f32.mrf.mxu1  ;;  %5081 = vmatmul.bf16.gmra.mxu2 %v21440_v5  ;;  %v21444_v5 = vld [vmem:[#allocation7_spill] sm:$0xff] }
 0x482   : > { %v4838_v22 = vadd.f32 %v4837_v52, %v4789_v6  ;;  %v17180_v51 = vadd.f32 %v4981_v43, %v4933_v0  ;;  %v11585_v43 = vld [vmem:[%s21088_s1 + $0x8f0] sm:$0xf0] }
 0x483   : > { %v4984_v48 = vpop.f32.mrf.mxu0  ;;  %v11588_v18 = vor.u32 %v13761_v46, %v11585_v43 }
 0x484   : > { %5032 = vmatmul.bf16.gmra.mxu1 %v21439_v59  ;;  %5130 = vmatmul.bf16.gmra.mxu3 %v21441_v25  ;;  %v4886_v41 = vpop.f32.mrf.mxu2  ;;  %v11076_v25 = vor.u32 %v13633_v1, %v11073_v55 }
 0x485   : > { %v4887_v16 = vadd.f32 %v4886_v41, %v4838_v22  ;;  %5312 = vmatpush.bf16.msra.mxu3 %v11588_v18  ;;  %v4794_v22 = vadd.f32 %v16910_v56, %v17104_v45  ;;  %v13689_v56 = vld [vmem:[%s21088_s1 + $0x694] sm:$0xf] }
 0x486   : > { %5179 = vmatmul.bf16.gmra.mxu0 %v21393_v28  ;;  %5214 = vmatpush.bf16.msra.mxu1 %v11076_v25  ;;  %v11297_v25 = vld [vmem:[%s21088_s1 + $0x6b0] sm:$0xf0] }
 0x487   : > { %v4935_v6 = vpop.f32.mrf.mxu3 }
 0x488   : > { %v4936_v0 = vadd.f32 %v4935_v6, %v4887_v16  ;;  %v21442_v16 = vld [vmem:[#allocation40_spill] sm:$0xff] }
 0x489   : > { %v4839_v61 = vpop.f32.mrf.mxu1 }
 0x48a   : > { %v4840_v52 = vadd.f32 %v4839_v61, %v4791_v17  ;;  %v17203_v47 = vadd.f32 %v4984_v48, %v4936_v0  ;;  %v21443_v61 = vld [vmem:[#allocation41_spill] sm:$0xff]  ;;  %v13753_v48 = vld [vmem:[%s21088_s1 + $0x894] sm:$0xf]  ;;  %v4796_v0 = vadd.f32 %v16931_v7, %v17104_v45 }
 0x48b   : > { %v4986_v28 = vpop.f32.mrf.mxu0 }
 0x48c   : > { %v4888_v46 = vpop.f32.mrf.mxu2 }
 0x48d   : > { %v4889_v43 = vadd.f32 %v4888_v46, %v4840_v52  ;;  %v11300_v52 = vor.u32 %v13689_v56, %v11297_v25  ;;  %v13625_v56 = vld [vmem:[%s21088_s1 + $0x494] sm:$0xf] }
 0x48e   : > { %v11041_v25 = vld [vmem:[%s21088_s1 + $0x4b0] sm:$0xf0] }
 0x48f   : > { %v4937_v10 = vpop.f32.mrf.mxu3  ;;  %5264 = vmatpush.bf16.msra.mxu2 %v11300_v52 }
 0x490   : > { %v4938_v6 = vadd.f32 %v4937_v10, %v4889_v43 }
 0x491   : > { %v4842_v17 = vpop.f32.mrf.mxu1  ;;  %5086 = vmatmul.bf16.gmra.mxu2 %v21443_v61  ;;  %v21456_v61 = vld [vmem:[#allocation9_spill] sm:$0xff] }
 0x492   : > { %v4843_v41 = vadd.f32 %v4842_v17, %v4794_v22  ;;  %v17210_v1 = vadd.f32 %v4986_v28, %v4938_v6  ;;  %v11553_v28 = vld [vmem:[%s21088_s1 + $0x8b0] sm:$0xf0] }
 0x493   : > { %v4989_v18 = vpop.f32.mrf.mxu0  ;;  %v11556_v46 = vor.u32 %v13753_v48, %v11553_v28 }
 0x494   : > { %5037 = vmatmul.bf16.gmra.mxu1 %v21442_v16  ;;  %5135 = vmatmul.bf16.gmra.mxu3 %v21444_v5  ;;  %v4891_v55 = vpop.f32.mrf.mxu2  ;;  %v11044_v5 = vor.u32 %v13625_v56, %v11041_v25  ;;  %v13681_v56 = vld [vmem:[%s21088_s1 + $0x654] sm:$0xf] }
 0x495   : > { %v4892_v10 = vadd.f32 %v4891_v55, %v4843_v41  ;;  %5313 = vmatpush.bf16.msra.mxu3 %v11556_v46  ;;  %v4799_v41 = vadd.f32 %v16940_v37, %v17104_v45  ;;  %v21447_v37 = vld [vmem:[#allocation4_spill] sm:$0xff] }
 0x496   : > { %5184 = vmatmul.bf16.gmra.mxu0 %v21396_v49  ;;  %5215 = vmatpush.bf16.msra.mxu1 %v11044_v5  ;;  %v11265_v25 = vld [vmem:[%s21088_s1 + $0x670] sm:$0xf0] }
 0x497   : > { %v4940_v22 = vpop.f32.mrf.mxu3 }
 0x498   : > { %v4941_v6 = vadd.f32 %v4940_v22, %v4892_v10  ;;  %v21445_v10 = vld [vmem:[#allocation42_spill] sm:$0xff] }
 0x499   : > { %v4844_v43 = vpop.f32.mrf.mxu1 }
 0x49a   : > { %v4845_v17 = vadd.f32 %v4844_v43, %v4796_v0  ;;  %v17233_v7 = vadd.f32 %v4989_v18, %v4941_v6  ;;  %v13857_v43 = vld [vmem:[%s21088_s1 + $0xbd4] sm:$0xf]  ;;  %v21446_v6 = vld [vmem:[#allocation43_spill] sm:$0xff] }
 0x49b   : > { %v4991_v49 = vpop.f32.mrf.mxu0  ;;  %v11969_v18 = vld [vmem:[%s21088_s1 + $0xbf0] sm:$0xf0] }
 0x49c   : > { %v4893_v48 = vpop.f32.mrf.mxu2  ;;  %v11972_v5 = vor.u32 %v13857_v43, %v11969_v18  ;;  %v13849_v43 = vld [vmem:[%s21088_s1 + $0xb94] sm:$0xf] }
 0x49d   : > { %v4894_v28 = vadd.f32 %v4893_v48, %v4845_v17  ;;  %v11268_v48 = vor.u32 %v13681_v56, %v11265_v25  ;;  %v11937_v18 = vld [vmem:[%s21088_s1 + $0xbb0] sm:$0xf0] }
 0x49e   : > { %5357 = vmatpush.bf16.msra.mxu0 %v11972_v5  ;;  %v11940_v25 = vor.u32 %v13849_v43, %v11937_v18  ;;  %v13833_v18 = vld [vmem:[%s21088_s1 + $0xb14] sm:$0xf] }
 0x49f   : > { %v4942_v52 = vpop.f32.mrf.mxu3  ;;  %5265 = vmatpush.bf16.msra.mxu2 %v11268_v48  ;;  %v11905_v48 = vld [vmem:[%s21088_s1 + $0xb70] sm:$0xf0] }
 0x4a0   : > { %v4943_v22 = vadd.f32 %v4942_v52, %v4894_v28  ;;  %v4801_v52 = vadd.f32 %v16973_v40, %v17104_v45  ;;  %v13617_v40 = vld [vmem:[%s21088_s1 + $0x454] sm:$0xf] }
 0x4a1   : > { %v4847_v0 = vpop.f32.mrf.mxu1  ;;  %5091 = vmatmul.bf16.gmra.mxu2 %v21446_v6 }
 0x4a2   : > { %v4848_v55 = vadd.f32 %v4847_v0, %v4799_v41  ;;  %v17246_v17 = vadd.f32 %v4991_v49, %v4943_v22  ;;  %v13745_v41 = vld [vmem:[%s21088_s1 + $0x854] sm:$0xf]  ;;  %5358 = vmatpush.bf16.msra.mxu0 %v11940_v25 }
 0x4a3   : > { %v4994_v46 = vpop.f32.mrf.mxu0  ;;  %v11521_v49 = vld [vmem:[%s21088_s1 + $0x870] sm:$0xf0] }
 0x4a4   : > { %5042 = vmatmul.bf16.gmra.mxu1 %v21445_v10  ;;  %5140 = vmatmul.bf16.gmra.mxu3 %v21447_v37  ;;  %v4896_v28 = vpop.f32.mrf.mxu2  ;;  %v11524_v22 = vor.u32 %v13745_v41, %v11521_v49  ;;  %v11009_v41 = vld [vmem:[%s21088_s1 + $0x470] sm:$0xf0] }
 0x4a5   : > { %v4897_v56 = vadd.f32 %v4896_v28, %v4848_v55  ;;  %v13841_v55 = vld [vmem:[%s21088_s1 + $0xb54] sm:$0xf]  ;;  %v11012_v49 = vor.u32 %v13617_v40, %v11009_v41 }
 0x4a6   : > { %5189 = vmatmul.bf16.gmra.mxu0 %v14816_v26  ;;  %5314 = vmatpush.bf16.msra.mxu3 %v11524_v22 }
 0x4a7   : > { %v4945_v0 = vpop.f32.mrf.mxu3  ;;  %5216 = vmatpush.bf16.msra.mxu1 %v11012_v49  ;;  %v11841_v49 = vld [vmem:[%s21088_s1 + $0xaf0] sm:$0xf0] }
 0x4a8   : > { %v4946_v37 = vadd.f32 %v4945_v0, %v4897_v56  ;;  %v4804_v0 = vadd.f32 %v16994_v57, %v17104_v45  ;;  %v11873_v56 = vld [vmem:[%s21088_s1 + $0xb30] sm:$0xf0] }
 0x4a9   : > { %v4849_v5 = vpop.f32.mrf.mxu1  ;;  %v11876_v40 = vor.u32 %v13833_v18, %v11873_v56  ;;  %v21448_v57 = vld [vmem:[#allocation44_spill] sm:$0xff] }
 0x4aa   : > { %v4850_v26 = vadd.f32 %v4849_v5, %v4801_v52  ;;  %v11908_v52 = vor.u32 %v13841_v55, %v11905_v48  ;;  %v17281_v28 = vadd.f32 %v4994_v46, %v4946_v37  ;;  %v13825_v55 = vld [vmem:[%s21088_s1 + $0xad4] sm:$0xf]  ;;  %v21449_v48 = vld [vmem:[#allocation45_spill] sm:$0xff] }
 0x4ab   : > { %v4996_v6 = vpop.f32.mrf.mxu0  ;;  %v13737_v18 = vld [vmem:[%s21088_s1 + $0x814] sm:$0xf] }
 0x4ac   : > { %5359 = vmatpush.bf16.msra.mxu0 %v11908_v52  ;;  %v4898_v22 = vpop.f32.mrf.mxu2  ;;  %v21450_v52 = vld [vmem:[#allocation8_spill] sm:$0xff] }
 0x4ad   : > { %v4899_v5 = vadd.f32 %v4898_v22, %v4850_v26  ;;  %v11844_v26 = vor.u32 %v13825_v55, %v11841_v49  ;;  %v13817_v55 = vld [vmem:[%s21088_s1 + $0xa94] sm:$0xf] }
 0x4ae   : > { %v11809_v49 = vld [vmem:[%s21088_s1 + $0xab0] sm:$0xf0] }
 0x4af   : > { %v4947_v43 = vpop.f32.mrf.mxu3 }
 0x4b0   : > { %v4948_v37 = vadd.f32 %v4947_v43, %v4899_v5  ;;  %5360 = vmatpush.bf16.msra.mxu0 %v11876_v40  ;;  %v11233_v43 = vld [vmem:[%s21088_s1 + $0x630] sm:$0xf0]  ;;  %v4806_v5 = vadd.f32 %v17027_v63, %v17104_v45 }
 0x4b1   : > { %v4852_v25 = vpop.f32.mrf.mxu1  ;;  %5096 = vmatmul.bf16.gmra.mxu2 %v21449_v48  ;;  %v13609_v63 = vld [vmem:[%s21088_s1 + $0x414] sm:$0xf] }
 0x4b2   : > { %v4853_v46 = vadd.f32 %v4852_v25, %v4804_v0  ;;  %v17300_v22 = vadd.f32 %v4996_v6, %v4948_v37  ;;  %v13673_v0 = vld [vmem:[%s21088_s1 + $0x614] sm:$0xf] }
 0x4b3   : > { %v4999_v41 = vpop.f32.mrf.mxu0  ;;  %v11236_v56 = vor.u32 %v13673_v0, %v11233_v43  ;;  %v11489_v6 = vld [vmem:[%s21088_s1 + $0x830] sm:$0xf0]  ;;  %v11812_v43 = vor.u32 %v13817_v55, %v11809_v49 }
 0x4b4   : > { %5047 = vmatmul.bf16.gmra.mxu1 %v21448_v57  ;;  %5145 = vmatmul.bf16.gmra.mxu3 %v21450_v52  ;;  %v4901_v25 = vpop.f32.mrf.mxu2  ;;  %v11492_v37 = vor.u32 %v13737_v18, %v11489_v6  ;;  %v10977_v18 = vld [vmem:[%s21088_s1 + $0x430] sm:$0xf0] }
 0x4b5   : > { %5361 = vmatpush.bf16.msra.mxu0 %v11844_v26  ;;  %v4902_v0 = vadd.f32 %v4901_v25, %v4853_v46  ;;  %5266 = vmatpush.bf16.msra.mxu2 %v11236_v56  ;;  %v13809_v46 = vld [vmem:[%s21088_s1 + $0xa54] sm:$0xf]  ;;  %v10980_v6 = vor.u32 %v13609_v63, %v10977_v18 }
 0x4b6   : > { %5194 = vmatmul.bf16.gmra.mxu0 %v21401_v21  ;;  %5315 = vmatpush.bf16.msra.mxu3 %v11492_v37  ;;  %v11777_v56 = vld [vmem:[%s21088_s1 + $0xa70] sm:$0xf0] }
 0x4b7   : > { %v4950_v40 = vpop.f32.mrf.mxu3  ;;  %5217 = vmatpush.bf16.msra.mxu1 %v10980_v6  ;;  %v13801_v49 = vld [vmem:[%s21088_s1 + $0xa14] sm:$0xf]  ;;  %v21453_v6 = vld [vmem:[#allocation5_spill] sm:$0xff] }
 0x4b8   : > { %v4951_v52 = vadd.f32 %v4950_v40, %v4902_v0  ;;  %v4809_v40 = vadd.f32 %v17048_v50, %v17104_v45  ;;  %v11745_v0 = vld [vmem:[%s21088_s1 + $0xa30] sm:$0xf0]  ;;  %v21451_v50 = vld [vmem:[#allocation46_spill] sm:$0xff] }
 0x4b9   : > { %v4854_v26 = vpop.f32.mrf.mxu1  ;;  %5362 = vmatpush.bf16.msra.mxu0 %v11812_v43  ;;  %v11748_v63 = vor.u32 %v13801_v49, %v11745_v0 }
 0x4ba   : > { %v4855_v21 = vadd.f32 %v4854_v26, %v4806_v5  ;;  %v11780_v5 = vor.u32 %v13809_v46, %v11777_v56  ;;  %v17335_v25 = vadd.f32 %v4999_v41, %v4951_v52  ;;  %v21452_v46 = vld [vmem:[#allocation47_spill] sm:$0xff] }
 0x4bb   : > { %v5001_v48 = vpop.f32.mrf.mxu0 }
 0x4bc   : > { %v4903_v37 = vpop.f32.mrf.mxu2 }
 0x4bd   : > { %5363 = vmatpush.bf16.msra.mxu0 %v11780_v5  ;;  %v4904_v26 = vadd.f32 %v4903_v37, %v4855_v21  ;;  %v10695_v21 = vld [vmem:[%s21088_s1 + $0x1d8] sm:$0xf] }
 0x4be   : > { %v13542_v5 = vld [vmem:[%s21088_s1 + $0x1f4] sm:$0xf0] }
 0x4bf   : > { %v4952_v55 = vpop.f32.mrf.mxu3  ;;  %v10696_v37 = vor.u32 %v13542_v5, %v10695_v21  ;;  %v13921_v21 = vld [vmem:[%s21088_s1 + $0xdd4] sm:$0xf] }
 0x4c0   : > { %v4953_v52 = vadd.f32 %v4952_v55, %v4904_v26  ;;  %v4811_v55 = vadd.f32 %v17069_v11, %v17104_v45  ;;  %v12225_v5 = vld [vmem:[%s21088_s1 + $0xdf0] sm:$0xf0] }
 0x4c1   : > { %v4857_v43 = vpop.f32.mrf.mxu1  ;;  %5364 = vmatpush.bf16.msra.mxu0 %v11748_v63  ;;  %5101 = vmatmul.bf16.gmra.mxu2 %v21452_v46  ;;  %v12228_v46 = vor.u32 %v13921_v21, %v12225_v5 }
 0x4c2   : > { %v4858_v41 = vadd.f32 %v4857_v43, %v4809_v40  ;;  %v17348_v56 = vadd.f32 %v5001_v48, %v4953_v52  ;;  %v10951_v40 = vld [vmem:[%s21088_s1 + $0x3d8] sm:$0xf]  ;;  %5455 = vmatpush.bf16.msrb.mxu2 %v10696_v37 }
 0x4c3   : > { %v5004_v18 = vpop.f32.mrf.mxu0  ;;  %v13606_v48 = vld [vmem:[%s21088_s1 + $0x3f4] sm:$0xf0]  ;;  %5406 = vmatpush.bf16.msrb.mxu1 %v12228_v46 }
 0x4c4   : > { %5052 = vmatmul.bf16.gmra.mxu1 %v21451_v50  ;;  %5150 = vmatmul.bf16.gmra.mxu3 %v21453_v6  ;;  %v4906_v49 = vpop.f32.mrf.mxu2  ;;  %v10952_v26 = vor.u32 %v13606_v48, %v10951_v40 }
 0x4c5   : > { %v4907_v43 = vadd.f32 %v4906_v49, %v4858_v41  ;;  %v4814_v41 = vadd.f32 %v17078_v29, %v17104_v45  ;;  %v13534_v29 = vld [vmem:[%s21088_s1 + $0x1b4] sm:$0xf0] }
 0x4c6   : > { %5199 = vmatmul.bf16.gmra.mxu0 %v21405_v62  ;;  %5504 = vmatpush.bf16.msrb.mxu3 %v10952_v26 }
 0x4c7   : > { %v4955_v0 = vpop.f32.mrf.mxu3 }
 0x4c8   : > { %v4956_v62 = vadd.f32 %v4955_v0, %v4907_v43  ;;  %v21454_v43 = vld [vmem:[#allocation48_spill] sm:$0xff] }
 0x4c9   : > { %v4859_v63 = vpop.f32.mrf.mxu1 }
 0x4ca   : > { %v4860_v52 = vadd.f32 %v4859_v63, %v4811_v55  ;;  %v17371_v11 = vadd.f32 %v5004_v18, %v4956_v62  ;;  %v21455_v63 = vld [vmem:[#allocation49_spill] sm:$0xff] }
 0x4cb   : > { %v5006_v6 = vpop.f32.mrf.mxu0  ;;  %v10663_v62 = vld [vmem:[%s21088_s1 + $0x198] sm:$0xf] }
 0x4cc   : > { %v4908_v40 = vpop.f32.mrf.mxu2  ;;  %v10919_v18 = vld [vmem:[%s21088_s1 + $0x398] sm:$0xf]  ;;  %v10664_v46 = vor.u32 %v13534_v29, %v10663_v62  ;;  %v13913_v62 = vld [vmem:[%s21088_s1 + $0xd94] sm:$0xf] }
 0x4cd   : > { %v4909_v48 = vadd.f32 %v4908_v40, %v4860_v52  ;;  %v4816_v52 = vadd.f32 %v17107_v42, %v17104_v45  ;;  %v12193_v29 = vld [vmem:[%s21088_s1 + $0xdb0] sm:$0xf0] }
 0x4ce   : > { %5456 = vmatpush.bf16.msrb.mxu2 %v10664_v46 }
 0x4cf   : > { %v4957_v37 = vpop.f32.mrf.mxu3 }
 0x4d0   : > { %v4958_v0 = vadd.f32 %v4957_v37, %v4909_v48 }
 0x4d1   : > { %v4862_v55 = vpop.f32.mrf.mxu1  ;;  %5106 = vmatmul.bf16.gmra.mxu2 %v21455_v63 }
 0x4d2   : > { %v4863_v49 = vadd.f32 %v4862_v55, %v4814_v41  ;;  %v17378_v21 = vadd.f32 %v5006_v6, %v4958_v0  ;;  %v13598_v6 = vld [vmem:[%s21088_s1 + $0x3b4] sm:$0xf0] }
 0x4d3   : > { %v5009_v26 = vpop.f32.mrf.mxu0  ;;  %v10920_v40 = vor.u32 %v13598_v6, %v10919_v18 }
 0x4d4   : > { %5057 = vmatmul.bf16.gmra.mxu1 %v21454_v43  ;;  %5155 = vmatmul.bf16.gmra.mxu3 %v21456_v61  ;;  %v4911_v5 = vpop.f32.mrf.mxu2  ;;  %v12196_v61 = vor.u32 %v13913_v62, %v12193_v29 }
 0x4d5   : > { %v4912_v37 = vadd.f32 %v4911_v5, %v4863_v49  ;;  %5505 = vmatpush.bf16.msrb.mxu3 %v10920_v40  ;;  %v10887_v40 = vld [vmem:[%s21088_s1 + $0x358] sm:$0xf] }
 0x4d6   : > { %5204 = vmatmul.bf16.gmra.mxu0 %v15000_v36  ;;  %5407 = vmatpush.bf16.msrb.mxu1 %v12196_v61  ;;  %v10631_v61 = vld [vmem:[%s21088_s1 + $0x158] sm:$0xf] }
 0x4d7   : > { %v4960_v41 = vpop.f32.mrf.mxu3 }
 0x4d8   : > { %v4961_v0 = vadd.f32 %v4960_v41, %v4912_v37  ;;  %v17408_v41 = vperm.slane %v17101_v9, 5 }
 0x4d9   : > { %v4864_v48 = vpop.f32.mrf.mxu1 }
 0x4da   : > { %v4865_v55 = vadd.f32 %v4864_v48, %v4816_v52  ;;  %v17401_v45 = vadd.f32 %v5009_v26, %v4961_v0 }
 0x4db   : > { %v5011_v36 = vpop.f32.mrf.mxu0 }
 0x4dc   : > { %v4913_v42 = vpop.f32.mrf.mxu2 }
 0x4dd   : > { %v4914_v18 = vadd.f32 %v4913_v42, %v4865_v55 }
 0x4df   : > { %v4962_v49 = vpop.f32.mrf.mxu3 }
 0x4e0   : > { %v4963_v52 = vadd.f32 %v4962_v49, %v4914_v18  ;;  %v13905_v18 = vld [vmem:[%s21088_s1 + $0xd54] sm:$0xf] }
 0x4e1   : > { %v5023_v46 = vpop.f32.mrf.mxu1  ;;  %5267 = vmatmul.bf16.vlgmr.msra.gmra.mxu2 %v14668_v54 }
 0x4e2   : > { %v5024_v6 = vadd.f32 %v5023_v46, %v17143_v19  ;;  %v17410_v26 = vadd.f32 %v5011_v36, %v4963_v52  ;;  %v13526_v19 = vld [vmem:[%s21088_s1 + $0x174] sm:$0xf0]  ;;  %v12161_v46 = vld [vmem:[%s21088_s1 + $0xd70] sm:$0xf0] }
 0x4e3   : > { %v5170_v5 = vpop.f32.mrf.mxu0  ;;  %v10632_v37 = vor.u32 %v13526_v19, %v10631_v61  ;;  %v13590_v36 = vld [vmem:[%s21088_s1 + $0x374] sm:$0xf0]  ;;  %v12164_v61 = vor.u32 %v13905_v18, %v12161_v46 }
 0x4e4   : > { %5218 = vmatmul.bf16.vlgmr.msra.gmra.mxu1 %v14666_v53  ;;  %5316 = vmatmul.bf16.vlgmr.msra.gmra.mxu3 %v21409_v58  ;;  %v5072_v9 = vpop.f32.mrf.mxu2  ;;  %v10888_v55 = vor.u32 %v13590_v36, %v10887_v40 }
 0x4e5   : > { %v5073_v0 = vadd.f32 %v5072_v9, %v5024_v6  ;;  %5457 = vmatpush.bf16.msrb.mxu2 %v10632_v37  ;;  %5408 = vmatpush.bf16.msrb.mxu1 %v12164_v61 }
 0x4e6   : > { %5365 = vmatmul.bf16.vlgmr.msra.gmra.mxu0 %v21432_v32  ;;  %5506 = vmatpush.bf16.msrb.mxu3 %v10888_v55 }
 0x4e7   : > { %v5121_v48 = vpop.f32.mrf.mxu3  ;;  %v6145_v9 = vmax.f32 %v5073_v0, 0.0  ;;  %v10855_v0 = vld [vmem:[%s21088_s1 + $0x318] sm:$0xf] }
 0x4e8   : > { %v5122_v62 = vadd.f32 %v5121_v48, %v17408_v41 }
 0x4e9   : > { %v5025_v29 = vpop.f32.mrf.mxu1 }
 0x4ea   : > { %v5026_v42 = vadd.f32 %v5025_v29, %v17150_v24  ;;  %v17433_v52 = vadd.f32 %v5170_v5, %v5122_v62  ;;  %v10599_v5 = vld [vmem:[%s21088_s1 + $0x118] sm:$0xf] }
 0x4eb   : > { %v5172_v49 = vpop.f32.mrf.mxu0 }
 0x4ec   : > { %v5074_v6 = vpop.f32.mrf.mxu2 }
 0x4ed   : > { %v5075_v40 = vadd.f32 %v5074_v6, %v5026_v42  ;;  %v13582_v42 = vld [vmem:[%s21088_s1 + $0x334] sm:$0xf0] }
 0x4ee   : > { %v10856_v46 = vor.u32 %v13582_v42, %v10855_v0 }
 0x4ef   : > { %v5123_v19 = vpop.f32.mrf.mxu3  ;;  %v6153_v48 = vmax.f32 %v5075_v40, 0.0 }
 0x4f0   : > { %v5124_v37 = vadd.f32 %v5123_v19, %v17408_v41  ;;  %5507 = vmatpush.bf16.msrb.mxu3 %v10856_v46 }
 0x4f1   : > { %v5028_v24 = vpop.f32.mrf.mxu1  ;;  %v17440_v32 = vpack.c.bf16 %v6153_v48, %v6145_v9  ;;  %5272 = vmatmul.bf16.gmra.mxu2 %v14706_v13  ;;  %v12129_v9 = vld [vmem:[%s21088_s1 + $0xd30] sm:$0xf0] }
 0x4f2   : > { %v5029_v36 = vadd.f32 %v5028_v24, %v17173_v2  ;;  %v17437_v29 = vadd.f32 %v5172_v49, %v5124_v37  ;;  %v13518_v2 = vld [vmem:[%s21088_s1 + $0x134] sm:$0xf0]  ;;  %v13897_v24 = vld [vmem:[%s21088_s1 + $0xd14] sm:$0xf] }
 0x4f3   : > { %v5175_v55 = vpop.f32.mrf.mxu0  ;;  %21457 = vst [vmem:[#allocation36_spill] sm:$0xff] %v17440_v32  ;;  %v10600_v62 = vor.u32 %v13518_v2, %v10599_v5  ;;  %v12132_v5 = vor.u32 %v13897_v24, %v12129_v9 }
 0x4f4   : > { %5223 = vmatmul.bf16.gmra.mxu1 %v21391_v60  ;;  %5321 = vmatmul.bf16.gmra.mxu3 %v14708_v14  ;;  %v5077_v49 = vpop.f32.mrf.mxu2 }
 0x4f5   : > { %v5078_v61 = vadd.f32 %v5077_v49, %v5029_v36  ;;  %5458 = vmatpush.bf16.msrb.mxu2 %v10600_v62  ;;  %5409 = vmatpush.bf16.msrb.mxu1 %v12132_v5 }
 0x4f6   : > { %5370 = vmatmul.bf16.gmra.mxu0 %v21436_v30 }
 0x4f7   : > { %v5126_v18 = vpop.f32.mrf.mxu3  ;;  %v6161_v49 = vmax.f32 %v5078_v61, 0.0  ;;  %v10823_v61 = vld [vmem:[%s21088_s1 + $0x2d8] sm:$0xf] }
 0x4f8   : > { %v5127_v6 = vadd.f32 %v5126_v18, %v17408_v41 }
 0x4f9   : > { %v5030_v19 = vpop.f32.mrf.mxu1 }
 0x4fa   : > { %v5031_v40 = vadd.f32 %v5030_v19, %v17180_v51  ;;  %v17465_v48 = vadd.f32 %v5175_v55, %v5127_v6  ;;  %v10567_v55 = vld [vmem:[%s21088_s1 + $0xd8] sm:$0xf] }
 0x4fb   : > { %v5177_v37 = vpop.f32.mrf.mxu0 }
 0x4fc   : > { %v5079_v36 = vpop.f32.mrf.mxu2 }
 0x4fd   : > { %v5080_v0 = vadd.f32 %v5079_v36, %v5031_v40  ;;  %v13574_v40 = vld [vmem:[%s21088_s1 + $0x2f4] sm:$0xf0] }
 0x4fe   : > { %v10824_v9 = vor.u32 %v13574_v40, %v10823_v61 }
 0x4ff   : > { %v5128_v2 = vpop.f32.mrf.mxu3  ;;  %v6169_v18 = vmax.f32 %v5080_v0, 0.0 }
 0x500   : > { %v5129_v62 = vadd.f32 %v5128_v2, %v17408_v41  ;;  %5508 = vmatpush.bf16.msrb.mxu3 %v10824_v9 }
 0x501   : > { %v5033_v51 = vpop.f32.mrf.mxu1  ;;  %v17472_v32 = vpack.c.bf16 %v6169_v18, %v6161_v49  ;;  %5277 = vmatmul.bf16.gmra.mxu2 %v14744_v34  ;;  %v12097_v49 = vld [vmem:[%s21088_s1 + $0xcf0] sm:$0xf0] }
 0x502   : > { %v5034_v42 = vadd.f32 %v5033_v51, %v17203_v47  ;;  %v17469_v19 = vadd.f32 %v5177_v37, %v5129_v62  ;;  %v13510_v47 = vld [vmem:[%s21088_s1 + $0xf4] sm:$0xf0]  ;;  %v13889_v51 = vld [vmem:[%s21088_s1 + $0xcd4] sm:$0xf] }
 0x503   : > { %v5180_v46 = vpop.f32.mrf.mxu0  ;;  %21458 = vst [vmem:[#allocation37_spill] sm:$0xff] %v17472_v32  ;;  %v10568_v6 = vor.u32 %v13510_v47, %v10567_v55  ;;  %v12100_v55 = vor.u32 %v13889_v51, %v12097_v49 }
 0x504   : > { %5228 = vmatmul.bf16.gmra.mxu1 %v21394_v39  ;;  %5326 = vmatmul.bf16.gmra.mxu3 %v14746_v35  ;;  %v5082_v37 = vpop.f32.mrf.mxu2 }
 0x505   : > { %v5083_v5 = vadd.f32 %v5082_v37, %v5034_v42  ;;  %5459 = vmatpush.bf16.msrb.mxu2 %v10568_v6  ;;  %5410 = vmatpush.bf16.msrb.mxu1 %v12100_v55 }
 0x506   : > { %5375 = vmatmul.bf16.gmra.mxu0 %v21439_v59 }
 0x507   : > { %v5131_v24 = vpop.f32.mrf.mxu3  ;;  %v6177_v37 = vmax.f32 %v5083_v5, 0.0  ;;  %v10791_v5 = vld [vmem:[%s21088_s1 + $0x298] sm:$0xf] }
 0x508   : > { %v5132_v36 = vadd.f32 %v5131_v24, %v17408_v41 }
 0x509   : > { %v5035_v2 = vpop.f32.mrf.mxu1 }
 0x50a   : > { %v5036_v0 = vadd.f32 %v5035_v2, %v17210_v1  ;;  %v17497_v18 = vadd.f32 %v5180_v46, %v5132_v36  ;;  %v10535_v46 = vld [vmem:[%s21088_s1 + $0x98] sm:$0xf] }
 0x50b   : > { %v5182_v62 = vpop.f32.mrf.mxu0 }
 0x50c   : > { %v5084_v42 = vpop.f32.mrf.mxu2 }
 0x50d   : > { %v5085_v61 = vadd.f32 %v5084_v42, %v5036_v0  ;;  %v13566_v0 = vld [vmem:[%s21088_s1 + $0x2b4] sm:$0xf0] }
 0x50e   : > { %v10792_v49 = vor.u32 %v13566_v0, %v10791_v5 }
 0x50f   : > { %v5133_v47 = vpop.f32.mrf.mxu3  ;;  %v6185_v24 = vmax.f32 %v5085_v61, 0.0 }
 0x510   : > { %v5134_v6 = vadd.f32 %v5133_v47, %v17408_v41  ;;  %5509 = vmatpush.bf16.msrb.mxu3 %v10792_v49 }
 0x511   : > { %v5038_v1 = vpop.f32.mrf.mxu1  ;;  %v17504_v32 = vpack.c.bf16 %v6185_v24, %v6177_v37  ;;  %5282 = vmatmul.bf16.gmra.mxu2 %v14782_v3  ;;  %v12065_v37 = vld [vmem:[%s21088_s1 + $0xcb0] sm:$0xf0] }
 0x512   : > { %v5039_v40 = vadd.f32 %v5038_v1, %v17233_v7  ;;  %v17501_v2 = vadd.f32 %v5182_v62, %v5134_v6  ;;  %v13502_v7 = vld [vmem:[%s21088_s1 + $0xb4] sm:$0xf0]  ;;  %v13881_v1 = vld [vmem:[%s21088_s1 + $0xc94] sm:$0xf] }
 0x513   : > { %v5185_v9 = vpop.f32.mrf.mxu0  ;;  %21459 = vst [vmem:[#allocation38_spill] sm:$0xff] %v17504_v32  ;;  %v10536_v36 = vor.u32 %v13502_v7, %v10535_v46  ;;  %v12068_v46 = vor.u32 %v13881_v1, %v12065_v37  ;;  %v13494_v1 = vld [vmem:[%s21088_s1 + $0x74] sm:$0xf0] }
 0x514   : > { %5233 = vmatmul.bf16.gmra.mxu1 %v21397_v31  ;;  %5331 = vmatmul.bf16.gmra.mxu3 %v14784_v4  ;;  %v5087_v62 = vpop.f32.mrf.mxu2  ;;  %v10759_v37 = vld [vmem:[%s21088_s1 + $0x258] sm:$0xf] }
 0x515   : > { %v5088_v55 = vadd.f32 %v5087_v62, %v5039_v40  ;;  %5460 = vmatpush.bf16.msrb.mxu2 %v10536_v36  ;;  %5411 = vmatpush.bf16.msrb.mxu1 %v12068_v46 }
 0x516   : > { %5380 = vmatmul.bf16.gmra.mxu0 %v21442_v16 }
 0x517   : > { %v5136_v51 = vpop.f32.mrf.mxu3  ;;  %v6193_v62 = vmax.f32 %v5088_v55, 0.0 }
 0x518   : > { %v5137_v42 = vadd.f32 %v5136_v51, %v17408_v41 }
 0x519   : > { %v5040_v47 = vpop.f32.mrf.mxu1 }
 0x51a   : > { %v5041_v61 = vadd.f32 %v5040_v47, %v17246_v17  ;;  %v17529_v24 = vadd.f32 %v5185_v9, %v5137_v42  ;;  %v11207_v9 = vld [vmem:[%s21088_s1 + $0x5d8] sm:$0xf] }
 0x51b   : > { %v5187_v6 = vpop.f32.mrf.mxu0  ;;  %v13670_v42 = vld [vmem:[%s21088_s1 + $0x5f4] sm:$0xf0] }
 0x51c   : > { %v5089_v40 = vpop.f32.mrf.mxu2  ;;  %v11208_v55 = vor.u32 %v13670_v42, %v11207_v9 }
 0x51d   : > { %v5090_v5 = vadd.f32 %v5089_v40, %v5041_v61  ;;  %v13558_v40 = vld [vmem:[%s21088_s1 + $0x274] sm:$0xf0] }
 0x51e   : > { %5553 = vmatpush.bf16.msrb.mxu0 %v11208_v55 }
 0x51f   : > { %v5138_v7 = vpop.f32.mrf.mxu3  ;;  %v6201_v51 = vmax.f32 %v5090_v5, 0.0 }
 0x520   : > { %v5139_v36 = vadd.f32 %v5138_v7, %v17408_v41 }
 0x521   : > { %v5043_v17 = vpop.f32.mrf.mxu1  ;;  %v17542_v61 = vpack.c.bf16 %v6201_v51, %v6193_v62  ;;  %5287 = vmatmul.bf16.gmra.mxu2 %v21375_v20  ;;  %v13662_v62 = vld [vmem:[%s21088_s1 + $0x5b4] sm:$0xf0] }
 0x522   : > { %v5044_v0 = vadd.f32 %v5043_v17, %v17281_v28  ;;  %v17533_v47 = vadd.f32 %v5187_v6, %v5139_v36  ;;  %v21461_v28 = vld [vmem:[#allocation21_spill] sm:$0xff]  ;;  %v10760_v36 = vor.u32 %v13558_v40, %v10759_v37  ;;  %v13873_v37 = vld [vmem:[%s21088_s1 + $0xc54] sm:$0xf] }
 0x523   : > { %v5190_v49 = vpop.f32.mrf.mxu0  ;;  %21460 = vst [vmem:[#allocation40_spill] sm:$0xff] %v17542_v61  ;;  %v10503_v6 = vld [vmem:[%s21088_s1 + $0x58] sm:$0xf]  ;;  %v12033_v40 = vld [vmem:[%s21088_s1 + $0xc70] sm:$0xf0] }
 0x524   : > { %5238 = vmatmul.bf16.gmra.mxu1 %v14818_v27  ;;  %5336 = vmatmul.bf16.gmra.mxu3 %v21461_v28  ;;  %v10504_v46 = vor.u32 %v13494_v1, %v10503_v6  ;;  %v5092_v7 = vpop.f32.mrf.mxu2  ;;  %v11175_v17 = vld [vmem:[%s21088_s1 + $0x598] sm:$0xf] }
 0x525   : > { %v5093_v51 = vadd.f32 %v5092_v7, %v5044_v0  ;;  %v11176_v55 = vor.u32 %v13662_v62, %v11175_v17  ;;  %5510 = vmatpush.bf16.msrb.mxu3 %v10760_v36  ;;  %v12036_v0 = vor.u32 %v13873_v37, %v12033_v40  ;;  %v11111_v17 = vld [vmem:[%s21088_s1 + $0x518] sm:$0xf] }
 0x526   : > { %5385 = vmatmul.bf16.gmra.mxu0 %v21445_v10  ;;  %5461 = vmatpush.bf16.msrb.mxu2 %v10504_v46  ;;  %v11143_v46 = vld [vmem:[%s21088_s1 + $0x558] sm:$0xf] }
 0x527   : > { %v5141_v5 = vpop.f32.mrf.mxu3  ;;  %5554 = vmatpush.bf16.msrb.mxu0 %v11176_v55  ;;  %5412 = vmatpush.bf16.msrb.mxu1 %v12036_v0  ;;  %v6209_v40 = vmax.f32 %v5093_v51, 0.0  ;;  %v10471_v51 = vld [vmem:[%s21088_s1 + $0x18] sm:$0xf] }
 0x528   : > { %v5142_v9 = vadd.f32 %v5141_v5, %v17408_v41 }
 0x529   : > { %v5045_v42 = vpop.f32.mrf.mxu1 }
 0x52a   : > { %v5046_v6 = vadd.f32 %v5045_v42, %v17300_v22  ;;  %v17573_v61 = vadd.f32 %v5190_v49, %v5142_v9  ;;  %v13654_v22 = vld [vmem:[%s21088_s1 + $0x574] sm:$0xf0] }
 0x52b   : > { %v5192_v1 = vpop.f32.mrf.mxu0  ;;  %v11144_v7 = vor.u32 %v13654_v22, %v11143_v46  ;;  %v13646_v49 = vld [vmem:[%s21088_s1 + $0x534] sm:$0xf0] }
 0x52c   : > { %v5094_v5 = vpop.f32.mrf.mxu2  ;;  %v11112_v55 = vor.u32 %v13646_v49, %v11111_v17  ;;  %v13550_v49 = vld [vmem:[%s21088_s1 + $0x234] sm:$0xf0] }
 0x52d   : > { %5555 = vmatpush.bf16.msrb.mxu0 %v11144_v7  ;;  %v5095_v62 = vadd.f32 %v5094_v5, %v5046_v6  ;;  %v11079_v7 = vld [vmem:[%s21088_s1 + $0x4d8] sm:$0xf] }
 0x52e   : > { %v13638_v6 = vld [vmem:[%s21088_s1 + $0x4f4] sm:$0xf0] }
 0x52f   : > { %v5143_v36 = vpop.f32.mrf.mxu3  ;;  %v6217_v0 = vmax.f32 %v5095_v62, 0.0 }
 0x530   : > { %v5144_v9 = vadd.f32 %v5143_v36, %v17408_v41  ;;  %v10727_v36 = vld [vmem:[%s21088_s1 + $0x218] sm:$0xf] }
 0x531   : > { %v5048_v42 = vpop.f32.mrf.mxu1  ;;  %5556 = vmatpush.bf16.msrb.mxu0 %v11112_v55  ;;  %v17598_v5 = vpack.c.bf16 %v6217_v0, %v6209_v40  ;;  %5292 = vmatmul.bf16.gmra.mxu2 %v21379_v8  ;;  %v11047_v55 = vld [vmem:[%s21088_s1 + $0x498] sm:$0xf] }
 0x532   : > { %v5049_v37 = vadd.f32 %v5048_v42, %v17335_v25  ;;  %v17589_v22 = vadd.f32 %v5192_v1, %v5144_v9  ;;  %v11080_v25 = vor.u32 %v13638_v6, %v11079_v7  ;;  %v13486_v1 = vld [vmem:[%s21088_s1 + $0x34] sm:$0xf0]  ;;  %v10728_v42 = vor.u32 %v13550_v49, %v10727_v36  ;;  %v13865_v36 = vld [vmem:[%s21088_s1 + $0xc14] sm:$0xf] }
 0x533   : > { %v5195_v46 = vpop.f32.mrf.mxu0  ;;  %21462 = vst [vmem:[#allocation42_spill] sm:$0xff] %v17598_v5  ;;  %v10472_v17 = vor.u32 %v13486_v1, %v10471_v51  ;;  %v13630_v40 = vld [vmem:[%s21088_s1 + $0x4b4] sm:$0xf0]  ;;  %v12001_v49 = vld [vmem:[%s21088_s1 + $0xc30] sm:$0xf0] }
 0x534   : > { %5243 = vmatmul.bf16.gmra.mxu1 %v21402_v23  ;;  %5341 = vmatmul.bf16.gmra.mxu3 %v21416_v44  ;;  %v5097_v62 = vpop.f32.mrf.mxu2 }
 0x535   : > { %5557 = vmatpush.bf16.msrb.mxu0 %v11080_v25  ;;  %v5098_v0 = vadd.f32 %v5097_v62, %v5049_v37  ;;  %5462 = vmatpush.bf16.msrb.mxu2 %v10472_v17  ;;  %v11048_v25 = vor.u32 %v13630_v40, %v11047_v55  ;;  %v12004_v37 = vor.u32 %v13865_v36, %v12001_v49  ;;  %v11015_v17 = vld [vmem:[%s21088_s1 + $0x458] sm:$0xf] }
 0x536   : > { %5390 = vmatmul.bf16.gmra.mxu0 %v21448_v57  ;;  %5511 = vmatpush.bf16.msrb.mxu3 %v10728_v42  ;;  %v10983_v55 = vld [vmem:[%s21088_s1 + $0x418] sm:$0xf] }
 0x537   : > { %v5146_v9 = vpop.f32.mrf.mxu3  ;;  %5413 = vmatpush.bf16.msrb.mxu1 %v12004_v37  ;;  %v6225_v49 = vmax.f32 %v5098_v0, 0.0  ;;  %v13798_v0 = vld [vmem:[%s21088_s1 + $0x9f4] sm:$0xf0] }
 0x538   : > { %v5147_v7 = vadd.f32 %v5146_v9, %v17408_v41 }
 0x539   : > { %v5050_v6 = vpop.f32.mrf.mxu1  ;;  %5558 = vmatpush.bf16.msrb.mxu0 %v11048_v25 }
 0x53a   : > { %v5051_v51 = vadd.f32 %v5050_v6, %v17348_v56  ;;  %v17629_v5 = vadd.f32 %v5195_v46, %v5147_v7  ;;  %v13622_v56 = vld [vmem:[%s21088_s1 + $0x474] sm:$0xf0] }
 0x53b   : > { %v5197_v1 = vpop.f32.mrf.mxu0  ;;  %v11016_v62 = vor.u32 %v13622_v56, %v11015_v17  ;;  %v13614_v46 = vld [vmem:[%s21088_s1 + $0x434] sm:$0xf0] }
 0x53c   : > { %v5099_v9 = vpop.f32.mrf.mxu2  ;;  %v10984_v25 = vor.u32 %v13614_v46, %v10983_v55 }
 0x53d   : > { %5559 = vmatpush.bf16.msrb.mxu0 %v11016_v62  ;;  %v5100_v40 = vadd.f32 %v5099_v9, %v5051_v51  ;;  %v11975_v51 = vld [vmem:[%s21088_s1 + $0xbd8] sm:$0xf] }
 0x53e   : > { %v13862_v9 = vld [vmem:[%s21088_s1 + $0xbf4] sm:$0xf0] }
 0x53f   : > { %v5148_v42 = vpop.f32.mrf.mxu3  ;;  %v6233_v37 = vmax.f32 %v5100_v40, 0.0  ;;  %v11976_v46 = vor.u32 %v13862_v9, %v11975_v51 }
 0x540   : > { %v5149_v7 = vadd.f32 %v5148_v42, %v17408_v41 }
 0x541   : > { %v5053_v6 = vpop.f32.mrf.mxu1  ;;  %5560 = vmatpush.bf16.msrb.mxu0 %v10984_v25  ;;  %v17648_v62 = vpack.c.bf16 %v6233_v37, %v6225_v49  ;;  %5297 = vmatmul.bf16.gmra.mxu2 %v21383_v12  ;;  %v11463_v37 = vld [vmem:[%s21088_s1 + $0x7d8] sm:$0xf] }
 0x542   : > { %v5054_v36 = vadd.f32 %v5053_v6, %v17371_v11  ;;  %v17645_v56 = vadd.f32 %v5197_v1, %v5149_v7  ;;  %v11719_v11 = vld [vmem:[%s21088_s1 + $0x9d8] sm:$0xf]  ;;  %5700 = vmatpush.bf16.msra.mxu3 %v11976_v46 }
 0x543   : > { %v5200_v17 = vpop.f32.mrf.mxu0  ;;  %21463 = vst [vmem:[#allocation44_spill] sm:$0xff] %v17648_v62  ;;  %v11720_v1 = vor.u32 %v13798_v0, %v11719_v11  ;;  %v13734_v11 = vld [vmem:[%s21088_s1 + $0x7f4] sm:$0xf0] }
 0x544   : > { %5248 = vmatmul.bf16.gmra.mxu1 %v21406_v38  ;;  %5346 = vmatmul.bf16.gmra.mxu3 %v21419_v15  ;;  %v5102_v42 = vpop.f32.mrf.mxu2  ;;  %v11464_v51 = vor.u32 %v13734_v11, %v11463_v37  ;;  %v13854_v37 = vld [vmem:[%s21088_s1 + $0xbb4] sm:$0xf0] }
 0x545   : > { %v5103_v40 = vadd.f32 %v5102_v42, %v5054_v36  ;;  %5651 = vmatpush.bf16.msra.mxu2 %v11720_v1 }
 0x546   : > { %5395 = vmatmul.bf16.gmra.mxu0 %v21451_v50  ;;  %5602 = vmatpush.bf16.msra.mxu1 %v11464_v51  ;;  %v21464_v50 = vld [vmem:[#allocation31_spill] sm:$0xff] }
 0x547   : > { %v5151_v55 = vpop.f32.mrf.mxu3  ;;  %v6241_v46 = vmax.f32 %v5103_v40, 0.0  ;;  %v11943_v40 = vld [vmem:[%s21088_s1 + $0xb98] sm:$0xf] }
 0x548   : > { %v5152_v7 = vadd.f32 %v5151_v55, %v17408_v41 }
 0x549   : > { %v5055_v6 = vpop.f32.mrf.mxu1 }
 0x54a   : > { %v5056_v25 = vadd.f32 %v5055_v6, %v17378_v21  ;;  %v17673_v0 = vadd.f32 %v5200_v17, %v5152_v7  ;;  %v21466_v17 = vld [vmem:[#allocation32_spill] sm:$0xff]  ;;  %v21467_v7 = vld [vmem:[#allocation33_spill] sm:$0xff] }
 0x54b   : > { %v5202_v49 = vpop.f32.mrf.mxu0 }
 0x54c   : > { %v5104_v36 = vpop.f32.mrf.mxu2 }
 0x54d   : > { %v5105_v42 = vadd.f32 %v5104_v36, %v5056_v25  ;;  %v11687_v25 = vld [vmem:[%s21088_s1 + $0x998] sm:$0xf]  ;;  %v11944_v36 = vor.u32 %v13854_v37, %v11943_v40 }
 0x54f   : > { %v5153_v9 = vpop.f32.mrf.mxu3  ;;  %v6249_v6 = vmax.f32 %v5105_v42, 0.0  ;;  %5701 = vmatpush.bf16.msra.mxu3 %v11944_v36 }
 0x550   : > { %v5154_v1 = vadd.f32 %v5153_v9, %v17408_v41 }
 0x551   : > { %v5058_v21 = vpop.f32.mrf.mxu1  ;;  %v17680_v15 = vpack.c.bf16 %v6249_v6, %v6241_v46  ;;  %5302 = vmatmul.bf16.gmra.mxu2 %v21466_v17  ;;  %v11431_v6 = vld [vmem:[%s21088_s1 + $0x798] sm:$0xf] }
 0x552   : > { %v5059_v55 = vadd.f32 %v5058_v21, %v17401_v45  ;;  %v17677_v32 = vadd.f32 %v5202_v49, %v5154_v1  ;;  %v13790_v45 = vld [vmem:[%s21088_s1 + $0x9b4] sm:$0xf0] }
 0x553   : > { %v5205_v62 = vpop.f32.mrf.mxu0  ;;  %21465 = vst [vmem:[#allocation21_spill] sm:$0xff] %v17680_v15  ;;  %v11688_v49 = vor.u32 %v13790_v45, %v11687_v25  ;;  %v13726_v25 = vld [vmem:[%s21088_s1 + $0x7b4] sm:$0xf0] }
 0x554   : > { %5253 = vmatmul.bf16.gmra.mxu1 %v21464_v50  ;;  %5351 = vmatmul.bf16.gmra.mxu3 %v21467_v7  ;;  %v5107_v11 = vpop.f32.mrf.mxu2  ;;  %v11432_v40 = vor.u32 %v13726_v25, %v11431_v6  ;;  %v21468_v7 = vld [vmem:[#allocation35_spill] sm:$0xff] }
 0x555   : > { %v5108_v9 = vadd.f32 %v5107_v11, %v5059_v55  ;;  %5652 = vmatpush.bf16.msra.mxu2 %v11688_v49 }
 0x556   : > { %5400 = vmatmul.bf16.gmra.mxu0 %v21454_v43  ;;  %5603 = vmatpush.bf16.msra.mxu1 %v11432_v40 }
 0x557   : > { %v5156_v51 = vpop.f32.mrf.mxu3  ;;  %v6257_v36 = vmax.f32 %v5108_v9, 0.0  ;;  %v11911_v9 = vld [vmem:[%s21088_s1 + $0xb58] sm:$0xf] }
 0x558   : > { %v5157_v42 = vadd.f32 %v5156_v51, %v17408_v41 }
 0x559   : > { %v5060_v1 = vpop.f32.mrf.mxu1 }
 0x55a   : > { %v5061_v21 = vadd.f32 %v5060_v1, %v17410_v26  ;;  %v17705_v45 = vadd.f32 %v5205_v62, %v5157_v42  ;;  %v21470_v62 = vld [vmem:[#allocation2_spill] sm:$0xff] }
 0x55b   : > { %v5207_v46 = vpop.f32.mrf.mxu0  ;;  %v21471_v42 = vld [vmem:[#allocation10_spill] sm:$0xff] }
 0x55c   : > { %v5109_v55 = vpop.f32.mrf.mxu2 }
 0x55d   : > { %v5110_v11 = vadd.f32 %v5109_v55, %v5061_v21 }
 0x55f   : > { %v5158_v37 = vpop.f32.mrf.mxu3  ;;  %v6265_v1 = vmax.f32 %v5110_v11, 0.0 }
 0x560   : > { %v5159_v49 = vadd.f32 %v5158_v37, %v17408_v41  ;;  %v11655_v41 = vld [vmem:[%s21088_s1 + $0x958] sm:$0xf] }
 0x561   : > { %v5219_v26 = vpop.f32.mrf.mxu1  ;;  %v17712_v17 = vpack.c.bf16 %v6265_v1, %v6257_v36  ;;  %5463 = vmatmul.bf16.vlgmr.msrb.gmra.mxu2 %v21470_v62  ;;  %v11399_v36 = vld [vmem:[%s21088_s1 + $0x758] sm:$0xf] }
 0x562   : > { %v5220_v51 = vadd.f32 %v5219_v26, %v17433_v52  ;;  %v17709_v43 = vadd.f32 %v5207_v46, %v5159_v49  ;;  %v13782_v52 = vld [vmem:[%s21088_s1 + $0x974] sm:$0xf0] }
 0x563   : > { %v5366_v15 = vpop.f32.mrf.mxu0  ;;  %21469 = vst [vmem:[#allocation78_spill] sm:$0xff] %v17712_v17  ;;  %v11656_v21 = vor.u32 %v13782_v52, %v11655_v41  ;;  %v13846_v46 = vld [vmem:[%s21088_s1 + $0xb74] sm:$0xf0] }
 0x564   : > { %5414 = vmatmul.bf16.vlgmr.msrb.gmra.mxu1 %v21468_v7  ;;  %5512 = vmatmul.bf16.vlgmr.msrb.gmra.mxu3 %v21471_v42  ;;  %v5268_v6 = vpop.f32.mrf.mxu2  ;;  %v11912_v40 = vor.u32 %v13846_v46, %v11911_v9  ;;  %v13718_v1 = vld [vmem:[%s21088_s1 + $0x774] sm:$0xf0] }
 0x565   : > { %v5269_v55 = vadd.f32 %v5268_v6, %v5220_v51  ;;  %5653 = vmatpush.bf16.msra.mxu2 %v11656_v21  ;;  %v11400_v41 = vor.u32 %v13718_v1, %v11399_v36  ;;  %v11367_v17 = vld [vmem:[%s21088_s1 + $0x718] sm:$0xf] }
 0x566   : > { %5561 = vmatmul.bf16.vlgmr.msrb.gmra.mxu0 %v14666_v53  ;;  %5702 = vmatpush.bf16.msra.mxu3 %v11912_v40  ;;  %v21472_v40 = vld [vmem:[#allocation6_spill] sm:$0xff] }
 0x567   : > { %v5317_v25 = vpop.f32.mrf.mxu3  ;;  %5604 = vmatpush.bf16.msra.mxu1 %v11400_v41 }
 0x568   : > { %v5318_v49 = vadd.f32 %v5317_v25, %v5269_v55  ;;  %v21473_v55 = vld [vmem:[#allocation12_spill] sm:$0xff] }
 0x569   : > { %v5221_v37 = vpop.f32.mrf.mxu1 }
 0x56a   : > { %v5222_v11 = vadd.f32 %v5221_v37, %v17437_v29  ;;  %v17736_v52 = vadd.f32 %v5366_v15, %v5318_v49  ;;  %v11623_v15 = vld [vmem:[%s21088_s1 + $0x918] sm:$0xf] }
 0x56b   : > { %v5368_v26 = vpop.f32.mrf.mxu0 }
 0x56c   : > { %v5270_v51 = vpop.f32.mrf.mxu2 }
 0x56d   : > { %v5271_v21 = vadd.f32 %v5270_v51, %v5222_v11  ;;  %v11879_v11 = vld [vmem:[%s21088_s1 + $0xb18] sm:$0xf] }
 0x56f   : > { %v5319_v9 = vpop.f32.mrf.mxu3 }
 0x570   : > { %v5320_v6 = vadd.f32 %v5319_v9, %v5271_v21 }
 0x571   : > { %v5224_v46 = vpop.f32.mrf.mxu1  ;;  %5468 = vmatmul.bf16.gmra.mxu2 %v21472_v40 }
 0x572   : > { %v5225_v29 = vadd.f32 %v5224_v46, %v17465_v48  ;;  %v17742_v37 = vadd.f32 %v5368_v26, %v5320_v6  ;;  %v13774_v48 = vld [vmem:[%s21088_s1 + $0x934] sm:$0xf0] }
 0x573   : > { %v5371_v25 = vpop.f32.mrf.mxu0  ;;  %v11624_v49 = vor.u32 %v13774_v48, %v11623_v15  ;;  %v13838_v26 = vld [vmem:[%s21088_s1 + $0xb34] sm:$0xf0] }
 0x574   : > { %5419 = vmatmul.bf16.gmra.mxu1 %v21437_v33  ;;  %5517 = vmatmul.bf16.gmra.mxu3 %v21473_v55  ;;  %v5273_v36 = vpop.f32.mrf.mxu2  ;;  %v11880_v41 = vor.u32 %v13838_v26, %v11879_v11  ;;  %v13710_v15 = vld [vmem:[%s21088_s1 + $0x734] sm:$0xf0] }
 0x575   : > { %v5274_v51 = vadd.f32 %v5273_v36, %v5225_v29  ;;  %5654 = vmatpush.bf16.msra.mxu2 %v11624_v49  ;;  %v11368_v48 = vor.u32 %v13710_v15, %v11367_v17  ;;  %v11591_v17 = vld [vmem:[%s21088_s1 + $0x8d8] sm:$0xf] }
 0x576   : > { %5566 = vmatmul.bf16.gmra.mxu0 %v21391_v60  ;;  %5703 = vmatpush.bf16.msra.mxu3 %v11880_v41  ;;  %v21474_v41 = vld [vmem:[#allocation39_spill] sm:$0xff] }
 0x577   : > { %v5322_v1 = vpop.f32.mrf.mxu3  ;;  %5605 = vmatpush.bf16.msra.mxu1 %v11368_v48 }
 0x578   : > { %v5323_v46 = vadd.f32 %v5322_v1, %v5274_v51  ;;  %v21475_v51 = vld [vmem:[#allocation3_spill] sm:$0xff] }
 0x579   : > { %v5226_v9 = vpop.f32.mrf.mxu1 }
 0x57a   : > { %v5227_v21 = vadd.f32 %v5226_v9, %v17469_v19  ;;  %v17764_v60 = vadd.f32 %v5371_v25, %v5323_v46  ;;  %v21476_v9 = vld [vmem:[#allocation14_spill] sm:$0xff]  ;;  %v11847_v25 = vld [vmem:[%s21088_s1 + $0xad8] sm:$0xf] }
 0x57b   : > { %v5373_v6 = vpop.f32.mrf.mxu0  ;;  %v13830_v46 = vld [vmem:[%s21088_s1 + $0xaf4] sm:$0xf0] }
 0x57c   : > { %v5275_v29 = vpop.f32.mrf.mxu2  ;;  %v11848_v48 = vor.u32 %v13830_v46, %v11847_v25 }
 0x57d   : > { %v5276_v49 = vadd.f32 %v5275_v29, %v5227_v21 }
 0x57e   : > { %5704 = vmatpush.bf16.msra.mxu3 %v11848_v48  ;;  %v21477_v48 = vld [vmem:[#allocation41_spill] sm:$0xff] }
 0x57f   : > { %v5324_v11 = vpop.f32.mrf.mxu3 }
 0x580   : > { %v5325_v36 = vadd.f32 %v5324_v11, %v5276_v49 }
 0x581   : > { %v5229_v26 = vpop.f32.mrf.mxu1  ;;  %5473 = vmatmul.bf16.gmra.mxu2 %v21475_v51 }
 0x582   : > { %v5230_v19 = vadd.f32 %v5229_v26, %v17497_v18  ;;  %v17770_v55 = vadd.f32 %v5373_v6, %v5325_v36  ;;  %v13766_v18 = vld [vmem:[%s21088_s1 + $0x8f4] sm:$0xf0] }
 0x583   : > { %v5376_v1 = vpop.f32.mrf.mxu0  ;;  %v11592_v21 = vor.u32 %v13766_v18, %v11591_v17  ;;  %v13702_v17 = vld [vmem:[%s21088_s1 + $0x6f4] sm:$0xf0] }
 0x584   : > { %5424 = vmatmul.bf16.gmra.mxu1 %v21474_v41  ;;  %5522 = vmatmul.bf16.gmra.mxu3 %v21476_v9  ;;  %v5278_v6 = vpop.f32.mrf.mxu2 }
 0x585   : > { %v5279_v29 = vadd.f32 %v5278_v6, %v5230_v19  ;;  %5655 = vmatpush.bf16.msra.mxu2 %v11592_v21 }
 0x586   : > { %5571 = vmatmul.bf16.gmra.mxu0 %v21394_v39  ;;  %v11335_v39 = vld [vmem:[%s21088_s1 + $0x6d8] sm:$0xf] }
 0x587   : > { %v5327_v15 = vpop.f32.mrf.mxu3  ;;  %v11336_v18 = vor.u32 %v13702_v17, %v11335_v39  ;;  %v11559_v39 = vld [vmem:[%s21088_s1 + $0x898] sm:$0xf] }
 0x588   : > { %v5328_v26 = vadd.f32 %v5327_v15, %v5279_v29  ;;  %v21478_v29 = vld [vmem:[#allocation7_spill] sm:$0xff] }
 0x589   : > { %v5231_v11 = vpop.f32.mrf.mxu1  ;;  %5606 = vmatpush.bf16.msra.mxu1 %v11336_v18 }
 0x58a   : > { %v5232_v49 = vadd.f32 %v5231_v11, %v17501_v2  ;;  %v17792_v9 = vadd.f32 %v5376_v1, %v5328_v26  ;;  %v21479_v11 = vld [vmem:[#allocation16_spill] sm:$0xff]  ;;  %v11815_v1 = vld [vmem:[%s21088_s1 + $0xa98] sm:$0xf] }
 0x58b   : > { %v5378_v36 = vpop.f32.mrf.mxu0  ;;  %v13822_v26 = vld [vmem:[%s21088_s1 + $0xab4] sm:$0xf0] }
 0x58c   : > { %v5280_v19 = vpop.f32.mrf.mxu2  ;;  %v11816_v18 = vor.u32 %v13822_v26, %v11815_v1 }
 0x58d   : > { %v5281_v21 = vadd.f32 %v5280_v19, %v5232_v49 }
 0x58e   : > { %5705 = vmatpush.bf16.msra.mxu3 %v11816_v18  ;;  %v21480_v18 = vld [vmem:[#allocation43_spill] sm:$0xff] }
 0x58f   : > { %v5329_v25 = vpop.f32.mrf.mxu3 }
 0x590   : > { %v5330_v6 = vadd.f32 %v5329_v25, %v5281_v21 }
 0x591   : > { %v5234_v46 = vpop.f32.mrf.mxu1  ;;  %5478 = vmatmul.bf16.gmra.mxu2 %v21478_v29 }
 0x592   : > { %v5235_v2 = vadd.f32 %v5234_v46, %v17529_v24  ;;  %v17798_v51 = vadd.f32 %v5378_v36, %v5330_v6  ;;  %v13758_v24 = vld [vmem:[%s21088_s1 + $0x8b4] sm:$0xf0] }
 0x593   : > { %v5381_v15 = vpop.f32.mrf.mxu0  ;;  %v11560_v49 = vor.u32 %v13758_v24, %v11559_v39  ;;  %v13694_v39 = vld [vmem:[%s21088_s1 + $0x6b4] sm:$0xf0] }
 0x594   : > { %5429 = vmatmul.bf16.gmra.mxu1 %v21477_v48  ;;  %5527 = vmatmul.bf16.gmra.mxu3 %v21479_v11  ;;  %v5283_v36 = vpop.f32.mrf.mxu2 }
 0x595   : > { %v5284_v19 = vadd.f32 %v5283_v36, %v5235_v2  ;;  %5656 = vmatpush.bf16.msra.mxu2 %v11560_v49 }
 0x596   : > { %5576 = vmatmul.bf16.gmra.mxu0 %v21397_v31  ;;  %v11303_v31 = vld [vmem:[%s21088_s1 + $0x698] sm:$0xf] }
 0x597   : > { %v5332_v17 = vpop.f32.mrf.mxu3  ;;  %v11304_v24 = vor.u32 %v13694_v39, %v11303_v31  ;;  %v13926_v31 = vld [vmem:[%s21088_s1 + $0xdf4] sm:$0xf0] }
 0x598   : > { %v5333_v46 = vadd.f32 %v5332_v17, %v5284_v19  ;;  %v12231_v19 = vld [vmem:[%s21088_s1 + $0xdd8] sm:$0xf] }
 0x599   : > { %v5236_v25 = vpop.f32.mrf.mxu1  ;;  %5607 = vmatpush.bf16.msra.mxu1 %v11304_v24  ;;  %v13750_v39 = vld [vmem:[%s21088_s1 + $0x874] sm:$0xf0] }
 0x59a   : > { %v5237_v21 = vadd.f32 %v5236_v25, %v17533_v47  ;;  %v17820_v11 = vadd.f32 %v5381_v15, %v5333_v46  ;;  %v21481_v15 = vld [vmem:[#allocation4_spill] sm:$0xff]  ;;  %v21482_v25 = vld [vmem:[#allocation18_spill] sm:$0xff]  ;;  %v11783_v24 = vld [vmem:[%s21088_s1 + $0xa58] sm:$0xf] }
 0x59b   : > { %v5383_v6 = vpop.f32.mrf.mxu0 }
 0x59c   : > { %v5285_v2 = vpop.f32.mrf.mxu2 }
 0x59d   : > { %v5286_v49 = vadd.f32 %v5285_v2, %v5237_v21  ;;  %v12232_v21 = vor.u32 %v13926_v31, %v12231_v19  ;;  %v13918_v19 = vld [vmem:[%s21088_s1 + $0xdb4] sm:$0xf0] }
 0x59f   : > { %v5334_v1 = vpop.f32.mrf.mxu3  ;;  %5749 = vmatpush.bf16.msra.mxu0 %v12232_v21 }
 0x5a0   : > { %v5335_v36 = vadd.f32 %v5334_v1, %v5286_v49 }
 0x5a1   : > { %v5239_v26 = vpop.f32.mrf.mxu1  ;;  %5483 = vmatmul.bf16.gmra.mxu2 %v21481_v15 }
 0x5a2   : > { %v5240_v47 = vadd.f32 %v5239_v26, %v17573_v61  ;;  %v17832_v46 = vadd.f32 %v5383_v6, %v5335_v36  ;;  %v11527_v61 = vld [vmem:[%s21088_s1 + $0x858] sm:$0xf] }
 0x5a3   : > { %v5386_v17 = vpop.f32.mrf.mxu0  ;;  %v11528_v2 = vor.u32 %v13750_v39, %v11527_v61  ;;  %v13814_v6 = vld [vmem:[%s21088_s1 + $0xa74] sm:$0xf0] }
 0x5a4   : > { %5434 = vmatmul.bf16.gmra.mxu1 %v21480_v18  ;;  %5532 = vmatmul.bf16.gmra.mxu3 %v21482_v25  ;;  %v5288_v1 = vpop.f32.mrf.mxu2  ;;  %v11784_v26 = vor.u32 %v13814_v6, %v11783_v24  ;;  %v12199_v36 = vld [vmem:[%s21088_s1 + $0xd98] sm:$0xf] }
 0x5a5   : > { %v5289_v31 = vadd.f32 %v5288_v1, %v5240_v47  ;;  %5657 = vmatpush.bf16.msra.mxu2 %v11528_v2  ;;  %v12200_v61 = vor.u32 %v13918_v19, %v12199_v36  ;;  %v11271_v24 = vld [vmem:[%s21088_s1 + $0x658] sm:$0xf] }
 0x5a6   : > { %5581 = vmatmul.bf16.gmra.mxu0 %v14818_v27  ;;  %5706 = vmatpush.bf16.msra.mxu3 %v11784_v26  ;;  %v13686_v6 = vld [vmem:[%s21088_s1 + $0x674] sm:$0xf0] }
 0x5a7   : > { %v5337_v49 = vpop.f32.mrf.mxu3  ;;  %5750 = vmatpush.bf16.msra.mxu0 %v12200_v61  ;;  %v12167_v47 = vld [vmem:[%s21088_s1 + $0xd58] sm:$0xf]  ;;  %v11272_v2 = vor.u32 %v13686_v6, %v11271_v24 }
 0x5a8   : > { %v5338_v39 = vadd.f32 %v5337_v49, %v5289_v31  ;;  %v12135_v36 = vld [vmem:[%s21088_s1 + $0xd18] sm:$0xf] }
 0x5a9   : > { %v5241_v27 = vpop.f32.mrf.mxu1  ;;  %5608 = vmatpush.bf16.msra.mxu1 %v11272_v2  ;;  %v13902_v19 = vld [vmem:[%s21088_s1 + $0xd34] sm:$0xf0] }
 0x5aa   : > { %v5242_v21 = vadd.f32 %v5241_v27, %v17589_v22  ;;  %v13910_v27 = vld [vmem:[%s21088_s1 + $0xd74] sm:$0xf0]  ;;  %v17866_v1 = vadd.f32 %v5386_v17, %v5338_v39  ;;  %v12136_v24 = vor.u32 %v13902_v19, %v12135_v36 }
 0x5ab   : > { %v5388_v25 = vpop.f32.mrf.mxu0  ;;  %v12168_v22 = vor.u32 %v13910_v27, %v12167_v47  ;;  %v21483_v39 = vld [vmem:[#allocation45_spill] sm:$0xff] }
 0x5ac   : > { %v5290_v49 = vpop.f32.mrf.mxu2  ;;  %v12103_v2 = vld [vmem:[%s21088_s1 + $0xcd8] sm:$0xf] }
 0x5ad   : > { %5751 = vmatpush.bf16.msra.mxu0 %v12168_v22  ;;  %v5291_v31 = vadd.f32 %v5290_v49, %v5242_v21  ;;  %v13894_v27 = vld [vmem:[%s21088_s1 + $0xcf4] sm:$0xf0]  ;;  %v21484_v22 = vld [vmem:[#allocation8_spill] sm:$0xff]  ;;  %v21485_v21 = vld [vmem:[#allocation22_spill] sm:$0xff] }
 0x5ae   : > { %v12104_v49 = vor.u32 %v13894_v27, %v12103_v2  ;;  %v11751_v19 = vld [vmem:[%s21088_s1 + $0xa18] sm:$0xf] }
 0x5af   : > { %v5339_v26 = vpop.f32.mrf.mxu3  ;;  %v12071_v2 = vld [vmem:[%s21088_s1 + $0xc98] sm:$0xf] }
 0x5b0   : > { %v5340_v47 = vadd.f32 %v5339_v26, %v5291_v31  ;;  %v13742_v26 = vld [vmem:[%s21088_s1 + $0x834] sm:$0xf0] }
 0x5b1   : > { %v5244_v61 = vpop.f32.mrf.mxu1  ;;  %5752 = vmatpush.bf16.msra.mxu0 %v12136_v24  ;;  %5488 = vmatmul.bf16.gmra.mxu2 %v21484_v22  ;;  %v13886_v27 = vld [vmem:[%s21088_s1 + $0xcb4] sm:$0xf0] }
 0x5b2   : > { %v5245_v6 = vadd.f32 %v5244_v61, %v17629_v5  ;;  %v17884_v36 = vadd.f32 %v5388_v25, %v5340_v47  ;;  %v11495_v5 = vld [vmem:[%s21088_s1 + $0x818] sm:$0xf] }
 0x5b3   : > { %v5391_v17 = vpop.f32.mrf.mxu0  ;;  %v11496_v31 = vor.u32 %v13742_v26, %v11495_v5  ;;  %v13806_v25 = vld [vmem:[%s21088_s1 + $0xa34] sm:$0xf0]  ;;  %v12072_v5 = vor.u32 %v13886_v27, %v12071_v2 }
 0x5b4   : > { %5439 = vmatmul.bf16.gmra.mxu1 %v21483_v39  ;;  %5537 = vmatmul.bf16.gmra.mxu3 %v21485_v21  ;;  %v5293_v61 = vpop.f32.mrf.mxu2  ;;  %v11752_v47 = vor.u32 %v13806_v25, %v11751_v19  ;;  %v11239_v19 = vld [vmem:[%s21088_s1 + $0x618] sm:$0xf] }
 0x5b5   : > { %5753 = vmatpush.bf16.msra.mxu0 %v12104_v49  ;;  %5658 = vmatpush.bf16.msra.mxu2 %v11496_v31  ;;  %v13678_v25 = vld [vmem:[%s21088_s1 + $0x634] sm:$0xf0] }
 0x5b6   : > { %5586 = vmatmul.bf16.gmra.mxu0 %v21402_v23  ;;  %v5294_v23 = vadd.f32 %v5293_v61, %v5245_v6  ;;  %5707 = vmatpush.bf16.msra.mxu3 %v11752_v47  ;;  %v12039_v6 = vld [vmem:[%s21088_s1 + $0xc58] sm:$0xf]  ;;  %v11240_v31 = vor.u32 %v13678_v25, %v11239_v19 }
 0x5b7   : > { %v5342_v24 = vpop.f32.mrf.mxu3  ;;  %v12007_v47 = vld [vmem:[%s21088_s1 + $0xc18] sm:$0xf] }
 0x5b8   : > { %v5343_v26 = vadd.f32 %v5342_v24, %v5294_v23  ;;  %5609 = vmatpush.bf16.msra.mxu1 %v11240_v31  ;;  %v13870_v2 = vld [vmem:[%s21088_s1 + $0xc34] sm:$0xf0] }
 0x5b9   : > { %v5246_v21 = vpop.f32.mrf.mxu1  ;;  %5754 = vmatpush.bf16.msra.mxu0 %v12072_v5  ;;  %v12008_v19 = vor.u32 %v13870_v2, %v12007_v47  ;;  %v21487_v31 = vld [vmem:[#allocation5_spill] sm:$0xff] }
 0x5ba   : > { %v5247_v49 = vadd.f32 %v5246_v21, %v17645_v56  ;;  %v13878_v56 = vld [vmem:[%s21088_s1 + $0xc74] sm:$0xf0]  ;;  %v17918_v21 = vadd.f32 %v5391_v17, %v5343_v26  ;;  %v21486_v26 = vld [vmem:[#allocation47_spill] sm:$0xff] }
 0x5bb   : > { %v5393_v22 = vpop.f32.mrf.mxu0  ;;  %v12040_v23 = vor.u32 %v13878_v56, %v12039_v6  ;;  %v21488_v56 = vld [vmem:[#allocation26_spill] sm:$0xff] }
 0x5bc   : > { %v5295_v61 = vpop.f32.mrf.mxu2 }
 0x5bd   : > { %5755 = vmatpush.bf16.msra.mxu0 %v12040_v23  ;;  %v5296_v27 = vadd.f32 %v5295_v61, %v5247_v49  ;;  %v13602_v49 = vld [vmem:[%s21088_s1 + $0x3dc] sm:$0xf] }
 0x5be   : > { %v13666_v61 = vld [vmem:[%s21088_s1 + $0x5dc] sm:$0xf] }
 0x5bf   : > { %v5344_v24 = vpop.f32.mrf.mxu3 }
 0x5c0   : > { %v5345_v6 = vadd.f32 %v5344_v24, %v5296_v27 }
 0x5c1   : > { %v5249_v5 = vpop.f32.mrf.mxu1  ;;  %5756 = vmatpush.bf16.msra.mxu0 %v12008_v19  ;;  %5493 = vmatmul.bf16.gmra.mxu2 %v21487_v31  ;;  %v13538_v31 = vld [vmem:[%s21088_s1 + $0x1dc] sm:$0xf] }
 0x5c2   : > { %v5250_v25 = vadd.f32 %v5249_v5, %v17673_v0  ;;  %v17930_v23 = vadd.f32 %v5393_v22, %v5345_v6  ;;  %v10953_v0 = vld [vmem:[%s21088_s1 + $0x3f8] sm:$0xf0] }
 0x5c3   : > { %v5396_v17 = vpop.f32.mrf.mxu0  ;;  %v10956_v24 = vor.u32 %v13602_v49, %v10953_v0  ;;  %v11209_v22 = vld [vmem:[%s21088_s1 + $0x5f8] sm:$0xf0] }
 0x5c4   : > { %5444 = vmatmul.bf16.gmra.mxu1 %v21486_v26  ;;  %5542 = vmatmul.bf16.gmra.mxu3 %v21488_v56  ;;  %v5298_v47 = vpop.f32.mrf.mxu2  ;;  %v11212_v27 = vor.u32 %v13666_v61, %v11209_v22  ;;  %v10697_v49 = vld [vmem:[%s21088_s1 + $0x1f8] sm:$0xf0] }
 0x5c5   : > { %v5299_v5 = vadd.f32 %v5298_v47, %v5250_v25  ;;  %5847 = vmatpush.bf16.msrb.mxu2 %v10956_v24  ;;  %v10700_v0 = vor.u32 %v13538_v31, %v10697_v49 }
 0x5c6   : > { %5591 = vmatmul.bf16.gmra.mxu0 %v21406_v38  ;;  %5896 = vmatpush.bf16.msrb.mxu3 %v11212_v27  ;;  %v21489_v27 = vld [vmem:[#allocation9_spill] sm:$0xff] }
 0x5c7   : > { %v5347_v2 = vpop.f32.mrf.mxu3  ;;  %5798 = vmatpush.bf16.msrb.mxu1 %v10700_v0 }
 0x5c8   : > { %v5348_v38 = vadd.f32 %v5347_v2, %v5299_v5  ;;  %v21490_v5 = vld [vmem:[#allocation30_spill] sm:$0xff] }
 0x5c9   : > { %v5251_v19 = vpop.f32.mrf.mxu1 }
 0x5ca   : > { %v5252_v6 = vadd.f32 %v5251_v19, %v17677_v32  ;;  %v17952_v15 = vadd.f32 %v5396_v17, %v5348_v38  ;;  %v13594_v38 = vld [vmem:[%s21088_s1 + $0x39c] sm:$0xf] }
 0x5cb   : > { %v5398_v56 = vpop.f32.mrf.mxu0  ;;  %v13658_v17 = vld [vmem:[%s21088_s1 + $0x59c] sm:$0xf] }
 0x5cc   : > { %v5300_v25 = vpop.f32.mrf.mxu2 }
 0x5cd   : > { %v5301_v24 = vadd.f32 %v5300_v25, %v5252_v6 }
 0x5cf   : > { %v5349_v61 = vpop.f32.mrf.mxu3 }
 0x5d0   : > { %v5350_v47 = vadd.f32 %v5349_v61, %v5301_v24 }
 0x5d1   : > { %v5254_v22 = vpop.f32.mrf.mxu1  ;;  %5498 = vmatmul.bf16.gmra.mxu2 %v21489_v27 }
 0x5d2   : > { %v5255_v32 = vadd.f32 %v5254_v22, %v17705_v45  ;;  %v17958_v19 = vadd.f32 %v5398_v56, %v5350_v47  ;;  %v10921_v45 = vld [vmem:[%s21088_s1 + $0x3b8] sm:$0xf0] }
 0x5d3   : > { %v5401_v2 = vpop.f32.mrf.mxu0  ;;  %v10924_v31 = vor.u32 %v13594_v38, %v10921_v45  ;;  %v11177_v56 = vld [vmem:[%s21088_s1 + $0x5b8] sm:$0xf0] }
 0x5d4   : > { %5449 = vmatmul.bf16.gmra.mxu1 %v21455_v63  ;;  %5547 = vmatmul.bf16.gmra.mxu3 %v21490_v5  ;;  %v5303_v6 = vpop.f32.mrf.mxu2  ;;  %v11180_v0 = vor.u32 %v13658_v17, %v11177_v56  ;;  %v10665_v38 = vld [vmem:[%s21088_s1 + $0x1b8] sm:$0xf0] }
 0x5d5   : > { %v5304_v25 = vadd.f32 %v5303_v6, %v5255_v32  ;;  %5848 = vmatpush.bf16.msrb.mxu2 %v10924_v31 }
 0x5d6   : > { %5596 = vmatmul.bf16.gmra.mxu0 %v21464_v50  ;;  %5897 = vmatpush.bf16.msrb.mxu3 %v11180_v0  ;;  %v13530_v50 = vld [vmem:[%s21088_s1 + $0x19c] sm:$0xf]  ;;  %v21491_v0 = vld [vmem:[#allocation34_spill] sm:$0xff] }
 0x5d7   : > { %v5352_v49 = vpop.f32.mrf.mxu3  ;;  %v10668_v45 = vor.u32 %v13530_v50, %v10665_v38  ;;  %v14261_v50 = vld [vmem:[%s21089_s2] sm:$0xff] }
 0x5d8   : > { %v5353_v22 = vadd.f32 %v5352_v49, %v5304_v25 }
 0x5d9   : > { %v5256_v61 = vpop.f32.mrf.mxu1  ;;  %5799 = vmatpush.bf16.msrb.mxu1 %v10668_v45 }
 0x5da   : > { %v5257_v24 = vadd.f32 %v5256_v61, %v17709_v43  ;;  %v17980_v5 = vadd.f32 %v5401_v2, %v5353_v22  ;;  %v17989_v2 = vperm.slane %v14261_v50, 6  ;;  %v10889_v61 = vld [vmem:[%s21088_s1 + $0x378] sm:$0xf0] }
 0x5db   : > { %v5403_v47 = vpop.f32.mrf.mxu0 }
 0x5dc   : > { %v5305_v32 = vpop.f32.mrf.mxu2 }
 0x5dd   : > { %v5306_v31 = vadd.f32 %v5305_v32, %v5257_v24  ;;  %v13650_v24 = vld [vmem:[%s21088_s1 + $0x55c] sm:$0xf] }
 0x5df   : > { %v5354_v17 = vpop.f32.mrf.mxu3 }
 0x5e0   : > { %v5355_v6 = vadd.f32 %v5354_v17, %v5306_v31 }
 0x5e1   : > { %v5415_v56 = vpop.f32.mrf.mxu1  ;;  %5659 = vmatmul.bf16.vlgmr.msra.gmra.mxu2 %v21409_v58 }
 0x5e2   : > { %v5416_v43 = vadd.f32 %v5415_v56, %v17736_v52  ;;  %v17991_v25 = vadd.f32 %v5403_v47, %v5355_v6  ;;  %v13586_v52 = vld [vmem:[%s21088_s1 + $0x35c] sm:$0xf] }
 0x5e3   : > { %v5562_v49 = vpop.f32.mrf.mxu0  ;;  %v10892_v22 = vor.u32 %v13586_v52, %v10889_v61  ;;  %v11145_v47 = vld [vmem:[%s21088_s1 + $0x578] sm:$0xf0] }
 0x5e4   : > { %5610 = vmatmul.bf16.vlgmr.msra.gmra.mxu1 %v14668_v54  ;;  %5708 = vmatmul.bf16.vlgmr.msra.gmra.mxu3 %v21491_v0  ;;  %v5464_v38 = vpop.f32.mrf.mxu2  ;;  %v11148_v32 = vor.u32 %v13650_v24, %v11145_v47  ;;  %v13522_v52 = vld [vmem:[%s21088_s1 + $0x15c] sm:$0xf] }
 0x5e5   : > { %v5465_v17 = vadd.f32 %v5464_v38, %v17989_v2  ;;  %5849 = vmatpush.bf16.msrb.mxu2 %v10892_v22  ;;  %v10633_v61 = vld [vmem:[%s21088_s1 + $0x178] sm:$0xf0] }
 0x5e6   : > { %5757 = vmatmul.bf16.vlgmr.msra.gmra.mxu0 %v21468_v7  ;;  %5898 = vmatpush.bf16.msrb.mxu3 %v11148_v32  ;;  %v6146_v7 = vmax.f32 %v5416_v43, 0.0  ;;  %v10636_v24 = vor.u32 %v13522_v52, %v10633_v61 }
 0x5e7   : > { %v5513_v45 = vpop.f32.mrf.mxu3 }
 0x5e8   : > { %v5514_v6 = vadd.f32 %v5513_v45, %v5465_v17  ;;  %5800 = vmatpush.bf16.msrb.mxu1 %v10636_v24 }
 0x5e9   : > { %v5417_v31 = vpop.f32.mrf.mxu1 }
 0x5ea   : > { %v5418_v56 = vadd.f32 %v5417_v31, %v17742_v37  ;;  %v18014_v47 = vadd.f32 %v5562_v49, %v5514_v6  ;;  %v13642_v49 = vld [vmem:[%s21088_s1 + $0x51c] sm:$0xf] }
 0x5eb   : > { %v5564_v50 = vpop.f32.mrf.mxu0 }
 0x5ec   : > { %v6154_v0 = vmax.f32 %v5418_v56, 0.0  ;;  %v5466_v37 = vpop.f32.mrf.mxu2  ;;  %v11113_v56 = vld [vmem:[%s21088_s1 + $0x538] sm:$0xf0] }
 0x5ed   : > { %v5467_v45 = vadd.f32 %v5466_v37, %v17989_v2  ;;  %v11116_v52 = vor.u32 %v13642_v49, %v11113_v56 }
 0x5ee   : > { %v18016_v38 = vpack.c.bf16 %v6154_v0, %v6146_v7  ;;  %v13578_v7 = vld [vmem:[%s21088_s1 + $0x31c] sm:$0xf] }
 0x5ef   : > { %v5515_v22 = vpop.f32.mrf.mxu3  ;;  %5899 = vmatpush.bf16.msrb.mxu3 %v11116_v52 }
 0x5f0   : > { %21492 = vst [vmem:[#allocation2_spill] sm:$0xff] %v18016_v38  ;;  %v5516_v31 = vadd.f32 %v5515_v22, %v5467_v45 }
 0x5f1   : > { %v5420_v32 = vpop.f32.mrf.mxu1  ;;  %5664 = vmatmul.bf16.gmra.mxu2 %v14708_v14 }
 0x5f2   : > { %v5421_v17 = vadd.f32 %v5420_v32, %v17764_v60  ;;  %v18023_v43 = vadd.f32 %v5564_v50, %v5516_v31  ;;  %v10857_v60 = vld [vmem:[%s21088_s1 + $0x338] sm:$0xf0] }
 0x5f3   : > { %v5567_v58 = vpop.f32.mrf.mxu0  ;;  %v10860_v0 = vor.u32 %v13578_v7, %v10857_v60  ;;  %v13514_v32 = vld [vmem:[%s21088_s1 + $0x11c] sm:$0xf] }
 0x5f4   : > { %5615 = vmatmul.bf16.gmra.mxu1 %v14706_v13  ;;  %5713 = vmatmul.bf16.gmra.mxu3 %v21436_v30  ;;  %v5469_v6 = vpop.f32.mrf.mxu2  ;;  %v10601_v31 = vld [vmem:[%s21088_s1 + $0x138] sm:$0xf0]  ;;  %v6162_v7 = vmax.f32 %v5421_v17, 0.0 }
 0x5f5   : > { %v5470_v61 = vadd.f32 %v5469_v6, %v17989_v2  ;;  %5850 = vmatpush.bf16.msrb.mxu2 %v10860_v0  ;;  %v10604_v49 = vor.u32 %v13514_v32, %v10601_v31  ;;  %v13570_v17 = vld [vmem:[%s21088_s1 + $0x2dc] sm:$0xf] }
 0x5f6   : > { %5762 = vmatmul.bf16.gmra.mxu0 %v21437_v33 }
 0x5f7   : > { %v5518_v50 = vpop.f32.mrf.mxu3  ;;  %5801 = vmatpush.bf16.msrb.mxu1 %v10604_v49 }
 0x5f8   : > { %v5519_v22 = vadd.f32 %v5518_v50, %v5470_v61 }
 0x5f9   : > { %v5422_v24 = vpop.f32.mrf.mxu1 }
 0x5fa   : > { %v5423_v37 = vadd.f32 %v5422_v24, %v17770_v55  ;;  %v18046_v56 = vadd.f32 %v5567_v58, %v5519_v22 }
 0x5fb   : > { %v5569_v45 = vpop.f32.mrf.mxu0 }
 0x5fc   : > { %v6170_v60 = vmax.f32 %v5423_v37, 0.0  ;;  %v5471_v55 = vpop.f32.mrf.mxu2  ;;  %v13634_v37 = vld [vmem:[%s21088_s1 + $0x4dc] sm:$0xf] }
 0x5fd   : > { %v5472_v50 = vadd.f32 %v5471_v55, %v17989_v2 }
 0x5fe   : > { %v18048_v6 = vpack.c.bf16 %v6170_v60, %v6162_v7 }
 0x5ff   : > { %v5520_v0 = vpop.f32.mrf.mxu3 }
 0x600   : > { %21493 = vst [vmem:[#allocation10_spill] sm:$0xff] %v18048_v6  ;;  %v5521_v24 = vadd.f32 %v5520_v0, %v5472_v50 }
 0x601   : > { %v5425_v52 = vpop.f32.mrf.mxu1  ;;  %5669 = vmatmul.bf16.gmra.mxu2 %v14746_v35 }
 0x602   : > { %v5426_v61 = vadd.f32 %v5425_v52, %v17792_v9  ;;  %v18055_v58 = vadd.f32 %v5569_v45, %v5521_v24  ;;  %v10825_v9 = vld [vmem:[%s21088_s1 + $0x2f8] sm:$0xf0] }
 0x603   : > { %v5572_v38 = vpop.f32.mrf.mxu0  ;;  %v10828_v22 = vor.u32 %v13570_v17, %v10825_v9  ;;  %v11081_v45 = vld [vmem:[%s21088_s1 + $0x4f8] sm:$0xf0] }
 0x604   : > { %5620 = vmatmul.bf16.gmra.mxu1 %v14744_v34  ;;  %5718 = vmatmul.bf16.gmra.mxu3 %v21439_v59  ;;  %v5474_v32 = vpop.f32.mrf.mxu2  ;;  %v11084_v7 = vor.u32 %v13634_v37, %v11081_v45  ;;  %v13506_v52 = vld [vmem:[%s21088_s1 + $0xdc] sm:$0xf]  ;;  %v6178_v17 = vmax.f32 %v5426_v61, 0.0 }
 0x605   : > { %v5475_v60 = vadd.f32 %v5474_v32, %v17989_v2  ;;  %5851 = vmatpush.bf16.msrb.mxu2 %v10828_v22  ;;  %v10569_v24 = vld [vmem:[%s21088_s1 + $0xf8] sm:$0xf0] }
 0x606   : > { %5767 = vmatmul.bf16.gmra.mxu0 %v21474_v41  ;;  %5900 = vmatpush.bf16.msrb.mxu3 %v11084_v7  ;;  %v10572_v37 = vor.u32 %v13506_v52, %v10569_v24  ;;  %v13562_v61 = vld [vmem:[%s21088_s1 + $0x29c] sm:$0xf] }
 0x607   : > { %v5523_v31 = vpop.f32.mrf.mxu3 }
 0x608   : > { %v5524_v0 = vadd.f32 %v5523_v31, %v5475_v60  ;;  %5802 = vmatpush.bf16.msrb.mxu1 %v10572_v37 }
 0x609   : > { %v5427_v49 = vpop.f32.mrf.mxu1 }
 0x60a   : > { %v5428_v55 = vadd.f32 %v5427_v49, %v17798_v51  ;;  %v18078_v45 = vadd.f32 %v5572_v38, %v5524_v0 }
 0x60b   : > { %v5574_v50 = vpop.f32.mrf.mxu0 }
 0x60c   : > { %v6186_v9 = vmax.f32 %v5428_v55, 0.0  ;;  %v5476_v51 = vpop.f32.mrf.mxu2  ;;  %v13626_v55 = vld [vmem:[%s21088_s1 + $0x49c] sm:$0xf] }
 0x60d   : > { %v5477_v31 = vadd.f32 %v5476_v51, %v17989_v2 }
 0x60e   : > { %v18080_v32 = vpack.c.bf16 %v6186_v9, %v6178_v17 }
 0x60f   : > { %v5525_v22 = vpop.f32.mrf.mxu3 }
 0x610   : > { %21494 = vst [vmem:[#allocation6_spill] sm:$0xff] %v18080_v32  ;;  %v5526_v49 = vadd.f32 %v5525_v22, %v5477_v31 }
 0x611   : > { %v5430_v7 = vpop.f32.mrf.mxu1  ;;  %5674 = vmatmul.bf16.gmra.mxu2 %v14784_v4 }
 0x612   : > { %v5431_v60 = vadd.f32 %v5430_v7, %v17820_v11  ;;  %v18087_v38 = vadd.f32 %v5574_v50, %v5526_v49  ;;  %v10793_v11 = vld [vmem:[%s21088_s1 + $0x2b8] sm:$0xf0] }
 0x613   : > { %v5577_v6 = vpop.f32.mrf.mxu0  ;;  %v10796_v0 = vor.u32 %v13562_v61, %v10793_v11  ;;  %v11049_v50 = vld [vmem:[%s21088_s1 + $0x4b8] sm:$0xf0] }
 0x614   : > { %5625 = vmatmul.bf16.gmra.mxu1 %v14782_v3  ;;  %5723 = vmatmul.bf16.gmra.mxu3 %v21442_v16  ;;  %v5479_v52 = vpop.f32.mrf.mxu2  ;;  %v11052_v17 = vor.u32 %v13626_v55, %v11049_v50  ;;  %v13498_v7 = vld [vmem:[%s21088_s1 + $0x9c] sm:$0xf]  ;;  %v6194_v61 = vmax.f32 %v5431_v60, 0.0 }
 0x615   : > { %v5480_v9 = vadd.f32 %v5479_v52, %v17989_v2  ;;  %5852 = vmatpush.bf16.msrb.mxu2 %v10796_v0  ;;  %v10537_v49 = vld [vmem:[%s21088_s1 + $0xb8] sm:$0xf0] }
 0x616   : > { %5772 = vmatmul.bf16.gmra.mxu0 %v21477_v48  ;;  %5901 = vmatpush.bf16.msrb.mxu3 %v11052_v17  ;;  %v10540_v55 = vor.u32 %v13498_v7, %v10537_v49  ;;  %v13730_v60 = vld [vmem:[%s21088_s1 + $0x7dc] sm:$0xf] }
 0x617   : > { %v5528_v24 = vpop.f32.mrf.mxu3  ;;  %v10761_v7 = vld [vmem:[%s21088_s1 + $0x278] sm:$0xf0] }
 0x618   : > { %v5529_v22 = vadd.f32 %v5528_v24, %v5480_v9  ;;  %5803 = vmatpush.bf16.msrb.mxu1 %v10540_v55  ;;  %v13618_v49 = vld [vmem:[%s21088_s1 + $0x45c] sm:$0xf] }
 0x619   : > { %v5432_v37 = vpop.f32.mrf.mxu1 }
 0x61a   : > { %v5433_v51 = vadd.f32 %v5432_v37, %v17832_v46  ;;  %v18110_v50 = vadd.f32 %v5577_v6, %v5529_v22  ;;  %v11465_v6 = vld [vmem:[%s21088_s1 + $0x7f8] sm:$0xf0] }
 0x61b   : > { %v5579_v31 = vpop.f32.mrf.mxu0 }
 0x61c   : > { %v6202_v11 = vmax.f32 %v5433_v51, 0.0  ;;  %v5481_v46 = vpop.f32.mrf.mxu2  ;;  %v11468_v51 = vor.u32 %v13730_v60, %v11465_v6 }
 0x61d   : > { %v5482_v24 = vadd.f32 %v5481_v46, %v17989_v2 }
 0x61e   : > { %v18112_v52 = vpack.c.bf16 %v6202_v11, %v6194_v61  ;;  %5945 = vmatpush.bf16.msrb.mxu0 %v11468_v51 }
 0x61f   : > { %v5530_v0 = vpop.f32.mrf.mxu3 }
 0x620   : > { %21495 = vst [vmem:[#allocation39_spill] sm:$0xff] %v18112_v52  ;;  %v5531_v37 = vadd.f32 %v5530_v0, %v5482_v24  ;;  %v13722_v0 = vld [vmem:[%s21088_s1 + $0x79c] sm:$0xf] }
 0x621   : > { %v5435_v17 = vpop.f32.mrf.mxu1  ;;  %5679 = vmatmul.bf16.gmra.mxu2 %v21461_v28  ;;  %v11433_v24 = vld [vmem:[%s21088_s1 + $0x7b8] sm:$0xf0] }
 0x622   : > { %v5436_v9 = vadd.f32 %v5435_v17, %v17866_v1  ;;  %v18125_v22 = vadd.f32 %v5579_v31, %v5531_v37  ;;  %v13554_v1 = vld [vmem:[%s21088_s1 + $0x25c] sm:$0xf]  ;;  %v11436_v60 = vor.u32 %v13722_v0, %v11433_v24 }
 0x623   : > { %v5582_v32 = vpop.f32.mrf.mxu0  ;;  %v10764_v61 = vor.u32 %v13554_v1, %v10761_v7  ;;  %v11017_v31 = vld [vmem:[%s21088_s1 + $0x478] sm:$0xf0] }
 0x624   : > { %5630 = vmatmul.bf16.gmra.mxu1 %v21375_v20  ;;  %5728 = vmatmul.bf16.gmra.mxu3 %v21445_v10  ;;  %v5484_v11 = vpop.f32.mrf.mxu2  ;;  %v11020_v46 = vor.u32 %v13618_v49, %v11017_v31  ;;  %v13490_v7 = vld [vmem:[%s21088_s1 + $0x5c] sm:$0xf]  ;;  %v6210_v31 = vmax.f32 %v5436_v9, 0.0 }
 0x625   : > { %v5485_v17 = vadd.f32 %v5484_v11, %v17989_v2  ;;  %5853 = vmatpush.bf16.msrb.mxu2 %v10764_v61  ;;  %v10505_v49 = vld [vmem:[%s21088_s1 + $0x78] sm:$0xf0]  ;;  %5946 = vmatpush.bf16.msrb.mxu0 %v11436_v60 }
 0x626   : > { %5777 = vmatmul.bf16.gmra.mxu0 %v21480_v18  ;;  %5902 = vmatpush.bf16.msrb.mxu3 %v11020_v46  ;;  %v10508_v11 = vor.u32 %v13490_v7, %v10505_v49  ;;  %v13714_v61 = vld [vmem:[%s21088_s1 + $0x75c] sm:$0xf] }
 0x627   : > { %v5533_v55 = vpop.f32.mrf.mxu3  ;;  %v13706_v9 = vld [vmem:[%s21088_s1 + $0x71c] sm:$0xf] }
 0x628   : > { %v5534_v51 = vadd.f32 %v5533_v55, %v5485_v17  ;;  %5804 = vmatpush.bf16.msrb.mxu1 %v10508_v11  ;;  %v13698_v49 = vld [vmem:[%s21088_s1 + $0x6dc] sm:$0xf] }
 0x629   : > { %v5437_v37 = vpop.f32.mrf.mxu1 }
 0x62a   : > { %v5438_v6 = vadd.f32 %v5437_v37, %v17884_v36  ;;  %v11401_v36 = vld [vmem:[%s21088_s1 + $0x778] sm:$0xf0]  ;;  %v18160_v46 = vadd.f32 %v5582_v32, %v5534_v51 }
 0x62b   : > { %v5584_v1 = vpop.f32.mrf.mxu0  ;;  %v11404_v55 = vor.u32 %v13714_v61, %v11401_v36  ;;  %v11369_v37 = vld [vmem:[%s21088_s1 + $0x738] sm:$0xf0] }
 0x62c   : > { %v6218_v52 = vmax.f32 %v5438_v6, 0.0  ;;  %v5486_v24 = vpop.f32.mrf.mxu2  ;;  %v11372_v7 = vor.u32 %v13706_v9, %v11369_v37  ;;  %v10729_v36 = vld [vmem:[%s21088_s1 + $0x238] sm:$0xf0] }
 0x62d   : > { %5947 = vmatpush.bf16.msrb.mxu0 %v11404_v55  ;;  %v5487_v60 = vadd.f32 %v5486_v24, %v17989_v2  ;;  %v13610_v55 = vld [vmem:[%s21088_s1 + $0x41c] sm:$0xf] }
 0x62e   : > { %v18162_v0 = vpack.c.bf16 %v6218_v52, %v6210_v31  ;;  %v11337_v31 = vld [vmem:[%s21088_s1 + $0x6f8] sm:$0xf0] }
 0x62f   : > { %v5535_v17 = vpop.f32.mrf.mxu3  ;;  %v11340_v11 = vor.u32 %v13698_v49, %v11337_v31 }
 0x630   : > { %21496 = vst [vmem:[#allocation41_spill] sm:$0xff] %v18162_v0  ;;  %v5536_v52 = vadd.f32 %v5535_v17, %v5487_v60  ;;  %v13690_v60 = vld [vmem:[%s21088_s1 + $0x69c] sm:$0xf] }
 0x631   : > { %v5440_v6 = vpop.f32.mrf.mxu1  ;;  %5948 = vmatpush.bf16.msrb.mxu0 %v11372_v7  ;;  %5684 = vmatmul.bf16.gmra.mxu2 %v21416_v44 }
 0x632   : > { %v5441_v32 = vadd.f32 %v5440_v6, %v17918_v21  ;;  %v18181_v61 = vadd.f32 %v5584_v1, %v5536_v52  ;;  %v13546_v21 = vld [vmem:[%s21088_s1 + $0x21c] sm:$0xf] }
 0x633   : > { %v5587_v51 = vpop.f32.mrf.mxu0  ;;  %v10732_v24 = vor.u32 %v13546_v21, %v10729_v36  ;;  %v10985_v1 = vld [vmem:[%s21088_s1 + $0x438] sm:$0xf0] }
 0x634   : > { %5635 = vmatmul.bf16.gmra.mxu1 %v21379_v8  ;;  %5733 = vmatmul.bf16.gmra.mxu3 %v21448_v57  ;;  %v5489_v17 = vpop.f32.mrf.mxu2  ;;  %v10988_v37 = vor.u32 %v13610_v55, %v10985_v1  ;;  %v11305_v6 = vld [vmem:[%s21088_s1 + $0x6b8] sm:$0xf0]  ;;  %v6226_v1 = vmax.f32 %v5441_v32, 0.0 }
 0x635   : > { %5949 = vmatpush.bf16.msrb.mxu0 %v11340_v11  ;;  %v5490_v7 = vadd.f32 %v5489_v17, %v17989_v2  ;;  %5854 = vmatpush.bf16.msrb.mxu2 %v10732_v24  ;;  %v11308_v49 = vor.u32 %v13690_v60, %v11305_v6  ;;  %v13482_v36 = vld [vmem:[%s21088_s1 + $0x1c] sm:$0xf] }
 0x636   : > { %5782 = vmatmul.bf16.gmra.mxu0 %v21483_v39  ;;  %5903 = vmatpush.bf16.msrb.mxu3 %v10988_v37  ;;  %v10473_v55 = vld [vmem:[%s21088_s1 + $0x38] sm:$0xf0] }
 0x637   : > { %v5538_v9 = vpop.f32.mrf.mxu3  ;;  %v10476_v17 = vor.u32 %v13482_v36, %v10473_v55  ;;  %v13682_v24 = vld [vmem:[%s21088_s1 + $0x65c] sm:$0xf] }
 0x638   : > { %v5539_v11 = vadd.f32 %v5538_v9, %v5490_v7  ;;  %v13674_v32 = vld [vmem:[%s21088_s1 + $0x61c] sm:$0xf] }
 0x639   : > { %v5442_v52 = vpop.f32.mrf.mxu1  ;;  %5950 = vmatpush.bf16.msrb.mxu0 %v11308_v49  ;;  %5805 = vmatpush.bf16.msrb.mxu1 %v10476_v17  ;;  %v21498_v55 = vld [vmem:[#allocation29_spill] sm:$0xff] }
 0x63a   : > { %v5443_v31 = vadd.f32 %v5442_v52, %v17930_v23  ;;  %v11273_v23 = vld [vmem:[%s21088_s1 + $0x678] sm:$0xf0]  ;;  %v18216_v37 = vadd.f32 %v5587_v51, %v5539_v11 }
 0x63b   : > { %v5589_v21 = vpop.f32.mrf.mxu0  ;;  %v11276_v9 = vor.u32 %v13682_v24, %v11273_v23  ;;  %v11241_v52 = vld [vmem:[%s21088_s1 + $0x638] sm:$0xf0] }
 0x63c   : > { %v6234_v0 = vmax.f32 %v5443_v31, 0.0  ;;  %v5491_v6 = vpop.f32.mrf.mxu2  ;;  %v11244_v36 = vor.u32 %v13674_v32, %v11241_v52  ;;  %v13858_v24 = vld [vmem:[%s21088_s1 + $0xbdc] sm:$0xf] }
 0x63d   : > { %5951 = vmatpush.bf16.msrb.mxu0 %v11276_v9  ;;  %v5492_v49 = vadd.f32 %v5491_v6, %v17989_v2  ;;  %v13922_v23 = vld [vmem:[%s21088_s1 + $0xddc] sm:$0xf] }
 0x63e   : > { %v18218_v60 = vpack.c.bf16 %v6234_v0, %v6226_v1  ;;  %v21499_v1 = vld [vmem:[#allocation46_spill] sm:$0xff] }
 0x63f   : > { %v5540_v7 = vpop.f32.mrf.mxu3 }
 0x640   : > { %21497 = vst [vmem:[#allocation7_spill] sm:$0xff] %v18218_v60  ;;  %v5541_v0 = vadd.f32 %v5540_v7, %v5492_v49 }
 0x641   : > { %v5445_v31 = vpop.f32.mrf.mxu1  ;;  %5952 = vmatpush.bf16.msrb.mxu0 %v11244_v36  ;;  %5689 = vmatmul.bf16.gmra.mxu2 %v21498_v55 }
 0x642   : > { %v5446_v51 = vadd.f32 %v5445_v31, %v17952_v15  ;;  %v18231_v17 = vadd.f32 %v5589_v21, %v5541_v0  ;;  %v11977_v15 = vld [vmem:[%s21088_s1 + $0xbf8] sm:$0xf0] }
 0x643   : > { %v5592_v11 = vpop.f32.mrf.mxu0  ;;  %v11980_v9 = vor.u32 %v13858_v24, %v11977_v15  ;;  %v12233_v21 = vld [vmem:[%s21088_s1 + $0xdf8] sm:$0xf0] }
 0x644   : > { %5640 = vmatmul.bf16.gmra.mxu1 %v21383_v12  ;;  %5738 = vmatmul.bf16.gmra.mxu3 %v21499_v1  ;;  %v5494_v6 = vpop.f32.mrf.mxu2  ;;  %v12236_v32 = vor.u32 %v13922_v23, %v12233_v21  ;;  %v6242_v60 = vmax.f32 %v5446_v51, 0.0  ;;  %v13794_v15 = vld [vmem:[%s21088_s1 + $0x9dc] sm:$0xf] }
 0x645   : > { %v5495_v52 = vadd.f32 %v5494_v6, %v17989_v2  ;;  %6043 = vmatpush.bf16.msra.mxu2 %v11980_v9  ;;  %v11721_v23 = vld [vmem:[%s21088_s1 + $0x9f8] sm:$0xf0] }
 0x646   : > { %5787 = vmatmul.bf16.gmra.mxu0 %v21486_v26  ;;  %6092 = vmatpush.bf16.msra.mxu3 %v12236_v32  ;;  %v21502_v32 = vld [vmem:[#allocation33_spill] sm:$0xff] }
 0x647   : > { %v5543_v7 = vpop.f32.mrf.mxu3 }
 0x648   : > { %v5544_v36 = vadd.f32 %v5543_v7, %v5495_v52  ;;  %v21503_v52 = vld [vmem:[#allocation48_spill] sm:$0xff] }
 0x649   : > { %v5447_v49 = vpop.f32.mrf.mxu1 }
 0x64a   : > { %v5448_v31 = vadd.f32 %v5447_v49, %v17958_v19  ;;  %v18248_v1 = vadd.f32 %v5592_v11, %v5544_v36  ;;  %v11724_v19 = vor.u32 %v13794_v15, %v11721_v23 }
 0x64b   : > { %v5594_v0 = vpop.f32.mrf.mxu0 }
 0x64c   : > { %v6250_v26 = vmax.f32 %v5448_v31, 0.0  ;;  %v5496_v9 = vpop.f32.mrf.mxu2  ;;  %5994 = vmatpush.bf16.msra.mxu1 %v11724_v19 }
 0x64d   : > { %v5497_v6 = vadd.f32 %v5496_v9, %v17989_v2  ;;  %v11945_v9 = vld [vmem:[%s21088_s1 + $0xbb8] sm:$0xf0] }
 0x64e   : > { %v18250_v24 = vpack.c.bf16 %v6250_v26, %v6242_v60  ;;  %v21501_v60 = vld [vmem:[#allocation32_spill] sm:$0xff] }
 0x64f   : > { %v5545_v21 = vpop.f32.mrf.mxu3 }
 0x650   : > { %21500 = vst [vmem:[#allocation43_spill] sm:$0xff] %v18250_v24  ;;  %v5546_v11 = vadd.f32 %v5545_v21, %v5497_v6  ;;  %v12201_v6 = vld [vmem:[%s21088_s1 + $0xdb8] sm:$0xf0] }
 0x651   : > { %v5450_v7 = vpop.f32.mrf.mxu1  ;;  %5694 = vmatmul.bf16.gmra.mxu2 %v21502_v32 }
 0x652   : > { %v5451_v51 = vadd.f32 %v5450_v7, %v17980_v5  ;;  %v18263_v49 = vadd.f32 %v5594_v0, %v5546_v11  ;;  %v13850_v5 = vld [vmem:[%s21088_s1 + $0xb9c] sm:$0xf] }
 0x653   : > { %v5597_v26 = vpop.f32.mrf.mxu0  ;;  %v13914_v0 = vld [vmem:[%s21088_s1 + $0xd9c] sm:$0xf]  ;;  %v11948_v19 = vor.u32 %v13850_v5, %v11945_v9 }
 0x654   : > { %5645 = vmatmul.bf16.gmra.mxu1 %v21501_v60  ;;  %5743 = vmatmul.bf16.gmra.mxu3 %v21503_v52  ;;  %v5499_v31 = vpop.f32.mrf.mxu2  ;;  %v6258_v24 = vmax.f32 %v5451_v51, 0.0 }
 0x655   : > { %v5500_v15 = vadd.f32 %v5499_v31, %v17989_v2  ;;  %v12204_v31 = vor.u32 %v13914_v0, %v12201_v6  ;;  %6044 = vmatpush.bf16.msra.mxu2 %v11948_v19 }
 0x656   : > { %5792 = vmatmul.bf16.gmra.mxu0 %v21455_v63 }
 0x657   : > { %v5548_v36 = vpop.f32.mrf.mxu3  ;;  %6093 = vmatpush.bf16.msra.mxu3 %v12204_v31 }
 0x658   : > { %v5549_v7 = vadd.f32 %v5548_v36, %v5500_v15 }
 0x659   : > { %v5452_v23 = vpop.f32.mrf.mxu1 }
 0x65a   : > { %v5453_v21 = vadd.f32 %v5452_v23, %v17991_v25  ;;  %v18280_v52 = vadd.f32 %v5597_v26, %v5549_v7  ;;  %v13786_v25 = vld [vmem:[%s21088_s1 + $0x99c] sm:$0xf] }
 0x65b   : > { %v5599_v11 = vpop.f32.mrf.mxu0  ;;  %v11689_v23 = vld [vmem:[%s21088_s1 + $0x9b8] sm:$0xf0] }
 0x65c   : > { %v6266_v63 = vmax.f32 %v5453_v21, 0.0  ;;  %v5501_v5 = vpop.f32.mrf.mxu2  ;;  %v11692_v15 = vor.u32 %v13786_v25, %v11689_v23 }
 0x65d   : > { %v5502_v51 = vadd.f32 %v5501_v5, %v17989_v2  ;;  %v13778_v5 = vld [vmem:[%s21088_s1 + $0x95c] sm:$0xf] }
 0x65e   : > { %v18282_v32 = vpack.c.bf16 %v6266_v63, %v6258_v24  ;;  %5995 = vmatpush.bf16.msra.mxu1 %v11692_v15 }
 0x65f   : > { %v5550_v36 = vpop.f32.mrf.mxu3 }
 0x660   : > { %v5551_v26 = vadd.f32 %v5550_v36, %v5502_v51  ;;  %v11657_v36 = vld [vmem:[%s21088_s1 + $0x978] sm:$0xf0] }
 0x661   : > { %v5611_v9 = vpop.f32.mrf.mxu1  ;;  %5855 = vmatmul.bf16.vlgmr.msrb.gmra.mxu2 %v21471_v42  ;;  %v11660_v51 = vor.u32 %v13778_v5, %v11657_v36 }
 0x662   : > { %v5612_v0 = vadd.f32 %v5611_v9, %v18014_v47  ;;  %v18295_v24 = vadd.f32 %v5599_v11, %v5551_v26  ;;  %v13842_v47 = vld [vmem:[%s21088_s1 + $0xb5c] sm:$0xf] }
 0x663   : > { %v5758_v63 = vpop.f32.mrf.mxu0  ;;  %5996 = vmatpush.bf16.msra.mxu1 %v11660_v51  ;;  %v13770_v51 = vld [vmem:[%s21088_s1 + $0x91c] sm:$0xf] }
 0x664   : > { %5806 = vmatmul.bf16.vlgmr.msrb.gmra.mxu1 %v21470_v62  ;;  %5904 = vmatmul.bf16.vlgmr.msrb.gmra.mxu3 %v14666_v53  ;;  %v5660_v21 = vpop.f32.mrf.mxu2  ;;  %v11913_v62 = vld [vmem:[%s21088_s1 + $0xb78] sm:$0xf0] }
 0x665   : > { %v5661_v6 = vadd.f32 %v5660_v21, %v5612_v0  ;;  %v13906_v53 = vld [vmem:[%s21088_s1 + $0xd5c] sm:$0xf]  ;;  %v11916_v7 = vor.u32 %v13842_v47, %v11913_v62 }
 0x666   : > { %5953 = vmatmul.bf16.vlgmr.msrb.gmra.mxu0 %v14668_v54  ;;  %v12169_v54 = vld [vmem:[%s21088_s1 + $0xd78] sm:$0xf0] }
 0x667   : > { %v5709_v19 = vpop.f32.mrf.mxu3  ;;  %v12172_v25 = vor.u32 %v13906_v53, %v12169_v54  ;;  %6045 = vmatpush.bf16.msra.mxu2 %v11916_v7 }
 0x668   : > { %v5710_v11 = vadd.f32 %v5709_v19, %v5661_v6  ;;  %v21504_v6 = vld [vmem:[#allocation12_spill] sm:$0xff] }
 0x669   : > { %v5613_v2 = vpop.f32.mrf.mxu1  ;;  %6094 = vmatpush.bf16.msra.mxu3 %v12172_v25 }
 0x66a   : > { %v5614_v42 = vadd.f32 %v5613_v2, %v18023_v43  ;;  %v5759_v23 = vadd.f32 %v5758_v63, %v5710_v11  ;;  %v21505_v2 = vld [vmem:[#allocation13_spill] sm:$0xff] }
 0x66b   : > { %v5760_v31 = vpop.f32.mrf.mxu0  ;;  %v13834_v11 = vld [vmem:[%s21088_s1 + $0xb1c] sm:$0xf] }
 0x66c   : > { %v5662_v43 = vpop.f32.mrf.mxu2  ;;  %v6147_v47 = vmax.f32 %v5759_v23, 0.0  ;;  %v12137_v23 = vld [vmem:[%s21088_s1 + $0xd38] sm:$0xf0] }
 0x66d   : > { %v5663_v9 = vadd.f32 %v5662_v43, %v5614_v42 }
 0x66f   : > { %v5711_v15 = vpop.f32.mrf.mxu3 }
 0x670   : > { %v5712_v21 = vadd.f32 %v5711_v15, %v5663_v9  ;;  %v11625_v9 = vld [vmem:[%s21088_s1 + $0x938] sm:$0xf0] }
 0x671   : > { %v5616_v0 = vpop.f32.mrf.mxu1  ;;  %5860 = vmatmul.bf16.gmra.mxu2 %v21504_v6 }
 0x672   : > { %v5617_v26 = vadd.f32 %v5616_v0, %v18046_v56  ;;  %v5761_v63 = vadd.f32 %v5760_v31, %v5712_v21 }
 0x673   : > { %v5763_v19 = vpop.f32.mrf.mxu0 }
 0x674   : > { %5811 = vmatmul.bf16.gmra.mxu1 %v21472_v40  ;;  %5909 = vmatmul.bf16.gmra.mxu3 %v21505_v2  ;;  %v6155_v62 = vmax.f32 %v5761_v63, 0.0  ;;  %v5665_v53 = vpop.f32.mrf.mxu2  ;;  %v11881_v40 = vld [vmem:[%s21088_s1 + $0xb38] sm:$0xf0] }
 0x675   : > { %v5666_v54 = vadd.f32 %v5665_v53, %v5617_v26  ;;  %v11884_v25 = vor.u32 %v13834_v11, %v11881_v40  ;;  %v11628_v26 = vor.u32 %v13770_v51, %v11625_v9  ;;  %v21508_v53 = vld [vmem:[#allocation14_spill] sm:$0xff] }
 0x676   : > { %5958 = vmatmul.bf16.gmra.mxu0 %v14706_v13  ;;  %v18322_v42 = vpack.c.bf16 %v6155_v62, %v6147_v47  ;;  %v13898_v13 = vld [vmem:[%s21088_s1 + $0xd1c] sm:$0xf] }
 0x677   : > { %v5714_v7 = vpop.f32.mrf.mxu3  ;;  %v12140_v43 = vor.u32 %v13898_v13, %v12137_v23  ;;  %6046 = vmatpush.bf16.msra.mxu2 %v11884_v25  ;;  %5997 = vmatpush.bf16.msra.mxu1 %v11628_v26  ;;  %v13826_v25 = vld [vmem:[%s21088_s1 + $0xadc] sm:$0xf] }
 0x678   : > { %21506 = vst [vmem:[#allocation45_spill] sm:$0xff] %v18322_v42  ;;  %v5715_v5 = vadd.f32 %v5714_v7, %v5666_v54  ;;  %v21509_v7 = vld [vmem:[#allocation15_spill] sm:$0xff]  ;;  %v11849_v23 = vld [vmem:[%s21088_s1 + $0xaf8] sm:$0xf0] }
 0x679   : > { %v5618_v56 = vpop.f32.mrf.mxu1  ;;  %6095 = vmatpush.bf16.msra.mxu3 %v12140_v43  ;;  %v12105_v43 = vld [vmem:[%s21088_s1 + $0xcf8] sm:$0xf0] }
 0x67a   : > { %v5619_v31 = vadd.f32 %v5618_v56, %v18055_v58  ;;  %v5764_v15 = vadd.f32 %v5763_v19, %v5715_v5  ;;  %v21507_v19 = vld [vmem:[#allocation3_spill] sm:$0xff]  ;;  %v11593_v26 = vld [vmem:[%s21088_s1 + $0x8f8] sm:$0xf0] }
 0x67b   : > { %v5765_v36 = vpop.f32.mrf.mxu0 }
 0x67c   : > { %v5667_v58 = vpop.f32.mrf.mxu2  ;;  %v6163_v54 = vmax.f32 %v5764_v15, 0.0 }
 0x67d   : > { %v5668_v21 = vadd.f32 %v5667_v58, %v5619_v31 }
 0x67f   : > { %v5716_v0 = vpop.f32.mrf.mxu3 }
 0x680   : > { %v5717_v2 = vadd.f32 %v5716_v0, %v5668_v21  ;;  %v13762_v0 = vld [vmem:[%s21088_s1 + $0x8dc] sm:$0xf] }
 0x681   : > { %v5621_v63 = vpop.f32.mrf.mxu1  ;;  %5865 = vmatmul.bf16.gmra.mxu2 %v21508_v53 }
 0x682   : > { %v5622_v6 = vadd.f32 %v5621_v63, %v18078_v45  ;;  %v5766_v62 = vadd.f32 %v5765_v36, %v5717_v2  ;;  %v11852_v36 = vor.u32 %v13826_v25, %v11849_v23  ;;  %v11596_v63 = vor.u32 %v13762_v0, %v11593_v26  ;;  %v13818_v23 = vld [vmem:[%s21088_s1 + $0xa9c] sm:$0xf] }
 0x683   : > { %v5768_v47 = vpop.f32.mrf.mxu0  ;;  %v11561_v0 = vld [vmem:[%s21088_s1 + $0x8b8] sm:$0xf0] }
 0x684   : > { %5816 = vmatmul.bf16.gmra.mxu1 %v21507_v19  ;;  %5914 = vmatmul.bf16.gmra.mxu3 %v21509_v7  ;;  %v6171_v56 = vmax.f32 %v5766_v62, 0.0  ;;  %v5670_v11 = vpop.f32.mrf.mxu2  ;;  %v21510_v7 = vld [vmem:[#allocation16_spill] sm:$0xff] }
 0x685   : > { %v5671_v31 = vadd.f32 %v5670_v11, %v5622_v6  ;;  %6047 = vmatpush.bf16.msra.mxu2 %v11852_v36  ;;  %5998 = vmatpush.bf16.msra.mxu1 %v11596_v63  ;;  %v12073_v36 = vld [vmem:[%s21088_s1 + $0xcb8] sm:$0xf0] }
 0x686   : > { %5963 = vmatmul.bf16.gmra.mxu0 %v14744_v34  ;;  %v18348_v13 = vpack.c.bf16 %v6171_v56, %v6163_v54  ;;  %v13890_v34 = vld [vmem:[%s21088_s1 + $0xcdc] sm:$0xf] }
 0x687   : > { %v5719_v40 = vpop.f32.mrf.mxu3  ;;  %v12108_v9 = vor.u32 %v13890_v34, %v12105_v43  ;;  %v21511_v54 = vld [vmem:[#allocation17_spill] sm:$0xff] }
 0x688   : > { %v5720_v15 = vadd.f32 %v5719_v40, %v5671_v31 }
 0x689   : > { %v5623_v45 = vpop.f32.mrf.mxu1  ;;  %6096 = vmatpush.bf16.msra.mxu3 %v12108_v9 }
 0x68a   : > { %v5624_v5 = vadd.f32 %v5623_v45, %v18087_v38  ;;  %v5769_v58 = vadd.f32 %v5768_v47, %v5720_v15 }
 0x68b   : > { %v5770_v51 = vpop.f32.mrf.mxu0 }
 0x68c   : > { %v5672_v38 = vpop.f32.mrf.mxu2  ;;  %v6179_v56 = vmax.f32 %v5769_v58, 0.0  ;;  %v13754_v58 = vld [vmem:[%s21088_s1 + $0x89c] sm:$0xf] }
 0x68d   : > { %v5673_v6 = vadd.f32 %v5672_v38, %v5624_v5  ;;  %v11564_v38 = vor.u32 %v13754_v58, %v11561_v0 }
 0x68f   : > { %v5721_v21 = vpop.f32.mrf.mxu3  ;;  %5999 = vmatpush.bf16.msra.mxu1 %v11564_v38  ;;  %v13949_v38 = vld [vmem:[%s21090_s3 + $0xac] sm:$0xf0] }
 0x690   : > { %v5722_v62 = vadd.f32 %v5721_v21, %v5673_v6 }
 0x691   : > { %v5626_v2 = vpop.f32.mrf.mxu1  ;;  %5870 = vmatmul.bf16.gmra.mxu2 %v21510_v7 }
 0x692   : > { %v5627_v19 = vadd.f32 %v5626_v2, %v18110_v50  ;;  %v5771_v47 = vadd.f32 %v5770_v51, %v5722_v62  ;;  %v21512_v62 = vld [vmem:[#allocation4_spill] sm:$0xff] }
 0x693   : > { %v5773_v53 = vpop.f32.mrf.mxu0 }
 0x694   : > { %5821 = vmatmul.bf16.gmra.mxu1 %v21478_v29  ;;  %5919 = vmatmul.bf16.gmra.mxu3 %v21511_v54  ;;  %v6187_v11 = vmax.f32 %v5771_v47, 0.0  ;;  %v5675_v40 = vpop.f32.mrf.mxu2  ;;  %v11817_v29 = vld [vmem:[%s21088_s1 + $0xab8] sm:$0xf0]  ;;  %v13957_v47 = vld [vmem:[%s21090_s3 + $0xec] sm:$0xf0]  ;;  %v21513_v54 = vld [vmem:[#allocation18_spill] sm:$0xff] }
 0x695   : > { %v5676_v25 = vadd.f32 %v5675_v40, %v5627_v19  ;;  %v11820_v5 = vor.u32 %v13818_v23, %v11817_v29  ;;  %v13953_v23 = vld [vmem:[%s21090_s3 + $0xcc] sm:$0xf0] }
 0x696   : > { %5968 = vmatmul.bf16.gmra.mxu0 %v14782_v3  ;;  %v18374_v45 = vpack.c.bf16 %v6187_v11, %v6179_v56  ;;  %v13882_v3 = vld [vmem:[%s21088_s1 + $0xc9c] sm:$0xf]  ;;  %v21514_v56 = vld [vmem:[#allocation19_spill] sm:$0xff] }
 0x697   : > { %v5724_v31 = vpop.f32.mrf.mxu3  ;;  %v12076_v51 = vor.u32 %v13882_v3, %v12073_v36  ;;  %6048 = vmatpush.bf16.msra.mxu2 %v11820_v5  ;;  %v11785_v5 = vld [vmem:[%s21088_s1 + $0xa78] sm:$0xf0] }
 0x698   : > { %v5725_v43 = vadd.f32 %v5724_v31, %v5676_v25  ;;  %v13874_v36 = vld [vmem:[%s21088_s1 + $0xc5c] sm:$0xf] }
 0x699   : > { %v5628_v50 = vpop.f32.mrf.mxu1  ;;  %6097 = vmatpush.bf16.msra.mxu3 %v12076_v51 }
 0x69a   : > { %v5629_v34 = vadd.f32 %v5628_v50, %v18125_v22  ;;  %v5774_v9 = vadd.f32 %v5773_v53, %v5725_v43  ;;  %v12351_v53 = vld [vmem:[%s21090_s3 + $0xe0] sm:$0xf] }
 0x69b   : > { %v5775_v15 = vpop.f32.mrf.mxu0  ;;  %v12352_v11 = vor.u32 %v13957_v47, %v12351_v53  ;;  %v12335_v50 = vld [vmem:[%s21090_s3 + $0xc0] sm:$0xf] }
 0x69c   : > { %v5677_v22 = vpop.f32.mrf.mxu2  ;;  %v12336_v43 = vor.u32 %v13953_v23, %v12335_v50  ;;  %v12303_v47 = vld [vmem:[%s21090_s3 + $0x80] sm:$0xf]  ;;  %v13941_v50 = vld [vmem:[%s21090_s3 + $0x6c] sm:$0xf0] }
 0x69d   : > { %v5678_v21 = vadd.f32 %v5677_v22, %v5629_v34  ;;  %7879 = vmatpush.bf16.msra.mxu0 %v12352_v11 }
 0x69f   : > { %v5726_v26 = vpop.f32.mrf.mxu3 }
 0x6a0   : > { %v5727_v2 = vadd.f32 %v5726_v26, %v5678_v21  ;;  %v12319_v26 = vld [vmem:[%s21090_s3 + $0xa0] sm:$0xf] }
 0x6a1   : > { %v5631_v63 = vpop.f32.mrf.mxu1  ;;  %5875 = vmatmul.bf16.gmra.mxu2 %v21513_v54  ;;  %7880 = vmatpush.bf16.msra.mxu0 %v12336_v43 }
 0x6a2   : > { %v5632_v6 = vadd.f32 %v5631_v63, %v18160_v46  ;;  %v5776_v7 = vadd.f32 %v5775_v15, %v5727_v2  ;;  %v6195_v46 = vmax.f32 %v5774_v9, 0.0  ;;  %v12041_v9 = vld [vmem:[%s21088_s1 + $0xc78] sm:$0xf0] }
 0x6a3   : > { %v5778_v19 = vpop.f32.mrf.mxu0  ;;  %v12044_v22 = vor.u32 %v13874_v36, %v12041_v9  ;;  %v13746_v63 = vld [vmem:[%s21088_s1 + $0x85c] sm:$0xf] }
 0x6a4   : > { %5826 = vmatmul.bf16.gmra.mxu1 %v21512_v62  ;;  %5924 = vmatmul.bf16.gmra.mxu3 %v21514_v56  ;;  %v6203_v40 = vmax.f32 %v5776_v7, 0.0  ;;  %v5680_v31 = vpop.f32.mrf.mxu2 }
 0x6a5   : > { %v5681_v3 = vadd.f32 %v5680_v31, %v5632_v6  ;;  %6098 = vmatpush.bf16.msra.mxu3 %v12044_v22  ;;  %v11529_v6 = vld [vmem:[%s21088_s1 + $0x878] sm:$0xf0]  ;;  %v21515_v31 = vld [vmem:[#allocation8_spill] sm:$0xff] }
 0x6a6   : > { %5973 = vmatmul.bf16.gmra.mxu0 %v21375_v20  ;;  %v18412_v29 = vpack.c.bf16 %v6203_v40, %v6195_v46  ;;  %v13810_v20 = vld [vmem:[%s21088_s1 + $0xa5c] sm:$0xf]  ;;  %v11532_v53 = vor.u32 %v13746_v63, %v11529_v6 }
 0x6a7   : > { %v5729_v25 = vpop.f32.mrf.mxu3  ;;  %v11788_v51 = vor.u32 %v13810_v20, %v11785_v5  ;;  %v11753_v22 = vld [vmem:[%s21088_s1 + $0xa38] sm:$0xf0] }
 0x6a8   : > { %v5730_v58 = vadd.f32 %v5729_v25, %v5681_v3  ;;  %6000 = vmatpush.bf16.msra.mxu1 %v11532_v53  ;;  %v12287_v25 = vld [vmem:[%s21090_s3 + $0x60] sm:$0xf]  ;;  %v12009_v63 = vld [vmem:[%s21088_s1 + $0xc38] sm:$0xf0] }
 0x6a9   : > { %v5633_v34 = vpop.f32.mrf.mxu1  ;;  %6049 = vmatpush.bf16.msra.mxu2 %v11788_v51  ;;  %v21516_v3 = vld [vmem:[#allocation22_spill] sm:$0xff]  ;;  %v13937_v51 = vld [vmem:[%s21090_s3 + $0x4c] sm:$0xf0] }
 0x6aa   : > { %v5634_v15 = vadd.f32 %v5633_v34, %v18181_v61  ;;  %v5779_v21 = vadd.f32 %v5778_v19, %v5730_v58  ;;  %v12320_v61 = vor.u32 %v13949_v38, %v12319_v26  ;;  %v13945_v19 = vld [vmem:[%s21090_s3 + $0x8c] sm:$0xf0]  ;;  %v21517_v34 = vld [vmem:[#allocation23_spill] sm:$0xff]  ;;  %v13866_v26 = vld [vmem:[%s21088_s1 + $0xc1c] sm:$0xf] }
 0x6ab   : > { %v5780_v0 = vpop.f32.mrf.mxu0  ;;  %v12304_v56 = vor.u32 %v13945_v19, %v12303_v47  ;;  %v12255_v53 = vld [vmem:[%s21090_s3 + $0x20] sm:$0xf]  ;;  %v13933_v47 = vld [vmem:[%s21090_s3 + $0x2c] sm:$0xf0] }
 0x6ac   : > { %7881 = vmatpush.bf16.msra.mxu0 %v12320_v61  ;;  %v5682_v2 = vpop.f32.mrf.mxu2  ;;  %v6211_v20 = vmax.f32 %v5779_v21, 0.0 }
 0x6ad   : > { %v5683_v7 = vadd.f32 %v5682_v2, %v5634_v15  ;;  %v12271_v15 = vld [vmem:[%s21090_s3 + $0x40] sm:$0xf] }
 0x6ae   : > { %v12272_v38 = vor.u32 %v13937_v51, %v12271_v15 }
 0x6af   : > { %v5731_v62 = vpop.f32.mrf.mxu3 }
 0x6b0   : > { %v5732_v46 = vadd.f32 %v5731_v62, %v5683_v7  ;;  %7882 = vmatpush.bf16.msra.mxu0 %v12304_v56  ;;  %v12012_v62 = vor.u32 %v13866_v26, %v12009_v63  ;;  %v13738_v7 = vld [vmem:[%s21088_s1 + $0x81c] sm:$0xf]  ;;  %v12607_v26 = vld [vmem:[%s21090_s3 + $0x2e0] sm:$0xf]  ;;  %v14053_v63 = vld [vmem:[%s21090_s3 + $0x3ec] sm:$0xf0] }
 0x6b1   : > { %v5636_v54 = vpop.f32.mrf.mxu1  ;;  %5880 = vmatmul.bf16.gmra.mxu2 %v21516_v3 }
 0x6b2   : > { %v5637_v11 = vadd.f32 %v5636_v54, %v18216_v37  ;;  %v5781_v23 = vadd.f32 %v5780_v0, %v5732_v46  ;;  %v12288_v37 = vor.u32 %v13941_v50, %v12287_v25  ;;  %6099 = vmatpush.bf16.msra.mxu3 %v12012_v62  ;;  %v11497_v54 = vld [vmem:[%s21088_s1 + $0x838] sm:$0xf0] }
 0x6b3   : > { %v5783_v40 = vpop.f32.mrf.mxu0  ;;  %v11500_v46 = vor.u32 %v13738_v7, %v11497_v54 }
 0x6b4   : > { %5831 = vmatmul.bf16.gmra.mxu1 %v21515_v31  ;;  %5929 = vmatmul.bf16.gmra.mxu3 %v21517_v34  ;;  %v6219_v5 = vmax.f32 %v5781_v23, 0.0  ;;  %v5685_v36 = vpop.f32.mrf.mxu2  ;;  %v12239_v31 = vld [vmem:[%s21090_s3] sm:$0xf] }
 0x6b5   : > { %7883 = vmatpush.bf16.msra.mxu0 %v12288_v37  ;;  %v5686_v58 = vadd.f32 %v5685_v36, %v5637_v11  ;;  %6001 = vmatpush.bf16.msra.mxu1 %v11500_v46  ;;  %v21519_v36 = vld [vmem:[#allocation26_spill] sm:$0xff] }
 0x6b6   : > { %5978 = vmatmul.bf16.gmra.mxu0 %v21379_v8  ;;  %v18462_v9 = vpack.c.bf16 %v6219_v5, %v6211_v20  ;;  %v13802_v8 = vld [vmem:[%s21088_s1 + $0xa1c] sm:$0xf] }
 0x6b7   : > { %v5734_v43 = vpop.f32.mrf.mxu3  ;;  %v11756_v61 = vor.u32 %v13802_v8, %v11753_v22  ;;  %v21518_v20 = vld [vmem:[#allocation5_spill] sm:$0xff] }
 0x6b8   : > { %v5735_v6 = vadd.f32 %v5734_v43, %v5686_v58  ;;  %v21520_v43 = vld [vmem:[#allocation27_spill] sm:$0xff] }
 0x6b9   : > { %v5638_v0 = vpop.f32.mrf.mxu1  ;;  %7884 = vmatpush.bf16.msra.mxu0 %v12272_v38  ;;  %6050 = vmatpush.bf16.msra.mxu2 %v11756_v61  ;;  %v14021_v38 = vld [vmem:[%s21090_s3 + $0x2ec] sm:$0xf0] }
 0x6ba   : > { %v5639_v21 = vadd.f32 %v5638_v0, %v18231_v17  ;;  %v5784_v19 = vadd.f32 %v5783_v40, %v5735_v6  ;;  %v12256_v17 = vor.u32 %v13933_v47, %v12255_v53  ;;  %v13929_v40 = vld [vmem:[%s21090_s3 + $0xc] sm:$0xf0]  ;;  %v12608_v61 = vor.u32 %v14021_v38, %v12607_v26  ;;  %v12479_v53 = vld [vmem:[%s21090_s3 + $0x1e0] sm:$0xf] }
 0x6bb   : > { %v5785_v2 = vpop.f32.mrf.mxu0  ;;  %v12240_v23 = vor.u32 %v13929_v40, %v12239_v31  ;;  %v13989_v47 = vld [vmem:[%s21090_s3 + $0x1ec] sm:$0xf0] }
 0x6bc   : > { %v5687_v56 = vpop.f32.mrf.mxu2  ;;  %v6227_v15 = vmax.f32 %v5784_v19, 0.0  ;;  %v12480_v19 = vor.u32 %v13989_v47, %v12479_v53  ;;  %v13985_v26 = vld [vmem:[%s21090_s3 + $0x1cc] sm:$0xf0]  ;;  %v21523_v47 = vld [vmem:[#allocation11_spill] sm:$0xff] }
 0x6bd   : > { %7885 = vmatpush.bf16.msra.mxu0 %v12256_v17  ;;  %v5688_v25 = vadd.f32 %v5687_v56, %v5639_v21  ;;  %7977 = vmatpush.bf16.msrb.mxu2 %v12608_v61 }
 0x6be   : > { %7928 = vmatpush.bf16.msrb.mxu1 %v12480_v19 }
 0x6bf   : > { %v5736_v11 = vpop.f32.mrf.mxu3 }
 0x6c0   : > { %v5737_v34 = vadd.f32 %v5736_v11, %v5688_v25  ;;  %v21521_v25 = vld [vmem:[#allocation30_spill] sm:$0xff] }
 0x6c1   : > { %v5641_v50 = vpop.f32.mrf.mxu1  ;;  %7886 = vmatpush.bf16.msra.mxu0 %v12240_v23  ;;  %5885 = vmatmul.bf16.gmra.mxu2 %v21519_v36  ;;  %v12591_v23 = vld [vmem:[%s21090_s3 + $0x2c0] sm:$0xf] }
 0x6c2   : > { %v5642_v3 = vadd.f32 %v5641_v50, %v18248_v1  ;;  %v5786_v5 = vadd.f32 %v5785_v2, %v5737_v34  ;;  %v21522_v50 = vld [vmem:[#allocation31_spill] sm:$0xff] }
 0x6c3   : > { %v5788_v37 = vpop.f32.mrf.mxu0 }
 0x6c4   : > { %5836 = vmatmul.bf16.gmra.mxu1 %v21518_v20  ;;  %5934 = vmatmul.bf16.gmra.mxu3 %v21520_v43  ;;  %v6235_v51 = vmax.f32 %v5786_v5, 0.0  ;;  %v5690_v58 = vpop.f32.mrf.mxu2  ;;  %v14049_v20 = vld [vmem:[%s21090_s3 + $0x3cc] sm:$0xf0] }
 0x6c5   : > { %v5691_v1 = vadd.f32 %v5690_v58, %v5642_v3  ;;  %v14017_v3 = vld [vmem:[%s21090_s3 + $0x2cc] sm:$0xf0] }
 0x6c6   : > { %5983 = vmatmul.bf16.gmra.mxu0 %v21383_v12  ;;  %v18500_v8 = vpack.c.bf16 %v6235_v51, %v6227_v15  ;;  %v12735_v12 = vld [vmem:[%s21090_s3 + $0x3e0] sm:$0xf] }
 0x6c7   : > { %v5739_v0 = vpop.f32.mrf.mxu3  ;;  %v12736_v62 = vor.u32 %v14053_v63, %v12735_v12 }
 0x6c8   : > { %v5740_v6 = vadd.f32 %v5739_v0, %v5691_v1 }
 0x6c9   : > { %v5643_v22 = vpop.f32.mrf.mxu1  ;;  %8026 = vmatpush.bf16.msrb.mxu3 %v12736_v62 }
 0x6ca   : > { %v5644_v21 = vadd.f32 %v5643_v22, %v18263_v49  ;;  %v5789_v17 = vadd.f32 %v5788_v37, %v5740_v6  ;;  %v12592_v37 = vor.u32 %v14017_v3, %v12591_v23  ;;  %v12463_v22 = vld [vmem:[%s21090_s3 + $0x1c0] sm:$0xf] }
 0x6cb   : > { %v5790_v2 = vpop.f32.mrf.mxu0  ;;  %v12464_v38 = vor.u32 %v13985_v26, %v12463_v22 }
 0x6cc   : > { %v5692_v49 = vpop.f32.mrf.mxu2  ;;  %7978 = vmatpush.bf16.msrb.mxu2 %v12592_v37 }
 0x6cd   : > { %v5693_v54 = vadd.f32 %v5692_v49, %v5644_v21  ;;  %7929 = vmatpush.bf16.msrb.mxu1 %v12464_v38  ;;  %v21524_v49 = vld [vmem:[#allocation34_spill] sm:$0xff] }
 0x6cf   : > { %v5741_v7 = vpop.f32.mrf.mxu3 }
 0x6d0   : > { %v5742_v46 = vadd.f32 %v5741_v7, %v5693_v54  ;;  %v21525_v7 = vld [vmem:[#allocation35_spill] sm:$0xff]  ;;  %v21526_v54 = vld [vmem:[#allocation50_spill] sm:$0xff] }
 0x6d1   : > { %v5646_v56 = vpop.f32.mrf.mxu1  ;;  %5890 = vmatmul.bf16.gmra.mxu2 %v21521_v25 }
 0x6d2   : > { %v5647_v11 = vadd.f32 %v5646_v56, %v18280_v52  ;;  %v5791_v40 = vadd.f32 %v5790_v2, %v5742_v46  ;;  %v12719_v52 = vld [vmem:[%s21090_s3 + $0x3c0] sm:$0xf] }
 0x6d3   : > { %v5793_v31 = vpop.f32.mrf.mxu0  ;;  %v12720_v36 = vor.u32 %v14049_v20, %v12719_v52  ;;  %v12575_v56 = vld [vmem:[%s21090_s3 + $0x2a0] sm:$0xf] }
 0x6d4   : > { %5841 = vmatmul.bf16.gmra.mxu1 %v21489_v27  ;;  %5939 = vmatmul.bf16.gmra.mxu3 %v21522_v50  ;;  %v6243_v27 = vmax.f32 %v5789_v17, 0.0  ;;  %v6251_v34 = vmax.f32 %v5791_v40, 0.0  ;;  %v12703_v46 = vld [vmem:[%s21090_s3 + $0x3a0] sm:$0xf]  ;;  %v14045_v50 = vld [vmem:[%s21090_s3 + $0x3ac] sm:$0xf0] }
 0x6d5   : > { %8027 = vmatpush.bf16.msrb.mxu3 %v12720_v36  ;;  %v12704_v52 = vor.u32 %v14045_v50, %v12703_v46  ;;  %v13981_v36 = vld [vmem:[%s21090_s3 + $0x1ac] sm:$0xf0] }
 0x6d6   : > { %5988 = vmatmul.bf16.gmra.mxu0 %v21501_v60  ;;  %v5695_v60 = vpop.f32.mrf.mxu2  ;;  %v18538_v43 = vpack.c.bf16 %v6251_v34, %v6243_v27 }
 0x6d7   : > { %v5744_v5 = vpop.f32.mrf.mxu3  ;;  %v5696_v15 = vadd.f32 %v5695_v60, %v5647_v11  ;;  %v14013_v11 = vld [vmem:[%s21090_s3 + $0x2ac] sm:$0xf0] }
 0x6d8   : > { %v12576_v25 = vor.u32 %v14013_v11, %v12575_v56  ;;  %v12431_v56 = vld [vmem:[%s21090_s3 + $0x180] sm:$0xf]  ;;  %v13977_v11 = vld [vmem:[%s21090_s3 + $0x18c] sm:$0xf0] }
 0x6d9   : > { %v5648_v51 = vpop.f32.mrf.mxu1  ;;  %v5745_v0 = vadd.f32 %v5744_v5, %v5696_v15  ;;  %8028 = vmatpush.bf16.msrb.mxu3 %v12704_v52  ;;  %v12447_v5 = vld [vmem:[%s21090_s3 + $0x1a0] sm:$0xf]  ;;  %v12432_v46 = vor.u32 %v13977_v11, %v12431_v56  ;;  %v14001_v11 = vld [vmem:[%s21090_s3 + $0x24c] sm:$0xf0] }
 0x6da   : > { %v5649_v58 = vadd.f32 %v5648_v51, %v18295_v24  ;;  %v14262_v24 = vld [vmem:[%s21089_s2] sm:$0xff]  ;;  %7979 = vmatpush.bf16.msrb.mxu2 %v12576_v25  ;;  %v12448_v15 = vor.u32 %v13981_v36, %v12447_v5  ;;  %v14005_v36 = vld [vmem:[%s21090_s3 + $0x26c] sm:$0xf0] }
 0x6db   : > { %v5795_v1 = vpop.f32.mrf.mxu0  ;;  %v5794_v12 = vadd.f32 %v5793_v31, %v5745_v0  ;;  %v18550_v6 = vperm.slane %v14262_v24, 7  ;;  %v12559_v24 = vld [vmem:[%s21090_s3 + $0x280] sm:$0xf] }
 0x6dc   : > { %7930 = vmatpush.bf16.msrb.mxu1 %v12448_v15  ;;  %v12543_v5 = vld [vmem:[%s21090_s3 + $0x260] sm:$0xf] }
 0x6dd   : > { %v6259_v31 = vmax.f32 %v5794_v12, 0.0  ;;  %v12544_v15 = vor.u32 %v14005_v36, %v12543_v5  ;;  %v12527_v56 = vld [vmem:[%s21090_s3 + $0x240] sm:$0xf] }
 0x6de   : > { %v5697_v21 = vpop.f32.mrf.mxu2 }
 0x6df   : > { %v5746_v61 = vpop.f32.mrf.mxu3  ;;  %v5698_v63 = vadd.f32 %v5697_v21, %v5649_v58 }
 0x6e0   : > { %7931 = vmatpush.bf16.msrb.mxu1 %v12432_v46  ;;  %v12528_v46 = vor.u32 %v14001_v11, %v12527_v56 }
 0x6e1   : > { %v5807_v2 = vpop.f32.mrf.mxu1  ;;  %v5747_v62 = vadd.f32 %v5746_v61, %v5698_v63  ;;  %6051 = vmatmul.bf16.vlgmr.msra.gmra.mxu2 %v21524_v49  ;;  %v21527_v63 = vld [vmem:[#allocation51_spill] sm:$0xff] }
 0x6e2   : > { %v5808_v17 = vadd.f32 %v5807_v2, %v18550_v6  ;;  %v14009_v2 = vld [vmem:[%s21090_s3 + $0x28c] sm:$0xf0] }
 0x6e3   : > { %v5954_v53 = vpop.f32.mrf.mxu0  ;;  %v5796_v19 = vadd.f32 %v5795_v1, %v5747_v62  ;;  %v12560_v62 = vor.u32 %v14009_v2, %v12559_v24 }
 0x6e4   : > { %6002 = vmatmul.bf16.vlgmr.msra.gmra.mxu1 %v21523_v47  ;;  %6100 = vmatmul.bf16.vlgmr.msra.gmra.mxu3 %v21525_v7 }
 0x6e5   : > { %v6267_v40 = vmax.f32 %v5796_v19, 0.0  ;;  %7980 = vmatpush.bf16.msrb.mxu2 %v12560_v62 }
 0x6e6   : > { %7887 = vmatmul.bf16.vlgmr.msra.gmra.mxu0 %v21526_v54  ;;  %v5856_v23 = vpop.f32.mrf.mxu2 }
 0x6e7   : > { %v5905_v3 = vpop.f32.mrf.mxu3  ;;  %v18569_v27 = vpack.c.bf16 %v6267_v40, %v6259_v31  ;;  %v5857_v34 = vadd.f32 %v5856_v23, %v5808_v17 }
 0x6e9   : > { %v5809_v37 = vpop.f32.mrf.mxu1  ;;  %v5906_v20 = vadd.f32 %v5905_v3, %v5857_v34  ;;  %7981 = vmatpush.bf16.msrb.mxu2 %v12544_v15 }
 0x6ea   : > { %v5810_v58 = vadd.f32 %v5809_v37, %v18550_v6 }
 0x6eb   : > { %v5956_v60 = vpop.f32.mrf.mxu0  ;;  %v18577_v51 = vadd.f32 %v5954_v53, %v5906_v20 }
 0x6ed   : > { %7982 = vmatpush.bf16.msrb.mxu2 %v12528_v46 }
 0x6ee   : > { %v5858_v0 = vpop.f32.mrf.mxu2 }
 0x6ef   : > { %v5907_v1 = vpop.f32.mrf.mxu3  ;;  %v5859_v22 = vadd.f32 %v5858_v0, %v5810_v58 }
 0x6f1   : > { %v5812_v26 = vpop.f32.mrf.mxu1  ;;  %v5908_v38 = vadd.f32 %v5907_v1, %v5859_v22  ;;  %6056 = vmatmul.bf16.gmra.mxu2 %v21436_v30  ;;  %v14041_v30 = vld [vmem:[%s21090_s3 + $0x38c] sm:$0xf0] }
 0x6f2   : > { %v5813_v21 = vadd.f32 %v5812_v26, %v18550_v6 }
 0x6f3   : > { %v5959_v12 = vpop.f32.mrf.mxu0  ;;  %v18584_v61 = vadd.f32 %v5956_v60, %v5908_v38  ;;  %v21528_v60 = vld [vmem:[#allocation52_spill] sm:$0xff] }
 0x6f4   : > { %6007 = vmatmul.bf16.gmra.mxu1 %v14708_v14  ;;  %6105 = vmatmul.bf16.gmra.mxu3 %v21437_v33  ;;  %v12687_v14 = vld [vmem:[%s21090_s3 + $0x380] sm:$0xf] }
 0x6f5   : > { %v12688_v47 = vor.u32 %v14041_v30, %v12687_v14 }
 0x6f6   : > { %7892 = vmatmul.bf16.gmra.mxu0 %v21527_v63  ;;  %v5861_v33 = vpop.f32.mrf.mxu2 }
 0x6f7   : > { %v5910_v53 = vpop.f32.mrf.mxu3  ;;  %v5862_v19 = vadd.f32 %v5861_v33, %v5813_v21  ;;  %8029 = vmatpush.bf16.msrb.mxu3 %v12688_v47  ;;  %v13973_v21 = vld [vmem:[%s21090_s3 + $0x16c] sm:$0xf0] }
 0x6f9   : > { %v5814_v17 = vpop.f32.mrf.mxu1  ;;  %v5911_v49 = vadd.f32 %v5910_v53, %v5862_v19 }
 0x6fa   : > { %v5815_v40 = vadd.f32 %v5814_v17, %v18550_v6 }
 0x6fb   : > { %v5961_v7 = vpop.f32.mrf.mxu0  ;;  %v18605_v31 = vadd.f32 %v5959_v12, %v5911_v49  ;;  %v12415_v12 = vld [vmem:[%s21090_s3 + $0x160] sm:$0xf] }
 0x6fc   : > { %v12416_v24 = vor.u32 %v13973_v21, %v12415_v12 }
 0x6fe   : > { %v5863_v25 = vpop.f32.mrf.mxu2  ;;  %7932 = vmatpush.bf16.msrb.mxu1 %v12416_v24  ;;  %v21530_v24 = vld [vmem:[#allocation54_spill] sm:$0xff] }
 0x6ff   : > { %v5912_v50 = vpop.f32.mrf.mxu3  ;;  %v5864_v23 = vadd.f32 %v5863_v25, %v5815_v40 }
 0x701   : > { %v5817_v3 = vpop.f32.mrf.mxu1  ;;  %v5913_v52 = vadd.f32 %v5912_v50, %v5864_v23  ;;  %6061 = vmatmul.bf16.gmra.mxu2 %v21439_v59  ;;  %v14037_v59 = vld [vmem:[%s21090_s3 + $0x36c] sm:$0xf0] }
 0x702   : > { %v5818_v37 = vadd.f32 %v5817_v3, %v18550_v6 }
 0x703   : > { %v5964_v34 = vpop.f32.mrf.mxu0  ;;  %v18612_v20 = vadd.f32 %v5961_v7, %v5913_v52  ;;  %v21529_v7 = vld [vmem:[#allocation53_spill] sm:$0xff] }
 0x704   : > { %6012 = vmatmul.bf16.gmra.mxu1 %v14746_v35  ;;  %6110 = vmatmul.bf16.gmra.mxu3 %v21474_v41  ;;  %v12671_v35 = vld [vmem:[%s21090_s3 + $0x360] sm:$0xf] }
 0x705   : > { %v12672_v0 = vor.u32 %v14037_v59, %v12671_v35 }
 0x706   : > { %7897 = vmatmul.bf16.gmra.mxu0 %v21528_v60  ;;  %v5866_v41 = vpop.f32.mrf.mxu2 }
 0x707   : > { %v5915_v58 = vpop.f32.mrf.mxu3  ;;  %v5867_v1 = vadd.f32 %v5866_v41, %v5818_v37  ;;  %8030 = vmatpush.bf16.msrb.mxu3 %v12672_v0  ;;  %v13969_v37 = vld [vmem:[%s21090_s3 + $0x14c] sm:$0xf0] }
 0x709   : > { %v5819_v22 = vpop.f32.mrf.mxu1  ;;  %v5916_v26 = vadd.f32 %v5915_v58, %v5867_v1 }
 0x70a   : > { %v5820_v14 = vadd.f32 %v5819_v22, %v18550_v6  ;;  %v12863_v22 = vld [vmem:[%s21090_s3 + $0x4e0] sm:$0xf] }
 0x70b   : > { %v5966_v38 = vpop.f32.mrf.mxu0  ;;  %v18633_v2 = vadd.f32 %v5964_v34, %v5916_v26  ;;  %v12399_v34 = vld [vmem:[%s21090_s3 + $0x140] sm:$0xf]  ;;  %v14085_v26 = vld [vmem:[%s21090_s3 + $0x4ec] sm:$0xf0] }
 0x70c   : > { %v12400_v5 = vor.u32 %v13969_v37, %v12399_v34  ;;  %v12864_v12 = vor.u32 %v14085_v26, %v12863_v22  ;;  %v14069_v22 = vld [vmem:[%s21090_s3 + $0x46c] sm:$0xf0] }
 0x70e   : > { %v5868_v62 = vpop.f32.mrf.mxu2  ;;  %7933 = vmatpush.bf16.msrb.mxu1 %v12400_v5  ;;  %8075 = vmatpush.bf16.msrb.mxu0 %v12864_v12  ;;  %v12815_v5 = vld [vmem:[%s21090_s3 + $0x480] sm:$0xf] }
 0x70f   : > { %v5917_v30 = vpop.f32.mrf.mxu3  ;;  %v5869_v33 = vadd.f32 %v5868_v62, %v5820_v14  ;;  %v13997_v14 = vld [vmem:[%s21090_s3 + $0x22c] sm:$0xf0]  ;;  %v12639_v62 = vld [vmem:[%s21090_s3 + $0x320] sm:$0xf] }
 0x711   : > { %v5822_v53 = vpop.f32.mrf.mxu1  ;;  %v5918_v47 = vadd.f32 %v5917_v30, %v5869_v33  ;;  %6066 = vmatmul.bf16.gmra.mxu2 %v21442_v16  ;;  %v14033_v16 = vld [vmem:[%s21090_s3 + $0x34c] sm:$0xf0] }
 0x712   : > { %v5823_v17 = vadd.f32 %v5822_v53, %v18550_v6 }
 0x713   : > { %v5969_v19 = vpop.f32.mrf.mxu0  ;;  %v18640_v49 = vadd.f32 %v5966_v38, %v5918_v47  ;;  %v12847_v47 = vld [vmem:[%s21090_s3 + $0x4c0] sm:$0xf] }
 0x714   : > { %6017 = vmatmul.bf16.gmra.mxu1 %v14784_v4  ;;  %6115 = vmatmul.bf16.gmra.mxu3 %v21477_v48  ;;  %v12655_v4 = vld [vmem:[%s21090_s3 + $0x340] sm:$0xf] }
 0x715   : > { %v12656_v25 = vor.u32 %v14033_v16, %v12655_v4  ;;  %v12383_v16 = vld [vmem:[%s21090_s3 + $0x120] sm:$0xf] }
 0x716   : > { %7902 = vmatmul.bf16.gmra.mxu0 %v21529_v7  ;;  %v5871_v48 = vpop.f32.mrf.mxu2 }
 0x717   : > { %v5920_v40 = vpop.f32.mrf.mxu3  ;;  %v5872_v50 = vadd.f32 %v5871_v48, %v5823_v17  ;;  %8031 = vmatpush.bf16.msrb.mxu3 %v12656_v25  ;;  %v13965_v48 = vld [vmem:[%s21090_s3 + $0x12c] sm:$0xf0] }
 0x718   : > { %v12384_v25 = vor.u32 %v13965_v48, %v12383_v16  ;;  %v12767_v16 = vld [vmem:[%s21090_s3 + $0x420] sm:$0xf] }
 0x719   : > { %v5824_v23 = vpop.f32.mrf.mxu1  ;;  %v5921_v3 = vadd.f32 %v5920_v40, %v5872_v50  ;;  %v12831_v40 = vld [vmem:[%s21090_s3 + $0x4a0] sm:$0xf]  ;;  %v14077_v50 = vld [vmem:[%s21090_s3 + $0x4ac] sm:$0xf0] }
 0x71a   : > { %v5825_v35 = vadd.f32 %v5824_v23, %v18550_v6  ;;  %v12832_v23 = vor.u32 %v14077_v50, %v12831_v40  ;;  %7934 = vmatpush.bf16.msrb.mxu1 %v12384_v25  ;;  %v14061_v40 = vld [vmem:[%s21090_s3 + $0x42c] sm:$0xf0] }
 0x71b   : > { %v5971_v52 = vpop.f32.mrf.mxu0  ;;  %v18661_v36 = vadd.f32 %v5969_v19, %v5921_v3  ;;  %v14081_v19 = vld [vmem:[%s21090_s3 + $0x4cc] sm:$0xf0]  ;;  %v12768_v25 = vor.u32 %v14061_v40, %v12767_v16 }
 0x71c   : > { %v12848_v11 = vor.u32 %v14081_v19, %v12847_v47 }
 0x71e   : > { %v5873_v15 = vpop.f32.mrf.mxu2  ;;  %8076 = vmatpush.bf16.msrb.mxu0 %v12848_v11 }
 0x71f   : > { %v5922_v59 = vpop.f32.mrf.mxu3  ;;  %v5874_v41 = vadd.f32 %v5873_v15, %v5825_v35  ;;  %v14073_v35 = vld [vmem:[%s21090_s3 + $0x48c] sm:$0xf0] }
 0x721   : > { %v5827_v58 = vpop.f32.mrf.mxu1  ;;  %v5923_v0 = vadd.f32 %v5922_v59, %v5874_v41  ;;  %6071 = vmatmul.bf16.gmra.mxu2 %v21445_v10  ;;  %v12816_v41 = vor.u32 %v14073_v35, %v12815_v5  ;;  %v14057_v5 = vld [vmem:[%s21090_s3 + $0x40c] sm:$0xf0] }
 0x722   : > { %v5828_v38 = vadd.f32 %v5827_v58, %v18550_v6  ;;  %8077 = vmatpush.bf16.msrb.mxu0 %v12832_v23 }
 0x723   : > { %v5974_v1 = vpop.f32.mrf.mxu0  ;;  %v18674_v21 = vadd.f32 %v5971_v52, %v5923_v0 }
 0x724   : > { %6022 = vmatmul.bf16.gmra.mxu1 %v21461_v28  ;;  %6120 = vmatmul.bf16.gmra.mxu3 %v21480_v18  ;;  %v12511_v28 = vld [vmem:[%s21090_s3 + $0x220] sm:$0xf]  ;;  %v14029_v18 = vld [vmem:[%s21090_s3 + $0x32c] sm:$0xf0] }
 0x725   : > { %v12512_v10 = vor.u32 %v13997_v14, %v12511_v28  ;;  %v12640_v53 = vor.u32 %v14029_v18, %v12639_v62  ;;  %v21531_v28 = vld [vmem:[#allocation55_spill] sm:$0xff]  ;;  %v13993_v14 = vld [vmem:[%s21090_s3 + $0x20c] sm:$0xf0]  ;;  %v12623_v62 = vld [vmem:[%s21090_s3 + $0x300] sm:$0xf] }
 0x726   : > { %7907 = vmatmul.bf16.gmra.mxu0 %v21530_v24  ;;  %v5876_v30 = vpop.f32.mrf.mxu2 }
 0x727   : > { %v5925_v33 = vpop.f32.mrf.mxu3  ;;  %v5877_v17 = vadd.f32 %v5876_v30, %v5828_v38  ;;  %7983 = vmatpush.bf16.msrb.mxu2 %v12512_v10  ;;  %8032 = vmatpush.bf16.msrb.mxu3 %v12640_v53  ;;  %v14065_v53 = vld [vmem:[%s21090_s3 + $0x44c] sm:$0xf0] }
 0x728   : > { %8078 = vmatpush.bf16.msrb.mxu0 %v12816_v41 }
 0x729   : > { %v5829_v56 = vpop.f32.mrf.mxu1  ;;  %v5926_v4 = vadd.f32 %v5925_v33, %v5877_v17  ;;  %v12783_v33 = vld [vmem:[%s21090_s3 + $0x440] sm:$0xf] }
 0x72a   : > { %v5830_v52 = vadd.f32 %v5829_v56, %v18550_v6  ;;  %v12784_v17 = vor.u32 %v14065_v53, %v12783_v33 }
 0x72b   : > { %v5976_v46 = vpop.f32.mrf.mxu0  ;;  %v18707_v3 = vadd.f32 %v5974_v1, %v5926_v4  ;;  %v12799_v1 = vld [vmem:[%s21090_s3 + $0x460] sm:$0xf] }
 0x72c   : > { %v12800_v38 = vor.u32 %v14069_v22, %v12799_v1  ;;  %v12367_v4 = vld [vmem:[%s21090_s3 + $0x100] sm:$0xf]  ;;  %v21533_v22 = vld [vmem:[#allocation47_spill] sm:$0xff] }
 0x72d   : > { %v21532_v1 = vld [vmem:[#allocation46_spill] sm:$0xff] }
 0x72e   : > { %v5878_v34 = vpop.f32.mrf.mxu2  ;;  %8079 = vmatpush.bf16.msrb.mxu0 %v12800_v38  ;;  %v21534_v38 = vld [vmem:[#allocation56_spill] sm:$0xff] }
 0x72f   : > { %v5927_v37 = vpop.f32.mrf.mxu3  ;;  %v5879_v15 = vadd.f32 %v5878_v34, %v5830_v52 }
 0x731   : > { %v5832_v59 = vpop.f32.mrf.mxu1  ;;  %v5928_v58 = vadd.f32 %v5927_v37, %v5879_v15  ;;  %6076 = vmatmul.bf16.gmra.mxu2 %v21448_v57  ;;  %v12751_v37 = vld [vmem:[%s21090_s3 + $0x400] sm:$0xf] }
 0x732   : > { %v5833_v26 = vadd.f32 %v5832_v59, %v18550_v6  ;;  %8080 = vmatpush.bf16.msrb.mxu0 %v12784_v17  ;;  %v12752_v59 = vor.u32 %v14057_v5, %v12751_v37  ;;  %v14117_v17 = vld [vmem:[%s21090_s3 + $0x5ec] sm:$0xf0]  ;;  %v21537_v5 = vld [vmem:[#allocation49_spill] sm:$0xff] }
 0x733   : > { %v5979_v0 = vpop.f32.mrf.mxu0  ;;  %v18726_v12 = vadd.f32 %v5976_v46, %v5928_v58  ;;  %v13961_v46 = vld [vmem:[%s21090_s3 + $0x10c] sm:$0xf0] }
 0x734   : > { %6027 = vmatmul.bf16.gmra.mxu1 %v21416_v44  ;;  %6125 = vmatmul.bf16.gmra.mxu3 %v21483_v39  ;;  %v12495_v44 = vld [vmem:[%s21090_s3 + $0x200] sm:$0xf]  ;;  %v14025_v39 = vld [vmem:[%s21090_s3 + $0x30c] sm:$0xf0]  ;;  %v12368_v48 = vor.u32 %v13961_v46, %v12367_v4 }
 0x735   : > { %v12496_v57 = vor.u32 %v13993_v14, %v12495_v44  ;;  %v12624_v30 = vor.u32 %v14025_v39, %v12623_v62  ;;  %v13119_v44 = vld [vmem:[%s21090_s3 + $0x6e0] sm:$0xf]  ;;  %v14149_v14 = vld [vmem:[%s21090_s3 + $0x6ec] sm:$0xf0] }
 0x736   : > { %7912 = vmatmul.bf16.gmra.mxu0 %v21531_v28  ;;  %v5881_v10 = vpop.f32.mrf.mxu2  ;;  %7935 = vmatpush.bf16.msrb.mxu1 %v12368_v48  ;;  %v13120_v62 = vor.u32 %v14149_v14, %v13119_v44  ;;  %v21536_v37 = vld [vmem:[#allocation48_spill] sm:$0xff] }
 0x737   : > { %v5930_v18 = vpop.f32.mrf.mxu3  ;;  %v5882_v47 = vadd.f32 %v5881_v10, %v5833_v26  ;;  %7984 = vmatpush.bf16.msrb.mxu2 %v12496_v57  ;;  %8033 = vmatpush.bf16.msrb.mxu3 %v12624_v30  ;;  %v14181_v57 = vld [vmem:[%s21090_s3 + $0x7ec] sm:$0xf0] }
 0x738   : > { %8081 = vmatpush.bf16.msrb.mxu0 %v12768_v25  ;;  %v14177_v44 = vld [vmem:[%s21090_s3 + $0x7cc] sm:$0xf0] }
 0x739   : > { %v5834_v19 = vpop.f32.mrf.mxu1  ;;  %v5931_v56 = vadd.f32 %v5930_v18, %v5882_v47 }
 0x73a   : > { %v5835_v23 = vadd.f32 %v5834_v19, %v18550_v6  ;;  %v12991_v19 = vld [vmem:[%s21090_s3 + $0x5e0] sm:$0xf] }
 0x73b   : > { %v5981_v11 = vpop.f32.mrf.mxu0  ;;  %v18759_v50 = vadd.f32 %v5979_v0, %v5931_v56  ;;  %8173 = vmatpush.bf16.msra.mxu2 %v13120_v62 }
 0x73c   : > { %8082 = vmatpush.bf16.msrb.mxu0 %v12752_v59  ;;  %v13103_v59 = vld [vmem:[%s21090_s3 + $0x6c0] sm:$0xf] }
 0x73e   : > { %v5883_v52 = vpop.f32.mrf.mxu2 }
 0x73f   : > { %v5932_v34 = vpop.f32.mrf.mxu3  ;;  %v5884_v35 = vadd.f32 %v5883_v52, %v5835_v23  ;;  %v21535_v52 = vld [vmem:[#allocation33_spill] sm:$0xff] }
 0x741   : > { %v5837_v15 = vpop.f32.mrf.mxu1  ;;  %v5933_v41 = vadd.f32 %v5932_v34, %v5884_v35  ;;  %6081 = vmatmul.bf16.gmra.mxu2 %v21532_v1 }
 0x742   : > { %v5838_v0 = vadd.f32 %v5837_v15, %v18550_v6  ;;  %v21538_v15 = vld [vmem:[#allocation57_spill] sm:$0xff] }
 0x743   : > { %v5984_v58 = vpop.f32.mrf.mxu0  ;;  %v18772_v26 = vadd.f32 %v5981_v11, %v5933_v41  ;;  %v12992_v11 = vor.u32 %v14117_v17, %v12991_v19  ;;  %v14145_v41 = vld [vmem:[%s21090_s3 + $0x6cc] sm:$0xf0] }
 0x744   : > { %6032 = vmatmul.bf16.gmra.mxu1 %v21498_v55  ;;  %6130 = vmatmul.bf16.gmra.mxu3 %v21533_v22  ;;  %v13247_v55 = vld [vmem:[%s21090_s3 + $0x7e0] sm:$0xf]  ;;  %v13104_v22 = vor.u32 %v14145_v41, %v13103_v59  ;;  %v14173_v41 = vld [vmem:[%s21090_s3 + $0x7ac] sm:$0xf0] }
 0x745   : > { %v13248_v18 = vor.u32 %v14181_v57, %v13247_v55  ;;  %8124 = vmatpush.bf16.msra.mxu1 %v12992_v11 }
 0x746   : > { %7917 = vmatmul.bf16.gmra.mxu0 %v21534_v38  ;;  %v5886_v39 = vpop.f32.mrf.mxu2  ;;  %8174 = vmatpush.bf16.msra.mxu2 %v13104_v22 }
 0x747   : > { %v5935_v10 = vpop.f32.mrf.mxu3  ;;  %v5887_v30 = vadd.f32 %v5886_v39, %v5838_v0  ;;  %8222 = vmatpush.bf16.msra.mxu3 %v13248_v18  ;;  %v14113_v18 = vld [vmem:[%s21090_s3 + $0x5cc] sm:$0xf0] }
 0x749   : > { %v5839_v33 = vpop.f32.mrf.mxu1  ;;  %v5936_v53 = vadd.f32 %v5935_v10, %v5887_v30  ;;  %v12975_v10 = vld [vmem:[%s21090_s3 + $0x5c0] sm:$0xf] }
 0x74a   : > { %v5840_v4 = vadd.f32 %v5839_v33, %v18550_v6  ;;  %v12976_v33 = vor.u32 %v14113_v18, %v12975_v10 }
 0x74b   : > { %v5986_v47 = vpop.f32.mrf.mxu0  ;;  %v18793_v56 = vadd.f32 %v5984_v58, %v5936_v53  ;;  %v13231_v58 = vld [vmem:[%s21090_s3 + $0x7c0] sm:$0xf] }
 0x74c   : > { %v13232_v62 = vor.u32 %v14177_v44, %v13231_v58  ;;  %8125 = vmatpush.bf16.msra.mxu1 %v12976_v33 }
 0x74e   : > { %v5888_v46 = vpop.f32.mrf.mxu2  ;;  %8223 = vmatpush.bf16.msra.mxu3 %v13232_v62  ;;  %v14109_v62 = vld [vmem:[%s21090_s3 + $0x5ac] sm:$0xf0] }
 0x74f   : > { %v5937_v16 = vpop.f32.mrf.mxu3  ;;  %v5889_v48 = vadd.f32 %v5888_v46, %v5840_v4 }
 0x751   : > { %v5842_v40 = vpop.f32.mrf.mxu1  ;;  %v5938_v25 = vadd.f32 %v5937_v16, %v5889_v48  ;;  %6086 = vmatmul.bf16.gmra.mxu2 %v21536_v37  ;;  %v21539_v48 = vld [vmem:[#allocation58_spill] sm:$0xff] }
 0x752   : > { %v5843_v34 = vadd.f32 %v5842_v40, %v18550_v6  ;;  %v21540_v40 = vld [vmem:[#allocation63_spill] sm:$0xff] }
 0x753   : > { %v5989_v23 = vpop.f32.mrf.mxu0  ;;  %v18800_v35 = vadd.f32 %v5986_v47, %v5938_v25  ;;  %v21541_v25 = vld [vmem:[#allocation25_spill] sm:$0xff] }
 0x754   : > { %6037 = vmatmul.bf16.gmra.mxu1 %v21535_v52  ;;  %6135 = vmatmul.bf16.gmra.mxu3 %v21537_v5  ;;  %v21542_v52 = vld [vmem:[#allocation36_spill] sm:$0xff] }
 0x756   : > { %7922 = vmatmul.bf16.gmra.mxu0 %v21538_v15  ;;  %v5891_v0 = vpop.f32.mrf.mxu2 }
 0x757   : > { %v5940_v1 = vpop.f32.mrf.mxu3  ;;  %v5892_v14 = vadd.f32 %v5891_v0, %v5843_v34  ;;  %v13215_v34 = vld [vmem:[%s21090_s3 + $0x7a0] sm:$0xf] }
 0x759   : > { %v5844_v55 = vpop.f32.mrf.mxu1  ;;  %v5941_v57 = vadd.f32 %v5940_v1, %v5892_v14  ;;  %v13216_v1 = vor.u32 %v14173_v41, %v13215_v34  ;;  %v13071_v34 = vld [vmem:[%s21090_s3 + $0x680] sm:$0xf] }
 0x75a   : > { %v5845_v53 = vadd.f32 %v5844_v55, %v18550_v6  ;;  %v13087_v6 = vld [vmem:[%s21090_s3 + $0x6a0] sm:$0xf] }
 0x75b   : > { %v5991_v39 = vpop.f32.mrf.mxu0  ;;  %v18821_v30 = vadd.f32 %v5989_v23, %v5941_v57  ;;  %8224 = vmatpush.bf16.msra.mxu3 %v13216_v1  ;;  %v12959_v55 = vld [vmem:[%s21090_s3 + $0x5a0] sm:$0xf] }
 0x75c   : > { %v12960_v57 = vor.u32 %v14109_v62, %v12959_v55 }
 0x75e   : > { %v5893_v47 = vpop.f32.mrf.mxu2  ;;  %8126 = vmatpush.bf16.msra.mxu1 %v12960_v57  ;;  %v12943_v57 = vld [vmem:[%s21090_s3 + $0x580] sm:$0xf] }
 0x75f   : > { %v5942_v19 = vpop.f32.mrf.mxu3  ;;  %v5894_v17 = vadd.f32 %v5893_v47, %v5845_v53 }
 0x761   : > { %v6003_v11 = vpop.f32.mrf.mxu1  ;;  %v5943_v46 = vadd.f32 %v5942_v19, %v5894_v17  ;;  %7985 = vmatmul.bf16.vlgmr.msrb.gmra.mxu2 %v21540_v40  ;;  %v21543_v19 = vld [vmem:[#allocation59_spill] sm:$0xff] }
 0x762   : > { %v6004_v4 = vadd.f32 %v6003_v11, %v18577_v51  ;;  %v14141_v51 = vld [vmem:[%s21090_s3 + $0x6ac] sm:$0xf0] }
 0x763   : > { %v18825_v16 = vpop.f32.mrf.mxu0  ;;  %v18830_v23 = vadd.f32 %v5991_v39, %v5943_v46  ;;  %v13088_v59 = vor.u32 %v14141_v51, %v13087_v6  ;;  %v21545_v46 = vld [vmem:[#allocation71_spill] sm:$0xff]  ;;  %v21546_v6 = vld [vmem:[#allocation37_spill] sm:$0xff] }
 0x764   : > { %7936 = vmatmul.bf16.vlgmr.msrb.gmra.mxu1 %v21539_v48  ;;  %8034 = vmatmul.bf16.vlgmr.msrb.gmra.mxu3 %v21541_v25 }
 0x765   : > { %8175 = vmatpush.bf16.msra.mxu2 %v13088_v59 }
 0x766   : > { %8083 = vmatmul.bf16.vlgmr.msrb.gmra.mxu0 %v21542_v52  ;;  %v6052_v37 = vpop.f32.mrf.mxu2 }
 0x767   : > { %v6101_v5 = vpop.f32.mrf.mxu3  ;;  %v6053_v58 = vadd.f32 %v6052_v37, %v6004_v4  ;;  %v21544_v4 = vld [vmem:[#allocation64_spill] sm:$0xff]  ;;  %v13199_v37 = vld [vmem:[%s21090_s3 + $0x780] sm:$0xf] }
 0x769   : > { %v6005_v0 = vpop.f32.mrf.mxu1  ;;  %v6102_v44 = vadd.f32 %v6101_v5, %v6053_v58  ;;  %v14169_v58 = vld [vmem:[%s21090_s3 + $0x78c] sm:$0xf0] }
 0x76a   : > { %v6006_v22 = vadd.f32 %v6005_v0, %v18584_v61 }
 0x76b   : > { %v18846_v14 = vpop.f32.mrf.mxu0  ;;  %v6148_v17 = vmax.f32 %v6102_v44, 0.0 }
 0x76e   : > { %v6054_v39 = vpop.f32.mrf.mxu2 }
 0x76f   : > { %v6103_v10 = vpop.f32.mrf.mxu3  ;;  %v6055_v18 = vadd.f32 %v6054_v39, %v6006_v22  ;;  %v13200_v22 = vor.u32 %v14169_v58, %v13199_v37  ;;  %v14105_v39 = vld [vmem:[%s21090_s3 + $0x58c] sm:$0xf0] }
 0x771   : > { %v6008_v33 = vpop.f32.mrf.mxu1  ;;  %v6104_v53 = vadd.f32 %v6103_v10, %v6055_v18  ;;  %7990 = vmatmul.bf16.gmra.mxu2 %v21544_v4  ;;  %8225 = vmatpush.bf16.msra.mxu3 %v13200_v22  ;;  %v12944_v10 = vor.u32 %v14105_v39, %v12943_v57  ;;  %v14165_v57 = vld [vmem:[%s21090_s3 + $0x76c] sm:$0xf0] }
 0x772   : > { %v6009_v61 = vadd.f32 %v6008_v33, %v18605_v31  ;;  %v14137_v31 = vld [vmem:[%s21090_s3 + $0x68c] sm:$0xf0] }
 0x773   : > { %v18855_v47 = vpop.f32.mrf.mxu0  ;;  %v6156_v11 = vmax.f32 %v6104_v53, 0.0  ;;  %v13072_v41 = vor.u32 %v14137_v31, %v13071_v34  ;;  %8127 = vmatpush.bf16.msra.mxu1 %v12944_v10  ;;  %v21548_v34 = vld [vmem:[#allocation60_spill] sm:$0xff] }
 0x774   : > { %7941 = vmatmul.bf16.gmra.mxu1 %v21543_v19  ;;  %8039 = vmatmul.bf16.gmra.mxu3 %v21545_v46 }
 0x775   : > { %v18861_v51 = vpack.c.bf16 %v6156_v11, %v6148_v17  ;;  %8176 = vmatpush.bf16.msra.mxu2 %v13072_v41  ;;  %v21551_v41 = vld [vmem:[#allocation38_spill] sm:$0xff] }
 0x776   : > { %8088 = vmatmul.bf16.gmra.mxu0 %v21546_v6  ;;  %v6057_v5 = vpop.f32.mrf.mxu2 }
 0x777   : > { %21547 = vst [vmem:[#allocation9_spill] sm:$0xff] %v18861_v51  ;;  %v6106_v59 = vpop.f32.mrf.mxu3  ;;  %v6058_v0 = vadd.f32 %v6057_v5, %v6009_v61  ;;  %v21549_v5 = vld [vmem:[#allocation65_spill] sm:$0xff] }
 0x779   : > { %v6010_v1 = vpop.f32.mrf.mxu1  ;;  %v6107_v55 = vadd.f32 %v6106_v59, %v6058_v0  ;;  %v21550_v59 = vld [vmem:[#allocation72_spill] sm:$0xff]  ;;  %v13055_v0 = vld [vmem:[%s21090_s3 + $0x660] sm:$0xf] }
 0x77a   : > { %v6011_v44 = vadd.f32 %v6010_v1, %v18612_v20  ;;  %v13183_v1 = vld [vmem:[%s21090_s3 + $0x760] sm:$0xf] }
 0x77b   : > { %v18876_v62 = vpop.f32.mrf.mxu0  ;;  %v6164_v31 = vmax.f32 %v6107_v55, 0.0 }
 0x77e   : > { %v6059_v18 = vpop.f32.mrf.mxu2 }
 0x77f   : > { %v6108_v33 = vpop.f32.mrf.mxu3  ;;  %v6060_v61 = vadd.f32 %v6059_v18, %v6011_v44  ;;  %v13184_v18 = vor.u32 %v14165_v57, %v13183_v1 }
 0x781   : > { %v6013_v53 = vpop.f32.mrf.mxu1  ;;  %v6109_v17 = vadd.f32 %v6108_v33, %v6060_v61  ;;  %7995 = vmatmul.bf16.gmra.mxu2 %v21549_v5  ;;  %8226 = vmatpush.bf16.msra.mxu3 %v13184_v18  ;;  %v21554_v18 = vld [vmem:[#allocation73_spill] sm:$0xff]  ;;  %v12257_v5 = vld [vmem:[%s21090_s3 + $0x30] sm:$0xf0] }
 0x782   : > { %v6014_v20 = vadd.f32 %v6013_v53, %v18633_v2  ;;  %v14133_v2 = vld [vmem:[%s21090_s3 + $0x66c] sm:$0xf0] }
 0x783   : > { %v18885_v11 = vpop.f32.mrf.mxu0  ;;  %v6172_v37 = vmax.f32 %v6109_v17, 0.0  ;;  %v13056_v55 = vor.u32 %v14133_v2, %v13055_v0  ;;  %v12927_v17 = vld [vmem:[%s21090_s3 + $0x560] sm:$0xf] }
 0x784   : > { %7946 = vmatmul.bf16.gmra.mxu1 %v21548_v34  ;;  %8044 = vmatmul.bf16.gmra.mxu3 %v21550_v59  ;;  %v12321_v59 = vld [vmem:[%s21090_s3 + $0xb0] sm:$0xf0]  ;;  %v21567_v34 = vld [vmem:[#allocation21_spill] sm:$0xff] }
 0x785   : > { %v18891_v58 = vpack.c.bf16 %v6172_v37, %v6164_v31  ;;  %8177 = vmatpush.bf16.msra.mxu2 %v13056_v55  ;;  %v14101_v31 = vld [vmem:[%s21090_s3 + $0x56c] sm:$0xf0]  ;;  %v21552_v55 = vld [vmem:[#allocation61_spill] sm:$0xff] }
 0x786   : > { %8093 = vmatmul.bf16.gmra.mxu0 %v21551_v41  ;;  %v6062_v22 = vpop.f32.mrf.mxu2  ;;  %v12928_v37 = vor.u32 %v14101_v31, %v12927_v17  ;;  %v21555_v41 = vld [vmem:[#allocation40_spill] sm:$0xff] }
 0x787   : > { %v6111_v44 = vpop.f32.mrf.mxu3  ;;  %v6063_v39 = vadd.f32 %v6062_v22, %v6014_v20 }
 0x788   : > { %8128 = vmatpush.bf16.msra.mxu1 %v12928_v37 }
 0x789   : > { %v6015_v10 = vpop.f32.mrf.mxu1  ;;  %v6112_v61 = vadd.f32 %v6111_v44, %v6063_v39 }
 0x78a   : > { %v6016_v33 = vadd.f32 %v6015_v10, %v18640_v49  ;;  %v21553_v10 = vld [vmem:[#allocation66_spill] sm:$0xff] }
 0x78b   : > { %v18906_v53 = vpop.f32.mrf.mxu0  ;;  %v6180_v57 = vmax.f32 %v6112_v61, 0.0  ;;  %v13167_v61 = vld [vmem:[%s21090_s3 + $0x740] sm:$0xf] }
 0x78e   : > { %v6064_v0 = vpop.f32.mrf.mxu2 }
 0x78f   : > { %v6113_v20 = vpop.f32.mrf.mxu3  ;;  %v6065_v2 = vadd.f32 %v6064_v0, %v6016_v33  ;;  %v13039_v33 = vld [vmem:[%s21090_s3 + $0x640] sm:$0xf] }
 0x791   : > { %v6018_v1 = vpop.f32.mrf.mxu1  ;;  %v6114_v22 = vadd.f32 %v6113_v20, %v6065_v2  ;;  %8000 = vmatmul.bf16.gmra.mxu2 %v21553_v10  ;;  %v14161_v20 = vld [vmem:[%s21090_s3 + $0x74c] sm:$0xf0] }
 0x792   : > { %v6019_v49 = vadd.f32 %v6018_v1, %v18661_v36  ;;  %v14129_v36 = vld [vmem:[%s21090_s3 + $0x64c] sm:$0xf0] }
 0x793   : > { %v18915_v44 = vpop.f32.mrf.mxu0  ;;  %v6188_v39 = vmax.f32 %v6114_v22, 0.0  ;;  %v13040_v0 = vor.u32 %v14129_v36, %v13039_v33  ;;  %v13168_v22 = vor.u32 %v14161_v20, %v13167_v61  ;;  %v14097_v33 = vld [vmem:[%s21090_s3 + $0x54c] sm:$0xf0] }
 0x794   : > { %7951 = vmatmul.bf16.gmra.mxu1 %v21552_v55  ;;  %8049 = vmatmul.bf16.gmra.mxu3 %v21554_v18  ;;  %v12911_v18 = vld [vmem:[%s21090_s3 + $0x540] sm:$0xf]  ;;  %v21556_v20 = vld [vmem:[#allocation20_spill] sm:$0xff]  ;;  %v13947_v55 = vld [vmem:[%s21090_s3 + $0xa4] sm:$0xf] }
 0x795   : > { %v18921_v17 = vpack.c.bf16 %v6188_v39, %v6180_v57  ;;  %8178 = vmatpush.bf16.msra.mxu2 %v13040_v0  ;;  %8227 = vmatpush.bf16.msra.mxu3 %v13168_v22  ;;  %v12912_v36 = vor.u32 %v14097_v33, %v12911_v18  ;;  %v12353_v18 = vld [vmem:[%s21090_s3 + $0xf0] sm:$0xf0]  ;;  %v21557_v33 = vld [vmem:[#allocation67_spill] sm:$0xff] }
 0x796   : > { %8098 = vmatmul.bf16.gmra.mxu0 %v21555_v41  ;;  %v6067_v31 = vpop.f32.mrf.mxu2 }
 0x797   : > { %v6116_v37 = vpop.f32.mrf.mxu3  ;;  %v6068_v2 = vadd.f32 %v6067_v31, %v6019_v49  ;;  %8129 = vmatpush.bf16.msra.mxu1 %v12912_v36 }
 0x799   : > { %v6020_v1 = vpop.f32.mrf.mxu1  ;;  %v6117_v39 = vadd.f32 %v6116_v37, %v6068_v2  ;;  %v13955_v2 = vld [vmem:[%s21090_s3 + $0xe4] sm:$0xf] }
 0x79a   : > { %v6021_v57 = vadd.f32 %v6020_v1, %v18674_v21 }
 0x79b   : > { %v18936_v41 = vpop.f32.mrf.mxu0  ;;  %v6196_v1 = vmax.f32 %v6117_v39, 0.0  ;;  %v13151_v39 = vld [vmem:[%s21090_s3 + $0x720] sm:$0xf] }
 0x79e   : > { %v6069_v10 = vpop.f32.mrf.mxu2 }
 0x79f   : > { %v6118_v49 = vpop.f32.mrf.mxu3  ;;  %v6070_v61 = vadd.f32 %v6069_v10, %v6021_v57  ;;  %v21558_v10 = vld [vmem:[#allocation74_spill] sm:$0xff] }
 0x7a0   : > { %v21559_v57 = vld [vmem:[#allocation42_spill] sm:$0xff] }
 0x7a1   : > { %v6023_v31 = vpop.f32.mrf.mxu1  ;;  %v6119_v37 = vadd.f32 %v6118_v49, %v6070_v61  ;;  %8005 = vmatmul.bf16.gmra.mxu2 %v21557_v33  ;;  %v13023_v49 = vld [vmem:[%s21090_s3 + $0x620] sm:$0xf]  ;;  %v14125_v61 = vld [vmem:[%s21090_s3 + $0x62c] sm:$0xf0] }
 0x7a2   : > { %v6024_v21 = vadd.f32 %v6023_v31, %v18707_v3  ;;  %v12356_v3 = vor.u32 %v13955_v2, %v12353_v18  ;;  %v13024_v2 = vor.u32 %v14125_v61, %v13023_v49  ;;  %v14157_v18 = vld [vmem:[%s21090_s3 + $0x72c] sm:$0xf0] }
 0x7a3   : > { %v18945_v0 = vpop.f32.mrf.mxu0  ;;  %v6204_v22 = vmax.f32 %v6119_v37, 0.0 }
 0x7a4   : > { %7956 = vmatmul.bf16.gmra.mxu1 %v21556_v20  ;;  %8054 = vmatmul.bf16.gmra.mxu3 %v21558_v10  ;;  %v13152_v10 = vor.u32 %v14157_v18, %v13151_v39 }
 0x7a5   : > { %v18957_v36 = vpack.c.bf16 %v6204_v22, %v6196_v1  ;;  %8271 = vmatpush.bf16.msra.mxu0 %v12356_v3  ;;  %v13951_v1 = vld [vmem:[%s21090_s3 + $0xc4] sm:$0xf]  ;;  %v12337_v22 = vld [vmem:[%s21090_s3 + $0xd0] sm:$0xf0]  ;;  %8179 = vmatpush.bf16.msra.mxu2 %v13024_v2 }
 0x7a6   : > { %8103 = vmatmul.bf16.gmra.mxu0 %v21559_v57  ;;  %v6072_v31 = vpop.f32.mrf.mxu2  ;;  %v12340_v33 = vor.u32 %v13951_v1, %v12337_v22  ;;  %8228 = vmatpush.bf16.msra.mxu3 %v13152_v10 }
 0x7a7   : > { %v6121_v37 = vpop.f32.mrf.mxu3  ;;  %v6073_v3 = vadd.f32 %v6072_v31, %v6024_v21  ;;  %v12895_v21 = vld [vmem:[%s21090_s3 + $0x520] sm:$0xf]  ;;  %v13943_v31 = vld [vmem:[%s21090_s3 + $0x84] sm:$0xf] }
 0x7a9   : > { %v6025_v57 = vpop.f32.mrf.mxu1  ;;  %v6122_v49 = vadd.f32 %v6121_v37, %v6073_v3  ;;  %8272 = vmatpush.bf16.msra.mxu0 %v12340_v33  ;;  %v12305_v37 = vld [vmem:[%s21090_s3 + $0x90] sm:$0xf0] }
 0x7aa   : > { %v6026_v20 = vadd.f32 %v6025_v57, %v18726_v12  ;;  %v14093_v12 = vld [vmem:[%s21090_s3 + $0x52c] sm:$0xf0]  ;;  %v12324_v57 = vor.u32 %v13947_v55, %v12321_v59  ;;  %v12308_v1 = vor.u32 %v13943_v31, %v12305_v37  ;;  %v13007_v37 = vld [vmem:[%s21090_s3 + $0x600] sm:$0xf] }
 0x7ab   : > { %v18978_v61 = vpop.f32.mrf.mxu0  ;;  %v12896_v39 = vor.u32 %v14093_v12, %v12895_v21  ;;  %v21560_v55 = vld [vmem:[#allocation24_spill] sm:$0xff]  ;;  %v13939_v21 = vld [vmem:[%s21090_s3 + $0x64] sm:$0xf] }
 0x7ac   : > { %v12289_v12 = vld [vmem:[%s21090_s3 + $0x70] sm:$0xf0] }
 0x7ad   : > { %8273 = vmatpush.bf16.msra.mxu0 %v12324_v57  ;;  %8130 = vmatpush.bf16.msra.mxu1 %v12896_v39  ;;  %v6212_v57 = vmax.f32 %v6122_v49, 0.0  ;;  %v21561_v39 = vld [vmem:[#allocation68_spill] sm:$0xff]  ;;  %v13135_v49 = vld [vmem:[%s21090_s3 + $0x700] sm:$0xf] }
 0x7ae   : > { %v6074_v33 = vpop.f32.mrf.mxu2 }
 0x7af   : > { %v6123_v10 = vpop.f32.mrf.mxu3  ;;  %v6075_v2 = vadd.f32 %v6074_v33, %v6026_v20  ;;  %v21562_v33 = vld [vmem:[#allocation75_spill] sm:$0xff] }
 0x7b1   : > { %v6028_v18 = vpop.f32.mrf.mxu1  ;;  %v6124_v3 = vadd.f32 %v6123_v10, %v6075_v2  ;;  %8274 = vmatpush.bf16.msra.mxu0 %v12308_v1  ;;  %8010 = vmatmul.bf16.gmra.mxu2 %v21561_v39  ;;  %v21563_v10 = vld [vmem:[#allocation44_spill] sm:$0xff] }
 0x7b2   : > { %v6029_v22 = vadd.f32 %v6028_v18, %v18759_v50  ;;  %v12292_v50 = vor.u32 %v13939_v21, %v12289_v12  ;;  %v14121_v2 = vld [vmem:[%s21090_s3 + $0x60c] sm:$0xf0]  ;;  %v13935_v12 = vld [vmem:[%s21090_s3 + $0x44] sm:$0xf] }
 0x7b3   : > { %v18999_v59 = vpop.f32.mrf.mxu0  ;;  %v6220_v20 = vmax.f32 %v6124_v3, 0.0  ;;  %v13008_v3 = vor.u32 %v14121_v2, %v13007_v37  ;;  %v14153_v21 = vld [vmem:[%s21090_s3 + $0x70c] sm:$0xf0] }
 0x7b4   : > { %7961 = vmatmul.bf16.gmra.mxu1 %v21560_v55  ;;  %8059 = vmatmul.bf16.gmra.mxu3 %v21562_v33  ;;  %v13931_v55 = vld [vmem:[%s21090_s3 + $0x24] sm:$0xf] }
 0x7b5   : > { %v19011_v31 = vpack.c.bf16 %v6220_v20, %v6212_v57  ;;  %8275 = vmatpush.bf16.msra.mxu0 %v12292_v50  ;;  %v12273_v57 = vld [vmem:[%s21090_s3 + $0x50] sm:$0xf0]  ;;  %8180 = vmatpush.bf16.msra.mxu2 %v13008_v3 }
 0x7b6   : > { %8108 = vmatmul.bf16.gmra.mxu0 %v21563_v10  ;;  %v6077_v18 = vpop.f32.mrf.mxu2  ;;  %v13136_v10 = vor.u32 %v14153_v21, %v13135_v49  ;;  %v12276_v33 = vor.u32 %v13935_v12, %v12273_v57  ;;  %v12260_v49 = vor.u32 %v13931_v55, %v12257_v5  ;;  %v12241_v3 = vld [vmem:[%s21090_s3 + $0x10] sm:$0xf0] }
 0x7b7   : > { %v6126_v1 = vpop.f32.mrf.mxu3  ;;  %v6078_v20 = vadd.f32 %v6077_v18, %v6029_v22  ;;  %v12879_v22 = vld [vmem:[%s21090_s3 + $0x500] sm:$0xf]  ;;  %v21564_v55 = vld [vmem:[#allocation28_spill] sm:$0xff] }
 0x7b8   : > { %8229 = vmatpush.bf16.msra.mxu3 %v13136_v10 }
 0x7b9   : > { %v6030_v50 = vpop.f32.mrf.mxu1  ;;  %v6127_v37 = vadd.f32 %v6126_v1, %v6078_v20  ;;  %8276 = vmatpush.bf16.msra.mxu0 %v12276_v33  ;;  %v13927_v1 = vld [vmem:[%s21090_s3 + $0x4] sm:$0xf] }
 0x7ba   : > { %v6031_v39 = vadd.f32 %v6030_v50, %v18772_v26  ;;  %v14089_v26 = vld [vmem:[%s21090_s3 + $0x50c] sm:$0xf0]  ;;  %v12244_v57 = vor.u32 %v13927_v1, %v12241_v3  ;;  %v12737_v3 = vld [vmem:[%s21090_s3 + $0x3f0] sm:$0xf0] }
 0x7bb   : > { %v19032_v2 = vpop.f32.mrf.mxu0  ;;  %v12880_v18 = vor.u32 %v14089_v26, %v12879_v22  ;;  %v6228_v22 = vmax.f32 %v6127_v37, 0.0  ;;  %v14051_v37 = vld [vmem:[%s21090_s3 + $0x3e4] sm:$0xf] }
 0x7bd   : > { %8277 = vmatpush.bf16.msra.mxu0 %v12260_v49  ;;  %8131 = vmatpush.bf16.msra.mxu1 %v12880_v18  ;;  %v21565_v49 = vld [vmem:[#allocation69_spill] sm:$0xff]  ;;  %v21566_v18 = vld [vmem:[#allocation76_spill] sm:$0xff] }
 0x7be   : > { %v6079_v33 = vpop.f32.mrf.mxu2 }
 0x7bf   : > { %v6128_v10 = vpop.f32.mrf.mxu3  ;;  %v6080_v21 = vadd.f32 %v6079_v33, %v6031_v39  ;;  %v12609_v39 = vld [vmem:[%s21090_s3 + $0x2f0] sm:$0xf0] }
 0x7c1   : > { %v6033_v12 = vpop.f32.mrf.mxu1  ;;  %v6129_v50 = vadd.f32 %v6128_v10, %v6080_v21  ;;  %8278 = vmatpush.bf16.msra.mxu0 %v12244_v57  ;;  %8015 = vmatmul.bf16.gmra.mxu2 %v21565_v49  ;;  %v12740_v57 = vor.u32 %v14051_v37, %v12737_v3  ;;  %v21570_v49 = vld [vmem:[#allocation77_spill] sm:$0xff] }
 0x7c2   : > { %v6034_v20 = vadd.f32 %v6033_v12, %v18793_v56  ;;  %v14019_v56 = vld [vmem:[%s21090_s3 + $0x2e4] sm:$0xf] }
 0x7c3   : > { %v19053_v5 = vpop.f32.mrf.mxu0  ;;  %v6236_v26 = vmax.f32 %v6129_v50, 0.0  ;;  %v12612_v1 = vor.u32 %v14019_v56, %v12609_v39  ;;  %8418 = vmatpush.bf16.msrb.mxu3 %v12740_v57  ;;  %v12481_v56 = vld [vmem:[%s21090_s3 + $0x1f0] sm:$0xf0] }
 0x7c4   : > { %7966 = vmatmul.bf16.gmra.mxu1 %v21564_v55  ;;  %8064 = vmatmul.bf16.gmra.mxu3 %v21566_v18  ;;  %v21569_v18 = vld [vmem:[#allocation70_spill] sm:$0xff] }
 0x7c5   : > { %v19059_v6 = vpack.c.bf16 %v6236_v26, %v6228_v22  ;;  %8369 = vmatpush.bf16.msrb.mxu2 %v12612_v1  ;;  %v21571_v55 = vld [vmem:[#allocation78_spill] sm:$0xff] }
 0x7c6   : > { %8113 = vmatmul.bf16.gmra.mxu0 %v21567_v34  ;;  %v6082_v33 = vpop.f32.mrf.mxu2  ;;  %v13987_v34 = vld [vmem:[%s21090_s3 + $0x1e4] sm:$0xf] }
 0x7c7   : > { %v6131_v10 = vpop.f32.mrf.mxu3  ;;  %v6083_v21 = vadd.f32 %v6082_v33, %v6034_v20  ;;  %v12484_v39 = vor.u32 %v13987_v34, %v12481_v56  ;;  %v14015_v34 = vld [vmem:[%s21090_s3 + $0x2c4] sm:$0xf] }
 0x7c9   : > { %v6035_v12 = vpop.f32.mrf.mxu1  ;;  %v6132_v22 = vadd.f32 %v6131_v10, %v6083_v21  ;;  %8320 = vmatpush.bf16.msrb.mxu1 %v12484_v39  ;;  %v21568_v21 = vld [vmem:[#allocation62_spill] sm:$0xff]  ;;  %v12721_v39 = vld [vmem:[%s21090_s3 + $0x3d0] sm:$0xf0] }
 0x7ca   : > { %v6036_v50 = vadd.f32 %v6035_v12, %v18800_v35 }
 0x7cb   : > { %v19074_v26 = vpop.f32.mrf.mxu0  ;;  %v6244_v12 = vmax.f32 %v6132_v22, 0.0 }
 0x7ce   : > { %v6084_v20 = vpop.f32.mrf.mxu2 }
 0x7cf   : > { %v6133_v33 = vpop.f32.mrf.mxu3  ;;  %v6085_v37 = vadd.f32 %v6084_v20, %v6036_v50  ;;  %v14047_v50 = vld [vmem:[%s21090_s3 + $0x3c4] sm:$0xf] }
 0x7d1   : > { %v6038_v3 = vpop.f32.mrf.mxu1  ;;  %v6134_v10 = vadd.f32 %v6133_v33, %v6085_v37  ;;  %8020 = vmatmul.bf16.gmra.mxu2 %v21569_v18  ;;  %v12724_v37 = vor.u32 %v14047_v50, %v12721_v39  ;;  %v21572_v18 = vld [vmem:[#allocation2_spill] sm:$0xff] }
 0x7d2   : > { %v6039_v35 = vadd.f32 %v6038_v3, %v18821_v30  ;;  %v12593_v30 = vld [vmem:[%s21090_s3 + $0x2d0] sm:$0xf0]  ;;  %v6589_v3 = vld [vmem:[%s21091_s4] sm:$0xf] }
 0x7d3   : > { %v19083_v1 = vpop.f32.mrf.mxu0  ;;  %v6252_v57 = vmax.f32 %v6134_v10, 0.0  ;;  %v12596_v56 = vor.u32 %v14015_v34, %v12593_v30  ;;  %8419 = vmatpush.bf16.msrb.mxu3 %v12724_v37  ;;  %v13983_v34 = vld [vmem:[%s21090_s3 + $0x1c4] sm:$0xf]  ;;  %v12465_v30 = vld [vmem:[%s21090_s3 + $0x1d0] sm:$0xf0]  ;;  %v19115_v50 = vperm.slane %v6589_v3, 0 }
 0x7d4   : > { %7971 = vmatmul.bf16.gmra.mxu1 %v21568_v21  ;;  %8069 = vmatmul.bf16.gmra.mxu3 %v21570_v49  ;;  %v12468_v39 = vor.u32 %v13983_v34, %v12465_v30  ;;  %v14043_v3 = vld [vmem:[%s21090_s3 + $0x3a4] sm:$0xf]  ;;  %v12705_v30 = vld [vmem:[%s21090_s3 + $0x3b0] sm:$0xf0] }
 0x7d5   : > { %v19098_v22 = vpack.c.bf16 %v6252_v57, %v6244_v12  ;;  %8370 = vmatpush.bf16.msrb.mxu2 %v12596_v56 }
 0x7d6   : > { %8118 = vmatmul.bf16.gmra.mxu0 %v21571_v55  ;;  %v6087_v20 = vpop.f32.mrf.mxu2  ;;  %8321 = vmatpush.bf16.msrb.mxu1 %v12468_v39  ;;  %v7891_v39 = vadd.f32 %v18846_v14, %v19115_v50 }
 0x7d7   : > { %v6136_v33 = vpop.f32.mrf.mxu3  ;;  %v6088_v10 = vadd.f32 %v6087_v20, %v6039_v35  ;;  %v7889_v35 = vadd.f32 %v18825_v16, %v19115_v50  ;;  %v14011_v16 = vld [vmem:[%s21090_s3 + $0x2a4] sm:$0xf] }
 0x7d9   : > { %v6040_v55 = vpop.f32.mrf.mxu1  ;;  %v6137_v12 = vadd.f32 %v6136_v33, %v6088_v10 }
 0x7da   : > { %v6041_v49 = vadd.f32 %v6040_v55, %v18830_v23 }
 0x7db   : > { %v19107_v57 = vpop.f32.mrf.mxu0  ;;  %v6260_v21 = vmax.f32 %v6137_v12, 0.0 }
 0x7de   : > { %v6089_v23 = vpop.f32.mrf.mxu2 }
 0x7df   : > { %v6138_v55 = vpop.f32.mrf.mxu3  ;;  %v6090_v56 = vadd.f32 %v6089_v23, %v6041_v49  ;;  %v12577_v49 = vld [vmem:[%s21090_s3 + $0x2b0] sm:$0xf0] }
 0x7e0   : > { %v12580_v34 = vor.u32 %v14011_v16, %v12577_v49 }
 0x7e1   : > { %v7937_v20 = vpop.f32.mrf.mxu1  ;;  %v6139_v37 = vadd.f32 %v6138_v55, %v6090_v56  ;;  %8181 = vmatmul.bf16.vlgmr.msra.gmra.mxu2 %v18322_v42  ;;  %v12708_v55 = vor.u32 %v14043_v3, %v12705_v30 }
 0x7e2   : > { %v7938_v33 = vadd.f32 %v7937_v20, %v7889_v35  ;;  %8371 = vmatpush.bf16.msrb.mxu2 %v12580_v34 }
 0x7e3   : > { %v8084_v10 = vpop.f32.mrf.mxu0  ;;  %v6268_v46 = vmax.f32 %v6139_v37, 0.0  ;;  %8420 = vmatpush.bf16.msrb.mxu3 %v12708_v55  ;;  %v21573_v55 = vld [vmem:[#allocation10_spill] sm:$0xff] }
 0x7e4   : > { %8132 = vmatmul.bf16.vlgmr.msra.gmra.mxu1 %v21572_v18  ;;  %8230 = vmatmul.bf16.vlgmr.msra.gmra.mxu3 %v18861_v51 }
 0x7e5   : > { %v19132_v12 = vpack.c.bf16 %v6268_v46, %v6260_v21  ;;  %v13979_v46 = vld [vmem:[%s21090_s3 + $0x1a4] sm:$0xf]  ;;  %v12449_v21 = vld [vmem:[%s21090_s3 + $0x1b0] sm:$0xf0] }
 0x7e6   : > { %8279 = vmatmul.bf16.vlgmr.msra.gmra.mxu0 %v21526_v54  ;;  %v7986_v35 = vpop.f32.mrf.mxu2  ;;  %v12452_v16 = vor.u32 %v13979_v46, %v12449_v21 }
 0x7e7   : > { %v8035_v23 = vpop.f32.mrf.mxu3  ;;  %v7987_v56 = vadd.f32 %v7986_v35, %v7938_v33  ;;  %v7894_v33 = vadd.f32 %v18855_v47, %v19115_v50  ;;  %v12561_v47 = vld [vmem:[%s21090_s3 + $0x290] sm:$0xf0] }
 0x7e8   : > { %8322 = vmatpush.bf16.msrb.mxu1 %v12452_v16 }
 0x7e9   : > { %v7939_v20 = vpop.f32.mrf.mxu1  ;;  %v8036_v54 = vadd.f32 %v8035_v23, %v7987_v56 }
 0x7ea   : > { %v7940_v37 = vadd.f32 %v7939_v20, %v7891_v39 }
 0x7eb   : > { %v8086_v51 = vpop.f32.mrf.mxu0  ;;  %v19145_v14 = vadd.f32 %v8084_v10, %v8036_v54  ;;  %v14007_v54 = vld [vmem:[%s21090_s3 + $0x284] sm:$0xf] }
 0x7ec   : > { %v14039_v10 = vld [vmem:[%s21090_s3 + $0x384] sm:$0xf]  ;;  %v12564_v20 = vor.u32 %v14007_v54, %v12561_v47  ;;  %v12433_v54 = vld [vmem:[%s21090_s3 + $0x190] sm:$0xf0] }
 0x7ee   : > { %v7988_v49 = vpop.f32.mrf.mxu2  ;;  %8372 = vmatpush.bf16.msrb.mxu2 %v12564_v20 }
 0x7ef   : > { %v8037_v3 = vpop.f32.mrf.mxu3  ;;  %v7989_v34 = vadd.f32 %v7988_v49, %v7940_v37  ;;  %v7896_v37 = vadd.f32 %v18876_v62, %v19115_v50 }
 0x7f1   : > { %v7942_v30 = vpop.f32.mrf.mxu1  ;;  %v8038_v35 = vadd.f32 %v8037_v3, %v7989_v34  ;;  %8186 = vmatmul.bf16.gmra.mxu2 %v18348_v13 }
 0x7f2   : > { %v7943_v39 = vadd.f32 %v7942_v30, %v7894_v33 }
 0x7f3   : > { %v8089_v23 = vpop.f32.mrf.mxu0  ;;  %v19152_v56 = vadd.f32 %v8086_v51, %v8038_v35  ;;  %v12689_v51 = vld [vmem:[%s21090_s3 + $0x390] sm:$0xf0]  ;;  %v13975_v35 = vld [vmem:[%s21090_s3 + $0x184] sm:$0xf] }
 0x7f4   : > { %8137 = vmatmul.bf16.gmra.mxu1 %v21573_v55  ;;  %8235 = vmatmul.bf16.gmra.mxu3 %v18891_v58  ;;  %v12692_v16 = vor.u32 %v14039_v10, %v12689_v51  ;;  %v12436_v47 = vor.u32 %v13975_v35, %v12433_v54  ;;  %v7901_v35 = vadd.f32 %v18906_v53, %v19115_v50 }
 0x7f6   : > { %8284 = vmatmul.bf16.gmra.mxu0 %v21527_v63  ;;  %v7991_v46 = vpop.f32.mrf.mxu2  ;;  %8421 = vmatpush.bf16.msrb.mxu3 %v12692_v16 }
 0x7f7   : > { %v8040_v21 = vpop.f32.mrf.mxu3  ;;  %v7992_v33 = vadd.f32 %v7991_v46, %v7943_v39  ;;  %8323 = vmatpush.bf16.msrb.mxu1 %v12436_v47  ;;  %v7899_v39 = vadd.f32 %v18885_v11, %v19115_v50  ;;  %v14003_v11 = vld [vmem:[%s21090_s3 + $0x264] sm:$0xf] }
 0x7f9   : > { %v7944_v49 = vpop.f32.mrf.mxu1  ;;  %v8041_v34 = vadd.f32 %v8040_v21, %v7992_v33  ;;  %v21574_v33 = vld [vmem:[#allocation6_spill] sm:$0xff] }
 0x7fa   : > { %v7945_v3 = vadd.f32 %v7944_v49, %v7896_v37 }
 0x7fb   : > { %v8091_v30 = vpop.f32.mrf.mxu0  ;;  %v19175_v62 = vadd.f32 %v8089_v23, %v8041_v34  ;;  %v12545_v23 = vld [vmem:[%s21090_s3 + $0x270] sm:$0xf0] }
 0x7fc   : > { %v12548_v34 = vor.u32 %v14003_v11, %v12545_v23  ;;  %v13971_v11 = vld [vmem:[%s21090_s3 + $0x164] sm:$0xf]  ;;  %v12417_v23 = vld [vmem:[%s21090_s3 + $0x170] sm:$0xf0] }
 0x7fe   : > { %v7993_v10 = vpop.f32.mrf.mxu2  ;;  %8373 = vmatpush.bf16.msrb.mxu2 %v12548_v34 }
 0x7ff   : > { %v8042_v20 = vpop.f32.mrf.mxu3  ;;  %v7994_v51 = vadd.f32 %v7993_v10, %v7945_v3  ;;  %v14035_v3 = vld [vmem:[%s21090_s3 + $0x364] sm:$0xf] }
 0x801   : > { %v7947_v37 = vpop.f32.mrf.mxu1  ;;  %v8043_v21 = vadd.f32 %v8042_v20, %v7994_v51  ;;  %8191 = vmatmul.bf16.gmra.mxu2 %v18374_v45 }
 0x802   : > { %v7948_v46 = vadd.f32 %v7947_v37, %v7899_v39 }
 0x803   : > { %v8094_v16 = vpop.f32.mrf.mxu0  ;;  %v19182_v49 = vadd.f32 %v8091_v30, %v8043_v21  ;;  %v12673_v30 = vld [vmem:[%s21090_s3 + $0x370] sm:$0xf0] }
 0x804   : > { %8142 = vmatmul.bf16.gmra.mxu1 %v21574_v33  ;;  %8240 = vmatmul.bf16.gmra.mxu3 %v18921_v17  ;;  %v12676_v39 = vor.u32 %v14035_v3, %v12673_v30 }
 0x806   : > { %8289 = vmatmul.bf16.gmra.mxu0 %v21528_v60  ;;  %v7996_v54 = vpop.f32.mrf.mxu2  ;;  %8422 = vmatpush.bf16.msrb.mxu3 %v12676_v39  ;;  %v12420_v60 = vor.u32 %v13971_v11, %v12417_v23 }
 0x807   : > { %v8045_v47 = vpop.f32.mrf.mxu3  ;;  %v7997_v10 = vadd.f32 %v7996_v54, %v7948_v46  ;;  %v7904_v46 = vadd.f32 %v18915_v44, %v19115_v50  ;;  %v12529_v44 = vld [vmem:[%s21090_s3 + $0x250] sm:$0xf0] }
 0x808   : > { %8324 = vmatpush.bf16.msrb.mxu1 %v12420_v60  ;;  %v13999_v60 = vld [vmem:[%s21090_s3 + $0x244] sm:$0xf] }
 0x809   : > { %v7949_v20 = vpop.f32.mrf.mxu1  ;;  %v8046_v37 = vadd.f32 %v8045_v47, %v7997_v10  ;;  %v21575_v10 = vld [vmem:[#allocation39_spill] sm:$0xff] }
 0x80a   : > { %v7950_v51 = vadd.f32 %v7949_v20, %v7901_v35 }
 0x80b   : > { %v8096_v21 = vpop.f32.mrf.mxu0  ;;  %v19205_v53 = vadd.f32 %v8094_v16, %v8046_v37  ;;  %v14031_v16 = vld [vmem:[%s21090_s3 + $0x344] sm:$0xf]  ;;  %v12657_v37 = vld [vmem:[%s21090_s3 + $0x350] sm:$0xf0] }
 0x80e   : > { %v7998_v3 = vpop.f32.mrf.mxu2 }
 0x80f   : > { %v8047_v34 = vpop.f32.mrf.mxu3  ;;  %v7999_v30 = vadd.f32 %v7998_v3, %v7950_v51  ;;  %v12532_v51 = vor.u32 %v13999_v60, %v12529_v44  ;;  %v13967_v60 = vld [vmem:[%s21090_s3 + $0x144] sm:$0xf]  ;;  %v12401_v44 = vld [vmem:[%s21090_s3 + $0x150] sm:$0xf0] }
 0x811   : > { %v7952_v35 = vpop.f32.mrf.mxu1  ;;  %v8048_v47 = vadd.f32 %v8047_v34, %v7999_v30  ;;  %8196 = vmatmul.bf16.gmra.mxu2 %v18412_v29 }
 0x812   : > { %v7953_v54 = vadd.f32 %v7952_v35, %v7904_v46  ;;  %v12660_v46 = vor.u32 %v14031_v16, %v12657_v37  ;;  %8374 = vmatpush.bf16.msrb.mxu2 %v12532_v51 }
 0x813   : > { %v8099_v39 = vpop.f32.mrf.mxu0  ;;  %v19212_v20 = vadd.f32 %v8096_v21, %v8048_v47  ;;  %v7906_v21 = vadd.f32 %v18936_v41, %v19115_v50 }
 0x814   : > { %8147 = vmatmul.bf16.gmra.mxu1 %v21575_v10  ;;  %8245 = vmatmul.bf16.gmra.mxu3 %v18957_v36 }
 0x815   : > { %8423 = vmatpush.bf16.msrb.mxu3 %v12660_v46 }
 0x816   : > { %8294 = vmatmul.bf16.gmra.mxu0 %v21529_v7  ;;  %v8001_v11 = vpop.f32.mrf.mxu2  ;;  %v12404_v7 = vor.u32 %v13967_v60, %v12401_v44  ;;  %v14027_v60 = vld [vmem:[%s21090_s3 + $0x324] sm:$0xf] }
 0x817   : > { %v8050_v23 = vpop.f32.mrf.mxu3  ;;  %v8002_v3 = vadd.f32 %v8001_v11, %v7953_v54  ;;  %v7909_v54 = vadd.f32 %v18945_v0, %v19115_v50 }
 0x818   : > { %8325 = vmatpush.bf16.msrb.mxu1 %v12404_v7  ;;  %v12865_v7 = vld [vmem:[%s21090_s3 + $0x4f0] sm:$0xf0] }
 0x819   : > { %v7954_v34 = vpop.f32.mrf.mxu1  ;;  %v8051_v35 = vadd.f32 %v8050_v23, %v8002_v3  ;;  %v21576_v3 = vld [vmem:[#allocation41_spill] sm:$0xff] }
 0x81a   : > { %v7955_v30 = vadd.f32 %v7954_v34, %v7906_v21  ;;  %v14083_v34 = vld [vmem:[%s21090_s3 + $0x4e4] sm:$0xf] }
 0x81b   : > { %v8101_v47 = vpop.f32.mrf.mxu0  ;;  %v19235_v41 = vadd.f32 %v8099_v39, %v8051_v35  ;;  %v12868_v0 = vor.u32 %v14083_v34, %v12865_v7  ;;  %v12513_v35 = vld [vmem:[%s21090_s3 + $0x230] sm:$0xf0] }
 0x81d   : > { %8467 = vmatpush.bf16.msrb.mxu0 %v12868_v0 }
 0x81e   : > { %v8003_v16 = vpop.f32.mrf.mxu2 }
 0x81f   : > { %v8052_v51 = vpop.f32.mrf.mxu3  ;;  %v8004_v37 = vadd.f32 %v8003_v16, %v7955_v30  ;;  %v13995_v30 = vld [vmem:[%s21090_s3 + $0x224] sm:$0xf] }
 0x820   : > { %v12516_v44 = vor.u32 %v13995_v30, %v12513_v35 }
 0x821   : > { %v7957_v21 = vpop.f32.mrf.mxu1  ;;  %v8053_v23 = vadd.f32 %v8052_v51, %v8004_v37  ;;  %8201 = vmatmul.bf16.gmra.mxu2 %v18462_v9 }
 0x822   : > { %v7958_v11 = vadd.f32 %v7957_v21, %v7909_v54  ;;  %v7911_v54 = vadd.f32 %v18978_v61, %v19115_v50  ;;  %v14079_v21 = vld [vmem:[%s21090_s3 + $0x4c4] sm:$0xf]  ;;  %8375 = vmatpush.bf16.msrb.mxu2 %v12516_v44  ;;  %v12833_v44 = vld [vmem:[%s21090_s3 + $0x4b0] sm:$0xf0] }
 0x823   : > { %v8104_v46 = vpop.f32.mrf.mxu0  ;;  %v19248_v39 = vadd.f32 %v8101_v47, %v8053_v23  ;;  %v12641_v47 = vld [vmem:[%s21090_s3 + $0x330] sm:$0xf0]  ;;  %v13963_v61 = vld [vmem:[%s21090_s3 + $0x124] sm:$0xf] }
 0x824   : > { %8152 = vmatmul.bf16.gmra.mxu1 %v21576_v3  ;;  %8250 = vmatmul.bf16.gmra.mxu3 %v19011_v31  ;;  %v12644_v37 = vor.u32 %v14027_v60, %v12641_v47  ;;  %v12849_v23 = vld [vmem:[%s21090_s3 + $0x4d0] sm:$0xf0] }
 0x825   : > { %v12852_v0 = vor.u32 %v14079_v21, %v12849_v23  ;;  %v12385_v60 = vld [vmem:[%s21090_s3 + $0x130] sm:$0xf0]  ;;  %v14071_v23 = vld [vmem:[%s21090_s3 + $0x484] sm:$0xf] }
 0x826   : > { %8299 = vmatmul.bf16.gmra.mxu0 %v21530_v24  ;;  %v8006_v16 = vpop.f32.mrf.mxu2  ;;  %8424 = vmatpush.bf16.msrb.mxu3 %v12644_v37  ;;  %v12388_v47 = vor.u32 %v13963_v61, %v12385_v60 }
 0x827   : > { %v8055_v51 = vpop.f32.mrf.mxu3  ;;  %v8007_v34 = vadd.f32 %v8006_v16, %v7958_v11  ;;  %8468 = vmatpush.bf16.msrb.mxu0 %v12852_v0  ;;  %v14075_v11 = vld [vmem:[%s21090_s3 + $0x4a4] sm:$0xf] }
 0x828   : > { %8326 = vmatpush.bf16.msrb.mxu1 %v12388_v47  ;;  %v12801_v47 = vld [vmem:[%s21090_s3 + $0x470] sm:$0xf0] }
 0x829   : > { %v7959_v7 = vpop.f32.mrf.mxu1  ;;  %v8056_v35 = vadd.f32 %v8055_v51, %v8007_v34  ;;  %v7914_v51 = vadd.f32 %v18999_v59, %v19115_v50  ;;  %v12817_v34 = vld [vmem:[%s21090_s3 + $0x490] sm:$0xf0]  ;;  %v14067_v59 = vld [vmem:[%s21090_s3 + $0x464] sm:$0xf] }
 0x82a   : > { %v7960_v30 = vadd.f32 %v7959_v7, %v7911_v54  ;;  %v12836_v54 = vor.u32 %v14075_v11, %v12833_v44  ;;  %v12820_v61 = vor.u32 %v14071_v23, %v12817_v34  ;;  %v21577_v11 = vld [vmem:[#allocation7_spill] sm:$0xff]  ;;  %v7916_v23 = vadd.f32 %v19032_v2, %v19115_v50  ;;  %v13959_v2 = vld [vmem:[%s21090_s3 + $0x104] sm:$0xf] }
 0x82b   : > { %v8106_v24 = vpop.f32.mrf.mxu0  ;;  %v19283_v16 = vadd.f32 %v8104_v46, %v8056_v35 }
 0x82c   : > { %8469 = vmatpush.bf16.msrb.mxu0 %v12836_v54  ;;  %v13991_v54 = vld [vmem:[%s21090_s3 + $0x204] sm:$0xf] }
 0x82e   : > { %v8008_v37 = vpop.f32.mrf.mxu2 }
 0x82f   : > { %v8057_v21 = vpop.f32.mrf.mxu3  ;;  %v8009_v7 = vadd.f32 %v8008_v37, %v7960_v30  ;;  %v12804_v30 = vor.u32 %v14067_v59, %v12801_v47  ;;  %v14023_v37 = vld [vmem:[%s21090_s3 + $0x304] sm:$0xf] }
 0x830   : > { %8470 = vmatpush.bf16.msrb.mxu0 %v12820_v61  ;;  %v14063_v61 = vld [vmem:[%s21090_s3 + $0x444] sm:$0xf] }
 0x831   : > { %v7962_v0 = vpop.f32.mrf.mxu1  ;;  %v8058_v35 = vadd.f32 %v8057_v21, %v8009_v7  ;;  %8206 = vmatmul.bf16.gmra.mxu2 %v18500_v8 }
 0x832   : > { %v7963_v46 = vadd.f32 %v7962_v0, %v7914_v51  ;;  %v12497_v51 = vld [vmem:[%s21090_s3 + $0x210] sm:$0xf0] }
 0x833   : > { %v8109_v60 = vpop.f32.mrf.mxu0  ;;  %v19302_v44 = vadd.f32 %v8106_v24, %v8058_v35  ;;  %v12500_v21 = vor.u32 %v13991_v54, %v12497_v51  ;;  %v12625_v24 = vld [vmem:[%s21090_s3 + $0x310] sm:$0xf0] }
 0x834   : > { %8157 = vmatmul.bf16.gmra.mxu1 %v21577_v11  ;;  %8255 = vmatmul.bf16.gmra.mxu3 %v19059_v6  ;;  %v12628_v0 = vor.u32 %v14023_v37, %v12625_v24  ;;  %v12785_v35 = vld [vmem:[%s21090_s3 + $0x450] sm:$0xf0] }
 0x835   : > { %8471 = vmatpush.bf16.msrb.mxu0 %v12804_v30  ;;  %8376 = vmatpush.bf16.msrb.mxu2 %v12500_v21  ;;  %v12788_v30 = vor.u32 %v14063_v61, %v12785_v35  ;;  %v12369_v37 = vld [vmem:[%s21090_s3 + $0x110] sm:$0xf0]  ;;  %v14055_v35 = vld [vmem:[%s21090_s3 + $0x404] sm:$0xf] }
 0x836   : > { %8304 = vmatmul.bf16.gmra.mxu0 %v21531_v28  ;;  %v8011_v34 = vpop.f32.mrf.mxu2  ;;  %8425 = vmatpush.bf16.msrb.mxu3 %v12628_v0  ;;  %v12372_v24 = vor.u32 %v13959_v2, %v12369_v37  ;;  %v12769_v21 = vld [vmem:[%s21090_s3 + $0x430] sm:$0xf0] }
 0x837   : > { %v8060_v7 = vpop.f32.mrf.mxu3  ;;  %v8012_v59 = vadd.f32 %v8011_v34, %v7963_v46  ;;  %v14059_v46 = vld [vmem:[%s21090_s3 + $0x424] sm:$0xf] }
 0x838   : > { %8327 = vmatpush.bf16.msrb.mxu1 %v12372_v24  ;;  %v13121_v24 = vld [vmem:[%s21090_s3 + $0x6f0] sm:$0xf0] }
 0x839   : > { %v7964_v47 = vpop.f32.mrf.mxu1  ;;  %v8061_v51 = vadd.f32 %v8060_v7, %v8012_v59  ;;  %8472 = vmatpush.bf16.msrb.mxu0 %v12788_v30  ;;  %v7919_v7 = vadd.f32 %v19053_v5, %v19115_v50  ;;  %v12753_v59 = vld [vmem:[%s21090_s3 + $0x410] sm:$0xf0] }
 0x83a   : > { %v7965_v54 = vadd.f32 %v7964_v47, %v7916_v23  ;;  %v12772_v23 = vor.u32 %v14059_v46, %v12769_v21  ;;  %v12756_v2 = vor.u32 %v14055_v35, %v12753_v59  ;;  %v21578_v46 = vld [vmem:[#allocation43_spill] sm:$0xff]  ;;  %v14179_v21 = vld [vmem:[%s21090_s3 + $0x7e4] sm:$0xf] }
 0x83b   : > { %v8111_v28 = vpop.f32.mrf.mxu0  ;;  %v19337_v34 = vadd.f32 %v8109_v60, %v8061_v51 }
 0x83d   : > { %8473 = vmatpush.bf16.msrb.mxu0 %v12772_v23 }
 0x83e   : > { %v8013_v0 = vpop.f32.mrf.mxu2 }
 0x83f   : > { %v8062_v61 = vpop.f32.mrf.mxu3  ;;  %v8014_v47 = vadd.f32 %v8013_v0, %v7965_v54  ;;  %v14147_v54 = vld [vmem:[%s21090_s3 + $0x6e4] sm:$0xf] }
 0x840   : > { %v13124_v23 = vor.u32 %v14147_v54, %v13121_v24  ;;  %v14115_v54 = vld [vmem:[%s21090_s3 + $0x5e4] sm:$0xf]  ;;  %v12993_v24 = vld [vmem:[%s21090_s3 + $0x5f0] sm:$0xf0] }
 0x841   : > { %v7967_v30 = vpop.f32.mrf.mxu1  ;;  %v8063_v51 = vadd.f32 %v8062_v61, %v8014_v47  ;;  %8474 = vmatpush.bf16.msrb.mxu0 %v12756_v2  ;;  %8211 = vmatmul.bf16.gmra.mxu2 %v18538_v43 }
 0x842   : > { %v7968_v60 = vadd.f32 %v7967_v30, %v7919_v7  ;;  %v7921_v7 = vadd.f32 %v19074_v26, %v19115_v50  ;;  %8565 = vmatpush.bf16.msra.mxu2 %v13124_v23  ;;  %v12996_v26 = vor.u32 %v14115_v54, %v12993_v24  ;;  %v13233_v24 = vld [vmem:[%s21090_s3 + $0x7d0] sm:$0xf0] }
 0x843   : > { %v8114_v37 = vpop.f32.mrf.mxu0  ;;  %v19350_v5 = vadd.f32 %v8111_v28, %v8063_v51  ;;  %v13249_v28 = vld [vmem:[%s21090_s3 + $0x7f0] sm:$0xf0] }
 0x844   : > { %8162 = vmatmul.bf16.gmra.mxu1 %v21578_v46  ;;  %8260 = vmatmul.bf16.gmra.mxu3 %v19098_v22  ;;  %v13252_v35 = vor.u32 %v14179_v21, %v13249_v28 }
 0x845   : > { %8516 = vmatpush.bf16.msra.mxu1 %v12996_v26 }
 0x846   : > { %8309 = vmatmul.bf16.gmra.mxu0 %v21534_v38  ;;  %v8016_v0 = vpop.f32.mrf.mxu2  ;;  %8614 = vmatpush.bf16.msra.mxu3 %v13252_v35 }
 0x847   : > { %v8065_v61 = vpop.f32.mrf.mxu3  ;;  %v8017_v59 = vadd.f32 %v8016_v0, %v7968_v60  ;;  %v7924_v60 = vadd.f32 %v19083_v1, %v19115_v50  ;;  %v14143_v1 = vld [vmem:[%s21090_s3 + $0x6c4] sm:$0xf] }
 0x849   : > { %v7969_v47 = vpop.f32.mrf.mxu1  ;;  %v8066_v2 = vadd.f32 %v8065_v61, %v8017_v59  ;;  %v13105_v59 = vld [vmem:[%s21090_s3 + $0x6d0] sm:$0xf0] }
 0x84a   : > { %v7970_v30 = vadd.f32 %v7969_v47, %v7921_v7  ;;  %v14175_v47 = vld [vmem:[%s21090_s3 + $0x7c4] sm:$0xf]  ;;  %v13108_v54 = vor.u32 %v14143_v1, %v13105_v59 }
 0x84b   : > { %v8116_v51 = vpop.f32.mrf.mxu0  ;;  %v19373_v38 = vadd.f32 %v8114_v37, %v8066_v2 }
 0x84c   : > { %8566 = vmatpush.bf16.msra.mxu2 %v13108_v54 }
 0x84e   : > { %v8018_v21 = vpop.f32.mrf.mxu2 }
 0x84f   : > { %v8067_v23 = vpop.f32.mrf.mxu3  ;;  %v8019_v28 = vadd.f32 %v8018_v21, %v7970_v30  ;;  %v7926_v30 = vadd.f32 %v19107_v57, %v19115_v50  ;;  %v13236_v21 = vor.u32 %v14175_v47, %v13233_v24  ;;  %v12977_v57 = vld [vmem:[%s21090_s3 + $0x5d0] sm:$0xf0] }
 0x851   : > { %v7972_v7 = vpop.f32.mrf.mxu1  ;;  %v8068_v61 = vadd.f32 %v8067_v23, %v8019_v28  ;;  %8216 = vmatmul.bf16.gmra.mxu2 %v18569_v27  ;;  %8615 = vmatpush.bf16.msra.mxu3 %v13236_v21  ;;  %v13217_v21 = vld [vmem:[%s21090_s3 + $0x7b0] sm:$0xf0] }
 0x852   : > { %v7973_v0 = vadd.f32 %v7972_v7, %v7924_v60 }
 0x853   : > { %v8119_v35 = vpop.f32.mrf.mxu0  ;;  %v19380_v37 = vadd.f32 %v8116_v51, %v8068_v61  ;;  %v14111_v61 = vld [vmem:[%s21090_s3 + $0x5c4] sm:$0xf] }
 0x854   : > { %8167 = vmatmul.bf16.gmra.mxu1 %v18282_v32  ;;  %8265 = vmatmul.bf16.gmra.mxu3 %v19132_v12  ;;  %v12980_v1 = vor.u32 %v14111_v61, %v12977_v57 }
 0x856   : > { %8314 = vmatmul.bf16.gmra.mxu0 %v21538_v15  ;;  %v8021_v2 = vpop.f32.mrf.mxu2  ;;  %8517 = vmatpush.bf16.msra.mxu1 %v12980_v1 }
 0x857   : > { %v8070_v51 = vpop.f32.mrf.mxu3  ;;  %v8022_v26 = vadd.f32 %v8021_v2, %v7973_v0 }
 0x859   : > { %v7974_v60 = vpop.f32.mrf.mxu1  ;;  %v8071_v28 = vadd.f32 %v8070_v51, %v8022_v26  ;;  %v14171_v26 = vld [vmem:[%s21090_s3 + $0x7a4] sm:$0xf] }
 0x85a   : > { %v7975_v23 = vadd.f32 %v7974_v60, %v7926_v30 }
 0x85b   : > { %v8121_v7 = vpop.f32.mrf.mxu0  ;;  %v19403_v50 = vadd.f32 %v8119_v35, %v8071_v28  ;;  %v14139_v35 = vld [vmem:[%s21090_s3 + $0x6a4] sm:$0xf] }
 0x85e   : > { %v8023_v59 = vpop.f32.mrf.mxu2 }
 0x85f   : > { %v8072_v0 = vpop.f32.mrf.mxu3  ;;  %v8024_v47 = vadd.f32 %v8023_v59, %v7975_v23 }
 0x861   : > { %v8133_v30 = vpop.f32.mrf.mxu1  ;;  %v8073_v51 = vadd.f32 %v8072_v0, %v8024_v47  ;;  %8377 = vmatmul.bf16.vlgmr.msrb.gmra.mxu2 %v21540_v40  ;;  %v14107_v47 = vld [vmem:[%s21090_s3 + $0x5a4] sm:$0xf] }
 0x862   : > { %v8134_v2 = vadd.f32 %v8133_v30, %v19145_v14  ;;  %v13089_v14 = vld [vmem:[%s21090_s3 + $0x6b0] sm:$0xf0] }
 0x863   : > { %v19406_v54 = vpop.f32.mrf.mxu0  ;;  %v19411_v24 = vadd.f32 %v8121_v7, %v8073_v51  ;;  %v13092_v60 = vor.u32 %v14139_v35, %v13089_v14  ;;  %v13220_v7 = vor.u32 %v14171_v26, %v13217_v21  ;;  %v12961_v30 = vld [vmem:[%s21090_s3 + $0x5b0] sm:$0xf0] }
 0x864   : > { %8328 = vmatmul.bf16.vlgmr.msrb.gmra.mxu1 %v21539_v48  ;;  %8426 = vmatmul.bf16.vlgmr.msrb.gmra.mxu3 %v21541_v25  ;;  %v12964_v51 = vor.u32 %v14107_v47, %v12961_v30  ;;  %v13201_v30 = vld [vmem:[%s21090_s3 + $0x790] sm:$0xf0] }
 0x865   : > { %8567 = vmatpush.bf16.msra.mxu2 %v13092_v60  ;;  %8616 = vmatpush.bf16.msra.mxu3 %v13220_v7  ;;  %v21579_v7 = vld [vmem:[#allocation71_spill] sm:$0xff] }
 0x866   : > { %8475 = vmatmul.bf16.vlgmr.msrb.gmra.mxu0 %v21542_v52  ;;  %v8182_v23 = vpop.f32.mrf.mxu2  ;;  %8518 = vmatpush.bf16.msra.mxu1 %v12964_v51 }
 0x867   : > { %v8231_v28 = vpop.f32.mrf.mxu3  ;;  %v8183_v61 = vadd.f32 %v8182_v23, %v8134_v2 }
 0x869   : > { %v8135_v57 = vpop.f32.mrf.mxu1  ;;  %v8232_v59 = vadd.f32 %v8231_v28, %v8183_v61  ;;  %v21580_v61 = vld [vmem:[#allocation37_spill] sm:$0xff] }
 0x86a   : > { %v8136_v1 = vadd.f32 %v8135_v57, %v19152_v56  ;;  %v14135_v57 = vld [vmem:[%s21090_s3 + $0x684] sm:$0xf] }
 0x86b   : > { %v19427_v0 = vpop.f32.mrf.mxu0  ;;  %v9447_v23 = vmax.f32 %v8232_v59, 0.0 }
 0x86e   : > { %v8184_v35 = vpop.f32.mrf.mxu2 }
 0x86f   : > { %v8233_v14 = vpop.f32.mrf.mxu3  ;;  %v8185_v2 = vadd.f32 %v8184_v35, %v8136_v1  ;;  %v14167_v1 = vld [vmem:[%s21090_s3 + $0x784] sm:$0xf] }
 0x871   : > { %v8138_v26 = vpop.f32.mrf.mxu1  ;;  %v8234_v60 = vadd.f32 %v8233_v14, %v8185_v2  ;;  %8382 = vmatmul.bf16.gmra.mxu2 %v21544_v4  ;;  %v13204_v14 = vor.u32 %v14167_v1, %v13201_v30  ;;  %v21585_v4 = vld [vmem:[#allocation38_spill] sm:$0xff] }
 0x872   : > { %v8139_v56 = vadd.f32 %v8138_v26, %v19175_v62  ;;  %v13073_v62 = vld [vmem:[%s21090_s3 + $0x690] sm:$0xf0] }
 0x873   : > { %v19436_v21 = vpop.f32.mrf.mxu0  ;;  %v9451_v28 = vmax.f32 %v8234_v60, 0.0  ;;  %v13076_v47 = vor.u32 %v14135_v57, %v13073_v62  ;;  %8617 = vmatpush.bf16.msra.mxu3 %v13204_v14 }
 0x874   : > { %8333 = vmatmul.bf16.gmra.mxu1 %v21543_v19  ;;  %8431 = vmatmul.bf16.gmra.mxu3 %v21579_v7 }
 0x875   : > { %v19451_v59 = vpack.c.bf16 %v9451_v28, %v9447_v23  ;;  %8568 = vmatpush.bf16.msra.mxu2 %v13076_v47  ;;  %v14103_v23 = vld [vmem:[%s21090_s3 + $0x584] sm:$0xf]  ;;  %v12945_v28 = vld [vmem:[%s21090_s3 + $0x590] sm:$0xf0] }
 0x876   : > { %8480 = vmatmul.bf16.gmra.mxu0 %v21580_v61  ;;  %v8187_v51 = vpop.f32.mrf.mxu2  ;;  %v12948_v57 = vor.u32 %v14103_v23, %v12945_v28  ;;  %v14163_v23 = vld [vmem:[%s21090_s3 + $0x764] sm:$0xf]  ;;  %v13185_v28 = vld [vmem:[%s21090_s3 + $0x770] sm:$0xf0] }
 0x877   : > { %21581 = vst [vmem:[#allocation29_spill] sm:$0xff] %v19451_v59  ;;  %v8236_v35 = vpop.f32.mrf.mxu3  ;;  %v8188_v2 = vadd.f32 %v8187_v51, %v8139_v56  ;;  %v21584_v59 = vld [vmem:[#allocation72_spill] sm:$0xff] }
 0x878   : > { %8519 = vmatpush.bf16.msra.mxu1 %v12948_v57 }
 0x879   : > { %v8140_v26 = vpop.f32.mrf.mxu1  ;;  %v8237_v61 = vadd.f32 %v8236_v35, %v8188_v2  ;;  %v21582_v35 = vld [vmem:[#allocation60_spill] sm:$0xff] }
 0x87a   : > { %v8141_v60 = vadd.f32 %v8140_v26, %v19182_v49  ;;  %v21583_v26 = vld [vmem:[#allocation65_spill] sm:$0xff] }
 0x87b   : > { %v19457_v7 = vpop.f32.mrf.mxu0  ;;  %v9455_v14 = vmax.f32 %v8237_v61, 0.0 }
 0x87e   : > { %v8189_v62 = vpop.f32.mrf.mxu2 }
 0x87f   : > { %v8238_v1 = vpop.f32.mrf.mxu3  ;;  %v8190_v56 = vadd.f32 %v8189_v62, %v8141_v60  ;;  %v14131_v60 = vld [vmem:[%s21090_s3 + $0x664] sm:$0xf] }
 0x881   : > { %v8143_v47 = vpop.f32.mrf.mxu1  ;;  %v8239_v30 = vadd.f32 %v8238_v1, %v8190_v56  ;;  %8387 = vmatmul.bf16.gmra.mxu2 %v21583_v26  ;;  %v13188_v56 = vor.u32 %v14163_v23, %v13185_v28 }
 0x882   : > { %v8144_v49 = vadd.f32 %v8143_v47, %v19205_v53  ;;  %v13057_v53 = vld [vmem:[%s21090_s3 + $0x670] sm:$0xf0] }
 0x883   : > { %v19466_v51 = vpop.f32.mrf.mxu0  ;;  %v9459_v2 = vmax.f32 %v8239_v30, 0.0  ;;  %v13060_v61 = vor.u32 %v14131_v60, %v13057_v53  ;;  %8618 = vmatpush.bf16.msra.mxu3 %v13188_v56  ;;  %v14099_v60 = vld [vmem:[%s21090_s3 + $0x564] sm:$0xf] }
 0x884   : > { %8338 = vmatmul.bf16.gmra.mxu1 %v21582_v35  ;;  %8436 = vmatmul.bf16.gmra.mxu3 %v21584_v59  ;;  %v21590_v35 = vld [vmem:[#allocation40_spill] sm:$0xff] }
 0x885   : > { %v19484_v57 = vpack.c.bf16 %v9459_v2, %v9455_v14  ;;  %8569 = vmatpush.bf16.msra.mxu2 %v13060_v61  ;;  %v12929_v14 = vld [vmem:[%s21090_s3 + $0x570] sm:$0xf0] }
 0x886   : > { %8485 = vmatmul.bf16.gmra.mxu0 %v21585_v4  ;;  %v8192_v62 = vpop.f32.mrf.mxu2  ;;  %v12932_v2 = vor.u32 %v14099_v60, %v12929_v14  ;;  %v14159_v60 = vld [vmem:[%s21090_s3 + $0x744] sm:$0xf]  ;;  %v13169_v14 = vld [vmem:[%s21090_s3 + $0x750] sm:$0xf0] }
 0x887   : > { %21586 = vst [vmem:[#allocation32_spill] sm:$0xff] %v19484_v57  ;;  %v8241_v1 = vpop.f32.mrf.mxu3  ;;  %v8193_v47 = vadd.f32 %v8192_v62, %v8144_v49  ;;  %v21589_v57 = vld [vmem:[#allocation73_spill] sm:$0xff] }
 0x888   : > { %8520 = vmatpush.bf16.msra.mxu1 %v12932_v2 }
 0x889   : > { %v8145_v30 = vpop.f32.mrf.mxu1  ;;  %v8242_v59 = vadd.f32 %v8241_v1, %v8193_v47  ;;  %v21587_v1 = vld [vmem:[#allocation61_spill] sm:$0xff] }
 0x88a   : > { %v8146_v4 = vadd.f32 %v8145_v30, %v19212_v20  ;;  %v21588_v30 = vld [vmem:[#allocation66_spill] sm:$0xff] }
 0x88b   : > { %v19487_v26 = vpop.f32.mrf.mxu0  ;;  %v9463_v56 = vmax.f32 %v8242_v59, 0.0 }
 0x88e   : > { %v8194_v53 = vpop.f32.mrf.mxu2 }
 0x88f   : > { %v8243_v23 = vpop.f32.mrf.mxu3  ;;  %v8195_v49 = vadd.f32 %v8194_v53, %v8146_v4  ;;  %v14127_v4 = vld [vmem:[%s21090_s3 + $0x644] sm:$0xf] }
 0x891   : > { %v8148_v61 = vpop.f32.mrf.mxu1  ;;  %v8244_v28 = vadd.f32 %v8243_v23, %v8195_v49  ;;  %8392 = vmatmul.bf16.gmra.mxu2 %v21588_v30  ;;  %v13172_v49 = vor.u32 %v14159_v60, %v13169_v14 }
 0x892   : > { %v8149_v20 = vadd.f32 %v8148_v61, %v19235_v41  ;;  %v13041_v41 = vld [vmem:[%s21090_s3 + $0x650] sm:$0xf0] }
 0x893   : > { %v19496_v62 = vpop.f32.mrf.mxu0  ;;  %v9467_v47 = vmax.f32 %v8244_v28, 0.0  ;;  %v13044_v59 = vor.u32 %v14127_v4, %v13041_v41  ;;  %8619 = vmatpush.bf16.msra.mxu3 %v13172_v49  ;;  %v14095_v4 = vld [vmem:[%s21090_s3 + $0x544] sm:$0xf]  ;;  %v12359_v49 = vld [vmem:[%s21090_s3 + $0xe8] sm:$0xf] }
 0x894   : > { %8343 = vmatmul.bf16.gmra.mxu1 %v21587_v1  ;;  %8441 = vmatmul.bf16.gmra.mxu3 %v21589_v57  ;;  %v21605_v1 = vld [vmem:[#allocation21_spill] sm:$0xff] }
 0x895   : > { %v19514_v2 = vpack.c.bf16 %v9467_v47, %v9463_v56  ;;  %8570 = vmatpush.bf16.msra.mxu2 %v13044_v59  ;;  %v12913_v56 = vld [vmem:[%s21090_s3 + $0x550] sm:$0xf0] }
 0x896   : > { %8490 = vmatmul.bf16.gmra.mxu0 %v21590_v35  ;;  %v8197_v53 = vpop.f32.mrf.mxu2  ;;  %v12916_v47 = vor.u32 %v14095_v4, %v12913_v56  ;;  %v21593_v56 = vld [vmem:[#allocation67_spill] sm:$0xff] }
 0x897   : > { %21591 = vst [vmem:[#allocation12_spill] sm:$0xff] %v19514_v2  ;;  %v8246_v23 = vpop.f32.mrf.mxu3  ;;  %v8198_v61 = vadd.f32 %v8197_v53, %v8149_v20 }
 0x898   : > { %8521 = vmatpush.bf16.msra.mxu1 %v12916_v47  ;;  %v21595_v47 = vld [vmem:[#allocation42_spill] sm:$0xff] }
 0x899   : > { %v8150_v28 = vpop.f32.mrf.mxu1  ;;  %v8247_v57 = vadd.f32 %v8246_v23, %v8198_v61  ;;  %v21592_v23 = vld [vmem:[#allocation20_spill] sm:$0xff]  ;;  %v13958_v61 = vld [vmem:[%s21090_s3 + $0xf4] sm:$0xf0] }
 0x89a   : > { %v8151_v35 = vadd.f32 %v8150_v28, %v19248_v39 }
 0x89b   : > { %v19517_v30 = vpop.f32.mrf.mxu0  ;;  %v9471_v28 = vmax.f32 %v8247_v57, 0.0  ;;  %v14155_v57 = vld [vmem:[%s21090_s3 + $0x724] sm:$0xf] }
 0x89e   : > { %v8199_v41 = vpop.f32.mrf.mxu2 }
 0x89f   : > { %v8248_v60 = vpop.f32.mrf.mxu3  ;;  %v8200_v20 = vadd.f32 %v8199_v41, %v8151_v35  ;;  %v21594_v35 = vld [vmem:[#allocation74_spill] sm:$0xff] }
 0x8a0   : > { %v14123_v41 = vld [vmem:[%s21090_s3 + $0x624] sm:$0xf] }
 0x8a1   : > { %v8153_v59 = vpop.f32.mrf.mxu1  ;;  %v8249_v14 = vadd.f32 %v8248_v60, %v8200_v20  ;;  %8397 = vmatmul.bf16.gmra.mxu2 %v21593_v56  ;;  %v13025_v60 = vld [vmem:[%s21090_s3 + $0x630] sm:$0xf0] }
 0x8a2   : > { %v8154_v39 = vadd.f32 %v8153_v59, %v19283_v16  ;;  %v12360_v16 = vor.u32 %v13958_v61, %v12359_v49  ;;  %v13028_v20 = vor.u32 %v14123_v41, %v13025_v60  ;;  %v13153_v59 = vld [vmem:[%s21090_s3 + $0x730] sm:$0xf0] }
 0x8a3   : > { %v19526_v53 = vpop.f32.mrf.mxu0  ;;  %v9475_v4 = vmax.f32 %v8249_v14, 0.0  ;;  %v13156_v2 = vor.u32 %v14155_v57, %v13153_v59  ;;  %v12327_v57 = vld [vmem:[%s21090_s3 + $0xa8] sm:$0xf]  ;;  %v13950_v59 = vld [vmem:[%s21090_s3 + $0xb4] sm:$0xf0] }
 0x8a4   : > { %8348 = vmatmul.bf16.gmra.mxu1 %v21592_v23  ;;  %8446 = vmatmul.bf16.gmra.mxu3 %v21594_v35  ;;  %v13954_v35 = vld [vmem:[%s21090_s3 + $0xd4] sm:$0xf0] }
 0x8a5   : > { %8663 = vmatpush.bf16.msra.mxu0 %v12360_v16  ;;  %v19550_v14 = vpack.c.bf16 %v9475_v4, %v9471_v28  ;;  %8571 = vmatpush.bf16.msra.mxu2 %v13028_v20  ;;  %v12311_v20 = vld [vmem:[%s21090_s3 + $0x88] sm:$0xf] }
 0x8a6   : > { %8495 = vmatmul.bf16.gmra.mxu0 %v21595_v47  ;;  %v8202_v49 = vpop.f32.mrf.mxu2  ;;  %v12343_v47 = vld [vmem:[%s21090_s3 + $0xc8] sm:$0xf]  ;;  %8620 = vmatpush.bf16.msra.mxu3 %v13156_v2  ;;  %v12328_v2 = vor.u32 %v13950_v59, %v12327_v57  ;;  %v21597_v59 = vld [vmem:[#allocation24_spill] sm:$0xff] }
 0x8a7   : > { %21596 = vst [vmem:[#allocation13_spill] sm:$0xff] %v19550_v14  ;;  %v8251_v61 = vpop.f32.mrf.mxu3  ;;  %v8203_v56 = vadd.f32 %v8202_v49, %v8154_v39  ;;  %v12344_v16 = vor.u32 %v13954_v35, %v12343_v47  ;;  %v14091_v39 = vld [vmem:[%s21090_s3 + $0x524] sm:$0xf]  ;;  %v13946_v49 = vld [vmem:[%s21090_s3 + $0x94] sm:$0xf0] }
 0x8a9   : > { %v8155_v41 = vpop.f32.mrf.mxu1  ;;  %v8252_v28 = vadd.f32 %v8251_v61, %v8203_v56  ;;  %8664 = vmatpush.bf16.msra.mxu0 %v12344_v16  ;;  %v12312_v16 = vor.u32 %v13946_v49, %v12311_v20  ;;  %v14119_v20 = vld [vmem:[%s21090_s3 + $0x604] sm:$0xf]  ;;  %v13009_v49 = vld [vmem:[%s21090_s3 + $0x610] sm:$0xf0] }
 0x8aa   : > { %v8156_v60 = vadd.f32 %v8155_v41, %v19302_v44  ;;  %v12897_v44 = vld [vmem:[%s21090_s3 + $0x530] sm:$0xf0] }
 0x8ab   : > { %v19559_v4 = vpop.f32.mrf.mxu0  ;;  %v12900_v56 = vor.u32 %v14091_v39, %v12897_v44  ;;  %v12295_v39 = vld [vmem:[%s21090_s3 + $0x68] sm:$0xf]  ;;  %v13942_v44 = vld [vmem:[%s21090_s3 + $0x74] sm:$0xf0] }
 0x8ad   : > { %8665 = vmatpush.bf16.msra.mxu0 %v12328_v2  ;;  %8522 = vmatpush.bf16.msra.mxu1 %v12900_v56  ;;  %v9479_v2 = vmax.f32 %v8252_v28, 0.0  ;;  %v21598_v56 = vld [vmem:[#allocation68_spill] sm:$0xff]  ;;  %v14151_v28 = vld [vmem:[%s21090_s3 + $0x704] sm:$0xf] }
 0x8ae   : > { %v8204_v35 = vpop.f32.mrf.mxu2 }
 0x8af   : > { %v8253_v47 = vpop.f32.mrf.mxu3  ;;  %v8205_v61 = vadd.f32 %v8204_v35, %v8156_v60  ;;  %v21599_v35 = vld [vmem:[#allocation75_spill] sm:$0xff] }
 0x8b1   : > { %v8158_v41 = vpop.f32.mrf.mxu1  ;;  %v8254_v23 = vadd.f32 %v8253_v47, %v8205_v61  ;;  %8666 = vmatpush.bf16.msra.mxu0 %v12312_v16  ;;  %8402 = vmatmul.bf16.gmra.mxu2 %v21598_v56  ;;  %v21600_v47 = vld [vmem:[#allocation44_spill] sm:$0xff] }
 0x8b2   : > { %v8159_v14 = vadd.f32 %v8158_v41, %v19337_v34  ;;  %v12296_v34 = vor.u32 %v13942_v44, %v12295_v39  ;;  %v13137_v61 = vld [vmem:[%s21090_s3 + $0x710] sm:$0xf0] }
 0x8b3   : > { %v19580_v57 = vpop.f32.mrf.mxu0  ;;  %v9483_v60 = vmax.f32 %v8254_v23, 0.0  ;;  %v13012_v23 = vor.u32 %v14119_v20, %v13009_v49  ;;  %v13140_v44 = vor.u32 %v14151_v28, %v13137_v61  ;;  %v12263_v28 = vld [vmem:[%s21090_s3 + $0x28] sm:$0xf]  ;;  %v13934_v61 = vld [vmem:[%s21090_s3 + $0x34] sm:$0xf0] }
 0x8b4   : > { %8353 = vmatmul.bf16.gmra.mxu1 %v21597_v59  ;;  %8451 = vmatmul.bf16.gmra.mxu3 %v21599_v35  ;;  %v13938_v35 = vld [vmem:[%s21090_s3 + $0x54] sm:$0xf0] }
 0x8b5   : > { %8667 = vmatpush.bf16.msra.mxu0 %v12296_v34  ;;  %v19604_v41 = vpack.c.bf16 %v9483_v60, %v9479_v2  ;;  %8572 = vmatpush.bf16.msra.mxu2 %v13012_v23 }
 0x8b6   : > { %8500 = vmatmul.bf16.gmra.mxu0 %v21600_v47  ;;  %v8207_v16 = vpop.f32.mrf.mxu2  ;;  %v12279_v47 = vld [vmem:[%s21090_s3 + $0x48] sm:$0xf]  ;;  %8621 = vmatpush.bf16.msra.mxu3 %v13140_v44 }
 0x8b7   : > { %21601 = vst [vmem:[#allocation3_spill] sm:$0xff] %v19604_v41  ;;  %v8256_v39 = vpop.f32.mrf.mxu3  ;;  %v8208_v56 = vadd.f32 %v8207_v16, %v8159_v14  ;;  %v12280_v34 = vor.u32 %v13938_v35, %v12279_v47  ;;  %v14087_v14 = vld [vmem:[%s21090_s3 + $0x504] sm:$0xf]  ;;  %v12247_v16 = vld [vmem:[%s21090_s3 + $0x8] sm:$0xf] }
 0x8b9   : > { %v8160_v20 = vpop.f32.mrf.mxu1  ;;  %v8257_v2 = vadd.f32 %v8256_v39, %v8208_v56  ;;  %8668 = vmatpush.bf16.msra.mxu0 %v12280_v34  ;;  %v12264_v56 = vor.u32 %v13934_v61, %v12263_v28  ;;  %v13930_v39 = vld [vmem:[%s21090_s3 + $0x14] sm:$0xf0]  ;;  %v21602_v61 = vld [vmem:[#allocation28_spill] sm:$0xff] }
 0x8ba   : > { %v8161_v49 = vadd.f32 %v8160_v20, %v19350_v5  ;;  %v12881_v5 = vld [vmem:[%s21090_s3 + $0x510] sm:$0xf0]  ;;  %v12248_v34 = vor.u32 %v13930_v39, %v12247_v16 }
 0x8bb   : > { %v19613_v60 = vpop.f32.mrf.mxu0  ;;  %v12884_v35 = vor.u32 %v14087_v14, %v12881_v5  ;;  %v9487_v14 = vmax.f32 %v8257_v2, 0.0 }
 0x8bd   : > { %8669 = vmatpush.bf16.msra.mxu0 %v12264_v56  ;;  %8523 = vmatpush.bf16.msra.mxu1 %v12884_v35  ;;  %v21603_v56 = vld [vmem:[#allocation69_spill] sm:$0xff]  ;;  %v21604_v35 = vld [vmem:[#allocation76_spill] sm:$0xff] }
 0x8be   : > { %v8209_v47 = vpop.f32.mrf.mxu2 }
 0x8bf   : > { %v8258_v23 = vpop.f32.mrf.mxu3  ;;  %v8210_v44 = vadd.f32 %v8209_v47, %v8161_v49  ;;  %v12615_v49 = vld [vmem:[%s21090_s3 + $0x2e8] sm:$0xf] }
 0x8c0   : > { %v12743_v47 = vld [vmem:[%s21090_s3 + $0x3e8] sm:$0xf] }
 0x8c1   : > { %v8163_v20 = vpop.f32.mrf.mxu1  ;;  %v8259_v59 = vadd.f32 %v8258_v23, %v8210_v44  ;;  %8670 = vmatpush.bf16.msra.mxu0 %v12248_v34  ;;  %8407 = vmatmul.bf16.gmra.mxu2 %v21603_v56 }
 0x8c2   : > { %v8164_v41 = vadd.f32 %v8163_v20, %v19373_v38  ;;  %v14022_v38 = vld [vmem:[%s21090_s3 + $0x2f4] sm:$0xf0] }
 0x8c3   : > { %v19634_v28 = vpop.f32.mrf.mxu0  ;;  %v9491_v5 = vmax.f32 %v8259_v59, 0.0  ;;  %v12616_v2 = vor.u32 %v14022_v38, %v12615_v49  ;;  %v14054_v59 = vld [vmem:[%s21090_s3 + $0x3f4] sm:$0xf0]  ;;  %v12487_v49 = vld [vmem:[%s21090_s3 + $0x1e8] sm:$0xf] }
 0x8c4   : > { %8358 = vmatmul.bf16.gmra.mxu1 %v21602_v61  ;;  %8456 = vmatmul.bf16.gmra.mxu3 %v21604_v35  ;;  %v12744_v44 = vor.u32 %v14054_v59, %v12743_v47  ;;  %v21610_v61 = vld [vmem:[#allocation78_spill] sm:$0xff] }
 0x8c5   : > { %v19652_v23 = vpack.c.bf16 %v9491_v5, %v9487_v14  ;;  %8761 = vmatpush.bf16.msrb.mxu2 %v12616_v2  ;;  %v13990_v14 = vld [vmem:[%s21090_s3 + $0x1f4] sm:$0xf0] }
 0x8c6   : > { %8505 = vmatmul.bf16.gmra.mxu0 %v21605_v1  ;;  %v8212_v16 = vpop.f32.mrf.mxu2  ;;  %8810 = vmatpush.bf16.msrb.mxu3 %v12744_v44  ;;  %v12488_v5 = vor.u32 %v13990_v14, %v12487_v49  ;;  %v12727_v49 = vld [vmem:[%s21090_s3 + $0x3c8] sm:$0xf]  ;;  %v14050_v14 = vld [vmem:[%s21090_s3 + $0x3d4] sm:$0xf0] }
 0x8c7   : > { %21606 = vst [vmem:[#allocation14_spill] sm:$0xff] %v19652_v23  ;;  %v8261_v39 = vpop.f32.mrf.mxu3  ;;  %v8213_v20 = vadd.f32 %v8212_v16, %v8164_v41  ;;  %v21609_v23 = vld [vmem:[#allocation77_spill] sm:$0xff] }
 0x8c8   : > { %8712 = vmatpush.bf16.msrb.mxu1 %v12488_v5 }
 0x8c9   : > { %v8165_v34 = vpop.f32.mrf.mxu1  ;;  %v8262_v35 = vadd.f32 %v8261_v39, %v8213_v20  ;;  %v21607_v39 = vld [vmem:[#allocation62_spill] sm:$0xff] }
 0x8ca   : > { %v8166_v1 = vadd.f32 %v8165_v34, %v19380_v37  ;;  %v21608_v34 = vld [vmem:[#allocation70_spill] sm:$0xff] }
 0x8cb   : > { %v19655_v56 = vpop.f32.mrf.mxu0  ;;  %v9495_v44 = vmax.f32 %v8262_v35, 0.0 }
 0x8ce   : > { %v8214_v38 = vpop.f32.mrf.mxu2 }
 0x8cf   : > { %v8263_v41 = vpop.f32.mrf.mxu3  ;;  %v8215_v47 = vadd.f32 %v8214_v38, %v8166_v1  ;;  %v12599_v1 = vld [vmem:[%s21090_s3 + $0x2c8] sm:$0xf] }
 0x8d1   : > { %v8168_v2 = vpop.f32.mrf.mxu1  ;;  %v8264_v59 = vadd.f32 %v8263_v41, %v8215_v47  ;;  %8412 = vmatmul.bf16.gmra.mxu2 %v21608_v34  ;;  %v12728_v47 = vor.u32 %v14050_v14, %v12727_v49 }
 0x8d2   : > { %v8169_v37 = vadd.f32 %v8168_v2, %v19403_v50  ;;  %v14018_v50 = vld [vmem:[%s21090_s3 + $0x2d4] sm:$0xf0] }
 0x8d3   : > { %v19664_v16 = vpop.f32.mrf.mxu0  ;;  %v9499_v20 = vmax.f32 %v8264_v59, 0.0  ;;  %v12600_v35 = vor.u32 %v14018_v50, %v12599_v1  ;;  %8811 = vmatpush.bf16.msrb.mxu3 %v12728_v47  ;;  %v12471_v1 = vld [vmem:[%s21090_s3 + $0x1c8] sm:$0xf] }
 0x8d4   : > { %8363 = vmatmul.bf16.gmra.mxu1 %v21607_v39  ;;  %8461 = vmatmul.bf16.gmra.mxu3 %v21609_v23 }
 0x8d5   : > { %v19682_v5 = vpack.c.bf16 %v9499_v20, %v9495_v44  ;;  %8762 = vmatpush.bf16.msrb.mxu2 %v12600_v35  ;;  %v13986_v44 = vld [vmem:[%s21090_s3 + $0x1d4] sm:$0xf0] }
 0x8d6   : > { %8510 = vmatmul.bf16.gmra.mxu0 %v21610_v61  ;;  %v8217_v38 = vpop.f32.mrf.mxu2  ;;  %v12472_v50 = vor.u32 %v13986_v44, %v12471_v1  ;;  %v21613_v1 = vld [vmem:[#allocation50_spill] sm:$0xff]  ;;  %v12711_v44 = vld [vmem:[%s21090_s3 + $0x3a8] sm:$0xf] }
 0x8d7   : > { %21611 = vst [vmem:[#allocation15_spill] sm:$0xff] %v19682_v5  ;;  %v8266_v41 = vpop.f32.mrf.mxu3  ;;  %v8218_v2 = vadd.f32 %v8217_v38, %v8169_v37  ;;  %v14263_v37 = vld [vmem:[%s21091_s4] sm:$0xf] }
 0x8d8   : > { %v19696_v20 = vperm.slane %v14263_v37, 1  ;;  %8713 = vmatpush.bf16.msrb.mxu1 %v12472_v50  ;;  %v21612_v37 = vld [vmem:[#allocation9_spill] sm:$0xff] }
 0x8d9   : > { %v8170_v59 = vpop.f32.mrf.mxu1  ;;  %v8267_v23 = vadd.f32 %v8266_v41, %v8218_v2  ;;  %v14046_v50 = vld [vmem:[%s21090_s3 + $0x3b4] sm:$0xf0] }
 0x8da   : > { %v8171_v61 = vadd.f32 %v8170_v59, %v19411_v24  ;;  %v8281_v24 = vadd.f32 %v19406_v54, %v19696_v20  ;;  %v12583_v54 = vld [vmem:[%s21090_s3 + $0x2a8] sm:$0xf] }
 0x8db   : > { %v19685_v34 = vpop.f32.mrf.mxu0  ;;  %v9503_v59 = vmax.f32 %v8267_v23, 0.0 }
 0x8de   : > { %v8219_v49 = vpop.f32.mrf.mxu2 }
 0x8df   : > { %v8268_v35 = vpop.f32.mrf.mxu3  ;;  %v8220_v14 = vadd.f32 %v8219_v49, %v8171_v61  ;;  %v14014_v61 = vld [vmem:[%s21090_s3 + $0x2b4] sm:$0xf0]  ;;  %v8283_v49 = vadd.f32 %v19427_v0, %v19696_v20 }
 0x8e0   : > { %v12584_v23 = vor.u32 %v14014_v61, %v12583_v54  ;;  %v12455_v54 = vld [vmem:[%s21090_s3 + $0x1a8] sm:$0xf] }
 0x8e1   : > { %v8329_v38 = vpop.f32.mrf.mxu1  ;;  %v8269_v47 = vadd.f32 %v8268_v35, %v8220_v14  ;;  %8573 = vmatmul.bf16.vlgmr.msra.gmra.mxu2 %v18322_v42 }
 0x8e2   : > { %v8330_v41 = vadd.f32 %v8329_v38, %v8281_v24  ;;  %v12712_v38 = vor.u32 %v14046_v50, %v12711_v44  ;;  %8763 = vmatpush.bf16.msrb.mxu2 %v12584_v23 }
 0x8e3   : > { %v8476_v2 = vpop.f32.mrf.mxu0  ;;  %v9507_v5 = vmax.f32 %v8269_v47, 0.0 }
 0x8e4   : > { %8524 = vmatmul.bf16.vlgmr.msra.gmra.mxu1 %v21572_v18  ;;  %8622 = vmatmul.bf16.vlgmr.msra.gmra.mxu3 %v21612_v37 }
 0x8e5   : > { %v19716_v24 = vpack.c.bf16 %v9507_v5, %v9503_v59  ;;  %8812 = vmatpush.bf16.msrb.mxu3 %v12712_v38  ;;  %v13982_v5 = vld [vmem:[%s21090_s3 + $0x1b4] sm:$0xf0]  ;;  %v8288_v38 = vadd.f32 %v19457_v7, %v19696_v20 }
 0x8e6   : > { %8671 = vmatmul.bf16.vlgmr.msra.gmra.mxu0 %v21613_v1  ;;  %v8378_v35 = vpop.f32.mrf.mxu2  ;;  %v12456_v59 = vor.u32 %v13982_v5, %v12455_v54 }
 0x8e7   : > { %21614 = vst [vmem:[#allocation16_spill] sm:$0xff] %v19716_v24  ;;  %v8427_v14 = vpop.f32.mrf.mxu3  ;;  %v8379_v47 = vadd.f32 %v8378_v35, %v8330_v41  ;;  %v8286_v41 = vadd.f32 %v19436_v21, %v19696_v20  ;;  %v14010_v21 = vld [vmem:[%s21090_s3 + $0x294] sm:$0xf0] }
 0x8e8   : > { %8714 = vmatpush.bf16.msrb.mxu1 %v12456_v59 }
 0x8e9   : > { %v8331_v1 = vpop.f32.mrf.mxu1  ;;  %v8428_v42 = vadd.f32 %v8427_v14, %v8379_v47 }
 0x8ea   : > { %v8332_v37 = vadd.f32 %v8331_v1, %v8283_v49 }
 0x8eb   : > { %v8478_v18 = vpop.f32.mrf.mxu0  ;;  %v19726_v0 = vadd.f32 %v8476_v2, %v8428_v42  ;;  %v12567_v42 = vld [vmem:[%s21090_s3 + $0x288] sm:$0xf] }
 0x8ec   : > { %v12695_v2 = vld [vmem:[%s21090_s3 + $0x388] sm:$0xf] }
 0x8ee   : > { %v8380_v61 = vpop.f32.mrf.mxu2 }
 0x8ef   : > { %v8429_v1 = vpop.f32.mrf.mxu3  ;;  %v8381_v44 = vadd.f32 %v8380_v61, %v8332_v37  ;;  %v12568_v37 = vor.u32 %v14010_v21, %v12567_v42 }
 0x8f1   : > { %v8334_v23 = vpop.f32.mrf.mxu1  ;;  %v8430_v49 = vadd.f32 %v8429_v1, %v8381_v44  ;;  %8578 = vmatmul.bf16.gmra.mxu2 %v18348_v13 }
 0x8f2   : > { %v8335_v50 = vadd.f32 %v8334_v23, %v8286_v41  ;;  %8764 = vmatpush.bf16.msrb.mxu2 %v12568_v37  ;;  %v12439_v23 = vld [vmem:[%s21090_s3 + $0x188] sm:$0xf] }
 0x8f3   : > { %v8481_v35 = vpop.f32.mrf.mxu0  ;;  %v19733_v14 = vadd.f32 %v8478_v18, %v8430_v49  ;;  %v14042_v18 = vld [vmem:[%s21090_s3 + $0x394] sm:$0xf0] }
 0x8f4   : > { %8529 = vmatmul.bf16.gmra.mxu1 %v21573_v55  ;;  %8627 = vmatmul.bf16.gmra.mxu3 %v18891_v58  ;;  %v12696_v5 = vor.u32 %v14042_v18, %v12695_v2  ;;  %v13978_v49 = vld [vmem:[%s21090_s3 + $0x194] sm:$0xf0] }
 0x8f5   : > { %v12440_v42 = vor.u32 %v13978_v49, %v12439_v23 }
 0x8f6   : > { %8676 = vmatmul.bf16.gmra.mxu0 %v21527_v63  ;;  %v8383_v47 = vpop.f32.mrf.mxu2  ;;  %8813 = vmatpush.bf16.msrb.mxu3 %v12696_v5 }
 0x8f7   : > { %v8432_v54 = vpop.f32.mrf.mxu3  ;;  %v8384_v59 = vadd.f32 %v8383_v47, %v8335_v50  ;;  %8715 = vmatpush.bf16.msrb.mxu1 %v12440_v42  ;;  %v8291_v50 = vadd.f32 %v19466_v51, %v19696_v20  ;;  %v12551_v51 = vld [vmem:[%s21090_s3 + $0x268] sm:$0xf] }
 0x8f9   : > { %v8336_v41 = vpop.f32.mrf.mxu1  ;;  %v8433_v1 = vadd.f32 %v8432_v54, %v8384_v59  ;;  %v14006_v59 = vld [vmem:[%s21090_s3 + $0x274] sm:$0xf0] }
 0x8fa   : > { %v8337_v61 = vadd.f32 %v8336_v41, %v8288_v38  ;;  %v12679_v41 = vld [vmem:[%s21090_s3 + $0x368] sm:$0xf] }
 0x8fb   : > { %v8483_v44 = vpop.f32.mrf.mxu0  ;;  %v19756_v7 = vadd.f32 %v8481_v35, %v8433_v1  ;;  %v21615_v35 = vld [vmem:[#allocation52_spill] sm:$0xff]  ;;  %v14038_v1 = vld [vmem:[%s21090_s3 + $0x374] sm:$0xf0] }
 0x8fc   : > { %v12680_v42 = vor.u32 %v14038_v1, %v12679_v41 }
 0x8fe   : > { %v8385_v21 = vpop.f32.mrf.mxu2  ;;  %8814 = vmatpush.bf16.msrb.mxu3 %v12680_v42 }
 0x8ff   : > { %v8434_v2 = vpop.f32.mrf.mxu3  ;;  %v8386_v37 = vadd.f32 %v8385_v21, %v8337_v61  ;;  %v12552_v61 = vor.u32 %v14006_v59, %v12551_v51  ;;  %v13974_v51 = vld [vmem:[%s21090_s3 + $0x174] sm:$0xf0] }
 0x901   : > { %v8339_v18 = vpop.f32.mrf.mxu1  ;;  %v8435_v47 = vadd.f32 %v8434_v2, %v8386_v37  ;;  %8583 = vmatmul.bf16.gmra.mxu2 %v18374_v45 }
 0x902   : > { %v8340_v38 = vadd.f32 %v8339_v18, %v8291_v50  ;;  %8765 = vmatpush.bf16.msrb.mxu2 %v12552_v61 }
 0x903   : > { %v8486_v54 = vpop.f32.mrf.mxu0  ;;  %v19763_v5 = vadd.f32 %v8483_v44, %v8435_v47  ;;  %v8293_v44 = vadd.f32 %v19487_v26, %v19696_v20  ;;  %v12423_v47 = vld [vmem:[%s21090_s3 + $0x168] sm:$0xf] }
 0x904   : > { %8534 = vmatmul.bf16.gmra.mxu1 %v21574_v33  ;;  %8632 = vmatmul.bf16.gmra.mxu3 %v18921_v17  ;;  %v12424_v59 = vor.u32 %v13974_v51, %v12423_v47  ;;  %v8298_v47 = vadd.f32 %v19517_v30, %v19696_v20 }
 0x906   : > { %8681 = vmatmul.bf16.gmra.mxu0 %v21615_v35  ;;  %v8388_v23 = vpop.f32.mrf.mxu2  ;;  %8716 = vmatpush.bf16.msrb.mxu1 %v12424_v59 }
 0x907   : > { %v8437_v49 = vpop.f32.mrf.mxu3  ;;  %v8389_v50 = vadd.f32 %v8388_v23, %v8340_v38  ;;  %v8296_v38 = vadd.f32 %v19496_v62, %v19696_v20  ;;  %v12535_v62 = vld [vmem:[%s21090_s3 + $0x248] sm:$0xf] }
 0x909   : > { %v8341_v21 = vpop.f32.mrf.mxu1  ;;  %v8438_v37 = vadd.f32 %v8437_v49, %v8389_v50 }
 0x90a   : > { %v8342_v2 = vadd.f32 %v8341_v21, %v8293_v44  ;;  %v14002_v21 = vld [vmem:[%s21090_s3 + $0x254] sm:$0xf0] }
 0x90b   : > { %v8488_v18 = vpop.f32.mrf.mxu0  ;;  %v19786_v26 = vadd.f32 %v8486_v54, %v8438_v37  ;;  %v21616_v54 = vld [vmem:[#allocation53_spill] sm:$0xff]  ;;  %v12536_v37 = vor.u32 %v14002_v21, %v12535_v62  ;;  %v12407_v62 = vld [vmem:[%s21090_s3 + $0x148] sm:$0xf] }
 0x90c   : > { %v13970_v21 = vld [vmem:[%s21090_s3 + $0x154] sm:$0xf0] }
 0x90d   : > { %8766 = vmatpush.bf16.msrb.mxu2 %v12536_v37  ;;  %v12408_v24 = vor.u32 %v13970_v21, %v12407_v62  ;;  %v12647_v62 = vld [vmem:[%s21090_s3 + $0x328] sm:$0xf] }
 0x90e   : > { %v8390_v41 = vpop.f32.mrf.mxu2 }
 0x90f   : > { %v8439_v61 = vpop.f32.mrf.mxu3  ;;  %v8391_v1 = vadd.f32 %v8390_v41, %v8342_v2  ;;  %v12663_v2 = vld [vmem:[%s21090_s3 + $0x348] sm:$0xf]  ;;  %8717 = vmatpush.bf16.msrb.mxu1 %v12408_v24  ;;  %v14086_v24 = vld [vmem:[%s21090_s3 + $0x4f4] sm:$0xf0] }
 0x911   : > { %v8344_v44 = vpop.f32.mrf.mxu1  ;;  %v8440_v49 = vadd.f32 %v8439_v61, %v8391_v1  ;;  %8588 = vmatmul.bf16.gmra.mxu2 %v18412_v29 }
 0x912   : > { %v8345_v23 = vadd.f32 %v8344_v44, %v8296_v38 }
 0x913   : > { %v8491_v42 = vpop.f32.mrf.mxu0  ;;  %v19793_v50 = vadd.f32 %v8488_v18, %v8440_v49  ;;  %v14034_v18 = vld [vmem:[%s21090_s3 + $0x354] sm:$0xf0] }
 0x914   : > { %8539 = vmatmul.bf16.gmra.mxu1 %v21575_v10  ;;  %8637 = vmatmul.bf16.gmra.mxu3 %v18957_v36  ;;  %v12664_v38 = vor.u32 %v14034_v18, %v12663_v2 }
 0x916   : > { %8686 = vmatmul.bf16.gmra.mxu0 %v21616_v54  ;;  %v8393_v51 = vpop.f32.mrf.mxu2  ;;  %8815 = vmatpush.bf16.msrb.mxu3 %v12664_v38 }
 0x917   : > { %v8442_v59 = vpop.f32.mrf.mxu3  ;;  %v8394_v41 = vadd.f32 %v8393_v51, %v8345_v23  ;;  %v8301_v23 = vadd.f32 %v19526_v53, %v19696_v20 }
 0x919   : > { %v8346_v61 = vpop.f32.mrf.mxu1  ;;  %v8443_v44 = vadd.f32 %v8442_v59, %v8394_v41  ;;  %v12871_v41 = vld [vmem:[%s21090_s3 + $0x4e8] sm:$0xf] }
 0x91a   : > { %v8347_v1 = vadd.f32 %v8346_v61, %v8298_v47  ;;  %v12872_v53 = vor.u32 %v14086_v24, %v12871_v41  ;;  %v21617_v61 = vld [vmem:[#allocation54_spill] sm:$0xff] }
 0x91b   : > { %v8493_v49 = vpop.f32.mrf.mxu0  ;;  %v19816_v30 = vadd.f32 %v8491_v42, %v8443_v44  ;;  %v13998_v44 = vld [vmem:[%s21090_s3 + $0x234] sm:$0xf0] }
 0x91c   : > { %8859 = vmatpush.bf16.msrb.mxu0 %v12872_v53 }
 0x91e   : > { %v8395_v2 = vpop.f32.mrf.mxu2 }
 0x91f   : > { %v8444_v37 = vpop.f32.mrf.mxu3  ;;  %v8396_v18 = vadd.f32 %v8395_v2, %v8347_v1  ;;  %v12519_v1 = vld [vmem:[%s21090_s3 + $0x228] sm:$0xf] }
 0x920   : > { %v12520_v21 = vor.u32 %v13998_v44, %v12519_v1 }
 0x921   : > { %v8349_v47 = vpop.f32.mrf.mxu1  ;;  %v8445_v59 = vadd.f32 %v8444_v37, %v8396_v18  ;;  %8593 = vmatmul.bf16.gmra.mxu2 %v18462_v9 }
 0x922   : > { %v8350_v51 = vadd.f32 %v8349_v47, %v8301_v23  ;;  %v8303_v23 = vadd.f32 %v19559_v4, %v19696_v20  ;;  %v12855_v47 = vld [vmem:[%s21090_s3 + $0x4c8] sm:$0xf]  ;;  %8767 = vmatpush.bf16.msrb.mxu2 %v12520_v21  ;;  %v14078_v21 = vld [vmem:[%s21090_s3 + $0x4b4] sm:$0xf0] }
 0x923   : > { %v8496_v38 = vpop.f32.mrf.mxu0  ;;  %v19829_v42 = vadd.f32 %v8493_v49, %v8445_v59  ;;  %v14030_v49 = vld [vmem:[%s21090_s3 + $0x334] sm:$0xf0]  ;;  %v12391_v4 = vld [vmem:[%s21090_s3 + $0x128] sm:$0xf] }
 0x924   : > { %8544 = vmatmul.bf16.gmra.mxu1 %v21576_v3  ;;  %8642 = vmatmul.bf16.gmra.mxu3 %v19011_v31  ;;  %v12648_v18 = vor.u32 %v14030_v49, %v12647_v62  ;;  %v14082_v59 = vld [vmem:[%s21090_s3 + $0x4d4] sm:$0xf0] }
 0x925   : > { %v12856_v53 = vor.u32 %v14082_v59, %v12855_v47  ;;  %v13966_v62 = vld [vmem:[%s21090_s3 + $0x134] sm:$0xf0]  ;;  %v12823_v59 = vld [vmem:[%s21090_s3 + $0x488] sm:$0xf] }
 0x926   : > { %8691 = vmatmul.bf16.gmra.mxu0 %v21617_v61  ;;  %v8398_v2 = vpop.f32.mrf.mxu2  ;;  %8816 = vmatpush.bf16.msrb.mxu3 %v12648_v18  ;;  %v12392_v49 = vor.u32 %v13966_v62, %v12391_v4 }
 0x927   : > { %v8447_v37 = vpop.f32.mrf.mxu3  ;;  %v8399_v41 = vadd.f32 %v8398_v2, %v8350_v51  ;;  %8860 = vmatpush.bf16.msrb.mxu0 %v12856_v53  ;;  %v12839_v51 = vld [vmem:[%s21090_s3 + $0x4a8] sm:$0xf] }
 0x928   : > { %8718 = vmatpush.bf16.msrb.mxu1 %v12392_v49 }
 0x929   : > { %v8351_v24 = vpop.f32.mrf.mxu1  ;;  %v8448_v44 = vadd.f32 %v8447_v37, %v8399_v41  ;;  %v8306_v37 = vadd.f32 %v19580_v57, %v19696_v20  ;;  %v14074_v41 = vld [vmem:[%s21090_s3 + $0x494] sm:$0xf0]  ;;  %v12807_v57 = vld [vmem:[%s21090_s3 + $0x468] sm:$0xf] }
 0x92a   : > { %v8352_v1 = vadd.f32 %v8351_v24, %v8303_v23  ;;  %v12840_v23 = vor.u32 %v14078_v21, %v12839_v51  ;;  %v12824_v4 = vor.u32 %v14074_v41, %v12823_v59  ;;  %v14070_v51 = vld [vmem:[%s21090_s3 + $0x474] sm:$0xf0]  ;;  %v21618_v21 = vld [vmem:[#allocation55_spill] sm:$0xff]  ;;  %v8308_v59 = vadd.f32 %v19613_v60, %v19696_v20 }
 0x92b   : > { %v8498_v61 = vpop.f32.mrf.mxu0  ;;  %v19864_v2 = vadd.f32 %v8496_v38, %v8448_v44  ;;  %v12375_v60 = vld [vmem:[%s21090_s3 + $0x108] sm:$0xf] }
 0x92c   : > { %8861 = vmatpush.bf16.msrb.mxu0 %v12840_v23  ;;  %v12503_v23 = vld [vmem:[%s21090_s3 + $0x208] sm:$0xf] }
 0x92e   : > { %v8400_v18 = vpop.f32.mrf.mxu2 }
 0x92f   : > { %v8449_v47 = vpop.f32.mrf.mxu3  ;;  %v8401_v24 = vadd.f32 %v8400_v18, %v8352_v1  ;;  %v12808_v1 = vor.u32 %v14070_v51, %v12807_v57  ;;  %v12631_v18 = vld [vmem:[%s21090_s3 + $0x308] sm:$0xf] }
 0x930   : > { %8862 = vmatpush.bf16.msrb.mxu0 %v12824_v4  ;;  %v12791_v4 = vld [vmem:[%s21090_s3 + $0x448] sm:$0xf] }
 0x931   : > { %v8354_v53 = vpop.f32.mrf.mxu1  ;;  %v8450_v44 = vadd.f32 %v8449_v47, %v8401_v24  ;;  %8598 = vmatmul.bf16.gmra.mxu2 %v18500_v8 }
 0x932   : > { %v8355_v38 = vadd.f32 %v8354_v53, %v8306_v37  ;;  %v13994_v37 = vld [vmem:[%s21090_s3 + $0x214] sm:$0xf0] }
 0x933   : > { %v8501_v62 = vpop.f32.mrf.mxu0  ;;  %v19883_v49 = vadd.f32 %v8498_v61, %v8450_v44  ;;  %v12504_v47 = vor.u32 %v13994_v37, %v12503_v23  ;;  %v14026_v61 = vld [vmem:[%s21090_s3 + $0x314] sm:$0xf0] }
 0x934   : > { %8549 = vmatmul.bf16.gmra.mxu1 %v21577_v11  ;;  %8647 = vmatmul.bf16.gmra.mxu3 %v19059_v6  ;;  %v12632_v53 = vor.u32 %v14026_v61, %v12631_v18  ;;  %v14066_v44 = vld [vmem:[%s21090_s3 + $0x454] sm:$0xf0] }
 0x935   : > { %8863 = vmatpush.bf16.msrb.mxu0 %v12808_v1  ;;  %8768 = vmatpush.bf16.msrb.mxu2 %v12504_v47  ;;  %v12792_v1 = vor.u32 %v14066_v44, %v12791_v4  ;;  %v13962_v18 = vld [vmem:[%s21090_s3 + $0x114] sm:$0xf0]  ;;  %v12759_v44 = vld [vmem:[%s21090_s3 + $0x408] sm:$0xf] }
 0x936   : > { %8696 = vmatmul.bf16.gmra.mxu0 %v21618_v21  ;;  %v8403_v41 = vpop.f32.mrf.mxu2  ;;  %8817 = vmatpush.bf16.msrb.mxu3 %v12632_v53  ;;  %v12376_v61 = vor.u32 %v13962_v18, %v12375_v60  ;;  %v14062_v47 = vld [vmem:[%s21090_s3 + $0x434] sm:$0xf0] }
 0x937   : > { %v8452_v24 = vpop.f32.mrf.mxu3  ;;  %v8404_v57 = vadd.f32 %v8403_v41, %v8355_v38  ;;  %v12775_v38 = vld [vmem:[%s21090_s3 + $0x428] sm:$0xf] }
 0x938   : > { %8719 = vmatpush.bf16.msrb.mxu1 %v12376_v61  ;;  %v14150_v61 = vld [vmem:[%s21090_s3 + $0x6f4] sm:$0xf0] }
 0x939   : > { %v8356_v51 = vpop.f32.mrf.mxu1  ;;  %v8453_v37 = vadd.f32 %v8452_v24, %v8404_v57  ;;  %8864 = vmatpush.bf16.msrb.mxu0 %v12792_v1  ;;  %v8311_v24 = vadd.f32 %v19634_v28, %v19696_v20  ;;  %v14058_v57 = vld [vmem:[%s21090_s3 + $0x414] sm:$0xf0] }
 0x93a   : > { %v8357_v23 = vadd.f32 %v8356_v51, %v8308_v59  ;;  %v12776_v59 = vor.u32 %v14062_v47, %v12775_v38  ;;  %v12760_v60 = vor.u32 %v14058_v57, %v12759_v44  ;;  %v21619_v38 = vld [vmem:[#allocation56_spill] sm:$0xff]  ;;  %v13255_v47 = vld [vmem:[%s21090_s3 + $0x7e8] sm:$0xf] }
 0x93b   : > { %v8503_v21 = vpop.f32.mrf.mxu0  ;;  %v19918_v41 = vadd.f32 %v8501_v62, %v8453_v37 }
 0x93d   : > { %8865 = vmatpush.bf16.msrb.mxu0 %v12776_v59 }
 0x93e   : > { %v8405_v53 = vpop.f32.mrf.mxu2 }
 0x93f   : > { %v8454_v4 = vpop.f32.mrf.mxu3  ;;  %v8406_v51 = vadd.f32 %v8405_v53, %v8357_v23  ;;  %v13127_v23 = vld [vmem:[%s21090_s3 + $0x6e8] sm:$0xf] }
 0x940   : > { %v13128_v59 = vor.u32 %v14150_v61, %v13127_v23  ;;  %v12999_v23 = vld [vmem:[%s21090_s3 + $0x5e8] sm:$0xf]  ;;  %v14118_v61 = vld [vmem:[%s21090_s3 + $0x5f4] sm:$0xf0] }
 0x941   : > { %v8359_v1 = vpop.f32.mrf.mxu1  ;;  %v8455_v37 = vadd.f32 %v8454_v4, %v8406_v51  ;;  %8866 = vmatpush.bf16.msrb.mxu0 %v12760_v60  ;;  %8603 = vmatmul.bf16.gmra.mxu2 %v18538_v43 }
 0x942   : > { %v8360_v62 = vadd.f32 %v8359_v1, %v8311_v24  ;;  %v8313_v24 = vadd.f32 %v19655_v56, %v19696_v20  ;;  %8957 = vmatpush.bf16.msra.mxu2 %v13128_v59  ;;  %v13000_v56 = vor.u32 %v14118_v61, %v12999_v23  ;;  %v14178_v61 = vld [vmem:[%s21090_s3 + $0x7d4] sm:$0xf0] }
 0x943   : > { %v8506_v18 = vpop.f32.mrf.mxu0  ;;  %v19931_v28 = vadd.f32 %v8503_v21, %v8455_v37  ;;  %v14182_v21 = vld [vmem:[%s21090_s3 + $0x7f4] sm:$0xf0] }
 0x944   : > { %8554 = vmatmul.bf16.gmra.mxu1 %v21578_v46  ;;  %8652 = vmatmul.bf16.gmra.mxu3 %v19098_v22  ;;  %v13256_v44 = vor.u32 %v14182_v21, %v13255_v47 }
 0x945   : > { %8908 = vmatpush.bf16.msra.mxu1 %v13000_v56 }
 0x946   : > { %8701 = vmatmul.bf16.gmra.mxu0 %v21619_v38  ;;  %v8408_v53 = vpop.f32.mrf.mxu2  ;;  %9006 = vmatpush.bf16.msra.mxu3 %v13256_v44 }
 0x947   : > { %v8457_v4 = vpop.f32.mrf.mxu3  ;;  %v8409_v57 = vadd.f32 %v8408_v53, %v8360_v62  ;;  %v8316_v62 = vadd.f32 %v19664_v16, %v19696_v20  ;;  %v13111_v16 = vld [vmem:[%s21090_s3 + $0x6c8] sm:$0xf] }
 0x949   : > { %v8361_v51 = vpop.f32.mrf.mxu1  ;;  %v8458_v60 = vadd.f32 %v8457_v4, %v8409_v57  ;;  %v14146_v57 = vld [vmem:[%s21090_s3 + $0x6d4] sm:$0xf0] }
 0x94a   : > { %v8362_v1 = vadd.f32 %v8361_v51, %v8313_v24  ;;  %v13239_v51 = vld [vmem:[%s21090_s3 + $0x7c8] sm:$0xf]  ;;  %v13112_v23 = vor.u32 %v14146_v57, %v13111_v16 }
 0x94b   : > { %v8508_v37 = vpop.f32.mrf.mxu0  ;;  %v19954_v38 = vadd.f32 %v8506_v18, %v8458_v60 }
 0x94c   : > { %8958 = vmatpush.bf16.msra.mxu2 %v13112_v23 }
 0x94e   : > { %v8410_v47 = vpop.f32.mrf.mxu2 }
 0x94f   : > { %v8459_v59 = vpop.f32.mrf.mxu3  ;;  %v8411_v21 = vadd.f32 %v8410_v47, %v8362_v1  ;;  %v8318_v1 = vadd.f32 %v19685_v34, %v19696_v20  ;;  %v13240_v47 = vor.u32 %v14178_v61, %v13239_v51  ;;  %v14114_v34 = vld [vmem:[%s21090_s3 + $0x5d4] sm:$0xf0] }
 0x951   : > { %v8364_v24 = vpop.f32.mrf.mxu1  ;;  %v8460_v4 = vadd.f32 %v8459_v59, %v8411_v21  ;;  %8608 = vmatmul.bf16.gmra.mxu2 %v18569_v27  ;;  %9007 = vmatpush.bf16.msra.mxu3 %v13240_v47  ;;  %v14174_v47 = vld [vmem:[%s21090_s3 + $0x7b4] sm:$0xf0] }
 0x952   : > { %v8365_v53 = vadd.f32 %v8364_v24, %v8316_v62 }
 0x953   : > { %v8511_v44 = vpop.f32.mrf.mxu0  ;;  %v19961_v18 = vadd.f32 %v8508_v37, %v8460_v4  ;;  %v12983_v4 = vld [vmem:[%s21090_s3 + $0x5c8] sm:$0xf] }
 0x954   : > { %8559 = vmatmul.bf16.gmra.mxu1 %v18282_v32  ;;  %8657 = vmatmul.bf16.gmra.mxu3 %v19132_v12  ;;  %v12984_v16 = vor.u32 %v14114_v34, %v12983_v4 }
 0x956   : > { %8706 = vmatmul.bf16.gmra.mxu0 %v21538_v15  ;;  %v8413_v60 = vpop.f32.mrf.mxu2  ;;  %8909 = vmatpush.bf16.msra.mxu1 %v12984_v16 }
 0x957   : > { %v8462_v37 = vpop.f32.mrf.mxu3  ;;  %v8414_v56 = vadd.f32 %v8413_v60, %v8365_v53 }
 0x959   : > { %v8366_v62 = vpop.f32.mrf.mxu1  ;;  %v8463_v21 = vadd.f32 %v8462_v37, %v8414_v56  ;;  %v13223_v56 = vld [vmem:[%s21090_s3 + $0x7a8] sm:$0xf] }
 0x95a   : > { %v8367_v59 = vadd.f32 %v8366_v62, %v8318_v1 }
 0x95b   : > { %v8513_v24 = vpop.f32.mrf.mxu0  ;;  %v19984_v20 = vadd.f32 %v8511_v44, %v8463_v21  ;;  %v13095_v44 = vld [vmem:[%s21090_s3 + $0x6a8] sm:$0xf] }
 0x95e   : > { %v8415_v57 = vpop.f32.mrf.mxu2 }
 0x95f   : > { %v8464_v53 = vpop.f32.mrf.mxu3  ;;  %v8416_v51 = vadd.f32 %v8415_v57, %v8367_v59 }
 0x961   : > { %v8525_v1 = vpop.f32.mrf.mxu1  ;;  %v8465_v37 = vadd.f32 %v8464_v53, %v8416_v51  ;;  %8769 = vmatmul.bf16.vlgmr.msrb.gmra.mxu2 %v21540_v40  ;;  %v12967_v51 = vld [vmem:[%s21090_s3 + $0x5a8] sm:$0xf] }
 0x962   : > { %v8526_v60 = vadd.f32 %v8525_v1, %v19726_v0  ;;  %v14142_v0 = vld [vmem:[%s21090_s3 + $0x6b4] sm:$0xf0] }
 0x963   : > { %v19987_v23 = vpop.f32.mrf.mxu0  ;;  %v19992_v61 = vadd.f32 %v8513_v24, %v8465_v37  ;;  %v13096_v62 = vor.u32 %v14142_v0, %v13095_v44  ;;  %v13224_v24 = vor.u32 %v14174_v47, %v13223_v56  ;;  %v14110_v1 = vld [vmem:[%s21090_s3 + $0x5b4] sm:$0xf0] }
 0x964   : > { %8720 = vmatmul.bf16.vlgmr.msrb.gmra.mxu1 %v21539_v48  ;;  %8818 = vmatmul.bf16.vlgmr.msrb.gmra.mxu3 %v21541_v25  ;;  %v12968_v37 = vor.u32 %v14110_v1, %v12967_v51  ;;  %v13207_v51 = vld [vmem:[%s21090_s3 + $0x788] sm:$0xf] }
 0x965   : > { %8959 = vmatpush.bf16.msra.mxu2 %v13096_v62  ;;  %9008 = vmatpush.bf16.msra.mxu3 %v13224_v24  ;;  %v21620_v24 = vld [vmem:[#allocation64_spill] sm:$0xff] }
 0x966   : > { %8867 = vmatmul.bf16.vlgmr.msrb.gmra.mxu0 %v21542_v52  ;;  %v8574_v59 = vpop.f32.mrf.mxu2  ;;  %8910 = vmatpush.bf16.msra.mxu1 %v12968_v37  ;;  %v14170_v37 = vld [vmem:[%s21090_s3 + $0x794] sm:$0xf0] }
 0x967   : > { %v8623_v21 = vpop.f32.mrf.mxu3  ;;  %v8575_v4 = vadd.f32 %v8574_v59, %v8526_v60 }
 0x969   : > { %v8527_v34 = vpop.f32.mrf.mxu1  ;;  %v8624_v57 = vadd.f32 %v8623_v21, %v8575_v4  ;;  %v21621_v4 = vld [vmem:[#allocation71_spill] sm:$0xff] }
 0x96a   : > { %v8528_v16 = vadd.f32 %v8527_v34, %v19733_v14  ;;  %v21622_v34 = vld [vmem:[#allocation37_spill] sm:$0xff] }
 0x96b   : > { %v20008_v53 = vpop.f32.mrf.mxu0  ;;  %v9448_v59 = vmax.f32 %v8624_v57, 0.0 }
 0x96e   : > { %v8576_v44 = vpop.f32.mrf.mxu2 }
 0x96f   : > { %v8625_v0 = vpop.f32.mrf.mxu3  ;;  %v8577_v60 = vadd.f32 %v8576_v44, %v8528_v16  ;;  %v13079_v16 = vld [vmem:[%s21090_s3 + $0x688] sm:$0xf] }
 0x971   : > { %v8530_v56 = vpop.f32.mrf.mxu1  ;;  %v8626_v62 = vadd.f32 %v8625_v0, %v8577_v60  ;;  %8774 = vmatmul.bf16.gmra.mxu2 %v21620_v24  ;;  %v13208_v60 = vor.u32 %v14170_v37, %v13207_v51 }
 0x972   : > { %v8531_v14 = vadd.f32 %v8530_v56, %v19756_v7  ;;  %v14138_v7 = vld [vmem:[%s21090_s3 + $0x694] sm:$0xf0] }
 0x973   : > { %v20017_v47 = vpop.f32.mrf.mxu0  ;;  %v9452_v21 = vmax.f32 %v8626_v62, 0.0  ;;  %v13080_v1 = vor.u32 %v14138_v7, %v13079_v16  ;;  %9009 = vmatpush.bf16.msra.mxu3 %v13208_v60 }
 0x974   : > { %8725 = vmatmul.bf16.gmra.mxu1 %v21543_v19  ;;  %8823 = vmatmul.bf16.gmra.mxu3 %v21621_v4  ;;  %v21627_v19 = vld [vmem:[#allocation38_spill] sm:$0xff] }
 0x975   : > { %v20032_v57 = vpack.c.bf16 %v9452_v21, %v9448_v59  ;;  %8960 = vmatpush.bf16.msra.mxu2 %v13080_v1  ;;  %v12951_v59 = vld [vmem:[%s21090_s3 + $0x588] sm:$0xf]  ;;  %v14106_v21 = vld [vmem:[%s21090_s3 + $0x594] sm:$0xf0] }
 0x976   : > { %8872 = vmatmul.bf16.gmra.mxu0 %v21622_v34  ;;  %v8579_v44 = vpop.f32.mrf.mxu2  ;;  %v12952_v16 = vor.u32 %v14106_v21, %v12951_v59  ;;  %v13191_v59 = vld [vmem:[%s21090_s3 + $0x768] sm:$0xf]  ;;  %v14166_v21 = vld [vmem:[%s21090_s3 + $0x774] sm:$0xf0] }
 0x977   : > { %21623 = vst [vmem:[#allocation17_spill] sm:$0xff] %v20032_v57  ;;  %v8628_v0 = vpop.f32.mrf.mxu3  ;;  %v8580_v56 = vadd.f32 %v8579_v44, %v8531_v14  ;;  %v21626_v57 = vld [vmem:[#allocation72_spill] sm:$0xff] }
 0x978   : > { %8911 = vmatpush.bf16.msra.mxu1 %v12952_v16 }
 0x979   : > { %v8532_v62 = vpop.f32.mrf.mxu1  ;;  %v8629_v4 = vadd.f32 %v8628_v0, %v8580_v56  ;;  %v21624_v0 = vld [vmem:[#allocation60_spill] sm:$0xff] }
 0x97a   : > { %v8533_v34 = vadd.f32 %v8532_v62, %v19763_v5  ;;  %v21625_v62 = vld [vmem:[#allocation65_spill] sm:$0xff] }
 0x97b   : > { %v20038_v24 = vpop.f32.mrf.mxu0  ;;  %v9456_v60 = vmax.f32 %v8629_v4, 0.0 }
 0x97e   : > { %v8581_v7 = vpop.f32.mrf.mxu2 }
 0x97f   : > { %v8630_v51 = vpop.f32.mrf.mxu3  ;;  %v8582_v14 = vadd.f32 %v8581_v7, %v8533_v34  ;;  %v13063_v34 = vld [vmem:[%s21090_s3 + $0x668] sm:$0xf] }
 0x981   : > { %v8535_v1 = vpop.f32.mrf.mxu1  ;;  %v8631_v37 = vadd.f32 %v8630_v51, %v8582_v14  ;;  %8779 = vmatmul.bf16.gmra.mxu2 %v21625_v62  ;;  %v13192_v14 = vor.u32 %v14166_v21, %v13191_v59 }
 0x982   : > { %v8536_v5 = vadd.f32 %v8535_v1, %v19786_v26  ;;  %v14134_v26 = vld [vmem:[%s21090_s3 + $0x674] sm:$0xf0] }
 0x983   : > { %v20047_v44 = vpop.f32.mrf.mxu0  ;;  %v9460_v56 = vmax.f32 %v8631_v37, 0.0  ;;  %v13064_v4 = vor.u32 %v14134_v26, %v13063_v34  ;;  %9010 = vmatpush.bf16.msra.mxu3 %v13192_v14  ;;  %v12935_v34 = vld [vmem:[%s21090_s3 + $0x568] sm:$0xf] }
 0x984   : > { %8730 = vmatmul.bf16.gmra.mxu1 %v21624_v0  ;;  %8828 = vmatmul.bf16.gmra.mxu3 %v21626_v57  ;;  %v21632_v0 = vld [vmem:[#allocation40_spill] sm:$0xff] }
 0x985   : > { %v20065_v16 = vpack.c.bf16 %v9460_v56, %v9456_v60  ;;  %8961 = vmatpush.bf16.msra.mxu2 %v13064_v4  ;;  %v14102_v60 = vld [vmem:[%s21090_s3 + $0x574] sm:$0xf0] }
 0x986   : > { %8877 = vmatmul.bf16.gmra.mxu0 %v21627_v19  ;;  %v8584_v7 = vpop.f32.mrf.mxu2  ;;  %v12936_v56 = vor.u32 %v14102_v60, %v12935_v34  ;;  %v13175_v34 = vld [vmem:[%s21090_s3 + $0x748] sm:$0xf]  ;;  %v14162_v60 = vld [vmem:[%s21090_s3 + $0x754] sm:$0xf0] }
 0x987   : > { %21628 = vst [vmem:[#allocation4_spill] sm:$0xff] %v20065_v16  ;;  %v8633_v51 = vpop.f32.mrf.mxu3  ;;  %v8585_v1 = vadd.f32 %v8584_v7, %v8536_v5  ;;  %v21631_v16 = vld [vmem:[#allocation73_spill] sm:$0xff] }
 0x988   : > { %8912 = vmatpush.bf16.msra.mxu1 %v12936_v56 }
 0x989   : > { %v8537_v37 = vpop.f32.mrf.mxu1  ;;  %v8634_v57 = vadd.f32 %v8633_v51, %v8585_v1  ;;  %v21629_v51 = vld [vmem:[#allocation61_spill] sm:$0xff] }
 0x98a   : > { %v8538_v19 = vadd.f32 %v8537_v37, %v19793_v50  ;;  %v21630_v37 = vld [vmem:[#allocation66_spill] sm:$0xff] }
 0x98b   : > { %v20068_v62 = vpop.f32.mrf.mxu0  ;;  %v9464_v14 = vmax.f32 %v8634_v57, 0.0 }
 0x98e   : > { %v8586_v26 = vpop.f32.mrf.mxu2 }
 0x98f   : > { %v8635_v59 = vpop.f32.mrf.mxu3  ;;  %v8587_v5 = vadd.f32 %v8586_v26, %v8538_v19  ;;  %v13047_v19 = vld [vmem:[%s21090_s3 + $0x648] sm:$0xf] }
 0x991   : > { %v8540_v4 = vpop.f32.mrf.mxu1  ;;  %v8636_v21 = vadd.f32 %v8635_v59, %v8587_v5  ;;  %8784 = vmatmul.bf16.gmra.mxu2 %v21630_v37  ;;  %v13176_v5 = vor.u32 %v14162_v60, %v13175_v34 }
 0x992   : > { %v8541_v50 = vadd.f32 %v8540_v4, %v19816_v30  ;;  %v14130_v30 = vld [vmem:[%s21090_s3 + $0x654] sm:$0xf0] }
 0x993   : > { %v20077_v7 = vpop.f32.mrf.mxu0  ;;  %v9468_v1 = vmax.f32 %v8636_v21, 0.0  ;;  %v13048_v57 = vor.u32 %v14130_v30, %v13047_v19  ;;  %9011 = vmatpush.bf16.msra.mxu3 %v13176_v5  ;;  %v12919_v19 = vld [vmem:[%s21090_s3 + $0x548] sm:$0xf]  ;;  %v13956_v5 = vld [vmem:[%s21090_s3 + $0xec] sm:$0xf] }
 0x994   : > { %8735 = vmatmul.bf16.gmra.mxu1 %v21629_v51  ;;  %8833 = vmatmul.bf16.gmra.mxu3 %v21631_v16  ;;  %v21647_v51 = vld [vmem:[#allocation21_spill] sm:$0xff] }
 0x995   : > { %v20095_v56 = vpack.c.bf16 %v9468_v1, %v9464_v14  ;;  %8962 = vmatpush.bf16.msra.mxu2 %v13048_v57  ;;  %v14098_v14 = vld [vmem:[%s21090_s3 + $0x554] sm:$0xf0] }
 0x996   : > { %8882 = vmatmul.bf16.gmra.mxu0 %v21632_v0  ;;  %v8589_v26 = vpop.f32.mrf.mxu2  ;;  %v12920_v1 = vor.u32 %v14098_v14, %v12919_v19  ;;  %v21635_v14 = vld [vmem:[#allocation67_spill] sm:$0xff] }
 0x997   : > { %21633 = vst [vmem:[#allocation18_spill] sm:$0xff] %v20095_v56  ;;  %v8638_v59 = vpop.f32.mrf.mxu3  ;;  %v8590_v4 = vadd.f32 %v8589_v26, %v8541_v50 }
 0x998   : > { %8913 = vmatpush.bf16.msra.mxu1 %v12920_v1  ;;  %v21637_v1 = vld [vmem:[#allocation42_spill] sm:$0xff] }
 0x999   : > { %v8542_v21 = vpop.f32.mrf.mxu1  ;;  %v8639_v16 = vadd.f32 %v8638_v59, %v8590_v4  ;;  %v21634_v59 = vld [vmem:[#allocation20_spill] sm:$0xff]  ;;  %v12361_v4 = vld [vmem:[%s21090_s3 + $0xf8] sm:$0xf0] }
 0x99a   : > { %v8543_v0 = vadd.f32 %v8542_v21, %v19829_v42 }
 0x99b   : > { %v20098_v37 = vpop.f32.mrf.mxu0  ;;  %v9472_v21 = vmax.f32 %v8639_v16, 0.0  ;;  %v13159_v16 = vld [vmem:[%s21090_s3 + $0x728] sm:$0xf] }
 0x99e   : > { %v8591_v30 = vpop.f32.mrf.mxu2 }
 0x99f   : > { %v8640_v34 = vpop.f32.mrf.mxu3  ;;  %v8592_v50 = vadd.f32 %v8591_v30, %v8543_v0  ;;  %v21636_v0 = vld [vmem:[#allocation74_spill] sm:$0xff]  ;;  %v13031_v30 = vld [vmem:[%s21090_s3 + $0x628] sm:$0xf] }
 0x9a1   : > { %v8545_v57 = vpop.f32.mrf.mxu1  ;;  %v8641_v60 = vadd.f32 %v8640_v34, %v8592_v50  ;;  %8789 = vmatmul.bf16.gmra.mxu2 %v21635_v14  ;;  %v14126_v34 = vld [vmem:[%s21090_s3 + $0x634] sm:$0xf0] }
 0x9a2   : > { %v8546_v42 = vadd.f32 %v8545_v57, %v19864_v2  ;;  %v12364_v2 = vor.u32 %v13956_v5, %v12361_v4  ;;  %v13032_v50 = vor.u32 %v14126_v34, %v13031_v30  ;;  %v14158_v57 = vld [vmem:[%s21090_s3 + $0x734] sm:$0xf0] }
 0x9a3   : > { %v20107_v26 = vpop.f32.mrf.mxu0  ;;  %v9476_v19 = vmax.f32 %v8641_v60, 0.0  ;;  %v13160_v56 = vor.u32 %v14158_v57, %v13159_v16  ;;  %v13948_v16 = vld [vmem:[%s21090_s3 + $0xac] sm:$0xf]  ;;  %v12329_v57 = vld [vmem:[%s21090_s3 + $0xb8] sm:$0xf0] }
 0x9a4   : > { %8740 = vmatmul.bf16.gmra.mxu1 %v21634_v59  ;;  %8838 = vmatmul.bf16.gmra.mxu3 %v21636_v0  ;;  %v12345_v0 = vld [vmem:[%s21090_s3 + $0xd8] sm:$0xf0] }
 0x9a5   : > { %9055 = vmatpush.bf16.msra.mxu0 %v12364_v2  ;;  %v20131_v60 = vpack.c.bf16 %v9476_v19, %v9472_v21  ;;  %8963 = vmatpush.bf16.msra.mxu2 %v13032_v50  ;;  %v13944_v50 = vld [vmem:[%s21090_s3 + $0x8c] sm:$0xf] }
 0x9a6   : > { %8887 = vmatmul.bf16.gmra.mxu0 %v21637_v1  ;;  %v8594_v5 = vpop.f32.mrf.mxu2  ;;  %v13952_v1 = vld [vmem:[%s21090_s3 + $0xcc] sm:$0xf]  ;;  %9012 = vmatpush.bf16.msra.mxu3 %v13160_v56  ;;  %v12332_v56 = vor.u32 %v13948_v16, %v12329_v57  ;;  %v21639_v57 = vld [vmem:[#allocation24_spill] sm:$0xff] }
 0x9a7   : > { %21638 = vst [vmem:[#allocation19_spill] sm:$0xff] %v20131_v60  ;;  %v8643_v4 = vpop.f32.mrf.mxu3  ;;  %v8595_v14 = vadd.f32 %v8594_v5, %v8546_v42  ;;  %v12348_v2 = vor.u32 %v13952_v1, %v12345_v0  ;;  %v12903_v42 = vld [vmem:[%s21090_s3 + $0x528] sm:$0xf]  ;;  %v12313_v5 = vld [vmem:[%s21090_s3 + $0x98] sm:$0xf0] }
 0x9a9   : > { %v8547_v30 = vpop.f32.mrf.mxu1  ;;  %v8644_v21 = vadd.f32 %v8643_v4, %v8595_v14  ;;  %9056 = vmatpush.bf16.msra.mxu0 %v12348_v2  ;;  %v12316_v2 = vor.u32 %v13944_v50, %v12313_v5  ;;  %v13015_v50 = vld [vmem:[%s21090_s3 + $0x608] sm:$0xf]  ;;  %v14122_v5 = vld [vmem:[%s21090_s3 + $0x614] sm:$0xf0] }
 0x9aa   : > { %v8548_v34 = vadd.f32 %v8547_v30, %v19883_v49  ;;  %v14094_v49 = vld [vmem:[%s21090_s3 + $0x534] sm:$0xf0] }
 0x9ab   : > { %v20140_v19 = vpop.f32.mrf.mxu0  ;;  %v12904_v14 = vor.u32 %v14094_v49, %v12903_v42  ;;  %v13940_v42 = vld [vmem:[%s21090_s3 + $0x6c] sm:$0xf]  ;;  %v12297_v49 = vld [vmem:[%s21090_s3 + $0x78] sm:$0xf0] }
 0x9ad   : > { %9057 = vmatpush.bf16.msra.mxu0 %v12332_v56  ;;  %8914 = vmatpush.bf16.msra.mxu1 %v12904_v14  ;;  %v9480_v56 = vmax.f32 %v8644_v21, 0.0  ;;  %v21640_v14 = vld [vmem:[#allocation68_spill] sm:$0xff]  ;;  %v13143_v21 = vld [vmem:[%s21090_s3 + $0x708] sm:$0xf] }
 0x9ae   : > { %v8596_v0 = vpop.f32.mrf.mxu2 }
 0x9af   : > { %v8645_v1 = vpop.f32.mrf.mxu3  ;;  %v8597_v4 = vadd.f32 %v8596_v0, %v8548_v34  ;;  %v21641_v0 = vld [vmem:[#allocation75_spill] sm:$0xff] }
 0x9b1   : > { %v8550_v30 = vpop.f32.mrf.mxu1  ;;  %v8646_v59 = vadd.f32 %v8645_v1, %v8597_v4  ;;  %9058 = vmatpush.bf16.msra.mxu0 %v12316_v2  ;;  %8794 = vmatmul.bf16.gmra.mxu2 %v21640_v14  ;;  %v21642_v1 = vld [vmem:[#allocation44_spill] sm:$0xff]  ;;  %v14154_v4 = vld [vmem:[%s21090_s3 + $0x714] sm:$0xf0] }
 0x9b2   : > { %v8551_v60 = vadd.f32 %v8550_v30, %v19918_v41  ;;  %v12300_v41 = vor.u32 %v13940_v42, %v12297_v49  ;;  %v13144_v49 = vor.u32 %v14154_v4, %v13143_v21  ;;  %v13932_v21 = vld [vmem:[%s21090_s3 + $0x2c] sm:$0xf]  ;;  %v12265_v4 = vld [vmem:[%s21090_s3 + $0x38] sm:$0xf0] }
 0x9b3   : > { %v20161_v16 = vpop.f32.mrf.mxu0  ;;  %v9484_v34 = vmax.f32 %v8646_v59, 0.0  ;;  %v13016_v59 = vor.u32 %v14122_v5, %v13015_v50 }
 0x9b4   : > { %8745 = vmatmul.bf16.gmra.mxu1 %v21639_v57  ;;  %8843 = vmatmul.bf16.gmra.mxu3 %v21641_v0  ;;  %v12281_v0 = vld [vmem:[%s21090_s3 + $0x58] sm:$0xf0] }
 0x9b5   : > { %9059 = vmatpush.bf16.msra.mxu0 %v12300_v41  ;;  %v20185_v30 = vpack.c.bf16 %v9484_v34, %v9480_v56  ;;  %8964 = vmatpush.bf16.msra.mxu2 %v13016_v59 }
 0x9b6   : > { %8892 = vmatmul.bf16.gmra.mxu0 %v21642_v1  ;;  %v8599_v2 = vpop.f32.mrf.mxu2  ;;  %v13936_v1 = vld [vmem:[%s21090_s3 + $0x4c] sm:$0xf]  ;;  %9013 = vmatpush.bf16.msra.mxu3 %v13144_v49 }
 0x9b7   : > { %21643 = vst [vmem:[#allocation8_spill] sm:$0xff] %v20185_v30  ;;  %v8648_v42 = vpop.f32.mrf.mxu3  ;;  %v8600_v14 = vadd.f32 %v8599_v2, %v8551_v60  ;;  %v12284_v41 = vor.u32 %v13936_v1, %v12281_v0  ;;  %v12887_v60 = vld [vmem:[%s21090_s3 + $0x508] sm:$0xf]  ;;  %v13928_v2 = vld [vmem:[%s21090_s3 + $0xc] sm:$0xf] }
 0x9b9   : > { %v8552_v50 = vpop.f32.mrf.mxu1  ;;  %v8649_v56 = vadd.f32 %v8648_v42, %v8600_v14  ;;  %9060 = vmatpush.bf16.msra.mxu0 %v12284_v41  ;;  %v12268_v14 = vor.u32 %v13932_v21, %v12265_v4  ;;  %v12249_v42 = vld [vmem:[%s21090_s3 + $0x18] sm:$0xf0]  ;;  %v21644_v4 = vld [vmem:[#allocation28_spill] sm:$0xff] }
 0x9ba   : > { %v8553_v5 = vadd.f32 %v8552_v50, %v19931_v28  ;;  %v14090_v28 = vld [vmem:[%s21090_s3 + $0x514] sm:$0xf0]  ;;  %v12252_v41 = vor.u32 %v13928_v2, %v12249_v42 }
 0x9bb   : > { %v20194_v34 = vpop.f32.mrf.mxu0  ;;  %v12888_v0 = vor.u32 %v14090_v28, %v12887_v60  ;;  %v9488_v60 = vmax.f32 %v8649_v56, 0.0 }
 0x9bd   : > { %9061 = vmatpush.bf16.msra.mxu0 %v12268_v14  ;;  %8915 = vmatpush.bf16.msra.mxu1 %v12888_v0  ;;  %v21645_v14 = vld [vmem:[#allocation69_spill] sm:$0xff]  ;;  %v21646_v0 = vld [vmem:[#allocation76_spill] sm:$0xff] }
 0x9be   : > { %v8601_v1 = vpop.f32.mrf.mxu2 }
 0x9bf   : > { %v8650_v59 = vpop.f32.mrf.mxu3  ;;  %v8602_v49 = vadd.f32 %v8601_v1, %v8553_v5  ;;  %v14020_v5 = vld [vmem:[%s21090_s3 + $0x2ec] sm:$0xf] }
 0x9c0   : > { %v14052_v1 = vld [vmem:[%s21090_s3 + $0x3ec] sm:$0xf] }
 0x9c1   : > { %v8555_v50 = vpop.f32.mrf.mxu1  ;;  %v8651_v57 = vadd.f32 %v8650_v59, %v8602_v49  ;;  %9062 = vmatpush.bf16.msra.mxu0 %v12252_v41  ;;  %8799 = vmatmul.bf16.gmra.mxu2 %v21645_v14 }
 0x9c2   : > { %v8556_v30 = vadd.f32 %v8555_v50, %v19954_v38  ;;  %v12617_v38 = vld [vmem:[%s21090_s3 + $0x2f8] sm:$0xf0] }
 0x9c3   : > { %v20215_v21 = vpop.f32.mrf.mxu0  ;;  %v9492_v28 = vmax.f32 %v8651_v57, 0.0  ;;  %v12620_v56 = vor.u32 %v14020_v5, %v12617_v38  ;;  %v12745_v57 = vld [vmem:[%s21090_s3 + $0x3f8] sm:$0xf0]  ;;  %v13988_v5 = vld [vmem:[%s21090_s3 + $0x1ec] sm:$0xf] }
 0x9c4   : > { %8750 = vmatmul.bf16.gmra.mxu1 %v21644_v4  ;;  %8848 = vmatmul.bf16.gmra.mxu3 %v21646_v0  ;;  %v12748_v49 = vor.u32 %v14052_v1, %v12745_v57  ;;  %v21654_v4 = vld [vmem:[#allocation45_spill] sm:$0xff] }
 0x9c5   : > { %v20233_v59 = vpack.c.bf16 %v9492_v28, %v9488_v60  ;;  %9153 = vmatpush.bf16.msrb.mxu2 %v12620_v56  ;;  %v12489_v60 = vld [vmem:[%s21090_s3 + $0x1f8] sm:$0xf0] }
 0x9c6   : > { %8897 = vmatmul.bf16.gmra.mxu0 %v21647_v51  ;;  %v8604_v2 = vpop.f32.mrf.mxu2  ;;  %9202 = vmatpush.bf16.msrb.mxu3 %v12748_v49  ;;  %v12492_v28 = vor.u32 %v13988_v5, %v12489_v60  ;;  %v14048_v5 = vld [vmem:[%s21090_s3 + $0x3cc] sm:$0xf]  ;;  %v12729_v60 = vld [vmem:[%s21090_s3 + $0x3d8] sm:$0xf0] }
 0x9c7   : > { %21648 = vst [vmem:[#allocation22_spill] sm:$0xff] %v20233_v59  ;;  %v8653_v42 = vpop.f32.mrf.mxu3  ;;  %v8605_v50 = vadd.f32 %v8604_v2, %v8556_v30  ;;  %v21651_v59 = vld [vmem:[#allocation78_spill] sm:$0xff] }
 0x9c8   : > { %9104 = vmatpush.bf16.msrb.mxu1 %v12492_v28 }
 0x9c9   : > { %v8557_v41 = vpop.f32.mrf.mxu1  ;;  %v8654_v0 = vadd.f32 %v8653_v42, %v8605_v50  ;;  %v21649_v50 = vld [vmem:[#allocation70_spill] sm:$0xff] }
 0x9ca   : > { %v8558_v51 = vadd.f32 %v8557_v41, %v19961_v18  ;;  %v21650_v41 = vld [vmem:[#allocation77_spill] sm:$0xff] }
 0x9cb   : > { %v20236_v14 = vpop.f32.mrf.mxu0  ;;  %v9496_v42 = vmax.f32 %v8654_v0, 0.0 }
 0x9ce   : > { %v8606_v38 = vpop.f32.mrf.mxu2 }
 0x9cf   : > { %v8655_v30 = vpop.f32.mrf.mxu3  ;;  %v8607_v1 = vadd.f32 %v8606_v38, %v8558_v51  ;;  %v14016_v51 = vld [vmem:[%s21090_s3 + $0x2cc] sm:$0xf] }
 0x9d1   : > { %v8560_v56 = vpop.f32.mrf.mxu1  ;;  %v8656_v57 = vadd.f32 %v8655_v30, %v8607_v1  ;;  %8804 = vmatmul.bf16.gmra.mxu2 %v21649_v50  ;;  %v12732_v1 = vor.u32 %v14048_v5, %v12729_v60 }
 0x9d2   : > { %v8561_v18 = vadd.f32 %v8560_v56, %v19984_v20  ;;  %v12601_v20 = vld [vmem:[%s21090_s3 + $0x2d8] sm:$0xf0] }
 0x9d3   : > { %v20245_v2 = vpop.f32.mrf.mxu0  ;;  %v9500_v49 = vmax.f32 %v8656_v57, 0.0  ;;  %v12604_v0 = vor.u32 %v14016_v51, %v12601_v20  ;;  %9203 = vmatpush.bf16.msrb.mxu3 %v12732_v1  ;;  %v13984_v51 = vld [vmem:[%s21090_s3 + $0x1cc] sm:$0xf] }
 0x9d4   : > { %8755 = vmatmul.bf16.gmra.mxu1 %v21607_v39  ;;  %8853 = vmatmul.bf16.gmra.mxu3 %v21650_v41 }
 0x9d5   : > { %v20263_v28 = vpack.c.bf16 %v9500_v49, %v9496_v42  ;;  %9154 = vmatpush.bf16.msrb.mxu2 %v12604_v0  ;;  %v12473_v42 = vld [vmem:[%s21090_s3 + $0x1d8] sm:$0xf0] }
 0x9d6   : > { %8902 = vmatmul.bf16.gmra.mxu0 %v21651_v59  ;;  %v8609_v38 = vpop.f32.mrf.mxu2  ;;  %v12476_v20 = vor.u32 %v13984_v51, %v12473_v42  ;;  %v21656_v51 = vld [vmem:[#allocation50_spill] sm:$0xff]  ;;  %v14044_v42 = vld [vmem:[%s21090_s3 + $0x3ac] sm:$0xf] }
 0x9d7   : > { %21652 = vst [vmem:[#allocation23_spill] sm:$0xff] %v20263_v28  ;;  %v8658_v30 = vpop.f32.mrf.mxu3  ;;  %v8610_v56 = vadd.f32 %v8609_v38, %v8561_v18  ;;  %v14264_v18 = vld [vmem:[%s21091_s4] sm:$0xf] }
 0x9d8   : > { %v20277_v49 = vperm.slane %v14264_v18, 2  ;;  %9105 = vmatpush.bf16.msrb.mxu1 %v12476_v20  ;;  %v21655_v18 = vld [vmem:[#allocation9_spill] sm:$0xff] }
 0x9d9   : > { %v8562_v57 = vpop.f32.mrf.mxu1  ;;  %v8659_v41 = vadd.f32 %v8658_v30, %v8610_v56  ;;  %v12713_v20 = vld [vmem:[%s21090_s3 + $0x3b8] sm:$0xf0] }
 0x9da   : > { %v8563_v59 = vadd.f32 %v8562_v57, %v19992_v61  ;;  %v8673_v61 = vadd.f32 %v19987_v23, %v20277_v49  ;;  %v21653_v57 = vld [vmem:[#allocation2_spill] sm:$0xff]  ;;  %v14012_v23 = vld [vmem:[%s21090_s3 + $0x2ac] sm:$0xf] }
 0x9db   : > { %v20266_v50 = vpop.f32.mrf.mxu0  ;;  %v9504_v28 = vmax.f32 %v8659_v41, 0.0 }
 0x9de   : > { %v8611_v5 = vpop.f32.mrf.mxu2 }
 0x9df   : > { %v8660_v0 = vpop.f32.mrf.mxu3  ;;  %v8612_v60 = vadd.f32 %v8611_v5, %v8563_v59  ;;  %v12585_v59 = vld [vmem:[%s21090_s3 + $0x2b8] sm:$0xf0]  ;;  %v8675_v5 = vadd.f32 %v20008_v53, %v20277_v49 }
 0x9e0   : > { %v12588_v41 = vor.u32 %v14012_v23, %v12585_v59  ;;  %v13980_v23 = vld [vmem:[%s21090_s3 + $0x1ac] sm:$0xf] }
 0x9e1   : > { %v8721_v38 = vpop.f32.mrf.mxu1  ;;  %v8661_v1 = vadd.f32 %v8660_v0, %v8612_v60  ;;  %8965 = vmatmul.bf16.vlgmr.msra.gmra.mxu2 %v21654_v4 }
 0x9e2   : > { %v8722_v30 = vadd.f32 %v8721_v38, %v8673_v61  ;;  %v12716_v38 = vor.u32 %v14044_v42, %v12713_v20  ;;  %9155 = vmatpush.bf16.msrb.mxu2 %v12588_v41 }
 0x9e3   : > { %v8868_v56 = vpop.f32.mrf.mxu0  ;;  %v9508_v39 = vmax.f32 %v8661_v1, 0.0 }
 0x9e4   : > { %8916 = vmatmul.bf16.vlgmr.msra.gmra.mxu1 %v21653_v57  ;;  %9014 = vmatmul.bf16.vlgmr.msra.gmra.mxu3 %v21655_v18 }
 0x9e5   : > { %v20297_v61 = vpack.c.bf16 %v9508_v39, %v9504_v28  ;;  %9204 = vmatpush.bf16.msrb.mxu3 %v12716_v38  ;;  %v12457_v39 = vld [vmem:[%s21090_s3 + $0x1b8] sm:$0xf0] }
 0x9e6   : > { %9063 = vmatmul.bf16.vlgmr.msra.gmra.mxu0 %v21656_v51  ;;  %v8770_v0 = vpop.f32.mrf.mxu2  ;;  %v12460_v28 = vor.u32 %v13980_v23, %v12457_v39 }
 0x9e7   : > { %v8819_v60 = vpop.f32.mrf.mxu3  ;;  %v8771_v1 = vadd.f32 %v8770_v0, %v8722_v30  ;;  %v8678_v30 = vadd.f32 %v20017_v47, %v20277_v49  ;;  %v14008_v47 = vld [vmem:[%s21090_s3 + $0x28c] sm:$0xf] }
 0x9e8   : > { %9106 = vmatpush.bf16.msrb.mxu1 %v12460_v28 }
 0x9e9   : > { %v8723_v51 = vpop.f32.mrf.mxu1  ;;  %v8820_v4 = vadd.f32 %v8819_v60, %v8771_v1 }
 0x9ea   : > { %v8724_v18 = vadd.f32 %v8723_v51, %v8675_v5 }
 0x9eb   : > { %v8870_v57 = vpop.f32.mrf.mxu0  ;;  %v20307_v53 = vadd.f32 %v8868_v56, %v8820_v4  ;;  %v12569_v4 = vld [vmem:[%s21090_s3 + $0x298] sm:$0xf0]  ;;  %v14040_v56 = vld [vmem:[%s21090_s3 + $0x38c] sm:$0xf] }
 0x9ee   : > { %v8772_v59 = vpop.f32.mrf.mxu2 }
 0x9ef   : > { %v8821_v42 = vpop.f32.mrf.mxu3  ;;  %v8773_v41 = vadd.f32 %v8772_v59, %v8724_v18  ;;  %v12572_v18 = vor.u32 %v14008_v47, %v12569_v4 }
 0x9f1   : > { %v8726_v20 = vpop.f32.mrf.mxu1  ;;  %v8822_v0 = vadd.f32 %v8821_v42, %v8773_v41  ;;  %8970 = vmatmul.bf16.gmra.mxu2 %v18348_v13  ;;  %v13976_v41 = vld [vmem:[%s21090_s3 + $0x18c] sm:$0xf] }
 0x9f2   : > { %v8727_v5 = vadd.f32 %v8726_v20, %v8678_v30  ;;  %9156 = vmatpush.bf16.msrb.mxu2 %v12572_v18  ;;  %v12441_v20 = vld [vmem:[%s21090_s3 + $0x198] sm:$0xf0] }
 0x9f3   : > { %v8873_v60 = vpop.f32.mrf.mxu0  ;;  %v20314_v38 = vadd.f32 %v8870_v57, %v8822_v0  ;;  %v12697_v57 = vld [vmem:[%s21090_s3 + $0x398] sm:$0xf0]  ;;  %v12444_v0 = vor.u32 %v13976_v41, %v12441_v20 }
 0x9f4   : > { %8921 = vmatmul.bf16.gmra.mxu1 %v21573_v55  ;;  %9019 = vmatmul.bf16.gmra.mxu3 %v18891_v58  ;;  %v12700_v23 = vor.u32 %v14040_v56, %v12697_v57 }
 0x9f5   : > { %9107 = vmatpush.bf16.msrb.mxu1 %v12444_v0 }
 0x9f6   : > { %9068 = vmatmul.bf16.gmra.mxu0 %v21527_v63  ;;  %v8680_v63 = vadd.f32 %v20038_v24, %v20277_v49  ;;  %v8775_v1 = vpop.f32.mrf.mxu2  ;;  %9205 = vmatpush.bf16.msrb.mxu3 %v12700_v23  ;;  %v14036_v23 = vld [vmem:[%s21090_s3 + $0x36c] sm:$0xf] }
 0x9f7   : > { %v8824_v51 = vpop.f32.mrf.mxu3  ;;  %v8776_v39 = vadd.f32 %v8775_v1, %v8727_v5  ;;  %v8683_v5 = vadd.f32 %v20047_v44, %v20277_v49  ;;  %v14004_v44 = vld [vmem:[%s21090_s3 + $0x26c] sm:$0xf] }
 0x9f9   : > { %v8728_v28 = vpop.f32.mrf.mxu1  ;;  %v8825_v59 = vadd.f32 %v8824_v51, %v8776_v39 }
 0x9fa   : > { %v8729_v30 = vadd.f32 %v8728_v28, %v8680_v63  ;;  %v12681_v28 = vld [vmem:[%s21090_s3 + $0x378] sm:$0xf0] }
 0x9fb   : > { %v8875_v42 = vpop.f32.mrf.mxu0  ;;  %v20337_v24 = vadd.f32 %v8873_v60, %v8825_v59  ;;  %v12553_v60 = vld [vmem:[%s21090_s3 + $0x278] sm:$0xf0] }
 0x9fc   : > { %v12556_v39 = vor.u32 %v14004_v44, %v12553_v60 }
 0x9fe   : > { %v8777_v47 = vpop.f32.mrf.mxu2  ;;  %9157 = vmatpush.bf16.msrb.mxu2 %v12556_v39 }
 0x9ff   : > { %v8826_v4 = vpop.f32.mrf.mxu3  ;;  %v8778_v56 = vadd.f32 %v8777_v47, %v8729_v30 }
 0xa01   : > { %v8731_v18 = vpop.f32.mrf.mxu1  ;;  %v8827_v63 = vadd.f32 %v8826_v4, %v8778_v56  ;;  %8975 = vmatmul.bf16.gmra.mxu2 %v18374_v45  ;;  %v13972_v4 = vld [vmem:[%s21090_s3 + $0x16c] sm:$0xf]  ;;  %v12425_v56 = vld [vmem:[%s21090_s3 + $0x178] sm:$0xf0] }
 0xa02   : > { %v8732_v57 = vadd.f32 %v8731_v18, %v8683_v5  ;;  %v12428_v18 = vor.u32 %v13972_v4, %v12425_v56 }
 0xa03   : > { %v8878_v1 = vpop.f32.mrf.mxu0  ;;  %v20344_v51 = vadd.f32 %v8875_v42, %v8827_v63  ;;  %v12684_v42 = vor.u32 %v14036_v23, %v12681_v28 }
 0xa04   : > { %8926 = vmatmul.bf16.gmra.mxu1 %v21574_v33  ;;  %9024 = vmatmul.bf16.gmra.mxu3 %v18921_v17 }
 0xa05   : > { %9206 = vmatpush.bf16.msrb.mxu3 %v12684_v42  ;;  %9108 = vmatpush.bf16.msrb.mxu1 %v12428_v18 }
 0xa06   : > { %9073 = vmatmul.bf16.gmra.mxu0 %v21615_v35  ;;  %v8685_v35 = vadd.f32 %v20068_v62, %v20277_v49  ;;  %v8780_v30 = vpop.f32.mrf.mxu2 }
 0xa07   : > { %v8829_v59 = vpop.f32.mrf.mxu3  ;;  %v8781_v41 = vadd.f32 %v8780_v30, %v8732_v57  ;;  %v8688_v57 = vadd.f32 %v20077_v7, %v20277_v49  ;;  %v14000_v7 = vld [vmem:[%s21090_s3 + $0x24c] sm:$0xf] }
 0xa09   : > { %v8733_v20 = vpop.f32.mrf.mxu1  ;;  %v8830_v5 = vadd.f32 %v8829_v59, %v8781_v41  ;;  %v14032_v59 = vld [vmem:[%s21090_s3 + $0x34c] sm:$0xf]  ;;  %v12665_v41 = vld [vmem:[%s21090_s3 + $0x358] sm:$0xf0] }
 0xa0a   : > { %v8734_v0 = vadd.f32 %v8733_v20, %v8685_v35 }
 0xa0b   : > { %v8880_v47 = vpop.f32.mrf.mxu0  ;;  %v20367_v62 = vadd.f32 %v8878_v1, %v8830_v5  ;;  %v12537_v1 = vld [vmem:[%s21090_s3 + $0x258] sm:$0xf0]  ;;  %v12668_v5 = vor.u32 %v14032_v59, %v12665_v41 }
 0xa0c   : > { %v12540_v42 = vor.u32 %v14000_v7, %v12537_v1 }
 0xa0d   : > { %9207 = vmatpush.bf16.msrb.mxu3 %v12668_v5  ;;  %v13996_v5 = vld [vmem:[%s21090_s3 + $0x22c] sm:$0xf] }
 0xa0e   : > { %v8782_v63 = vpop.f32.mrf.mxu2  ;;  %9158 = vmatpush.bf16.msrb.mxu2 %v12540_v42 }
 0xa0f   : > { %v8831_v44 = vpop.f32.mrf.mxu3  ;;  %v8783_v60 = vadd.f32 %v8782_v63, %v8734_v0  ;;  %v13968_v63 = vld [vmem:[%s21090_s3 + $0x14c] sm:$0xf] }
 0xa11   : > { %v8736_v23 = vpop.f32.mrf.mxu1  ;;  %v8832_v28 = vadd.f32 %v8831_v44, %v8783_v60  ;;  %8980 = vmatmul.bf16.gmra.mxu2 %v18412_v29  ;;  %v12409_v44 = vld [vmem:[%s21090_s3 + $0x158] sm:$0xf0] }
 0xa12   : > { %v8737_v39 = vadd.f32 %v8736_v23, %v8688_v57  ;;  %v12412_v60 = vor.u32 %v13968_v63, %v12409_v44  ;;  %v8693_v23 = vadd.f32 %v20107_v26, %v20277_v49 }
 0xa13   : > { %v8883_v35 = vpop.f32.mrf.mxu0  ;;  %v20374_v30 = vadd.f32 %v8880_v47, %v8832_v28 }
 0xa14   : > { %8931 = vmatmul.bf16.gmra.mxu1 %v21575_v10  ;;  %9029 = vmatmul.bf16.gmra.mxu3 %v18957_v36 }
 0xa15   : > { %9109 = vmatpush.bf16.msrb.mxu1 %v12412_v60 }
 0xa16   : > { %9078 = vmatmul.bf16.gmra.mxu0 %v21616_v54  ;;  %v8690_v54 = vadd.f32 %v20098_v37, %v20277_v49  ;;  %v8785_v20 = vpop.f32.mrf.mxu2 }
 0xa17   : > { %v8834_v0 = vpop.f32.mrf.mxu3  ;;  %v8786_v47 = vadd.f32 %v8785_v20, %v8737_v39 }
 0xa19   : > { %v8738_v4 = vpop.f32.mrf.mxu1  ;;  %v8835_v18 = vadd.f32 %v8834_v0, %v8786_v47  ;;  %v21657_v0 = vld [vmem:[#allocation54_spill] sm:$0xff]  ;;  %v12521_v47 = vld [vmem:[%s21090_s3 + $0x238] sm:$0xf0] }
 0xa1a   : > { %v8739_v56 = vadd.f32 %v8738_v4, %v8690_v54  ;;  %v14084_v54 = vld [vmem:[%s21090_s3 + $0x4ec] sm:$0xf] }
 0xa1b   : > { %v8885_v57 = vpop.f32.mrf.mxu0  ;;  %v20397_v37 = vadd.f32 %v8883_v35, %v8835_v18  ;;  %v12873_v35 = vld [vmem:[%s21090_s3 + $0x4f8] sm:$0xf0]  ;;  %v14028_v4 = vld [vmem:[%s21090_s3 + $0x32c] sm:$0xf] }
 0xa1c   : > { %v12876_v26 = vor.u32 %v14084_v54, %v12873_v35  ;;  %v12649_v18 = vld [vmem:[%s21090_s3 + $0x338] sm:$0xf0] }
 0xa1d   : > { %v12652_v60 = vor.u32 %v14028_v4, %v12649_v18 }
 0xa1e   : > { %v8787_v39 = vpop.f32.mrf.mxu2  ;;  %9251 = vmatpush.bf16.msrb.mxu0 %v12876_v26  ;;  %v12393_v26 = vld [vmem:[%s21090_s3 + $0x138] sm:$0xf0] }
 0xa1f   : > { %v8836_v28 = vpop.f32.mrf.mxu3  ;;  %v8788_v7 = vadd.f32 %v8787_v39, %v8739_v56  ;;  %v12524_v56 = vor.u32 %v13996_v5, %v12521_v47  ;;  %v12857_v39 = vld [vmem:[%s21090_s3 + $0x4d8] sm:$0xf0]  ;;  %9208 = vmatpush.bf16.msrb.mxu3 %v12652_v60 }
 0xa20   : > { %v12841_v5 = vld [vmem:[%s21090_s3 + $0x4b8] sm:$0xf0] }
 0xa21   : > { %v8741_v1 = vpop.f32.mrf.mxu1  ;;  %v8837_v42 = vadd.f32 %v8836_v28, %v8788_v7  ;;  %8985 = vmatmul.bf16.gmra.mxu2 %v18462_v9 }
 0xa22   : > { %v8742_v59 = vadd.f32 %v8741_v1, %v8693_v23  ;;  %v14080_v23 = vld [vmem:[%s21090_s3 + $0x4cc] sm:$0xf]  ;;  %9159 = vmatpush.bf16.msrb.mxu2 %v12524_v56  ;;  %v8698_v56 = vadd.f32 %v20161_v16, %v20277_v49 }
 0xa23   : > { %v8888_v41 = vpop.f32.mrf.mxu0  ;;  %v20410_v20 = vadd.f32 %v8885_v57, %v8837_v42  ;;  %v8695_v57 = vadd.f32 %v20140_v19, %v20277_v49  ;;  %v12860_v1 = vor.u32 %v14080_v23, %v12857_v39  ;;  %v13964_v19 = vld [vmem:[%s21090_s3 + $0x12c] sm:$0xf] }
 0xa24   : > { %8936 = vmatmul.bf16.gmra.mxu1 %v21576_v3  ;;  %9034 = vmatmul.bf16.gmra.mxu3 %v19011_v31  ;;  %v14068_v16 = vld [vmem:[%s21090_s3 + $0x46c] sm:$0xf] }
 0xa25   : > { %9252 = vmatpush.bf16.msrb.mxu0 %v12860_v1  ;;  %v12809_v1 = vld [vmem:[%s21090_s3 + $0x478] sm:$0xf0] }
 0xa26   : > { %9083 = vmatmul.bf16.gmra.mxu0 %v21657_v0  ;;  %v8790_v63 = vpop.f32.mrf.mxu2  ;;  %v12396_v0 = vor.u32 %v13964_v19, %v12393_v26  ;;  %v21658_v19 = vld [vmem:[#allocation55_spill] sm:$0xff] }
 0xa27   : > { %v8839_v44 = vpop.f32.mrf.mxu3  ;;  %v8791_v28 = vadd.f32 %v8790_v63, %v8742_v59  ;;  %v14076_v59 = vld [vmem:[%s21090_s3 + $0x4ac] sm:$0xf] }
 0xa28   : > { %v12844_v47 = vor.u32 %v14076_v59, %v12841_v5  ;;  %9110 = vmatpush.bf16.msrb.mxu1 %v12396_v0  ;;  %v14072_v63 = vld [vmem:[%s21090_s3 + $0x48c] sm:$0xf]  ;;  %v12505_v59 = vld [vmem:[%s21090_s3 + $0x218] sm:$0xf0] }
 0xa29   : > { %v8743_v7 = vpop.f32.mrf.mxu1  ;;  %v8840_v54 = vadd.f32 %v8839_v44, %v8791_v28  ;;  %v12825_v44 = vld [vmem:[%s21090_s3 + $0x498] sm:$0xf0]  ;;  %v13992_v26 = vld [vmem:[%s21090_s3 + $0x20c] sm:$0xf] }
 0xa2a   : > { %v8744_v42 = vadd.f32 %v8743_v7, %v8695_v57  ;;  %9253 = vmatpush.bf16.msrb.mxu0 %v12844_v47  ;;  %v12828_v39 = vor.u32 %v14072_v63, %v12825_v44  ;;  %v14024_v0 = vld [vmem:[%s21090_s3 + $0x30c] sm:$0xf]  ;;  %v12508_v5 = vor.u32 %v13992_v26, %v12505_v59  ;;  %v8700_v47 = vadd.f32 %v20194_v34, %v20277_v49  ;;  %v12793_v44 = vld [vmem:[%s21090_s3 + $0x458] sm:$0xf0] }
 0xa2b   : > { %v8890_v35 = vpop.f32.mrf.mxu0  ;;  %v20445_v4 = vadd.f32 %v8888_v41, %v8840_v54  ;;  %v14064_v63 = vld [vmem:[%s21090_s3 + $0x44c] sm:$0xf]  ;;  %v12777_v26 = vld [vmem:[%s21090_s3 + $0x438] sm:$0xf0] }
 0xa2c   : > { %9160 = vmatpush.bf16.msrb.mxu2 %v12508_v5  ;;  %v13960_v34 = vld [vmem:[%s21090_s3 + $0x10c] sm:$0xf]  ;;  %v8703_v5 = vadd.f32 %v20215_v21, %v20277_v49 }
 0xa2e   : > { %v8792_v18 = vpop.f32.mrf.mxu2  ;;  %9254 = vmatpush.bf16.msrb.mxu0 %v12828_v39  ;;  %v12796_v39 = vor.u32 %v14064_v63, %v12793_v44 }
 0xa2f   : > { %v8841_v57 = vpop.f32.mrf.mxu3  ;;  %v8793_v60 = vadd.f32 %v8792_v18, %v8744_v42  ;;  %v12812_v42 = vor.u32 %v14068_v16, %v12809_v1 }
 0xa31   : > { %v8746_v23 = vpop.f32.mrf.mxu1  ;;  %v8842_v28 = vadd.f32 %v8841_v57, %v8793_v60  ;;  %8990 = vmatmul.bf16.gmra.mxu2 %v18500_v8 }
 0xa32   : > { %v8747_v41 = vadd.f32 %v8746_v23, %v8698_v56  ;;  %9255 = vmatpush.bf16.msrb.mxu0 %v12812_v42  ;;  %v12377_v42 = vld [vmem:[%s21090_s3 + $0x118] sm:$0xf0] }
 0xa33   : > { %v8893_v7 = vpop.f32.mrf.mxu0  ;;  %v20464_v54 = vadd.f32 %v8890_v35, %v8842_v28  ;;  %v12633_v35 = vld [vmem:[%s21090_s3 + $0x318] sm:$0xf0] }
 0xa34   : > { %8941 = vmatmul.bf16.gmra.mxu1 %v21577_v11  ;;  %9039 = vmatmul.bf16.gmra.mxu3 %v19059_v6  ;;  %v12636_v57 = vor.u32 %v14024_v0, %v12633_v35 }
 0xa36   : > { %9088 = vmatmul.bf16.gmra.mxu0 %v21658_v19  ;;  %v8795_v56 = vpop.f32.mrf.mxu2  ;;  %9209 = vmatpush.bf16.msrb.mxu3 %v12636_v57  ;;  %v12380_v19 = vor.u32 %v13960_v34, %v12377_v42  ;;  %v14180_v34 = vld [vmem:[%s21090_s3 + $0x7ec] sm:$0xf] }
 0xa37   : > { %v8844_v18 = vpop.f32.mrf.mxu3  ;;  %v8796_v60 = vadd.f32 %v8795_v56, %v8747_v41  ;;  %9256 = vmatpush.bf16.msrb.mxu0 %v12796_v39  ;;  %v14060_v41 = vld [vmem:[%s21090_s3 + $0x42c] sm:$0xf]  ;;  %v21659_v39 = vld [vmem:[#allocation56_spill] sm:$0xff] }
 0xa38   : > { %v12780_v59 = vor.u32 %v14060_v41, %v12777_v26  ;;  %9111 = vmatpush.bf16.msrb.mxu1 %v12380_v19  ;;  %v14056_v56 = vld [vmem:[%s21090_s3 + $0x40c] sm:$0xf]  ;;  %v8705_v41 = vadd.f32 %v20236_v14, %v20277_v49 }
 0xa39   : > { %v8748_v23 = vpop.f32.mrf.mxu1  ;;  %v8845_v16 = vadd.f32 %v8844_v18, %v8796_v60  ;;  %v12761_v18 = vld [vmem:[%s21090_s3 + $0x418] sm:$0xf0] }
 0xa3a   : > { %v8749_v28 = vadd.f32 %v8748_v23, %v8700_v47  ;;  %v12764_v44 = vor.u32 %v14056_v56, %v12761_v18 }
 0xa3b   : > { %v8895_v1 = vpop.f32.mrf.mxu0  ;;  %v20499_v0 = vadd.f32 %v8893_v7, %v8845_v16  ;;  %9257 = vmatpush.bf16.msrb.mxu0 %v12780_v59  ;;  %v13129_v16 = vld [vmem:[%s21090_s3 + $0x6f8] sm:$0xf0] }
 0xa3e   : > { %v8797_v35 = vpop.f32.mrf.mxu2 }
 0xa3f   : > { %v8846_v47 = vpop.f32.mrf.mxu3  ;;  %v8798_v57 = vadd.f32 %v8797_v35, %v8749_v28  ;;  %9258 = vmatpush.bf16.msrb.mxu0 %v12764_v44  ;;  %v14148_v28 = vld [vmem:[%s21090_s3 + $0x6ec] sm:$0xf] }
 0xa40   : > { %v13132_v42 = vor.u32 %v14148_v28, %v13129_v16 }
 0xa41   : > { %v8751_v63 = vpop.f32.mrf.mxu1  ;;  %v8847_v60 = vadd.f32 %v8846_v47, %v8798_v57  ;;  %8995 = vmatmul.bf16.gmra.mxu2 %v18538_v43  ;;  %v14116_v57 = vld [vmem:[%s21090_s3 + $0x5ec] sm:$0xf] }
 0xa42   : > { %v8752_v7 = vadd.f32 %v8751_v63, %v8703_v5  ;;  %9349 = vmatpush.bf16.msra.mxu2 %v13132_v42  ;;  %v13001_v63 = vld [vmem:[%s21090_s3 + $0x5f8] sm:$0xf0] }
 0xa43   : > { %v8898_v23 = vpop.f32.mrf.mxu0  ;;  %v20512_v21 = vadd.f32 %v8895_v1, %v8847_v60  ;;  %v13257_v1 = vld [vmem:[%s21090_s3 + $0x7f8] sm:$0xf0]  ;;  %v13004_v14 = vor.u32 %v14116_v57, %v13001_v63 }
 0xa44   : > { %8946 = vmatmul.bf16.gmra.mxu1 %v21578_v46  ;;  %9044 = vmatmul.bf16.gmra.mxu3 %v19098_v22  ;;  %v13260_v59 = vor.u32 %v14180_v34, %v13257_v1 }
 0xa45   : > { %9300 = vmatpush.bf16.msra.mxu1 %v13004_v14 }
 0xa46   : > { %9093 = vmatmul.bf16.gmra.mxu0 %v21659_v39  ;;  %v8800_v19 = vpop.f32.mrf.mxu2  ;;  %9398 = vmatpush.bf16.msra.mxu3 %v13260_v59 }
 0xa47   : > { %v8849_v26 = vpop.f32.mrf.mxu3  ;;  %v8801_v5 = vadd.f32 %v8800_v19, %v8752_v7  ;;  %v8708_v7 = vadd.f32 %v20245_v2, %v20277_v49  ;;  %v14144_v2 = vld [vmem:[%s21090_s3 + $0x6cc] sm:$0xf] }
 0xa48   : > { %v14176_v19 = vld [vmem:[%s21090_s3 + $0x7cc] sm:$0xf] }
 0xa49   : > { %v8753_v35 = vpop.f32.mrf.mxu1  ;;  %v8850_v56 = vadd.f32 %v8849_v26, %v8801_v5  ;;  %v8710_v26 = vadd.f32 %v20266_v50, %v20277_v49  ;;  %v12985_v50 = vld [vmem:[%s21090_s3 + $0x5d8] sm:$0xf0] }
 0xa4a   : > { %v8754_v47 = vadd.f32 %v8753_v35, %v8705_v41  ;;  %v13113_v41 = vld [vmem:[%s21090_s3 + $0x6d8] sm:$0xf0] }
 0xa4b   : > { %v8900_v18 = vpop.f32.mrf.mxu0  ;;  %v20535_v44 = vadd.f32 %v8898_v23, %v8850_v56  ;;  %v13116_v35 = vor.u32 %v14144_v2, %v13113_v41 }
 0xa4d   : > { %9350 = vmatpush.bf16.msra.mxu2 %v13116_v35 }
 0xa4e   : > { %v8802_v60 = vpop.f32.mrf.mxu2 }
 0xa4f   : > { %v8851_v39 = vpop.f32.mrf.mxu3  ;;  %v8803_v28 = vadd.f32 %v8802_v60, %v8754_v47 }
 0xa51   : > { %v8756_v16 = vpop.f32.mrf.mxu1  ;;  %v8852_v42 = vadd.f32 %v8851_v39, %v8803_v28  ;;  %9000 = vmatmul.bf16.gmra.mxu2 %v18569_v27 }
 0xa52   : > { %v8757_v34 = vadd.f32 %v8756_v16, %v8708_v7  ;;  %v14112_v7 = vld [vmem:[%s21090_s3 + $0x5cc] sm:$0xf] }
 0xa53   : > { %v8903_v1 = vpop.f32.mrf.mxu0  ;;  %v20542_v23 = vadd.f32 %v8900_v18, %v8852_v42  ;;  %v12988_v60 = vor.u32 %v14112_v7, %v12985_v50 }
 0xa54   : > { %8951 = vmatmul.bf16.gmra.mxu1 %v18282_v32  ;;  %9049 = vmatmul.bf16.gmra.mxu3 %v19132_v12 }
 0xa55   : > { %9301 = vmatpush.bf16.msra.mxu1 %v12988_v60 }
 0xa56   : > { %9098 = vmatmul.bf16.gmra.mxu0 %v21538_v15  ;;  %v8805_v59 = vpop.f32.mrf.mxu2  ;;  %v13241_v15 = vld [vmem:[%s21090_s3 + $0x7d8] sm:$0xf0] }
 0xa57   : > { %v8854_v5 = vpop.f32.mrf.mxu3  ;;  %v8806_v47 = vadd.f32 %v8805_v59, %v8757_v34  ;;  %v13244_v18 = vor.u32 %v14176_v19, %v13241_v15 }
 0xa59   : > { %v8758_v56 = vpop.f32.mrf.mxu1  ;;  %v8855_v63 = vadd.f32 %v8854_v5, %v8806_v47  ;;  %9399 = vmatpush.bf16.msra.mxu3 %v13244_v18  ;;  %v14108_v18 = vld [vmem:[%s21090_s3 + $0x5ac] sm:$0xf] }
 0xa5a   : > { %v8759_v57 = vadd.f32 %v8758_v56, %v8710_v26 }
 0xa5b   : > { %v8905_v14 = vpop.f32.mrf.mxu0  ;;  %v20565_v49 = vadd.f32 %v8903_v1, %v8855_v63  ;;  %v14140_v1 = vld [vmem:[%s21090_s3 + $0x6ac] sm:$0xf] }
 0xa5e   : > { %v8807_v39 = vpop.f32.mrf.mxu2 }
 0xa5f   : > { %v8856_v28 = vpop.f32.mrf.mxu3  ;;  %v8808_v16 = vadd.f32 %v8807_v39, %v8759_v57  ;;  %v12969_v57 = vld [vmem:[%s21090_s3 + $0x5b8] sm:$0xf0] }
 0xa60   : > { %v12972_v63 = vor.u32 %v14108_v18, %v12969_v57 }
 0xa61   : > { %v8917_v34 = vpop.f32.mrf.mxu1  ;;  %v8857_v2 = vadd.f32 %v8856_v28, %v8808_v16  ;;  %9161 = vmatmul.bf16.vlgmr.msrb.gmra.mxu2 %v21540_v40  ;;  %v13225_v40 = vld [vmem:[%s21090_s3 + $0x7b8] sm:$0xf0]  ;;  %v21660_v16 = vld [vmem:[#allocation59_spill] sm:$0xff] }
 0xa62   : > { %v8918_v42 = vadd.f32 %v8917_v34, %v20307_v53  ;;  %v13097_v53 = vld [vmem:[%s21090_s3 + $0x6b8] sm:$0xf0]  ;;  %9302 = vmatpush.bf16.msra.mxu1 %v12972_v63 }
 0xa63   : > { %v20568_v41 = vpop.f32.mrf.mxu0  ;;  %v20573_v19 = vadd.f32 %v8905_v14, %v8857_v2  ;;  %v13100_v26 = vor.u32 %v14140_v1, %v13097_v53  ;;  %v21661_v2 = vld [vmem:[#allocation64_spill] sm:$0xff]  ;;  %v21662_v1 = vld [vmem:[#allocation71_spill] sm:$0xff]  ;;  %v21663_v53 = vld [vmem:[#allocation37_spill] sm:$0xff] }
 0xa64   : > { %9112 = vmatmul.bf16.vlgmr.msrb.gmra.mxu1 %v21539_v48  ;;  %9210 = vmatmul.bf16.vlgmr.msrb.gmra.mxu3 %v21541_v25  ;;  %v14172_v48 = vld [vmem:[%s21090_s3 + $0x7ac] sm:$0xf] }
 0xa65   : > { %9351 = vmatpush.bf16.msra.mxu2 %v13100_v26  ;;  %v14168_v26 = vld [vmem:[%s21090_s3 + $0x78c] sm:$0xf] }
 0xa66   : > { %9259 = vmatmul.bf16.vlgmr.msrb.gmra.mxu0 %v21542_v52  ;;  %v8966_v25 = vpop.f32.mrf.mxu2  ;;  %v13228_v52 = vor.u32 %v14172_v48, %v13225_v40  ;;  %v14136_v48 = vld [vmem:[%s21090_s3 + $0x68c] sm:$0xf] }
 0xa67   : > { %v9015_v59 = vpop.f32.mrf.mxu3  ;;  %v8967_v5 = vadd.f32 %v8966_v25, %v8918_v42 }
 0xa68   : > { %9400 = vmatpush.bf16.msra.mxu3 %v13228_v52 }
 0xa69   : > { %v8919_v35 = vpop.f32.mrf.mxu1  ;;  %v9016_v47 = vadd.f32 %v9015_v59, %v8967_v5  ;;  %v13209_v59 = vld [vmem:[%s21090_s3 + $0x798] sm:$0xf0] }
 0xa6a   : > { %v8920_v15 = vadd.f32 %v8919_v35, %v20314_v38  ;;  %v13212_v35 = vor.u32 %v14168_v26, %v13209_v59  ;;  %v21667_v26 = vld [vmem:[#allocation38_spill] sm:$0xff]  ;;  %v14164_v59 = vld [vmem:[%s21090_s3 + $0x76c] sm:$0xf] }
 0xa6b   : > { %v20589_v56 = vpop.f32.mrf.mxu0  ;;  %v9449_v34 = vmax.f32 %v9016_v47, 0.0 }
 0xa6c   : > { %9401 = vmatpush.bf16.msra.mxu3 %v13212_v35 }
 0xa6e   : > { %v8968_v14 = vpop.f32.mrf.mxu2 }
 0xa6f   : > { %v9017_v7 = vpop.f32.mrf.mxu3  ;;  %v8969_v50 = vadd.f32 %v8968_v14, %v8920_v15  ;;  %v14104_v14 = vld [vmem:[%s21090_s3 + $0x58c] sm:$0xf] }
 0xa71   : > { %v8922_v60 = vpop.f32.mrf.mxu1  ;;  %v9018_v39 = vadd.f32 %v9017_v7, %v8969_v50  ;;  %9166 = vmatmul.bf16.gmra.mxu2 %v21661_v2  ;;  %v12953_v7 = vld [vmem:[%s21090_s3 + $0x598] sm:$0xf0]  ;;  %v21664_v2 = vld [vmem:[#allocation60_spill] sm:$0xff] }
 0xa72   : > { %v8923_v38 = vadd.f32 %v8922_v60, %v20337_v24  ;;  %v13081_v24 = vld [vmem:[%s21090_s3 + $0x698] sm:$0xf0]  ;;  %v12956_v50 = vor.u32 %v14104_v14, %v12953_v7 }
 0xa73   : > { %v20598_v28 = vpop.f32.mrf.mxu0  ;;  %v9453_v42 = vmax.f32 %v9018_v39, 0.0  ;;  %v13084_v25 = vor.u32 %v14136_v48, %v13081_v24  ;;  %v21665_v48 = vld [vmem:[#allocation65_spill] sm:$0xff]  ;;  %v21666_v24 = vld [vmem:[#allocation72_spill] sm:$0xff] }
 0xa74   : > { %9117 = vmatmul.bf16.gmra.mxu1 %v21660_v16  ;;  %9215 = vmatmul.bf16.gmra.mxu3 %v21662_v1 }
 0xa75   : > { %v20613_v40 = vpack.c.bf16 %v9453_v42, %v9449_v34  ;;  %9352 = vmatpush.bf16.msra.mxu2 %v13084_v25  ;;  %9303 = vmatpush.bf16.msra.mxu1 %v12956_v50  ;;  %v14132_v25 = vld [vmem:[%s21090_s3 + $0x66c] sm:$0xf] }
 0xa76   : > { %9264 = vmatmul.bf16.gmra.mxu0 %v21663_v53  ;;  %v8971_v52 = vpop.f32.mrf.mxu2 }
 0xa77   : > { %v9020_v5 = vpop.f32.mrf.mxu3  ;;  %v8972_v15 = vadd.f32 %v8971_v52, %v8923_v38 }
 0xa79   : > { %v8924_v47 = vpop.f32.mrf.mxu1  ;;  %v9021_v57 = vadd.f32 %v9020_v5, %v8972_v15  ;;  %v13193_v5 = vld [vmem:[%s21090_s3 + $0x778] sm:$0xf0] }
 0xa7a   : > { %v8925_v18 = vadd.f32 %v8924_v47, %v20344_v51 }
 0xa7b   : > { %v20619_v63 = vpop.f32.mrf.mxu0  ;;  %v9457_v1 = vmax.f32 %v9021_v57, 0.0 }
 0xa7e   : > { %v8973_v60 = vpop.f32.mrf.mxu2 }
 0xa7f   : > { %v9022_v39 = vpop.f32.mrf.mxu3  ;;  %v8974_v38 = vadd.f32 %v8973_v60, %v8925_v18  ;;  %v13196_v18 = vor.u32 %v14164_v59, %v13193_v5  ;;  %v21670_v59 = vld [vmem:[#allocation73_spill] sm:$0xff]  ;;  %v14128_v5 = vld [vmem:[%s21090_s3 + $0x64c] sm:$0xf] }
 0xa81   : > { %v8927_v16 = vpop.f32.mrf.mxu1  ;;  %v9023_v34 = vadd.f32 %v9022_v39, %v8974_v38  ;;  %9171 = vmatmul.bf16.gmra.mxu2 %v21665_v48  ;;  %9402 = vmatpush.bf16.msra.mxu3 %v13196_v18  ;;  %v14100_v39 = vld [vmem:[%s21090_s3 + $0x56c] sm:$0xf]  ;;  %v12937_v38 = vld [vmem:[%s21090_s3 + $0x578] sm:$0xf0] }
 0xa82   : > { %v8928_v51 = vadd.f32 %v8927_v16, %v20367_v62  ;;  %v13065_v62 = vld [vmem:[%s21090_s3 + $0x678] sm:$0xf0]  ;;  %v12940_v16 = vor.u32 %v14100_v39, %v12937_v38 }
 0xa83   : > { %v20628_v42 = vpop.f32.mrf.mxu0  ;;  %v9461_v53 = vmax.f32 %v9023_v34, 0.0  ;;  %v13068_v52 = vor.u32 %v14132_v25, %v13065_v62  ;;  %v21669_v62 = vld [vmem:[#allocation66_spill] sm:$0xff]  ;;  %v13177_v18 = vld [vmem:[%s21090_s3 + $0x758] sm:$0xf0] }
 0xa84   : > { %9122 = vmatmul.bf16.gmra.mxu1 %v21664_v2  ;;  %9220 = vmatmul.bf16.gmra.mxu3 %v21666_v24  ;;  %v21668_v24 = vld [vmem:[#allocation61_spill] sm:$0xff] }
 0xa85   : > { %v20646_v35 = vpack.c.bf16 %v9461_v53, %v9457_v1  ;;  %9353 = vmatpush.bf16.msra.mxu2 %v13068_v52  ;;  %9304 = vmatpush.bf16.msra.mxu1 %v12940_v16  ;;  %v21671_v52 = vld [vmem:[#allocation40_spill] sm:$0xff] }
 0xa86   : > { %9269 = vmatmul.bf16.gmra.mxu0 %v21667_v26  ;;  %v8976_v15 = vpop.f32.mrf.mxu2 }
 0xa87   : > { %v9025_v47 = vpop.f32.mrf.mxu3  ;;  %v8977_v57 = vadd.f32 %v8976_v15, %v8928_v51  ;;  %v14160_v15 = vld [vmem:[%s21090_s3 + $0x74c] sm:$0xf] }
 0xa89   : > { %v8929_v14 = vpop.f32.mrf.mxu1  ;;  %v9026_v50 = vadd.f32 %v9025_v47, %v8977_v57 }
 0xa8a   : > { %v8930_v7 = vadd.f32 %v8929_v14, %v20374_v30 }
 0xa8b   : > { %v20649_v60 = vpop.f32.mrf.mxu0  ;;  %v9465_v26 = vmax.f32 %v9026_v50, 0.0  ;;  %v13180_v50 = vor.u32 %v14160_v15, %v13177_v18  ;;  %v21673_v15 = vld [vmem:[#allocation67_spill] sm:$0xff]  ;;  %v14190_v18 = vld [vmem:[%s21092_s5 + $0x38] sm:$0xff] }
 0xa8c   : > { %9803 = vmatpush.bf16.msra.mxu0 %v14190_v18 }
 0xa8d   : > { %9403 = vmatpush.bf16.msra.mxu3 %v13180_v50  ;;  %v14156_v50 = vld [vmem:[%s21090_s3 + $0x72c] sm:$0xf] }
 0xa8e   : > { %v8978_v34 = vpop.f32.mrf.mxu2 }
 0xa8f   : > { %v9027_v2 = vpop.f32.mrf.mxu3  ;;  %v8979_v51 = vadd.f32 %v8978_v34, %v8930_v7 }
 0xa91   : > { %v8932_v1 = vpop.f32.mrf.mxu1  ;;  %v9028_v53 = vadd.f32 %v9027_v2, %v8979_v51  ;;  %9176 = vmatmul.bf16.gmra.mxu2 %v21669_v62  ;;  %v14096_v51 = vld [vmem:[%s21090_s3 + $0x54c] sm:$0xf] }
 0xa92   : > { %v8933_v30 = vadd.f32 %v8932_v1, %v20397_v37  ;;  %v13049_v37 = vld [vmem:[%s21090_s3 + $0x658] sm:$0xf0] }
 0xa93   : > { %v20658_v48 = vpop.f32.mrf.mxu0  ;;  %v9469_v25 = vmax.f32 %v9028_v53, 0.0  ;;  %v13052_v47 = vor.u32 %v14128_v5, %v13049_v37  ;;  %v12921_v1 = vld [vmem:[%s21090_s3 + $0x558] sm:$0xf0] }
 0xa94   : > { %9127 = vmatmul.bf16.gmra.mxu1 %v21668_v24  ;;  %9225 = vmatmul.bf16.gmra.mxu3 %v21670_v59  ;;  %v12924_v53 = vor.u32 %v14096_v51, %v12921_v1 }
 0xa95   : > { %v20676_v57 = vpack.c.bf16 %v9469_v25, %v9465_v26  ;;  %9354 = vmatpush.bf16.msra.mxu2 %v13052_v47  ;;  %v21674_v47 = vld [vmem:[#allocation74_spill] sm:$0xff] }
 0xa96   : > { %9274 = vmatmul.bf16.gmra.mxu0 %v21671_v52  ;;  %v8981_v14 = vpop.f32.mrf.mxu2  ;;  %9305 = vmatpush.bf16.msra.mxu1 %v12924_v53  ;;  %v21672_v52 = vld [vmem:[#allocation20_spill] sm:$0xff] }
 0xa97   : > { %v9030_v7 = vpop.f32.mrf.mxu3  ;;  %v8982_v39 = vadd.f32 %v8981_v14, %v8933_v30  ;;  %v21675_v14 = vld [vmem:[#allocation42_spill] sm:$0xff] }
 0xa99   : > { %v8934_v38 = vpop.f32.mrf.mxu1  ;;  %v9031_v34 = vadd.f32 %v9030_v7, %v8982_v39  ;;  %v13033_v7 = vld [vmem:[%s21090_s3 + $0x638] sm:$0xf0] }
 0xa9a   : > { %v8935_v16 = vadd.f32 %v8934_v38, %v20410_v20  ;;  %v13161_v38 = vld [vmem:[%s21090_s3 + $0x738] sm:$0xf0] }
 0xa9b   : > { %v20679_v2 = vpop.f32.mrf.mxu0  ;;  %v9473_v5 = vmax.f32 %v9031_v34, 0.0  ;;  %v13164_v1 = vor.u32 %v14156_v50, %v13161_v38 }
 0xa9d   : > { %9404 = vmatpush.bf16.msra.mxu3 %v13164_v1  ;;  %v21678_v1 = vld [vmem:[#allocation75_spill] sm:$0xff] }
 0xa9e   : > { %v8983_v24 = vpop.f32.mrf.mxu2 }
 0xa9f   : > { %v9032_v26 = vpop.f32.mrf.mxu3  ;;  %v8984_v30 = vadd.f32 %v8983_v24, %v8935_v16 }
 0xaa1   : > { %v8937_v25 = vpop.f32.mrf.mxu1  ;;  %v9033_v62 = vadd.f32 %v9032_v26, %v8984_v30  ;;  %9181 = vmatmul.bf16.gmra.mxu2 %v21673_v15  ;;  %v14189_v26 = vld [vmem:[%s21092_s5 + $0x30] sm:$0xff] }
 0xaa2   : > { %v8938_v20 = vadd.f32 %v8937_v25, %v20445_v4  ;;  %v14124_v4 = vld [vmem:[%s21090_s3 + $0x62c] sm:$0xf]  ;;  %9804 = vmatpush.bf16.msra.mxu0 %v14189_v26  ;;  %v13017_v26 = vld [vmem:[%s21090_s3 + $0x618] sm:$0xf0] }
 0xaa3   : > { %v20688_v59 = vpop.f32.mrf.mxu0  ;;  %v9477_v37 = vmax.f32 %v9033_v62, 0.0  ;;  %v13036_v39 = vor.u32 %v14124_v4, %v13033_v7 }
 0xaa4   : > { %9132 = vmatmul.bf16.gmra.mxu1 %v21672_v52  ;;  %9230 = vmatmul.bf16.gmra.mxu3 %v21674_v47  ;;  %v14092_v52 = vld [vmem:[%s21090_s3 + $0x52c] sm:$0xf] }
 0xaa5   : > { %v20709_v16 = vpack.c.bf16 %v9477_v37, %v9473_v5  ;;  %9355 = vmatpush.bf16.msra.mxu2 %v13036_v39  ;;  %v14188_v5 = vld [vmem:[%s21092_s5 + $0x28] sm:$0xff]  ;;  %v21676_v39 = vld [vmem:[#allocation24_spill] sm:$0xff] }
 0xaa6   : > { %9279 = vmatmul.bf16.gmra.mxu0 %v21675_v14  ;;  %v8986_v34 = vpop.f32.mrf.mxu2  ;;  %v14187_v14 = vld [vmem:[%s21092_s5 + $0x20] sm:$0xff] }
 0xaa7   : > { %v9035_v51 = vpop.f32.mrf.mxu3  ;;  %v8987_v53 = vadd.f32 %v8986_v34, %v8938_v20  ;;  %v12905_v20 = vld [vmem:[%s21090_s3 + $0x538] sm:$0xf0]  ;;  %9805 = vmatpush.bf16.msra.mxu0 %v14188_v5 }
 0xaa8   : > { %v12908_v37 = vor.u32 %v14092_v52, %v12905_v20  ;;  %v13145_v52 = vld [vmem:[%s21090_s3 + $0x718] sm:$0xf0] }
 0xaa9   : > { %v8939_v24 = vpop.f32.mrf.mxu1  ;;  %v9036_v25 = vadd.f32 %v9035_v51, %v8987_v53  ;;  %v21677_v51 = vld [vmem:[#allocation68_spill] sm:$0xff]  ;;  %v14186_v53 = vld [vmem:[%s21092_s5 + $0x18] sm:$0xff] }
 0xaaa   : > { %v8940_v30 = vadd.f32 %v8939_v24, %v20464_v54  ;;  %9306 = vmatpush.bf16.msra.mxu1 %v12908_v37  ;;  %v21679_v24 = vld [vmem:[#allocation44_spill] sm:$0xff] }
 0xaab   : > { %v20715_v62 = vpop.f32.mrf.mxu0  ;;  %9806 = vmatpush.bf16.msra.mxu0 %v14187_v14  ;;  %v9481_v38 = vmax.f32 %v9036_v25, 0.0 }
 0xaae   : > { %v8988_v54 = vpop.f32.mrf.mxu2 }
 0xaaf   : > { %v9037_v15 = vpop.f32.mrf.mxu3  ;;  %v8989_v47 = vadd.f32 %v8988_v54, %v8940_v30  ;;  %v14152_v30 = vld [vmem:[%s21090_s3 + $0x70c] sm:$0xf]  ;;  %9807 = vmatpush.bf16.msra.mxu0 %v14186_v53 }
 0xab0   : > { %v13148_v54 = vor.u32 %v14152_v30, %v13145_v52  ;;  %v21680_v52 = vld [vmem:[#allocation28_spill] sm:$0xff] }
 0xab1   : > { %v8942_v18 = vpop.f32.mrf.mxu1  ;;  %v9038_v7 = vadd.f32 %v9037_v15, %v8989_v47  ;;  %9186 = vmatmul.bf16.gmra.mxu2 %v21677_v51 }
 0xab2   : > { %v8943_v4 = vadd.f32 %v8942_v18, %v20499_v0  ;;  %v14120_v0 = vld [vmem:[%s21090_s3 + $0x60c] sm:$0xf]  ;;  %v14185_v18 = vld [vmem:[%s21092_s5 + $0x10] sm:$0xff]  ;;  %9405 = vmatpush.bf16.msra.mxu3 %v13148_v54  ;;  %v21681_v54 = vld [vmem:[#allocation69_spill] sm:$0xff] }
 0xab3   : > { %v20730_v50 = vpop.f32.mrf.mxu0  ;;  %v9485_v34 = vmax.f32 %v9038_v7, 0.0  ;;  %v13020_v25 = vor.u32 %v14120_v0, %v13017_v26  ;;  %9808 = vmatpush.bf16.msra.mxu0 %v14185_v18  ;;  %v14183_v0 = vld [vmem:[%s21092_s5] sm:$0xff] }
 0xab4   : > { %9137 = vmatmul.bf16.gmra.mxu1 %v21676_v39  ;;  %9235 = vmatmul.bf16.gmra.mxu3 %v21678_v1 }
 0xab5   : > { %v20751_v20 = vpack.c.bf16 %v9485_v34, %v9481_v38  ;;  %9356 = vmatpush.bf16.msra.mxu2 %v13020_v25  ;;  %v14088_v38 = vld [vmem:[%s21090_s3 + $0x50c] sm:$0xf] }
 0xab6   : > { %9284 = vmatmul.bf16.gmra.mxu0 %v21679_v24  ;;  %v8991_v5 = vpop.f32.mrf.mxu2  ;;  %v14184_v34 = vld [vmem:[%s21092_s5 + $0x8] sm:$0xff] }
 0xab7   : > { %v9040_v37 = vpop.f32.mrf.mxu3  ;;  %v8992_v15 = vadd.f32 %v8991_v5, %v8943_v4  ;;  %v12889_v4 = vld [vmem:[%s21090_s3 + $0x518] sm:$0xf0]  ;;  %9809 = vmatpush.bf16.msra.mxu0 %v14184_v34 }
 0xab8   : > { %v12892_v51 = vor.u32 %v14088_v38, %v12889_v4 }
 0xab9   : > { %v8944_v47 = vpop.f32.mrf.mxu1  ;;  %v9041_v7 = vadd.f32 %v9040_v37, %v8992_v15  ;;  %v21682_v15 = vld [vmem:[#allocation76_spill] sm:$0xff] }
 0xaba   : > { %v8945_v14 = vadd.f32 %v8944_v47, %v20512_v21  ;;  %9307 = vmatpush.bf16.msra.mxu1 %v12892_v51  ;;  %v21683_v47 = vld [vmem:[#allocation21_spill] sm:$0xff] }
 0xabb   : > { %v20757_v39 = vpop.f32.mrf.mxu0  ;;  %9810 = vmatpush.bf16.msra.mxu0 %v14183_v0  ;;  %v9489_v5 = vmax.f32 %v9041_v7, 0.0 }
 0xabe   : > { %v8993_v21 = vpop.f32.mrf.mxu2 }
 0xabf   : > { %v9042_v1 = vpop.f32.mrf.mxu3  ;;  %v8994_v53 = vadd.f32 %v8993_v21, %v8945_v14 }
 0xac1   : > { %v8947_v24 = vpop.f32.mrf.mxu1  ;;  %v9043_v30 = vadd.f32 %v9042_v1, %v8994_v53  ;;  %9191 = vmatmul.bf16.gmra.mxu2 %v21681_v54 }
 0xac2   : > { %v8948_v26 = vadd.f32 %v8947_v24, %v20535_v44 }
 0xac3   : > { %v20772_v25 = vpop.f32.mrf.mxu0  ;;  %v9493_v37 = vmax.f32 %v9043_v30, 0.0 }
 0xac4   : > { %9142 = vmatmul.bf16.gmra.mxu1 %v21680_v52  ;;  %9240 = vmatmul.bf16.gmra.mxu3 %v21682_v15  ;;  %v21686_v15 = vld [vmem:[#allocation77_spill] sm:$0xff] }
 0xac5   : > { %v20778_v18 = vpack.c.bf16 %v9493_v37, %v9489_v5  ;;  %v21684_v5 = vld [vmem:[#allocation62_spill] sm:$0xff] }
 0xac6   : > { %9289 = vmatmul.bf16.gmra.mxu0 %v21683_v47  ;;  %v8996_v14 = vpop.f32.mrf.mxu2  ;;  %v14206_v47 = vld [vmem:[%s21092_s5 + $0xb8] sm:$0xff] }
 0xac7   : > { %v9045_v38 = vpop.f32.mrf.mxu3  ;;  %v8997_v4 = vadd.f32 %v8996_v14, %v8948_v26  ;;  %v21685_v26 = vld [vmem:[#allocation70_spill] sm:$0xff]  ;;  %9901 = vmatpush.bf16.msrb.mxu2 %v14206_v47 }
 0xac8   : > { %v21688_v47 = vld [vmem:[#allocation2_spill] sm:$0xff] }
 0xac9   : > { %v8949_v44 = vpop.f32.mrf.mxu1  ;;  %v9046_v51 = vadd.f32 %v9045_v38, %v8997_v4 }
 0xaca   : > { %v8950_v34 = vadd.f32 %v8949_v44, %v20542_v23  ;;  %v21687_v23 = vld [vmem:[#allocation78_spill] sm:$0xff] }
 0xacb   : > { %v20781_v21 = vpop.f32.mrf.mxu0  ;;  %v9497_v37 = vmax.f32 %v9046_v51, 0.0 }
 0xace   : > { %v8998_v1 = vpop.f32.mrf.mxu2 }
 0xacf   : > { %v9047_v7 = vpop.f32.mrf.mxu3  ;;  %v8999_v53 = vadd.f32 %v8998_v1, %v8950_v34 }
 0xad1   : > { %v8952_v24 = vpop.f32.mrf.mxu1  ;;  %v9048_v30 = vadd.f32 %v9047_v7, %v8999_v53  ;;  %9196 = vmatmul.bf16.gmra.mxu2 %v21685_v26  ;;  %v14214_v7 = vld [vmem:[%s21092_s5 + $0xf8] sm:$0xff] }
 0xad2   : > { %v8953_v0 = vadd.f32 %v8952_v24, %v20565_v49  ;;  %v14198_v53 = vld [vmem:[%s21092_s5 + $0x78] sm:$0xff]  ;;  %v14265_v24 = vld [vmem:[%s21091_s4] sm:$0xf]  ;;  %9950 = vmatpush.bf16.msrb.mxu3 %v14214_v7 }
 0xad3   : > { %v20784_v52 = vpop.f32.mrf.mxu0  ;;  %v9501_v54 = vmax.f32 %v9048_v30, 0.0  ;;  %v20807_v30 = vperm.slane %v14265_v24, 3  ;;  %9852 = vmatpush.bf16.msrb.mxu1 %v14198_v53  ;;  %v21691_v7 = vld [vmem:[#allocation29_spill] sm:$0xff] }
 0xad4   : > { %9147 = vmatmul.bf16.gmra.mxu1 %v21684_v5  ;;  %9245 = vmatmul.bf16.gmra.mxu3 %v21686_v15 }
 0xad5   : > { %v20793_v14 = vpack.c.bf16 %v9501_v54, %v9497_v37 }
 0xad6   : > { %9294 = vmatmul.bf16.gmra.mxu0 %v21687_v23  ;;  %v9001_v49 = vpop.f32.mrf.mxu2 }
 0xad7   : > { %v9050_v38 = vpop.f32.mrf.mxu3  ;;  %v9002_v4 = vadd.f32 %v9001_v49, %v8953_v0 }
 0xad9   : > { %v8954_v44 = vpop.f32.mrf.mxu1  ;;  %v9051_v51 = vadd.f32 %v9050_v38, %v9002_v4  ;;  %v21689_v4 = vld [vmem:[#allocation45_spill] sm:$0xff] }
 0xada   : > { %v8955_v34 = vadd.f32 %v8954_v44, %v20573_v19  ;;  %v9065_v19 = vadd.f32 %v20568_v41, %v20807_v30  ;;  %v21690_v44 = vld [vmem:[#allocation9_spill] sm:$0xff]  ;;  %v14205_v41 = vld [vmem:[%s21092_s5 + $0xb0] sm:$0xff] }
 0xadb   : > { %v20796_v1 = vpop.f32.mrf.mxu0  ;;  %v9505_v49 = vmax.f32 %v9051_v51, 0.0  ;;  %9902 = vmatpush.bf16.msrb.mxu2 %v14205_v41 }
 0xade   : > { %v9003_v0 = vpop.f32.mrf.mxu2 }
 0xadf   : > { %v9052_v5 = vpop.f32.mrf.mxu3  ;;  %v9004_v37 = vadd.f32 %v9003_v0, %v8955_v34  ;;  %v9067_v34 = vadd.f32 %v20589_v56, %v20807_v30  ;;  %v9070_v56 = vadd.f32 %v20598_v28, %v20807_v30  ;;  %v14204_v28 = vld [vmem:[%s21092_s5 + $0xa8] sm:$0xff] }
 0xae0   : > { %9903 = vmatpush.bf16.msrb.mxu2 %v14204_v28  ;;  %v9077_v28 = vadd.f32 %v20649_v60, %v20807_v30 }
 0xae1   : > { %v9113_v54 = vpop.f32.mrf.mxu1  ;;  %v9053_v15 = vadd.f32 %v9052_v5, %v9004_v37  ;;  %9357 = vmatmul.bf16.vlgmr.msra.gmra.mxu2 %v21689_v4 }
 0xae2   : > { %v9114_v26 = vadd.f32 %v9113_v54, %v9065_v19 }
 0xae3   : > { %v9260_v23 = vpop.f32.mrf.mxu0  ;;  %v9509_v38 = vmax.f32 %v9053_v15, 0.0  ;;  %v14213_v15 = vld [vmem:[%s21092_s5 + $0xf0] sm:$0xff] }
 0xae4   : > { %9308 = vmatmul.bf16.vlgmr.msra.gmra.mxu1 %v21688_v47  ;;  %9406 = vmatmul.bf16.vlgmr.msra.gmra.mxu3 %v21690_v44  ;;  %v14197_v47 = vld [vmem:[%s21092_s5 + $0x70] sm:$0xff] }
 0xae5   : > { %v20818_v53 = vpack.c.bf16 %v9509_v38, %v9505_v49  ;;  %9951 = vmatpush.bf16.msrb.mxu3 %v14213_v15  ;;  %9853 = vmatpush.bf16.msrb.mxu1 %v14197_v47 }
 0xae6   : > { %9811 = vmatmul.bf16.vlgmr.msra.gmra.mxu0 %v21691_v7  ;;  %v9162_v24 = vpop.f32.mrf.mxu2 }
 0xae7   : > { %v9211_v19 = vpop.f32.mrf.mxu3  ;;  %v9163_v51 = vadd.f32 %v9162_v24, %v9114_v26 }
 0xae9   : > { %v9115_v0 = vpop.f32.mrf.mxu1  ;;  %v9212_v37 = vadd.f32 %v9211_v19, %v9163_v51  ;;  %v9072_v19 = vadd.f32 %v20619_v63, %v20807_v30  ;;  %v9075_v63 = vadd.f32 %v20628_v42, %v20807_v30  ;;  %v14203_v42 = vld [vmem:[%s21092_s5 + $0xa0] sm:$0xff] }
 0xaea   : > { %v9116_v5 = vadd.f32 %v9115_v0, %v9067_v34  ;;  %9904 = vmatpush.bf16.msrb.mxu2 %v14203_v42 }
 0xaeb   : > { %v9262_v54 = vpop.f32.mrf.mxu0  ;;  %v20828_v49 = vadd.f32 %v9260_v23, %v9212_v37  ;;  %v21692_v23 = vld [vmem:[#allocation32_spill] sm:$0xff] }
 0xaee   : > { %v9164_v26 = vpop.f32.mrf.mxu2 }
 0xaef   : > { %v9213_v38 = vpop.f32.mrf.mxu3  ;;  %v9165_v4 = vadd.f32 %v9164_v26, %v9116_v5 }
 0xaf1   : > { %v9118_v44 = vpop.f32.mrf.mxu1  ;;  %v9214_v41 = vadd.f32 %v9213_v38, %v9165_v4  ;;  %9362 = vmatmul.bf16.gmra.mxu2 %v18348_v13 }
 0xaf2   : > { %v9119_v7 = vadd.f32 %v9118_v44, %v9070_v56 }
 0xaf3   : > { %v9265_v34 = vpop.f32.mrf.mxu0  ;;  %v20835_v24 = vadd.f32 %v9262_v54, %v9214_v41  ;;  %v14196_v54 = vld [vmem:[%s21092_s5 + $0x68] sm:$0xff] }
 0xaf4   : > { %9313 = vmatmul.bf16.gmra.mxu1 %v21573_v55  ;;  %9411 = vmatmul.bf16.gmra.mxu3 %v18891_v58  ;;  %v14212_v58 = vld [vmem:[%s21092_s5 + $0xe8] sm:$0xff] }
 0xaf5   : > { %9952 = vmatpush.bf16.msrb.mxu3 %v14212_v58  ;;  %9854 = vmatpush.bf16.msrb.mxu1 %v14196_v54 }
 0xaf6   : > { %9816 = vmatmul.bf16.gmra.mxu0 %v21692_v23  ;;  %v9167_v51 = vpop.f32.mrf.mxu2 }
 0xaf7   : > { %v9216_v0 = vpop.f32.mrf.mxu3  ;;  %v9168_v5 = vadd.f32 %v9167_v51, %v9119_v7 }
 0xaf9   : > { %v9120_v55 = vpop.f32.mrf.mxu1  ;;  %v9217_v13 = vadd.f32 %v9216_v0, %v9168_v5 }
 0xafa   : > { %v9121_v37 = vadd.f32 %v9120_v55, %v9072_v19  ;;  %v14195_v55 = vld [vmem:[%s21092_s5 + $0x60] sm:$0xff] }
 0xafb   : > { %v9267_v15 = vpop.f32.mrf.mxu0  ;;  %v20849_v47 = vadd.f32 %v9265_v34, %v9217_v13  ;;  %v21693_v34 = vld [vmem:[#allocation12_spill] sm:$0xff]  ;;  %9855 = vmatpush.bf16.msrb.mxu1 %v14195_v55  ;;  %v9080_v13 = vadd.f32 %v20658_v48, %v20807_v30  ;;  %v14202_v48 = vld [vmem:[%s21092_s5 + $0x98] sm:$0xff] }
 0xafc   : > { %9905 = vmatpush.bf16.msrb.mxu2 %v14202_v48 }
 0xafe   : > { %v9169_v56 = vpop.f32.mrf.mxu2 }
 0xaff   : > { %v9218_v26 = vpop.f32.mrf.mxu3  ;;  %v9170_v38 = vadd.f32 %v9169_v56, %v9121_v37 }
 0xb01   : > { %v9123_v4 = vpop.f32.mrf.mxu1  ;;  %v9219_v7 = vadd.f32 %v9218_v26, %v9170_v38  ;;  %9367 = vmatmul.bf16.gmra.mxu2 %v18374_v45 }
 0xb02   : > { %v9124_v44 = vadd.f32 %v9123_v4, %v9075_v63  ;;  %v21694_v4 = vld [vmem:[#allocation13_spill] sm:$0xff] }
 0xb03   : > { %v9270_v41 = vpop.f32.mrf.mxu0  ;;  %v20856_v23 = vadd.f32 %v9267_v15, %v9219_v7 }
 0xb04   : > { %9318 = vmatmul.bf16.gmra.mxu1 %v21574_v33  ;;  %9416 = vmatmul.bf16.gmra.mxu3 %v18921_v17  ;;  %v14211_v17 = vld [vmem:[%s21092_s5 + $0xe0] sm:$0xff] }
 0xb05   : > { %9953 = vmatpush.bf16.msrb.mxu3 %v14211_v17 }
 0xb06   : > { %9821 = vmatmul.bf16.gmra.mxu0 %v21693_v34  ;;  %v9172_v19 = vpop.f32.mrf.mxu2 }
 0xb07   : > { %v9221_v51 = vpop.f32.mrf.mxu3  ;;  %v9173_v33 = vadd.f32 %v9172_v19, %v9124_v44  ;;  %v9082_v44 = vadd.f32 %v20679_v2, %v20807_v30  ;;  %v14194_v19 = vld [vmem:[%s21092_s5 + $0x58] sm:$0xff]  ;;  %v9085_v2 = vadd.f32 %v20688_v59, %v20807_v30  ;;  %v14201_v59 = vld [vmem:[%s21092_s5 + $0x90] sm:$0xff] }
 0xb08   : > { %9856 = vmatpush.bf16.msrb.mxu1 %v14194_v19  ;;  %9906 = vmatpush.bf16.msrb.mxu2 %v14201_v59 }
 0xb09   : > { %v9125_v0 = vpop.f32.mrf.mxu1  ;;  %v9222_v45 = vadd.f32 %v9221_v51, %v9173_v33 }
 0xb0a   : > { %v9126_v5 = vadd.f32 %v9125_v0, %v9077_v28 }
 0xb0b   : > { %v20870_v37 = vadd.f32 %v9270_v41, %v9222_v45  ;;  %v9272_v60 = vpop.f32.mrf.mxu0 }
 0xb0e   : > { %v9174_v15 = vpop.f32.mrf.mxu2 }
 0xb0f   : > { %v9223_v58 = vpop.f32.mrf.mxu3  ;;  %v9175_v54 = vadd.f32 %v9174_v15, %v9126_v5  ;;  %v21695_v15 = vld [vmem:[#allocation3_spill] sm:$0xff] }
 0xb11   : > { %v9128_v63 = vpop.f32.mrf.mxu1  ;;  %v9224_v26 = vadd.f32 %v9223_v58, %v9175_v54  ;;  %9372 = vmatmul.bf16.gmra.mxu2 %v18412_v29  ;;  %v9087_v58 = vadd.f32 %v20715_v62, %v20807_v30  ;;  %v9090_v62 = vadd.f32 %v20730_v50, %v20807_v30  ;;  %v9092_v50 = vadd.f32 %v20757_v39, %v20807_v30 }
 0xb12   : > { %v9129_v56 = vadd.f32 %v9128_v63, %v9080_v13  ;;  %v9095_v39 = vadd.f32 %v20772_v25, %v20807_v30  ;;  %v21697_v25 = vld [vmem:[#allocation15_spill] sm:$0xff] }
 0xb13   : > { %v20877_v38 = vadd.f32 %v9272_v60, %v9224_v26  ;;  %v9275_v42 = vpop.f32.mrf.mxu0 }
 0xb14   : > { %9323 = vmatmul.bf16.gmra.mxu1 %v21575_v10  ;;  %9421 = vmatmul.bf16.gmra.mxu3 %v18957_v36  ;;  %v14210_v36 = vld [vmem:[%s21092_s5 + $0xd8] sm:$0xff] }
 0xb15   : > { %9954 = vmatpush.bf16.msrb.mxu3 %v14210_v36 }
 0xb16   : > { %9826 = vmatmul.bf16.gmra.mxu0 %v21694_v4  ;;  %v9177_v7 = vpop.f32.mrf.mxu2  ;;  %v14193_v4 = vld [vmem:[%s21092_s5 + $0x50] sm:$0xff] }
 0xb17   : > { %v9226_v41 = vpop.f32.mrf.mxu3  ;;  %v9178_v34 = vadd.f32 %v9177_v7, %v9129_v56  ;;  %9857 = vmatpush.bf16.msrb.mxu1 %v14193_v4 }
 0xb19   : > { %v9130_v10 = vpop.f32.mrf.mxu1  ;;  %v9227_v28 = vadd.f32 %v9226_v41, %v9178_v34 }
 0xb1a   : > { %v9131_v29 = vadd.f32 %v9130_v10, %v9082_v44  ;;  %v21696_v10 = vld [vmem:[#allocation14_spill] sm:$0xff] }
 0xb1b   : > { %v20891_v51 = vadd.f32 %v9275_v42, %v9227_v28  ;;  %v9277_v60 = vpop.f32.mrf.mxu0  ;;  %v14200_v42 = vld [vmem:[%s21092_s5 + $0x88] sm:$0xff] }
 0xb1c   : > { %9907 = vmatpush.bf16.msrb.mxu2 %v14200_v42 }
 0xb1e   : > { %v9179_v33 = vpop.f32.mrf.mxu2 }
 0xb1f   : > { %v9228_v0 = vpop.f32.mrf.mxu3  ;;  %v9180_v5 = vadd.f32 %v9179_v33, %v9131_v29 }
 0xb21   : > { %v9133_v45 = vpop.f32.mrf.mxu1  ;;  %v9229_v55 = vadd.f32 %v9228_v0, %v9180_v5  ;;  %9377 = vmatmul.bf16.gmra.mxu2 %v18462_v9 }
 0xb22   : > { %v9134_v17 = vadd.f32 %v9133_v45, %v9085_v2 }
 0xb23   : > { %v20898_v13 = vadd.f32 %v9277_v60, %v9229_v55  ;;  %v14199_v55 = vld [vmem:[%s21092_s5 + $0x80] sm:$0xff] }
 0xb24   : > { %9328 = vmatmul.bf16.gmra.mxu1 %v21576_v3  ;;  %9426 = vmatmul.bf16.gmra.mxu3 %v19011_v31  ;;  %v14209_v31 = vld [vmem:[%s21092_s5 + $0xd0] sm:$0xff] }
 0xb25   : > { %9955 = vmatpush.bf16.msrb.mxu3 %v14209_v31  ;;  %9908 = vmatpush.bf16.msrb.mxu2 %v14199_v55 }
 0xb26   : > { %9831 = vmatmul.bf16.gmra.mxu0 %v21695_v15  ;;  %v9182_v54 = vpop.f32.mrf.mxu2  ;;  %v9097_v15 = vadd.f32 %v20781_v21, %v20807_v30 }
 0xb27   : > { %v9231_v63 = vpop.f32.mrf.mxu3  ;;  %v9183_v56 = vadd.f32 %v9182_v54, %v9134_v17  ;;  %v14191_v17 = vld [vmem:[%s21092_s5 + $0x40] sm:$0xff] }
 0xb29   : > { %v9135_v3 = vpop.f32.mrf.mxu1  ;;  %v20906_v9 = vadd.f32 %v9231_v63, %v9183_v56 }
 0xb2a   : > { %v9136_v26 = vadd.f32 %v9135_v3, %v9087_v58 }
 0xb2e   : > { %v9184_v48 = vpop.f32.mrf.mxu2 }
 0xb2f   : > { %v20916_v44 = vpop.f32.mrf.mxu3  ;;  %v20918_v7 = vadd.f32 %v9184_v48, %v9136_v26  ;;  %v9102_v48 = vadd.f32 %v20796_v1, %v20807_v30 }
 0xb31   : > { %v9138_v41 = vpop.f32.mrf.mxu1  ;;  %9382 = vmatmul.bf16.gmra.mxu2 %v18500_v8  ;;  %v14208_v8 = vld [vmem:[%s21092_s5 + $0xc8] sm:$0xff] }
 0xb32   : > { %v9139_v34 = vadd.f32 %v9138_v41, %v9090_v62  ;;  %9956 = vmatpush.bf16.msrb.mxu3 %v14208_v8  ;;  %v21698_v62 = vld [vmem:[#allocation16_spill] sm:$0xff]  ;;  %v14222_v8 = vld [vmem:[%s21094_s7 + $0x38] sm:$0xff] }
 0xb33   : > { %10091 = vmatpush.bf16.msrb.mxu0 %v14222_v8 }
 0xb34   : > { %9333 = vmatmul.bf16.gmra.mxu1 %v21577_v11  ;;  %9431 = vmatmul.bf16.gmra.mxu3 %v19059_v6  ;;  %v14192_v6 = vld [vmem:[%s21092_s5 + $0x48] sm:$0xff] }
 0xb35   : > { %9858 = vmatpush.bf16.msrb.mxu1 %v14192_v6 }
 0xb36   : > { %9836 = vmatmul.bf16.gmra.mxu0 %v21696_v10  ;;  %v9187_v29 = vpop.f32.mrf.mxu2 }
 0xb37   : > { %v9236_v28 = vpop.f32.mrf.mxu3  ;;  %v9188_v36 = vadd.f32 %v9187_v29, %v9139_v34 }
 0xb39   : > { %v9140_v19 = vpop.f32.mrf.mxu1  ;;  %v20929_v11 = vadd.f32 %v9236_v28, %v9188_v36  ;;  %9859 = vmatpush.bf16.msrb.mxu1 %v14191_v17  ;;  %v21699_v36 = vld [vmem:[#allocation17_spill] sm:$0xff] }
 0xb3a   : > { %v9141_v2 = vadd.f32 %v9140_v19, %v9092_v50 }
 0xb3e   : > { %v9189_v33 = vpop.f32.mrf.mxu2 }
 0xb3f   : > { %v20939_v0 = vpop.f32.mrf.mxu3  ;;  %v20941_v5 = vadd.f32 %v9189_v33, %v9141_v2 }
 0xb41   : > { %v9143_v45 = vpop.f32.mrf.mxu1  ;;  %9387 = vmatmul.bf16.gmra.mxu2 %v18538_v43  ;;  %v9100_v43 = vadd.f32 %v20784_v52, %v20807_v30 }
 0xb42   : > { %v9144_v60 = vadd.f32 %v9143_v45, %v9095_v39 }
 0xb44   : > { %9338 = vmatmul.bf16.gmra.mxu1 %v21578_v46  ;;  %9436 = vmatmul.bf16.gmra.mxu3 %v19098_v22  ;;  %v14207_v46 = vld [vmem:[%s21092_s5 + $0xc0] sm:$0xff] }
 0xb45   : > { %9957 = vmatpush.bf16.msrb.mxu3 %v14207_v46 }
 0xb46   : > { %9841 = vmatmul.bf16.gmra.mxu0 %v21697_v25  ;;  %v9192_v59 = vpop.f32.mrf.mxu2 }
 0xb47   : > { %v9241_v58 = vpop.f32.mrf.mxu3  ;;  %v9193_v54 = vadd.f32 %v9192_v59, %v9144_v60 }
 0xb49   : > { %v9145_v63 = vpop.f32.mrf.mxu1  ;;  %v20955_v3 = vadd.f32 %v9241_v58, %v9193_v54 }
 0xb4a   : > { %v9146_v56 = vadd.f32 %v9145_v63, %v9097_v15 }
 0xb4e   : > { %v9194_v22 = vpop.f32.mrf.mxu2 }
 0xb4f   : > { %v20962_v26 = vpop.f32.mrf.mxu3  ;;  %v20964_v31 = vadd.f32 %v9194_v22, %v9146_v56  ;;  %v14221_v56 = vld [vmem:[%s21094_s7 + $0x30] sm:$0xff] }
 0xb50   : > { %10092 = vmatpush.bf16.msrb.mxu0 %v14221_v56 }
 0xb51   : > { %v9148_v21 = vpop.f32.mrf.mxu1  ;;  %9392 = vmatmul.bf16.gmra.mxu2 %v18569_v27 }
 0xb52   : > { %v9149_v4 = vadd.f32 %v9148_v21, %v9100_v43 }
 0xb54   : > { %9343 = vmatmul.bf16.gmra.mxu1 %v18282_v32  ;;  %9441 = vmatmul.bf16.gmra.mxu3 %v19132_v12 }
 0xb56   : > { %9846 = vmatmul.bf16.gmra.mxu0 %v21698_v62  ;;  %v9197_v41 = vpop.f32.mrf.mxu2 }
 0xb57   : > { %v9246_v52 = vpop.f32.mrf.mxu3  ;;  %v9198_v34 = vadd.f32 %v9197_v41, %v9149_v4  ;;  %v9280_v41 = vpop.f32.mrf.mxu0 }
 0xb59   : > { %v9150_v10 = vpop.f32.mrf.mxu1  ;;  %v20972_v50 = vadd.f32 %v9246_v52, %v9198_v34 }
 0xb5a   : > { %v9151_v42 = vadd.f32 %v9150_v10, %v9102_v48  ;;  %v21701_v48 = vld [vmem:[#allocation18_spill] sm:$0xff] }
 0xb5e   : > { %v9199_v29 = vpop.f32.mrf.mxu2 }
 0xb5f   : > { %v20974_v28 = vpop.f32.mrf.mxu3  ;;  %v20976_v32 = vadd.f32 %v9199_v29, %v9151_v42 }
 0xb61   : > { %v9309_v27 = vpop.f32.mrf.mxu1  ;;  %9909 = vmatmul.bf16.vlgmr.msrb.gmra.mxu2 %v20613_v40  ;;  %v21700_v40 = vld [vmem:[#allocation4_spill] sm:$0xff] }
 0xb62   : > { %v9310_v30 = vadd.f32 %v9309_v27, %v20828_v49 }
 0xb64   : > { %9860 = vmatmul.bf16.vlgmr.msrb.gmra.mxu1 %v21699_v36  ;;  %v14220_v36 = vld [vmem:[%s21094_s7 + $0x28] sm:$0xff] }
 0xb65   : > { %10093 = vmatpush.bf16.msrb.mxu0 %v14220_v36 }
 0xb66   : > { %v9358_v12 = vpop.f32.mrf.mxu2 }
 0xb67   : > { %v9407_v19 = vpop.f32.mrf.mxu3  ;;  %v9359_v2 = vadd.f32 %v9358_v12, %v9310_v30  ;;  %v9282_v12 = vpop.f32.mrf.mxu0 }
 0xb69   : > { %v9311_v1 = vpop.f32.mrf.mxu1  ;;  %v9408_v45 = vadd.f32 %v9407_v19, %v9359_v2 }
 0xb6a   : > { %v9312_v6 = vadd.f32 %v9311_v1, %v20835_v24 }
 0xb6b   : > { %v9450_v25 = vmax.f32 %v9408_v45, 0.0 }
 0xb6e   : > { %v9360_v39 = vpop.f32.mrf.mxu2 }
 0xb6f   : > { %v9409_v33 = vpop.f32.mrf.mxu3  ;;  %v9361_v17 = vadd.f32 %v9360_v39, %v9312_v6  ;;  %v21702_v39 = vld [vmem:[#allocation19_spill] sm:$0xff] }
 0xb71   : > { %v9314_v55 = vpop.f32.mrf.mxu1  ;;  %v9410_v60 = vadd.f32 %v9409_v33, %v9361_v17  ;;  %9914 = vmatmul.bf16.gmra.mxu2 %v20646_v35 }
 0xb72   : > { %v9315_v24 = vadd.f32 %v9314_v55, %v20849_v47 }
 0xb73   : > { %v9454_v15 = vmax.f32 %v9410_v60, 0.0  ;;  %v9285_v60 = vpop.f32.mrf.mxu0 }
 0xb74   : > { %9865 = vmatmul.bf16.gmra.mxu1 %v21700_v40 }
 0xb75   : > { %v9514_v49 = vpack.c.bf16 %v9454_v15, %v9450_v25  ;;  %v14219_v15 = vld [vmem:[%s21094_s7 + $0x20] sm:$0xff] }
 0xb76   : > { %v9363_v59 = vpop.f32.mrf.mxu2  ;;  %10094 = vmatpush.bf16.msrb.mxu0 %v14219_v15 }
 0xb77   : > { %v9412_v58 = vpop.f32.mrf.mxu3  ;;  %9958 = vmatmul.bf16.vlgmr.msrb.gmra.mxu3 %v9514_v49  ;;  %v9364_v63 = vadd.f32 %v9363_v59, %v9315_v24 }
 0xb79   : > { %v9316_v54 = vpop.f32.mrf.mxu1  ;;  %v9413_v21 = vadd.f32 %v9412_v58, %v9364_v63 }
 0xb7a   : > { %v9317_v46 = vadd.f32 %v9316_v54, %v20856_v23 }
 0xb7b   : > { %v9458_v52 = vmax.f32 %v9413_v21, 0.0  ;;  %v9287_v63 = vpop.f32.mrf.mxu0 }
 0xb7e   : > { %v9365_v43 = vpop.f32.mrf.mxu2 }
 0xb7f   : > { %v9414_v22 = vpop.f32.mrf.mxu3  ;;  %v9366_v4 = vadd.f32 %v9365_v43, %v9317_v46  ;;  %v21703_v46 = vld [vmem:[#allocation8_spill] sm:$0xff] }
 0xb81   : > { %v9319_v35 = vpop.f32.mrf.mxu1  ;;  %v9415_v62 = vadd.f32 %v9414_v22, %v9366_v4  ;;  %9919 = vmatmul.bf16.gmra.mxu2 %v20676_v57 }
 0xb82   : > { %v9320_v23 = vadd.f32 %v9319_v35, %v20870_v37  ;;  %v9281_v35 = vadd.f32 %v9280_v41, %v20906_v9 }
 0xb83   : > { %v9462_v34 = vmax.f32 %v9415_v62, 0.0 }
 0xb84   : > { %9870 = vmatmul.bf16.gmra.mxu1 %v21701_v48 }
 0xb85   : > { %v9518_v47 = vpack.c.bf16 %v9462_v34, %v9458_v52  ;;  %v9290_v52 = vpop.f32.mrf.mxu0 }
 0xb86   : > { %v9368_v10 = vpop.f32.mrf.mxu2 }
 0xb87   : > { %v9417_v42 = vpop.f32.mrf.mxu3  ;;  %9963 = vmatmul.bf16.gmra.mxu3 %v9518_v47  ;;  %v9369_v27 = vadd.f32 %v9368_v10, %v9320_v23  ;;  %v14218_v10 = vld [vmem:[%s21094_s7 + $0x18] sm:$0xff] }
 0xb88   : > { %10095 = vmatpush.bf16.msrb.mxu0 %v14218_v10 }
 0xb89   : > { %v9321_v29 = vpop.f32.mrf.mxu1  ;;  %v9418_v2 = vadd.f32 %v9417_v42, %v9369_v27 }
 0xb8a   : > { %v9322_v19 = vadd.f32 %v9321_v29, %v20877_v38 }
 0xb8b   : > { %v9466_v33 = vmax.f32 %v9418_v2, 0.0  ;;  %v9239_v2 = vadd.f32 %v20939_v0, %v20941_v5  ;;  %v21705_v5 = vld [vmem:[#allocation23_spill] sm:$0xff] }
 0xb8e   : > { %v9370_v1 = vpop.f32.mrf.mxu2 }
 0xb8f   : > { %v9419_v30 = vpop.f32.mrf.mxu3  ;;  %v9371_v57 = vadd.f32 %v9370_v1, %v9322_v19  ;;  %v9292_v19 = vpop.f32.mrf.mxu0 }
 0xb91   : > { %v9324_v8 = vpop.f32.mrf.mxu1  ;;  %v9420_v6 = vadd.f32 %v9419_v30, %v9371_v57  ;;  %9924 = vmatmul.bf16.gmra.mxu2 %v20709_v16  ;;  %v9286_v57 = vadd.f32 %v9285_v60, %v20929_v11 }
 0xb92   : > { %v9325_v38 = vadd.f32 %v9324_v8, %v20891_v51 }
 0xb93   : > { %v9470_v45 = vmax.f32 %v9420_v6, 0.0 }
 0xb94   : > { %9875 = vmatmul.bf16.gmra.mxu1 %v21702_v39 }
 0xb95   : > { %v9522_v37 = vpack.c.bf16 %v9470_v45, %v9466_v33  ;;  %v9288_v33 = vadd.f32 %v9287_v63, %v9239_v2  ;;  %v14217_v45 = vld [vmem:[%s21094_s7 + $0x10] sm:$0xff] }
 0xb96   : > { %v9373_v17 = vpop.f32.mrf.mxu2  ;;  %10096 = vmatpush.bf16.msrb.mxu0 %v14217_v45 }
 0xb97   : > { %v9422_v55 = vpop.f32.mrf.mxu3  ;;  %9968 = vmatmul.bf16.gmra.mxu3 %v9522_v37  ;;  %v9374_v25 = vadd.f32 %v9373_v17, %v9325_v38 }
 0xb99   : > { %v9326_v40 = vpop.f32.mrf.mxu1  ;;  %v9423_v54 = vadd.f32 %v9422_v55, %v9374_v25  ;;  %v9295_v25 = vpop.f32.mrf.mxu0 }
 0xb9a   : > { %v9327_v49 = vadd.f32 %v9326_v40, %v20898_v13  ;;  %v9234_v13 = vadd.f32 %v20916_v44, %v20918_v7  ;;  %v21704_v7 = vld [vmem:[#allocation22_spill] sm:$0xff] }
 0xb9b   : > { %v9474_v43 = vmax.f32 %v9423_v54, 0.0  ;;  %v9291_v54 = vadd.f32 %v9290_v52, %v20955_v3 }
 0xb9c   : > { %v9283_v47 = vadd.f32 %v9282_v12, %v9234_v13 }
 0xb9e   : > { %v9375_v59 = vpop.f32.mrf.mxu2 }
 0xb9f   : > { %v9424_v58 = vpop.f32.mrf.mxu3  ;;  %v9376_v16 = vadd.f32 %v9375_v59, %v9327_v49 }
 0xba1   : > { %v9329_v24 = vpop.f32.mrf.mxu1  ;;  %v9425_v56 = vadd.f32 %v9424_v58, %v9376_v16  ;;  %9929 = vmatmul.bf16.gmra.mxu2 %v20751_v20  ;;  %v9244_v58 = vadd.f32 %v20962_v26, %v20964_v31 }
 0xba2   : > { %v9330_v48 = vadd.f32 %v9329_v24, %v9281_v35  ;;  %v14216_v24 = vld [vmem:[%s21094_s7 + $0x8] sm:$0xff] }
 0xba3   : > { %v9478_v22 = vmax.f32 %v9425_v56, 0.0  ;;  %v9297_v56 = vpop.f32.mrf.mxu0  ;;  %10097 = vmatpush.bf16.msrb.mxu0 %v14216_v24 }
 0xba4   : > { %9880 = vmatmul.bf16.gmra.mxu1 %v21703_v46 }
 0xba5   : > { %v9526_v51 = vpack.c.bf16 %v9478_v22, %v9474_v43  ;;  %v9293_v43 = vadd.f32 %v9292_v19, %v9244_v58 }
 0xba6   : > { %v9378_v21 = vpop.f32.mrf.mxu2 }
 0xba7   : > { %v9427_v4 = vpop.f32.mrf.mxu3  ;;  %9973 = vmatmul.bf16.gmra.mxu3 %v9526_v51  ;;  %v9379_v34 = vadd.f32 %v9378_v21, %v9330_v48 }
 0xba9   : > { %v9331_v62 = vpop.f32.mrf.mxu1  ;;  %v9428_v23 = vadd.f32 %v9427_v4, %v9379_v34  ;;  %v9249_v34 = vadd.f32 %v20974_v28, %v20976_v32 }
 0xbaa   : > { %v9332_v42 = vadd.f32 %v9331_v62, %v9283_v47  ;;  %v9296_v47 = vadd.f32 %v9295_v25, %v20972_v50 }
 0xbab   : > { %v9482_v9 = vmax.f32 %v9428_v23, 0.0  ;;  %v9812_v35 = vpop.f32.mrf.mxu0 }
 0xbae   : > { %v9380_v20 = vpop.f32.mrf.mxu2 }
 0xbaf   : > { %v9429_v29 = vpop.f32.mrf.mxu3  ;;  %v9381_v27 = vadd.f32 %v9380_v20, %v9332_v42  ;;  %v14215_v42 = vld [vmem:[%s21094_s7] sm:$0xff] }
 0xbb0   : > { %10098 = vmatpush.bf16.msrb.mxu0 %v14215_v42 }
 0xbb1   : > { %v9334_v36 = vpop.f32.mrf.mxu1  ;;  %v9430_v44 = vadd.f32 %v9429_v29, %v9381_v27  ;;  %9934 = vmatmul.bf16.gmra.mxu2 %v20778_v18  ;;  %v9298_v29 = vadd.f32 %v9297_v56, %v9249_v34 }
 0xbb2   : > { %v9335_v6 = vadd.f32 %v9334_v36, %v9286_v57 }
 0xbb3   : > { %v9486_v41 = vmax.f32 %v9430_v44, 0.0  ;;  %v9814_v23 = vpop.f32.mrf.mxu0 }
 0xbb4   : > { %9885 = vmatmul.bf16.gmra.mxu1 %v21704_v7 }
 0xbb5   : > { %v9530_v12 = vpack.c.bf16 %v9486_v41, %v9482_v9 }
 0xbb6   : > { %v9383_v1 = vpop.f32.mrf.mxu2 }
 0xbb7   : > { %v9432_v30 = vpop.f32.mrf.mxu3  ;;  %9978 = vmatmul.bf16.gmra.mxu3 %v9530_v12  ;;  %v9384_v39 = vadd.f32 %v9383_v1, %v9335_v6  ;;  %v21041_v6 = vld [vmem:[%s21093_s6] ss:$0 sm:$0xff] }
 0xbb8   : > { %v9813_v45 = vadd.f32 %v21041_v6, %v9812_v35 }
 0xbb9   : > { %v9336_v8 = vpop.f32.mrf.mxu1  ;;  %v9433_v55 = vadd.f32 %v9432_v30, %v9384_v39 }
 0xbba   : > { %v9337_v37 = vadd.f32 %v9336_v8, %v9288_v33 }
 0xbbb   : > { %v9490_v11 = vmax.f32 %v9433_v55, 0.0  ;;  %v9817_v1 = vpop.f32.mrf.mxu0 }
 0xbbe   : > { %v9385_v18 = vpop.f32.mrf.mxu2 }
 0xbbf   : > { %v9434_v17 = vpop.f32.mrf.mxu3  ;;  %v9386_v40 = vadd.f32 %v9385_v18, %v9337_v37  ;;  %v9815_v18 = vadd.f32 %v21041_v6, %v9814_v23 }
 0xbc1   : > { %v9339_v38 = vpop.f32.mrf.mxu1  ;;  %v9435_v0 = vadd.f32 %v9434_v17, %v9386_v40  ;;  %9939 = vmatmul.bf16.gmra.mxu2 %v20793_v14 }
 0xbc2   : > { %v9340_v63 = vadd.f32 %v9339_v38, %v9291_v54 }
 0xbc3   : > { %v9494_v60 = vmax.f32 %v9435_v0, 0.0  ;;  %v9819_v57 = vpop.f32.mrf.mxu0 }
 0xbc4   : > { %9890 = vmatmul.bf16.gmra.mxu1 %v21705_v5  ;;  %v9820_v56 = vadd.f32 %v21041_v6, %v9819_v57 }
 0xbc5   : > { %v9534_v15 = vpack.c.bf16 %v9494_v60, %v9490_v11 }
 0xbc6   : > { %v9388_v49 = vpop.f32.mrf.mxu2 }
 0xbc7   : > { %v9437_v59 = vpop.f32.mrf.mxu3  ;;  %9983 = vmatmul.bf16.gmra.mxu3 %v9534_v15  ;;  %v9389_v46 = vadd.f32 %v9388_v49, %v9340_v63  ;;  %v9818_v63 = vadd.f32 %v21041_v6, %v9817_v1 }
 0xbc9   : > { %v9341_v16 = vpop.f32.mrf.mxu1  ;;  %v9438_v21 = vadd.f32 %v9437_v59, %v9389_v46 }
 0xbca   : > { %v9342_v14 = vadd.f32 %v9341_v16, %v9293_v43 }
 0xbcb   : > { %v9498_v3 = vmax.f32 %v9438_v21, 0.0  ;;  %v9822_v37 = vpop.f32.mrf.mxu0 }
 0xbce   : > { %v9390_v22 = vpop.f32.mrf.mxu2 }
 0xbcf   : > { %v9439_v51 = vpop.f32.mrf.mxu3  ;;  %v9391_v4 = vadd.f32 %v9390_v22, %v9342_v14 }
 0xbd1   : > { %v9344_v13 = vpop.f32.mrf.mxu1  ;;  %v9440_v26 = vadd.f32 %v9439_v51, %v9391_v4  ;;  %9944 = vmatmul.bf16.gmra.mxu2 %v20818_v53 }
 0xbd3   : > { %v9502_v31 = vmax.f32 %v9440_v26, 0.0  ;;  %v9824_v59 = vpop.f32.mrf.mxu0 }
 0xbd4   : > { %9895 = vmatmul.bf16.gmra.mxu1 %v20297_v61  ;;  %v9345_v61 = vadd.f32 %v9344_v13, %v9296_v47  ;;  %v9823_v47 = vadd.f32 %v21041_v6, %v9822_v37  ;;  %v9825_v42 = vadd.f32 %v21041_v6, %v9824_v59 }
 0xbd5   : > { %v9538_v62 = vpack.c.bf16 %v9502_v31, %v9498_v3 }
 0xbd6   : > { %v9393_v48 = vpop.f32.mrf.mxu2 }
 0xbd7   : > { %v9442_v52 = vpop.f32.mrf.mxu3  ;;  %9988 = vmatmul.bf16.gmra.mxu3 %v9538_v62  ;;  %v9394_v20 = vadd.f32 %v9393_v48, %v9345_v61 }
 0xbd9   : > { %v9346_v10 = vpop.f32.mrf.mxu1  ;;  %v9443_v36 = vadd.f32 %v9442_v52, %v9394_v20 }
 0xbda   : > { %v9347_v53 = vadd.f32 %v9346_v10, %v9298_v29 }
 0xbdb   : > { %v9506_v32 = vmax.f32 %v9443_v36, 0.0  ;;  %v9827_v51 = vpop.f32.mrf.mxu0 }
 0xbde   : > { %v9395_v27 = vpop.f32.mrf.mxu2 }
 0xbdf   : > { %v9396_v44 = vadd.f32 %v9395_v27, %v9347_v53  ;;  %v9444_v9 = vpop.f32.mrf.mxu3 }
 0xbe1   : > { %v9861_v7 = vpop.f32.mrf.mxu1  ;;  %v9445_v28 = vadd.f32 %v9444_v9, %v9396_v44 }
 0xbe2   : > { %v9862_v17 = vadd.f32 %v9861_v7, %v9813_v45 }
 0xbe3   : > { %v9510_v50 = vmax.f32 %v9445_v28, 0.0  ;;  %v9829_v52 = vpop.f32.mrf.mxu0 }
 0xbe4   : > { %v9830_v1 = vadd.f32 %v21041_v6, %v9829_v52 }
 0xbe5   : > { %v9542_v41 = vpack.c.bf16 %v9510_v50, %v9506_v32 }
 0xbe6   : > { %v9910_v19 = vpop.f32.mrf.mxu2 }
 0xbe7   : > { %9993 = vmatmul.bf16.gmra.mxu3 %v9542_v41  ;;  %v9911_v40 = vadd.f32 %v9910_v19, %v9862_v17 }
 0xbe9   : > { %v9863_v12 = vpop.f32.mrf.mxu1 }
 0xbea   : > { %v9864_v38 = vadd.f32 %v9863_v12, %v9815_v18  ;;  %v9828_v12 = vadd.f32 %v21041_v6, %v9827_v51 }
 0xbeb   : > { %v9832_v7 = vpop.f32.mrf.mxu0 }
 0xbee   : > { %v9912_v30 = vpop.f32.mrf.mxu2 }
 0xbef   : > { %v9913_v0 = vadd.f32 %v9912_v30, %v9864_v38 }
 0xbf1   : > { %v9866_v2 = vpop.f32.mrf.mxu1 }
 0xbf2   : > { %v9867_v46 = vadd.f32 %v9866_v2, %v9818_v63 }
 0xbf3   : > { %v9834_v2 = vpop.f32.mrf.mxu0 }
 0xbf6   : > { %v9915_v8 = vpop.f32.mrf.mxu2 }
 0xbf7   : > { %v9916_v14 = vadd.f32 %v9915_v8, %v9867_v46 }
 0xbf9   : > { %v9868_v39 = vpop.f32.mrf.mxu1 }
 0xbfa   : > { %v9959_v33 = vpop.f32.mrf.mxu3  ;;  %v9869_v22 = vadd.f32 %v9868_v39, %v9820_v56 }
 0xbfb   : > { %v9960_v5 = vadd.f32 %v9959_v33, %v9911_v40 }
 0xbfd   : > { %v9999_v15 = vmax.f32 %v9960_v5, 0.0 }
 0xbfe   : > { %v9917_v55 = vpop.f32.mrf.mxu2 }
 0xbff   : > { %v9918_v21 = vadd.f32 %v9917_v55, %v9869_v22 }
 0xc01   : > { %v9871_v25 = vpop.f32.mrf.mxu1 }
 0xc02   : > { %v9961_v11 = vpop.f32.mrf.mxu3  ;;  %v9872_v61 = vadd.f32 %v9871_v25, %v9823_v47  ;;  %v9837_v25 = vpop.f32.mrf.mxu0 }
 0xc03   : > { %v9962_v60 = vadd.f32 %v9961_v11, %v9913_v0  ;;  %v9833_v11 = vadd.f32 %v21041_v6, %v9832_v7 }
 0xc05   : > { %v10000_v49 = vmax.f32 %v9962_v60, 0.0 }
 0xc06   : > { %v9920_v58 = vpop.f32.mrf.mxu2 }
 0xc07   : > { %v10015_v54 = vpack.c.bf16 %v10000_v49, %v9999_v15  ;;  %v9921_v29 = vadd.f32 %v9920_v58, %v9872_v61  ;;  %v9835_v15 = vadd.f32 %v21041_v6, %v9834_v2 }
 0xc09   : > { %v9873_v16 = vpop.f32.mrf.mxu1  ;;  %10099 = vmatmul.bf16.vlgmr.msrb.gmra.mxu0 %v10015_v54 }
 0xc0a   : > { %v9964_v24 = vpop.f32.mrf.mxu3  ;;  %v9874_v53 = vadd.f32 %v9873_v16, %v9825_v42 }
 0xc0b   : > { %v9965_v4 = vadd.f32 %v9964_v24, %v9916_v14  ;;  %v9839_v24 = vpop.f32.mrf.mxu0 }
 0xc0d   : > { %v10001_v31 = vmax.f32 %v9965_v4, 0.0  ;;  %v9838_v4 = vadd.f32 %v21041_v6, %v9837_v25 }
 0xc0e   : > { %v9922_v43 = vpop.f32.mrf.mxu2 }
 0xc0f   : > { %v9923_v23 = vadd.f32 %v9922_v43, %v9874_v53 }
 0xc11   : > { %v9876_v13 = vpop.f32.mrf.mxu1 }
 0xc12   : > { %v9966_v26 = vpop.f32.mrf.mxu3  ;;  %v9877_v30 = vadd.f32 %v9876_v13, %v9828_v12 }
 0xc13   : > { %v9967_v3 = vadd.f32 %v9966_v26, %v9918_v21  ;;  %v9842_v13 = vpop.f32.mrf.mxu0  ;;  %v9840_v26 = vadd.f32 %v21041_v6, %v9839_v24 }
 0xc15   : > { %v10002_v35 = vmax.f32 %v9967_v3, 0.0 }
 0xc16   : > { %v9925_v62 = vpop.f32.mrf.mxu2 }
 0xc17   : > { %v10016_v48 = vpack.c.bf16 %v10002_v35, %v10001_v31  ;;  %v9926_v57 = vadd.f32 %v9925_v62, %v9877_v30 }
 0xc19   : > { %10104 = vmatmul.bf16.gmra.mxu0 %v10016_v48  ;;  %v9878_v10 = vpop.f32.mrf.mxu1 }
 0xc1a   : > { %v9969_v34 = vpop.f32.mrf.mxu3  ;;  %v9879_v8 = vadd.f32 %v9878_v10, %v9830_v1 }
 0xc1b   : > { %v9970_v27 = vadd.f32 %v9969_v34, %v9921_v29 }
 0xc1d   : > { %v10003_v9 = vmax.f32 %v9970_v27, 0.0 }
 0xc1e   : > { %v9927_v20 = vpop.f32.mrf.mxu2 }
 0xc1f   : > { %v9928_v33 = vadd.f32 %v9927_v20, %v9879_v8  ;;  %v9844_v20 = vpop.f32.mrf.mxu0 }
 0xc21   : > { %v9881_v32 = vpop.f32.mrf.mxu1 }
 0xc22   : > { %v9971_v36 = vpop.f32.mrf.mxu3  ;;  %v9882_v49 = vadd.f32 %v9881_v32, %v9833_v11 }
 0xc23   : > { %v9972_v44 = vadd.f32 %v9971_v36, %v9923_v23  ;;  %v9843_v36 = vadd.f32 %v21041_v6, %v9842_v13 }
 0xc25   : > { %v10004_v28 = vmax.f32 %v9972_v44, 0.0  ;;  %v9845_v44 = vadd.f32 %v21041_v6, %v9844_v20 }
 0xc26   : > { %v9930_v41 = vpop.f32.mrf.mxu2 }
 0xc27   : > { %v10017_v50 = vpack.c.bf16 %v10004_v28, %v10003_v9  ;;  %v9931_v59 = vadd.f32 %v9930_v41, %v9882_v49  ;;  %v9847_v32 = vpop.f32.mrf.mxu0 }
 0xc29   : > { %10109 = vmatmul.bf16.gmra.mxu0 %v10017_v50  ;;  %v9883_v39 = vpop.f32.mrf.mxu1 }
 0xc2a   : > { %v9974_v19 = vpop.f32.mrf.mxu3  ;;  %v9884_v58 = vadd.f32 %v9883_v39, %v9835_v15 }
 0xc2b   : > { %v9975_v45 = vadd.f32 %v9974_v19, %v9926_v57 }
 0xc2d   : > { %v10005_v55 = vmax.f32 %v9975_v45, 0.0  ;;  %v9848_v45 = vadd.f32 %v21041_v6, %v9847_v32 }
 0xc2e   : > { %v9932_v37 = vpop.f32.mrf.mxu2 }
 0xc2f   : > { %v9933_v54 = vadd.f32 %v9932_v37, %v9884_v58  ;;  %v9849_v39 = vpop.f32.mrf.mxu0 }
 0xc31   : > { %v9886_v0 = vpop.f32.mrf.mxu1 }
 0xc32   : > { %v9976_v18 = vpop.f32.mrf.mxu3  ;;  %v9887_v3 = vadd.f32 %v9886_v0, %v9838_v4 }
 0xc33   : > { %v9977_v17 = vadd.f32 %v9976_v18, %v9928_v33  ;;  %v9850_v18 = vadd.f32 %v21041_v6, %v9849_v39 }
 0xc35   : > { %v10006_v40 = vmax.f32 %v9977_v17, 0.0 }
 0xc36   : > { %v9935_v60 = vpop.f32.mrf.mxu2 }
 0xc37   : > { %v10018_v38 = vpack.c.bf16 %v10006_v40, %v10005_v55  ;;  %v9936_v35 = vadd.f32 %v9935_v60, %v9887_v3 }
 0xc39   : > { %10114 = vmatmul.bf16.gmra.mxu0 %v10018_v38  ;;  %v9888_v46 = vpop.f32.mrf.mxu1 }
 0xc3a   : > { %v9979_v5 = vpop.f32.mrf.mxu3  ;;  %v9889_v62 = vadd.f32 %v9888_v46, %v9840_v26 }
 0xc3b   : > { %v9980_v16 = vadd.f32 %v9979_v5, %v9931_v59  ;;  %v14257_v59 = vld [vmem:[%s21095_s8] ss:$0 sm:$0xff] }
 0xc3d   : > { %v10007_v43 = vmax.f32 %v9980_v16, 0.0 }
 0xc3e   : > { %v9937_v22 = vpop.f32.mrf.mxu2 }
 0xc3f   : > { %v9938_v52 = vadd.f32 %v9937_v22, %v9889_v62 }
 0xc41   : > { %v9891_v31 = vpop.f32.mrf.mxu1 }
 0xc42   : > { %v9981_v63 = vpop.f32.mrf.mxu3  ;;  %v9892_v7 = vadd.f32 %v9891_v31, %v9843_v36 }
 0xc43   : > { %v9982_v56 = vadd.f32 %v9981_v63, %v9933_v54 }
 0xc45   : > { %v10008_v14 = vmax.f32 %v9982_v56, 0.0 }
 0xc46   : > { %v9940_v48 = vpop.f32.mrf.mxu2 }
 0xc47   : > { %v10019_v51 = vpack.c.bf16 %v10008_v14, %v10007_v43  ;;  %v9941_v9 = vadd.f32 %v9940_v48, %v9892_v7 }
 0xc49   : > { %10119 = vmatmul.bf16.gmra.mxu0 %v10019_v51  ;;  %v9893_v53 = vpop.f32.mrf.mxu1 }
 0xc4a   : > { %v9984_v21 = vpop.f32.mrf.mxu3  ;;  %v9894_v28 = vadd.f32 %v9893_v53, %v9845_v44 }
 0xc4b   : > { %v9985_v34 = vadd.f32 %v9984_v21, %v9936_v35 }
 0xc4d   : > { %v10009_v42 = vmax.f32 %v9985_v34, 0.0 }
 0xc4e   : > { %v9942_v23 = vpop.f32.mrf.mxu2 }
 0xc4f   : > { %v9943_v50 = vadd.f32 %v9942_v23, %v9894_v28 }
 0xc51   : > { %v9896_v19 = vpop.f32.mrf.mxu1 }
 0xc52   : > { %v9986_v47 = vpop.f32.mrf.mxu3  ;;  %v9897_v17 = vadd.f32 %v9896_v19, %v9848_v45 }
 0xc53   : > { %v9987_v10 = vadd.f32 %v9986_v47, %v9938_v52 }
 0xc55   : > { %v10010_v61 = vmax.f32 %v9987_v10, 0.0 }
 0xc56   : > { %v9945_v30 = vpop.f32.mrf.mxu2 }
 0xc57   : > { %v10020_v29 = vpack.c.bf16 %v10010_v61, %v10009_v42  ;;  %v9946_v40 = vadd.f32 %v9945_v30, %v9897_v17 }
 0xc59   : > { %10124 = vmatmul.bf16.gmra.mxu0 %v10020_v29  ;;  %v9898_v37 = vpop.f32.mrf.mxu1 }
 0xc5a   : > { %v9989_v27 = vpop.f32.mrf.mxu3  ;;  %v9899_v38 = vadd.f32 %v9898_v37, %v9850_v18 }
 0xc5b   : > { %v9990_v41 = vadd.f32 %v9989_v27, %v9941_v9 }
 0xc5d   : > { %v10011_v2 = vmax.f32 %v9990_v41, 0.0 }
 0xc5e   : > { %v9947_v55 = vpop.f32.mrf.mxu2 }
 0xc5f   : > { %v9948_v25 = vadd.f32 %v9947_v55, %v9899_v38 }
 0xc62   : > { %v9991_v12 = vpop.f32.mrf.mxu3 }
 0xc63   : > { %v9992_v1 = vadd.f32 %v9991_v12, %v9943_v50 }
 0xc65   : > { %v10012_v57 = vmax.f32 %v9992_v1, 0.0 }
 0xc67   : > { %v10021_v8 = vpack.c.bf16 %v10012_v57, %v10011_v2 }
 0xc69   : > { %10129 = vmatmul.bf16.gmra.mxu0 %v10021_v8 }
 0xc6a   : > { %v9994_v33 = vpop.f32.mrf.mxu3 }
 0xc6b   : > { %v9995_v0 = vadd.f32 %v9994_v33, %v9946_v40 }
 0xc6d   : > { %v10013_v60 = vmax.f32 %v9995_v0, 0.0 }
 0xc72   : > { %v9996_v5 = vpop.f32.mrf.mxu3 }
 0xc73   : > { %v9997_v11 = vadd.f32 %v9996_v5, %v9948_v25 }
 0xc75   : > { %v10014_v15 = vmax.f32 %v9997_v11, 0.0 }
 0xc77   : > { %v10022_v49 = vpack.c.bf16 %v10014_v15, %v10013_v60 }
 0xc79   : > { %10134 = vmatmul.bf16.gmra.mxu0 %v10022_v49 }
 0xc86   : > { %v10100_v6 = vpop.f32.mrf.mxu0 }
 0xc87   : > { %v10101_v58 = vadd.f32 %v14257_v59, %v10100_v6 }
 0xc89   : > { %10140 = vst [vmem:[%s21066_s14] sm:$0xff] %v10101_v58 }
 0xc8e   : > { %v10102_v54 = vpop.f32.mrf.mxu0 }
 0xc8f   : > { %v10103_v16 = vadd.f32 %v14257_v59, %v10102_v54 }
 0xc91   : > { %10141 = vst [vmem:[%s21066_s14 + $0x8] sm:$0xff] %v10103_v16 }
 0xc96   : > { %v10105_v24 = vpop.f32.mrf.mxu0 }
 0xc97   : > { %v10106_v63 = vadd.f32 %v14257_v59, %v10105_v24 }
 0xc99   : > { %10142 = vst [vmem:[%s21066_s14 + $0x10] sm:$0xff] %v10106_v63 }
 0xc9e   : > { %v10107_v56 = vpop.f32.mrf.mxu0 }
 0xc9f   : > { %v10108_v46 = vadd.f32 %v14257_v59, %v10107_v56 }
 0xca1   : > { %10143 = vst [vmem:[%s21066_s14 + $0x18] sm:$0xff] %v10108_v46 }
 0xca6   : > { %v10110_v43 = vpop.f32.mrf.mxu0 }
 0xca7   : > { %v10111_v14 = vadd.f32 %v14257_v59, %v10110_v43 }
 0xca9   : > { %10144 = vst [vmem:[%s21066_s14 + $0x20] sm:$0xff] %v10111_v14 }
 0xcae   : > { %v10112_v22 = vpop.f32.mrf.mxu0 }
 0xcaf   : > { %v10113_v51 = vadd.f32 %v14257_v59, %v10112_v22 }
 0xcb1   : > { %10145 = vst [vmem:[%s21066_s14 + $0x28] sm:$0xff] %v10113_v51 }
 0xcb6   : > { %v10115_v21 = vpop.f32.mrf.mxu0 }
 0xcb7   : > { %v10116_v4 = vadd.f32 %v14257_v59, %v10115_v21 }
 0xcb9   : > { %10146 = vst [vmem:[%s21066_s14 + $0x30] sm:$0xff] %v10116_v4 }
 0xcbe   : > { %v10117_v13 = vpop.f32.mrf.mxu0 }
 0xcbf   : > { %v10118_v26 = vadd.f32 %v14257_v59, %v10117_v13 }
 0xcc1   : > { %10147 = vst [vmem:[%s21066_s14 + $0x38] sm:$0xff] %v10118_v26 }
 0xcc6   : > { %v10120_v3 = vpop.f32.mrf.mxu0 }
 0xcc7   : > { %v10121_v31 = vadd.f32 %v14257_v59, %v10120_v3 }
 0xcc9   : > { %10148 = vst [vmem:[%s21066_s14 + $0x40] sm:$0xff] %v10121_v31 }
 0xcce   : > { %v10122_v35 = vpop.f32.mrf.mxu0 }
 0xccf   : > { %v10123_v62 = vadd.f32 %v14257_v59, %v10122_v35 }
 0xcd1   : > { %10149 = vst [vmem:[%s21066_s14 + $0x48] sm:$0xff] %v10123_v62 }
 0xcd6   : > { %v10125_v48 = vpop.f32.mrf.mxu0 }
 0xcd7   : > { %v10126_v52 = vadd.f32 %v14257_v59, %v10125_v48 }
 0xcd9   : > { %10150 = vst [vmem:[%s21066_s14 + $0x50] sm:$0xff] %v10126_v52 }
 0xcde   : > { %v10127_v34 = vpop.f32.mrf.mxu0 }
 0xcdf   : > { %v10128_v47 = vadd.f32 %v14257_v59, %v10127_v34 }
 0xce1   : > { %10151 = vst [vmem:[%s21066_s14 + $0x58] sm:$0xff] %v10128_v47 }
 0xce6   : > { %v10130_v10 = vpop.f32.mrf.mxu0 }
 0xce7   : > { %v10131_v42 = vadd.f32 %v14257_v59, %v10130_v10 }
 0xce9   : > { %10152 = vst [vmem:[%s21066_s14 + $0x60] sm:$0xff] %v10131_v42 }
 0xcee   : > { %v10132_v61 = vpop.f32.mrf.mxu0 }
 0xcef   : > { %v10133_v20 = vadd.f32 %v14257_v59, %v10132_v61 }
 0xcf1   : > { %10153 = vst [vmem:[%s21066_s14 + $0x68] sm:$0xff] %v10133_v20 }
 0xcf6   : > { %v10135_v29 = vpop.f32.mrf.mxu0 }
 0xcf7   : > { %v10136_v53 = vadd.f32 %v14257_v59, %v10135_v29 }
 0xcf9   : > { %10154 = vst [vmem:[%s21066_s14 + $0x70] sm:$0xff] %v10136_v53 }
 0xcfe   : > { %v10137_v23 = vpop.f32.mrf.mxu0 }
 0xcff   : > { %v10138_v27 = vadd.f32 %v14257_v59, %v10137_v23 }
 0xd01   : > { %10155 = vst [vmem:[%s21066_s14 + $0x78] sm:$0xff] %v10138_v27 }
 0xd02 PF: > { %s19_s30 = sadd.s32 1, %s14272_s30  }
 0xd03   : > { %p16_p4 = scmp.ge.s32.totalorder %s19_s30, 4  }
 0xd05   :  { %18 = sbr.rel (!%p16_p4) target bundleno = 1 (0x1), region = 86 }

</bundles_post_ra>
